<compile_context>
chip_gen: v6e
topology: v6e:2x2x1
jax: 0.10.0
libtpu: 0.0.40
codegen_flags: <defaults>
</compile_context>

<pallas_src>
import jax
import jax.numpy as jnp
from jax import lax
from jax.experimental import pallas as pl
from jax.experimental.pallas import tpu as pltpu


# ---------------- model config (from the PyTorch module) --------------------
EMBED = 300           # self.embed_size (hard-coded 300)
LSTM_H = 600          # nn.LSTM(hidden_size=600)
VOCAB = 16            # vocab_size constructor arg -- small example value
B = 2                 # batch
T = 8                 # caption length (ans_ix)
T1 = T + 1            # features token + caption tokens

# ---------------- padded, TPU tile-dense sizes -------------------------------
def _round_up(x, m):
    return (x + m - 1) // m * m

EP = _round_up(EMBED, 128)     # 384  lane-padded LSTM input width
HP = _round_up(LSTM_H, 128)    # 640  lane-padded LSTM hidden width
G4 = 4 * HP                    # 2560 packed gate width (i,f,g,o)
VP = _round_up(VOCAB, 128)     # 128  lane-padded vocab width
BP = _round_up(B, 8)           # 8    sublane-padded batch
M = T1 * BP                    # 72   time-major rows (multiple of 8)


# ============================ fused Pallas kernel ============================

def _decoder_kernel(cap_ref, wih_ref, b_ref, bfc_ref, whh_hbm, wfc_hbm,
                    out_ref, gx_ref, hid_ref, whh_vmem, wfc_vmem, sem):
    # Kick off the HBM->VMEM weight DMAs so they stream behind Phase 1.
    whh_cp = pltpu.make_async_copy(whh_hbm, whh_vmem, sem.at[0])
    wfc_cp = pltpu.make_async_copy(wfc_hbm, wfc_vmem, sem.at[1])
    whh_cp.start()
    wfc_cp.start()

    # Phase 1 -- time-parallel LSTM input projection as ONE MXU matmul:
    #   gx[t*BP + b, :] = cap[t, b, :] @ W_ih + (b_ih + b_hh)
    gx_ref[...] = (jnp.dot(cap_ref[...], wih_ref[...],
                           preferred_element_type=jnp.float32)
                   + b_ref[...])

    whh_cp.wait()                                 # W_hh resident in VMEM now

    # Phase 2 -- LSTM recurrence (PyTorch gate order i, f, g, o).  Only the
    # small (BP,HP)x(HP,4HP) recurrent matmul remains per step; elementwise
    # math stays f32 (safe on v5e: no bf16 VPU/EUP).  h is carried in bf16.
    def step(t, carry):
        h_b, c = carry
        r0 = pl.multiple_of(t * BP, BP)
        gates = (gx_ref[pl.ds(r0, BP), :]
                 + jnp.dot(h_b, whh_vmem[...],
                           preferred_element_type=jnp.float32))
        i_g = jax.nn.sigmoid(gates[:, 0 * HP:1 * HP])
        f_g = jax.nn.sigmoid(gates[:, 1 * HP:2 * HP])
        g_g = jnp.tanh(gates[:, 2 * HP:3 * HP])
        o_g = jax.nn.sigmoid(gates[:, 3 * HP:4 * HP])
        c = f_g * c + i_g * g_g
        h = o_g * jnp.tanh(c)
        hid_ref[pl.ds(r0, BP), :] = h             # aligned (8, 640) f32 store
        return h.astype(jnp.bfloat16), c

    h0 = jnp.zeros((BP, HP), jnp.bfloat16)
    c0 = jnp.zeros((BP, HP), jnp.float32)
    lax.fori_loop(0, T1, step, (h0, c0))

    wfc_cp.wait()                                 # W_fc resident in VMEM now

    # Phase 3 -- fc_out over ALL hidden states as one lane-dense matmul.
    logits = (jnp.dot(hid_ref[...].astype(jnp.bfloat16), wfc_vmem[...],
                      preferred_element_type=jnp.float32)
              + bfc_ref[...])                     # (M, VP) f32

    # Phase 4 -- softmax over the SEQUENCE dim (nn.Softmax(dim=1)): for each
    # (batch, vocab) column normalize across the T1 time steps.  Single pass:
    # the nine (8,128) exp blocks stay in vregs, one EUP reciprocal, one
    # aligned store per block (no store->reload round trip).
    m = logits[0:BP, :]
    for t in range(1, T1):
        m = jnp.maximum(m, logits[t * BP:(t + 1) * BP, :])
    exps = []
    s = jnp.zeros((BP, VP), jnp.float32)
    for t in range(T1):
        e = jnp.exp(logits[t * BP:(t + 1) * BP, :] - m)
        exps.append(e)
        s = s + e
    inv = pl.reciprocal(s, approx=True)
    for t in range(T1):
        out_ref[t * BP:(t + 1) * BP, :] = exps[t] * inv   # aligned (8,128)


def _decoder_pallas(cap_tm, wih_p, b_p, bfc_p, whh_p, wfc_p):
    return pl.pallas_call(
        _decoder_kernel,
        out_shape=jax.ShapeDtypeStruct((M, VP), jnp.float32),
        in_specs=[
            pl.BlockSpec(memory_space=pltpu.MemorySpace.VMEM),   # captions
            pl.BlockSpec(memory_space=pltpu.MemorySpace.VMEM),   # W_ih
            pl.BlockSpec(memory_space=pltpu.MemorySpace.VMEM),   # bias (gates)
            pl.BlockSpec(memory_space=pltpu.MemorySpace.VMEM),   # fc bias
            pl.BlockSpec(memory_space=pl.ANY),                   # W_hh (HBM)
            pl.BlockSpec(memory_space=pl.ANY),                   # W_fc (HBM)
        ],
        out_specs=pl.BlockSpec(memory_space=pltpu.MemorySpace.VMEM),
        scratch_shapes=[
            pltpu.VMEM((M, G4), jnp.float32),     # gx (input projection)
            pltpu.VMEM((M, HP), jnp.float32),     # hidden states (tile-aligned)
            pltpu.VMEM((HP, G4), jnp.bfloat16),   # W_hh landing buffer
            pltpu.VMEM((HP, VP), jnp.bfloat16),   # W_fc landing buffer
            pltpu.SemaphoreType.DMA((2,)),
        ],
        compiler_params=pltpu.CompilerParams(
            vmem_limit_bytes=16 * 1024 * 1024),
    )(cap_tm, wih_p, b_p, bfc_p, whh_p, wfc_p)


# ===================== one-time parameter preprocessing ======================

def _pad_gate_w(w, in_dim, in_pad):
    """(in_dim, 4*LSTM_H) -> (in_pad, 4*HP); gates [i,f,g,o] each padded to HP
    with zero columns (padded lanes stay exactly zero through the cell)."""
    out = jnp.zeros((in_pad, G4), jnp.float32)
    for g in range(4):
        out = out.at[:in_dim, g * HP:g * HP + LSTM_H].set(
            w[:, g * LSTM_H:(g + 1) * LSTM_H])
    return out


def _pad_gate_b(b):
    out = jnp.zeros((G4,), jnp.float32)
    for g in range(4):
        out = out.at[g * HP:g * HP + LSTM_H].set(
            b[g * LSTM_H:(g + 1) * LSTM_H])
    return out


def prepare_params(params):
    """One-time (per model) padding + bf16 conversion, hoisted out of the
    per-call forward path."""
    wih_p = _pad_gate_w(params['w_ih'], EMBED, EP).astype(jnp.bfloat16)
    whh_p = _pad_gate_w(params['w_hh'], LSTM_H, HP).astype(jnp.bfloat16)
    b_p = _pad_gate_b(params['b_ih'] + params['b_hh']).reshape(1, G4)
    wfc_p = jnp.zeros((HP, VP), jnp.float32).at[:LSTM_H, :VOCAB].set(
        params['w_fc']).astype(jnp.bfloat16)
    bfc_p = jnp.zeros((1, VP), jnp.float32).at[0, :VOCAB].set(params['b_fc'])
    return {
        'embedding': params['embedding'],
        'wih': wih_p, 'whh': whh_p, 'b': b_p, 'wfc': wfc_p, 'bfc': bfc_p,
    }


# ============================ forward wrapper ================================

def decoder_forward(prep, features, ans_ix):
    """features:(B,300) f32, ans_ix:(B,T) int32 -> (B, T+1, VOCAB) f32."""
    # host-side glue: embedding gather + concat (as in the PyTorch forward)
    lang_feat = jnp.take(prep['embedding'], ans_ix, axis=0)        # (B,T,300)
    captions = jnp.concatenate([features[:, None, :], lang_feat], axis=1)
    # TODO(synk): `lengths` / pack_padded_sequence are built in the reference
    # but never consumed (self.lstm runs on `captions`), so they are skipped.

    # pack into time-major, tile-padded, bf16 rows: row index = t*BP + b
    cap = jnp.zeros((T1, BP, EP), jnp.bfloat16)
    cap = cap.at[:, :B, :EMBED].set(
        jnp.transpose(captions, (1, 0, 2)).astype(jnp.bfloat16))
    cap_tm = cap.reshape(M, EP)

    out_pad = _decoder_pallas(cap_tm, prep['wih'], prep['b'], prep['bfc'],
                              prep['whh'], prep['wfc'])

    # unpad: (T1*BP, VP) -> (B, T1, VOCAB)
    out = out_pad.reshape(T1, BP, VP)[:, :B, :VOCAB]
    return jnp.transpose(out, (1, 0, 2))


# ============================ pure-JAX reference =============================

def decoder_reference(params, features, ans_ix):
    lang_feat = jnp.take(params['embedding'], ans_ix, axis=0)
    captions = jnp.concatenate([features[:, None, :], lang_feat], axis=1)
    bias = params['b_ih'] + params['b_hh']
    h = jnp.zeros((B, LSTM_H), jnp.float32)
    c = jnp.zeros((B, LSTM_H), jnp.float32)
    hs = []
    for t in range(T1):
        g = captions[:, t] @ params['w_ih'] + h @ params['w_hh'] + bias
        i_g = jax.nn.sigmoid(g[:, :LSTM_H])
        f_g = jax.nn.sigmoid(g[:, LSTM_H:2 * LSTM_H])
        g_g = jnp.tanh(g[:, 2 * LSTM_H:3 * LSTM_H])
        o_g = jax.nn.sigmoid(g[:, 3 * LSTM_H:])
        c = f_g * c + i_g * g_g
        h = o_g * jnp.tanh(c)
        hs.append(h)
    hid = jnp.stack(hs, axis=1)                                  # (B, T1, H)
    logits = hid @ params['w_fc'] + params['b_fc']               # (B, T1, V)
    return jax.nn.softmax(logits, axis=1)                        # dim=1 (seq)


# ============================ parameter init =================================

def init_params(key):
    ks = jax.random.split(key, 7)
    s = 1.0 / (LSTM_H ** 0.5)   # ~PyTorch default init scale
    return {
        # nn.Embedding(vocab, 300); ans_emb weight copy replaced by random.
        'embedding': jax.random.normal(ks[0], (VOCAB, EMBED), jnp.float32),
        # nn.LSTM(300, 600): stored transposed (in, 4H), gate order i,f,g,o.
        'w_ih': s * jax.random.normal(ks[1], (EMBED, 4 * LSTM_H), jnp.float32),
        'w_hh': s * jax.random.normal(ks[2], (LSTM_H, 4 * LSTM_H), jnp.float32),
        'b_ih': s * jax.random.normal(ks[3], (4 * LSTM_H,), jnp.float32),
        'b_hh': s * jax.random.normal(ks[4], (4 * LSTM_H,), jnp.float32),
        # nn.Linear(600, vocab): stored transposed (600, V).
        'w_fc': s * jax.random.normal(ks[5], (LSTM_H, VOCAB), jnp.float32),
        'b_fc': s * jax.random.normal(ks[6], (VOCAB,), jnp.float32),
    }
    # TODO(synk): self.lstm_gen (LSTMCell 1024->1024) and self.hidden_size=64
    # are defined in __init__ but unused in forward, so no params here.


# ================================= main ======================================

if __name__ == "__main__":
    key = jax.random.PRNGKey(0)
    pkey, fkey, akey = jax.random.split(key, 3)
    params = init_params(pkey)

    # one-time weight padding / bf16 conversion (hoisted out of forward)
    prep = prepare_params(params)
    prep = jax.tree_util.tree_map(jax.block_until_ready, prep)

    features = jax.random.normal(fkey, (B, EMBED), jnp.float32)
    ans_ix = jax.random.randint(akey, (B, T), 1, VOCAB).astype(jnp.int32)
    ans_ix = ans_ix.at[:, 6:].set(0)            # trailing padding tokens

    out = jax.jit(decoder_forward)(prep, features, ans_ix)
    out = jax.block_until_ready(out)

    assert out.shape == (B, T1, VOCAB) and out.dtype == jnp.float32
    assert bool(jnp.all(jnp.isfinite(out)))
    # softmax over dim=1 => each (batch, vocab) column sums to ~1
    col_sums = jnp.sum(out, axis=1)
    assert bool(jnp.all(jnp.abs(col_sums - 1.0) < 5e-2))

    # compare against pure-JAX f32 reference (bf16 MXU + approx reciprocal)
    ref = jax.block_until_ready(jax.jit(decoder_reference)(params, features,
                                                           ans_ix))
    assert bool(jnp.max(jnp.abs(out - ref)) < 5e-2)

    print("KERNEL_OK")
</pallas_src>

<mosaic_0001>
module attributes {stable_mosaic.version = 11 : i64} {
  func.func @_decoder_kernel(%arg0: memref<72x384xbf16, #tpu.memory_space<vmem>>, %arg1: memref<384x2560xbf16, #tpu.memory_space<vmem>>, %arg2: memref<1x2560xf32, #tpu.memory_space<vmem>>, %arg3: memref<1x128xf32, #tpu.memory_space<vmem>>, %arg4: memref<640x2560xbf16, #tpu.memory_space<any>>, %arg5: memref<640x128xbf16, #tpu.memory_space<any>>, %arg6: memref<72x128xf32, #tpu.memory_space<vmem>>, %arg7: memref<72x2560xf32, #tpu.memory_space<vmem>>, %arg8: memref<72x640xf32, #tpu.memory_space<vmem>>, %arg9: memref<640x2560xbf16, #tpu.memory_space<vmem>>, %arg10: memref<640x128xbf16, #tpu.memory_space<vmem>>, %arg11: memref<2x!tpu.dma_semaphore, #tpu.memory_space<semaphore_mem>>) attributes {dimension_semantics = [], scalar_prefetch = 0 : i64, scratch_operands = 5 : i64, tpu.core_type = #tpu.core_type<tc>} {
    %c0_i32 = arith.constant 0 : i32
    %0 = tpu.memref_slice %arg11[%c0_i32] : memref<2x!tpu.dma_semaphore, #tpu.memory_space<semaphore_mem>> -> memref<1x!tpu.dma_semaphore, #tpu.memory_space<semaphore_mem>>
    %1 = tpu.memref_squeeze %0 : memref<1x!tpu.dma_semaphore, #tpu.memory_space<semaphore_mem>> -> memref<!tpu.dma_semaphore, #tpu.memory_space<semaphore_mem>>
    tpu.enqueue_dma source(%arg4 : memref<640x2560xbf16, #tpu.memory_space<any>>) target(%arg9 : memref<640x2560xbf16, #tpu.memory_space<vmem>>) target_semaphore(%1 : memref<!tpu.dma_semaphore, #tpu.memory_space<semaphore_mem>>)
    %c1_i32 = arith.constant 1 : i32
    %2 = tpu.memref_slice %arg11[%c1_i32] : memref<2x!tpu.dma_semaphore, #tpu.memory_space<semaphore_mem>> -> memref<1x!tpu.dma_semaphore, #tpu.memory_space<semaphore_mem>>
    %3 = tpu.memref_squeeze %2 : memref<1x!tpu.dma_semaphore, #tpu.memory_space<semaphore_mem>> -> memref<!tpu.dma_semaphore, #tpu.memory_space<semaphore_mem>>
    tpu.enqueue_dma source(%arg5 : memref<640x128xbf16, #tpu.memory_space<any>>) target(%arg10 : memref<640x128xbf16, #tpu.memory_space<vmem>>) target_semaphore(%3 : memref<!tpu.dma_semaphore, #tpu.memory_space<semaphore_mem>>)
    %c0 = arith.constant 0 : index
    %c0_0 = arith.constant 0 : index
    %4 = vector.load %arg0[%c0, %c0_0] : memref<72x384xbf16, #tpu.memory_space<vmem>>, vector<72x384xbf16>
    %c0_1 = arith.constant 0 : index
    %c0_2 = arith.constant 0 : index
    %5 = vector.load %arg1[%c0_1, %c0_2] : memref<384x2560xbf16, #tpu.memory_space<vmem>>, vector<384x2560xbf16>
    %cst = arith.constant dense<0.000000e+00> : vector<72x2560xf32>
    %6 = tpu.matmul %4, %5, %cst {dimension_numbers = #tpu.dot_dimension_numbers<[1], [0], [0], [1], [0, 0, 1, 1], [], []>} : vector<72x384xbf16>, vector<384x2560xbf16>, vector<72x2560xf32> -> vector<72x2560xf32>
    %c0_3 = arith.constant 0 : index
    %c0_4 = arith.constant 0 : index
    %7 = vector.load %arg2[%c0_3, %c0_4] : memref<1x2560xf32, #tpu.memory_space<vmem>>, vector<1x2560xf32>
    %8 = vector.broadcast %7 : vector<1x2560xf32> to vector<72x2560xf32>
    %9 = arith.addf %6, %8 : vector<72x2560xf32>
    %c0_5 = arith.constant 0 : index
    %c0_6 = arith.constant 0 : index
    %10 = vector.load %arg7[%c0_5, %c0_6] : memref<72x2560xf32, #tpu.memory_space<vmem>>, vector<72x2560xf32>
    tpu.vector_store %arg7[%c0_5, %c0_6], %9 {strides = array<i32>} : memref<72x2560xf32, #tpu.memory_space<vmem>>, vector<72x2560xf32>,
    %c0_i32_7 = arith.constant 0 : i32
    %11 = tpu.memref_slice %arg11[%c0_i32_7] : memref<2x!tpu.dma_semaphore, #tpu.memory_space<semaphore_mem>> -> memref<1x!tpu.dma_semaphore, #tpu.memory_space<semaphore_mem>>
    %12 = tpu.memref_squeeze %11 : memref<1x!tpu.dma_semaphore, #tpu.memory_space<semaphore_mem>> -> memref<!tpu.dma_semaphore, #tpu.memory_space<semaphore_mem>>
    tpu.wait_dma2 semaphore(%12 : memref<!tpu.dma_semaphore, #tpu.memory_space<semaphore_mem>>) src(%arg4 : memref<640x2560xbf16, #tpu.memory_space<any>>) dst(%arg9 : memref<640x2560xbf16, #tpu.memory_space<vmem>>)
    %cst_8 = arith.constant 0.000000e+00 : bf16
    %13 = vector.broadcast %cst_8 : bf16 to vector<8x640xbf16>
    %cst_9 = arith.constant 0.000000e+00 : f32
    %14 = vector.broadcast %cst_9 : f32 to vector<8x640xf32>
    %c0_i32_10 = arith.constant 0 : i32
    %c9_i32 = arith.constant 9 : i32
    %15 = arith.addi %c0_i32_10, %c9_i32 : i32
    %c1_i32_11 = arith.constant 1 : i32
    %16:2 = scf.for %arg12 = %c0_i32_10 to %15 step %c1_i32_11 iter_args(%arg13 = %13, %arg14 = %14) -> (vector<8x640xbf16>, vector<8x640xf32>)  : i32 {
      %c8_i32 = arith.constant 8 : i32
      %99 = arith.muli %arg12, %c8_i32 : i32
      %100 = tpu.assume_multiple %99, 8 : i32
      %101 = arith.index_cast %100 : i32 to index
      %c0_32 = arith.constant 0 : index
      %102 = vector.load %arg7[%101, %c0_32] : memref<72x2560xf32, #tpu.memory_space<vmem>>, vector<8x2560xf32>
      %c0_33 = arith.constant 0 : index
      %c0_34 = arith.constant 0 : index
      %103 = vector.load %arg9[%c0_33, %c0_34] : memref<640x2560xbf16, #tpu.memory_space<vmem>>, vector<640x2560xbf16>
      %cst_35 = arith.constant dense<0.000000e+00> : vector<8x2560xf32>
      %104 = tpu.matmul %arg13, %103, %cst_35 {dimension_numbers = #tpu.dot_dimension_numbers<[1], [0], [0], [1], [0, 0, 1, 1], [], []>} : vector<8x640xbf16>, vector<640x2560xbf16>, vector<8x2560xf32> -> vector<8x2560xf32>
      %105 = arith.addf %102, %104 : vector<8x2560xf32>
      %106 = vector.extract_strided_slice %105 {offsets = [0, 0], sizes = [8, 640], strides = [1, 1]} : vector<8x2560xf32> to vector<8x640xf32>
      %107 = arith.negf %106 : vector<8x640xf32>
      %108 = math.exp %107 : vector<8x640xf32>
      %cst_36 = arith.constant 1.000000e+00 : f32
      %109 = vector.broadcast %cst_36 : f32 to vector<8x640xf32>
      %110 = arith.addf %109, %108 : vector<8x640xf32>
      %111 = arith.divf %109, %110 : vector<8x640xf32>
      %112 = vector.extract_strided_slice %105 {offsets = [0, 640], sizes = [8, 640], strides = [1, 1]} : vector<8x2560xf32> to vector<8x640xf32>
      %113 = arith.negf %112 : vector<8x640xf32>
      %114 = math.exp %113 : vector<8x640xf32>
      %cst_37 = arith.constant 1.000000e+00 : f32
      %115 = vector.broadcast %cst_37 : f32 to vector<8x640xf32>
      %116 = arith.addf %115, %114 : vector<8x640xf32>
      %117 = arith.divf %115, %116 : vector<8x640xf32>
      %118 = vector.extract_strided_slice %105 {offsets = [0, 1280], sizes = [8, 640], strides = [1, 1]} : vector<8x2560xf32> to vector<8x640xf32>
      %119 = math.tanh %118 : vector<8x640xf32>
      %120 = vector.extract_strided_slice %105 {offsets = [0, 1920], sizes = [8, 640], strides = [1, 1]} : vector<8x2560xf32> to vector<8x640xf32>
      %121 = arith.negf %120 : vector<8x640xf32>
      %122 = math.exp %121 : vector<8x640xf32>
      %cst_38 = arith.constant 1.000000e+00 : f32
      %123 = vector.broadcast %cst_38 : f32 to vector<8x640xf32>
      %124 = arith.addf %123, %122 : vector<8x640xf32>
      %125 = arith.divf %123, %124 : vector<8x640xf32>
      %126 = arith.mulf %117, %arg14 : vector<8x640xf32>
      %127 = arith.mulf %111, %119 : vector<8x640xf32>
      %128 = arith.addf %126, %127 : vector<8x640xf32>
      %129 = math.tanh %128 : vector<8x640xf32>
      %130 = arith.mulf %125, %129 : vector<8x640xf32>
      %131 = arith.index_cast %100 : i32 to index
      %c0_39 = arith.constant 0 : index
      %132 = vector.load %arg8[%131, %c0_39] : memref<72x640xf32, #tpu.memory_space<vmem>>, vector<8x640xf32>
      tpu.vector_store %arg8[%131, %c0_39], %130 {strides = array<i32>} : memref<72x640xf32, #tpu.memory_space<vmem>>, vector<8x640xf32>,
      %133 = arith.truncf %130 : vector<8x640xf32> to vector<8x640xbf16>
      scf.yield %133, %128 : vector<8x640xbf16>, vector<8x640xf32>
    }
    %c9_i32_12 = arith.constant 9 : i32
    %c1_i32_13 = arith.constant 1 : i32
    %17 = tpu.memref_slice %arg11[%c1_i32_13] : memref<2x!tpu.dma_semaphore, #tpu.memory_space<semaphore_mem>> -> memref<1x!tpu.dma_semaphore, #tpu.memory_space<semaphore_mem>>
    %18 = tpu.memref_squeeze %17 : memref<1x!tpu.dma_semaphore, #tpu.memory_space<semaphore_mem>> -> memref<!tpu.dma_semaphore, #tpu.memory_space<semaphore_mem>>
    tpu.wait_dma2 semaphore(%18 : memref<!tpu.dma_semaphore, #tpu.memory_space<semaphore_mem>>) src(%arg5 : memref<640x128xbf16, #tpu.memory_space<any>>) dst(%arg10 : memref<640x128xbf16, #tpu.memory_space<vmem>>)
    %c0_14 = arith.constant 0 : index
    %c0_15 = arith.constant 0 : index
    %19 = vector.load %arg8[%c0_14, %c0_15] : memref<72x640xf32, #tpu.memory_space<vmem>>, vector<72x640xf32>
    %20 = arith.truncf %19 : vector<72x640xf32> to vector<72x640xbf16>
    %c0_16 = arith.constant 0 : index
    %c0_17 = arith.constant 0 : index
    %21 = vector.load %arg10[%c0_16, %c0_17] : memref<640x128xbf16, #tpu.memory_space<vmem>>, vector<640x128xbf16>
    %cst_18 = arith.constant dense<0.000000e+00> : vector<72x128xf32>
    %22 = tpu.matmul %20, %21, %cst_18 {dimension_numbers = #tpu.dot_dimension_numbers<[1], [0], [0], [1], [0, 0, 1, 1], [], []>} : vector<72x640xbf16>, vector<640x128xbf16>, vector<72x128xf32> -> vector<72x128xf32>
    %c0_19 = arith.constant 0 : index
    %c0_20 = arith.constant 0 : index
    %23 = vector.load %arg3[%c0_19, %c0_20] : memref<1x128xf32, #tpu.memory_space<vmem>>, vector<1x128xf32>
    %24 = vector.broadcast %23 : vector<1x128xf32> to vector<72x128xf32>
    %25 = arith.addf %22, %24 : vector<72x128xf32>
    %26 = vector.extract_strided_slice %25 {offsets = [0, 0], sizes = [8, 128], strides = [1, 1]} : vector<72x128xf32> to vector<8x128xf32>
    %27 = vector.extract_strided_slice %25 {offsets = [8, 0], sizes = [8, 128], strides = [1, 1]} : vector<72x128xf32> to vector<8x128xf32>
    %28 = arith.maximumf %26, %27 : vector<8x128xf32>
    %29 = vector.extract_strided_slice %25 {offsets = [16, 0], sizes = [8, 128], strides = [1, 1]} : vector<72x128xf32> to vector<8x128xf32>
    %30 = arith.maximumf %28, %29 : vector<8x128xf32>
    %31 = vector.extract_strided_slice %25 {offsets = [24, 0], sizes = [8, 128], strides = [1, 1]} : vector<72x128xf32> to vector<8x128xf32>
    %32 = arith.maximumf %30, %31 : vector<8x128xf32>
    %33 = vector.extract_strided_slice %25 {offsets = [32, 0], sizes = [8, 128], strides = [1, 1]} : vector<72x128xf32> to vector<8x128xf32>
    %34 = arith.maximumf %32, %33 : vector<8x128xf32>
    %35 = vector.extract_strided_slice %25 {offsets = [40, 0], sizes = [8, 128], strides = [1, 1]} : vector<72x128xf32> to vector<8x128xf32>
    %36 = arith.maximumf %34, %35 : vector<8x128xf32>
    %37 = vector.extract_strided_slice %25 {offsets = [48, 0], sizes = [8, 128], strides = [1, 1]} : vector<72x128xf32> to vector<8x128xf32>
    %38 = arith.maximumf %36, %37 : vector<8x128xf32>
    %39 = vector.extract_strided_slice %25 {offsets = [56, 0], sizes = [8, 128], strides = [1, 1]} : vector<72x128xf32> to vector<8x128xf32>
    %40 = arith.maximumf %38, %39 : vector<8x128xf32>
    %41 = vector.extract_strided_slice %25 {offsets = [64, 0], sizes = [8, 128], strides = [1, 1]} : vector<72x128xf32> to vector<8x128xf32>
    %42 = arith.maximumf %40, %41 : vector<8x128xf32>
    %cst_21 = arith.constant 0.000000e+00 : f32
    %43 = vector.broadcast %cst_21 : f32 to vector<8x128xf32>
    %44 = vector.extract_strided_slice %25 {offsets = [0, 0], sizes = [8, 128], strides = [1, 1]} : vector<72x128xf32> to vector<8x128xf32>
    %45 = arith.subf %44, %42 : vector<8x128xf32>
    %46 = math.exp %45 : vector<8x128xf32>
    %47 = arith.addf %43, %46 : vector<8x128xf32>
    %48 = vector.extract_strided_slice %25 {offsets = [8, 0], sizes = [8, 128], strides = [1, 1]} : vector<72x128xf32> to vector<8x128xf32>
    %49 = arith.subf %48, %42 : vector<8x128xf32>
    %50 = math.exp %49 : vector<8x128xf32>
    %51 = arith.addf %47, %50 : vector<8x128xf32>
    %52 = vector.extract_strided_slice %25 {offsets = [16, 0], sizes = [8, 128], strides = [1, 1]} : vector<72x128xf32> to vector<8x128xf32>
    %53 = arith.subf %52, %42 : vector<8x128xf32>
    %54 = math.exp %53 : vector<8x128xf32>
    %55 = arith.addf %51, %54 : vector<8x128xf32>
    %56 = vector.extract_strided_slice %25 {offsets = [24, 0], sizes = [8, 128], strides = [1, 1]} : vector<72x128xf32> to vector<8x128xf32>
    %57 = arith.subf %56, %42 : vector<8x128xf32>
    %58 = math.exp %57 : vector<8x128xf32>
    %59 = arith.addf %55, %58 : vector<8x128xf32>
    %60 = vector.extract_strided_slice %25 {offsets = [32, 0], sizes = [8, 128], strides = [1, 1]} : vector<72x128xf32> to vector<8x128xf32>
    %61 = arith.subf %60, %42 : vector<8x128xf32>
    %62 = math.exp %61 : vector<8x128xf32>
    %63 = arith.addf %59, %62 : vector<8x128xf32>
    %64 = vector.extract_strided_slice %25 {offsets = [40, 0], sizes = [8, 128], strides = [1, 1]} : vector<72x128xf32> to vector<8x128xf32>
    %65 = arith.subf %64, %42 : vector<8x128xf32>
    %66 = math.exp %65 : vector<8x128xf32>
    %67 = arith.addf %63, %66 : vector<8x128xf32>
    %68 = vector.extract_strided_slice %25 {offsets = [48, 0], sizes = [8, 128], strides = [1, 1]} : vector<72x128xf32> to vector<8x128xf32>
    %69 = arith.subf %68, %42 : vector<8x128xf32>
    %70 = math.exp %69 : vector<8x128xf32>
    %71 = arith.addf %67, %70 : vector<8x128xf32>
    %72 = vector.extract_strided_slice %25 {offsets = [56, 0], sizes = [8, 128], strides = [1, 1]} : vector<72x128xf32> to vector<8x128xf32>
    %73 = arith.subf %72, %42 : vector<8x128xf32>
    %74 = math.exp %73 : vector<8x128xf32>
    %75 = arith.addf %71, %74 : vector<8x128xf32>
    %76 = vector.extract_strided_slice %25 {offsets = [64, 0], sizes = [8, 128], strides = [1, 1]} : vector<72x128xf32> to vector<8x128xf32>
    %77 = arith.subf %76, %42 : vector<8x128xf32>
    %78 = math.exp %77 : vector<8x128xf32>
    %79 = arith.addf %75, %78 : vector<8x128xf32>
    %80 = tpu.reciprocal %79 {approx = true} : vector<8x128xf32> -> vector<8x128xf32>
    %81 = arith.mulf %46, %80 : vector<8x128xf32>
    %c0_22 = arith.constant 0 : index
    %c0_23 = arith.constant 0 : index
    %82 = vector.load %arg6[%c0_22, %c0_23] : memref<72x128xf32, #tpu.memory_space<vmem>>, vector<8x128xf32>
    tpu.vector_store %arg6[%c0_22, %c0_23], %81 {strides = array<i32>} : memref<72x128xf32, #tpu.memory_space<vmem>>, vector<8x128xf32>,
    %83 = arith.mulf %50, %80 : vector<8x128xf32>
    %c8 = arith.constant 8 : index
    %c0_24 = arith.constant 0 : index
    %84 = vector.load %arg6[%c8, %c0_24] : memref<72x128xf32, #tpu.memory_space<vmem>>, vector<8x128xf32>
    tpu.vector_store %arg6[%c8, %c0_24], %83 {strides = array<i32>} : memref<72x128xf32, #tpu.memory_space<vmem>>, vector<8x128xf32>,
    %85 = arith.mulf %54, %80 : vector<8x128xf32>
    %c16 = arith.constant 16 : index
    %c0_25 = arith.constant 0 : index
    %86 = vector.load %arg6[%c16, %c0_25] : memref<72x128xf32, #tpu.memory_space<vmem>>, vector<8x128xf32>
    tpu.vector_store %arg6[%c16, %c0_25], %85 {strides = array<i32>} : memref<72x128xf32, #tpu.memory_space<vmem>>, vector<8x128xf32>,
    %87 = arith.mulf %58, %80 : vector<8x128xf32>
    %c24 = arith.constant 24 : index
    %c0_26 = arith.constant 0 : index
    %88 = vector.load %arg6[%c24, %c0_26] : memref<72x128xf32, #tpu.memory_space<vmem>>, vector<8x128xf32>
    tpu.vector_store %arg6[%c24, %c0_26], %87 {strides = array<i32>} : memref<72x128xf32, #tpu.memory_space<vmem>>, vector<8x128xf32>,
    %89 = arith.mulf %62, %80 : vector<8x128xf32>
    %c32 = arith.constant 32 : index
    %c0_27 = arith.constant 0 : index
    %90 = vector.load %arg6[%c32, %c0_27] : memref<72x128xf32, #tpu.memory_space<vmem>>, vector<8x128xf32>
    tpu.vector_store %arg6[%c32, %c0_27], %89 {strides = array<i32>} : memref<72x128xf32, #tpu.memory_space<vmem>>, vector<8x128xf32>,
    %91 = arith.mulf %66, %80 : vector<8x128xf32>
    %c40 = arith.constant 40 : index
    %c0_28 = arith.constant 0 : index
    %92 = vector.load %arg6[%c40, %c0_28] : memref<72x128xf32, #tpu.memory_space<vmem>>, vector<8x128xf32>
    tpu.vector_store %arg6[%c40, %c0_28], %91 {strides = array<i32>} : memref<72x128xf32, #tpu.memory_space<vmem>>, vector<8x128xf32>,
    %93 = arith.mulf %70, %80 : vector<8x128xf32>
    %c48 = arith.constant 48 : index
    %c0_29 = arith.constant 0 : index
    %94 = vector.load %arg6[%c48, %c0_29] : memref<72x128xf32, #tpu.memory_space<vmem>>, vector<8x128xf32>
    tpu.vector_store %arg6[%c48, %c0_29], %93 {strides = array<i32>} : memref<72x128xf32, #tpu.memory_space<vmem>>, vector<8x128xf32>,
    %95 = arith.mulf %74, %80 : vector<8x128xf32>
    %c56 = arith.constant 56 : index
    %c0_30 = arith.constant 0 : index
    %96 = vector.load %arg6[%c56, %c0_30] : memref<72x128xf32, #tpu.memory_space<vmem>>, vector<8x128xf32>
    tpu.vector_store %arg6[%c56, %c0_30], %95 {strides = array<i32>} : memref<72x128xf32, #tpu.memory_space<vmem>>, vector<8x128xf32>,
    %97 = arith.mulf %78, %80 : vector<8x128xf32>
    %c64 = arith.constant 64 : index
    %c0_31 = arith.constant 0 : index
    %98 = vector.load %arg6[%c64, %c0_31] : memref<72x128xf32, #tpu.memory_space<vmem>>, vector<8x128xf32>
    tpu.vector_store %arg6[%c64, %c0_31], %97 {strides = array<i32>} : memref<72x128xf32, #tpu.memory_space<vmem>>, vector<8x128xf32>,
    return
  }
}

</mosaic_0001>

<bundles_post_ra>
// kernel: decoder_forward.1
= control target key start
LH: loop header
LB: loop body
LE: loop exit
PB: predicated region body
PF: predicated region fallthrough
CT: control target
= control target key end

     0   :  { %11 = vsyncpa [#allocation8], 0  ;;  %s17165_s0 = inlined_call_operand.vmem [shape: bf16[72,384], index: 0, kind: input, shape index: {}]   ;;  %s17166_s1 = inlined_call_operand.hbm [shape: bf16[384,2560], index: 1, kind: input, shape index: {}]   ;;  %s17167_s2 = inlined_call_operand.hbm [shape: f32[1,2560], index: 2, kind: input, shape index: {}]   ;;  %s17168_s3 = inlined_call_operand.hbm [shape: f32[1,128], index: 3, kind: input, shape index: {}]   ;;  %s17169_s4 = inlined_call_operand.hbm [shape: bf16[640,2560], index: 4, kind: input, shape index: {}]   ;;  %s17170_s5 = inlined_call_operand.hbm [shape: bf16[640,128], index: 5, kind: input, shape index: {}]   ;;  %s17171_s6 = inlined_call_operand.vmem [shape: f32[72,128], index: 6, kind: output, shape index: {}]  }
   0x1   :  { %12 = vsyncpa [#allocation10], 0  ;;  %s15854_s21 = smov [#allocation9]   ;;  %s15855_s23 = smov [#allocation7]  }
   0x2   :  { %s33_s22 = sshll.u32 %s15854_s21, 4  ;;  %s20_s24 = sshll.u32 %s15855_s23, 4  ;;  %s34_s22 = int_to_ptr.vmem [resolvable:$true] %s33_s22  ;;  %s21_s24 = int_to_ptr.vmem [resolvable:$true] %s20_s24 }
   0x3   :  { %s15666_s25 = scalar_lea.vmem %s34_s22, 320  ;;  %p15671_p1 = scmp.lt.s32.totalorder %s34_s22, %s34_s22 }
   0x4   :  { %p15667_p0 = scmp.ne.s32.totalorder %s34_s22, %s15666_s25  ;;  %p15672_p2 = scmp.lt.s32.totalorder %s15666_s25, %s15666_s25 }
   0x6   :  { %p15673_p3 = por %p15672_p2, %p15671_p1 }
   0x8   :  { %p15674_p4 = pnand %p15673_p3, %p15667_p0 }
   0xa   :  { %15677 = shalt.err (!%p15674_p4)
}
   0xb   :  { %36 = dma.hbm_to_vmem [thread:$0]  %s17167_s2, 320, %s34_s22, [#allocation10]  }
   0xc   :  { %s15686_s28 = scalar_lea.vmem %s21_s24, 61440  ;;  %p15691_p6 = scmp.lt.s32.totalorder %s21_s24, %s21_s24 }
   0xd   :  { %p15687_p5 = scmp.ne.s32.totalorder %s21_s24, %s15686_s28  ;;  %p15692_p7 = scmp.lt.s32.totalorder %s15686_s28, %s15686_s28 }
   0xf   :  { %p15693_p8 = por %p15692_p7, %p15691_p6 }
  0x11   :  { %p15694_p9 = pnand %p15693_p8, %p15687_p5 }
  0x13   :  { %15697 = shalt.err (!%p15694_p9)
}
  0x14   :  { %s15856_s29 = smov 1280   ;;  %s15857_s30 = smov 80  }
  0x15   :  { %26 = dma.hbm_to_vmem [thread:$0]  %s17166_s1, 61440, %s21_s24, [#allocation8], %s15856_s29, %s15856_s29, %s15857_s30  }
  0x16   :  { %s15858_s9 = smov [#allocation11]  }
  0x17   :  { %s43_s10 = sshll.u32 %s15858_s9, 4  ;;  %s44_s10 = int_to_ptr.vmem [resolvable:$true] %s43_s10 }
  0x18   :  { %s15706_s11 = scalar_lea.vmem %s44_s10, 16  ;;  %s15710_s12 = scalar_lea.vmem %s44_s10, 32 }
  0x19   :  { %p15707_p10 = scmp.ne.s32.totalorder %s44_s10, %s15706_s11  ;;  %p15711_p11 = scmp.lt.s32.totalorder %s44_s10, %s44_s10 }
  0x1a   :  { %p15712_p12 = scmp.lt.s32.totalorder %s15710_s12, %s15706_s11 }
  0x1c   :  { %p15713_p13 = por %p15712_p12, %p15711_p11 }
  0x1e   :  { %p15714_p0 = pnand %p15713_p13, %p15707_p10 }
  0x20   :  { %15717 = shalt.err (!%p15714_p0)
}
  0x21   :  { %46 = dma.hbm_to_vmem [thread:$0]  %s17168_s3, 16, %s44_s10, [#allocation10]  }
  0x22   :  { %15802 = dma.done.wait [#allocation8], 61440  }
  0x23   :  { %15803 = vsyncadd [#allocation8], 4294905856 }
  0x24   :  { %15804 = dma.done.wait [#allocation10], 336  }
  0x25   :  { %15805 = vsyncadd [#allocation10], 4294966960  ;;  %v15859_v0 = vmov 0   ;;  %v13539_v1 = vld [vmem:[#allocation7 + $0x464] ss:$80 sps:$4 sm:$0xff]   ;;  %s15861_s13 = smov [#allocation5]  }
  0x26   :  { %3272 = vmatprep.mubr.bf16.mxu1 %v15859_v0  ;;  %v13541_v2 = vld [vmem:[#allocation7 + $0xe64] ss:$80 sps:$4 sm:$0xff]   ;;  %3159 = vmatprep.subr.bf16.mxu0 %v13539_v1  ;;  %v13543_v3 = vld [vmem:[#allocation7 + $0x460] ss:$80 sps:$4 sm:$0xff]   ;;  %v13591_v34 = vld [vmem:[#allocation7 + $0x46c] ss:$80 sps:$4 sm:$0xff]  }
  0x27   :  { %v13544_v4 = vld [vmem:[#allocation7 + $0xe60] ss:$80 sps:$4 sm:$0xff]   ;;  %3240 = vmatprep.subr.bf16.mxu1 %v13541_v2  ;;  %v13545_v5 = vld [vmem:[#allocation7 + $0x3c4] ss:$80 sps:$4 sm:$0xff]   ;;  %3160 = vmatpush1.bf16.msra.mxu0 %v13543_v3  ;;  %v13589_v36 = vld [vmem:[#allocation7 + $0x468] ss:$80 sps:$4 sm:$0xff]  }
  0x28   :  { %3241 = vmatpush1.bf16.msra.mxu1 %v13544_v4  ;;  %v13547_v6 = vld [vmem:[#allocation7 + $0xdc4] ss:$80 sps:$4 sm:$0xff]   ;;  %v13549_v7 = vld [vmem:[#allocation7 + $0x3c0] ss:$80 sps:$4 sm:$0xff]   ;;  %3161 = vmatprep.subr.bf16.mxu0 %v13545_v5  ;;  %v13598_v39 = vld [vmem:[#allocation7 + $0x3cc] ss:$80 sps:$4 sm:$0xff]  }
  0x29   :  { %v13550_v8 = vld [vmem:[#allocation7 + $0xdc0] ss:$80 sps:$4 sm:$0xff]   ;;  %3242 = vmatprep.subr.bf16.mxu1 %v13547_v6  ;;  %v13551_v9 = vld [vmem:[#allocation7 + $0x324] ss:$80 sps:$4 sm:$0xff]   ;;  %v13596_v40 = vld [vmem:[#allocation7 + $0x3c8] ss:$80 sps:$4 sm:$0xff]  }
  0x2a   :  { %v13553_v10 = vld [vmem:[#allocation7 + $0xd24] ss:$80 sps:$4 sm:$0xff]   ;;  %v13555_v11 = vld [vmem:[#allocation7 + $0x320] ss:$80 sps:$4 sm:$0xff]   ;;  %v13604_v43 = vld [vmem:[#allocation7 + $0x32c] ss:$80 sps:$4 sm:$0xff]  }
  0x2b   :  { %v13556_v12 = vld [vmem:[#allocation7 + $0xd20] ss:$80 sps:$4 sm:$0xff]   ;;  %3162 = vmatpush1.bf16.msra.mxu0 %v13549_v7  ;;  %v13557_v13 = vld [vmem:[#allocation7 + $0x284] ss:$80 sps:$4 sm:$0xff]   ;;  %v13602_v44 = vld [vmem:[#allocation7 + $0x328] ss:$80 sps:$4 sm:$0xff]  }
  0x2c   :  { %3243 = vmatpush1.bf16.msra.mxu1 %v13550_v8  ;;  %3163 = vmatprep.subr.bf16.mxu0 %v13551_v9  ;;  %v13559_v14 = vld [vmem:[#allocation7 + $0xc84] ss:$80 sps:$4 sm:$0xff]   ;;  %v13561_v15 = vld [vmem:[#allocation7 + $0x280] ss:$80 sps:$4 sm:$0xff]   ;;  %v13610_v47 = vld [vmem:[#allocation7 + $0x28c] ss:$80 sps:$4 sm:$0xff]  }
  0x2d   :  { %3244 = vmatprep.subr.bf16.mxu1 %v13553_v10  ;;  %v13562_v16 = vld [vmem:[#allocation7 + $0xc80] ss:$80 sps:$4 sm:$0xff]   ;;  %v13563_v17 = vld [vmem:[#allocation7 + $0x1e4] ss:$80 sps:$4 sm:$0xff]   ;;  %v13608_v48 = vld [vmem:[#allocation7 + $0x288] ss:$80 sps:$4 sm:$0xff]  }
  0x2e   :  { %v13565_v18 = vld [vmem:[#allocation7 + $0xbe4] ss:$80 sps:$4 sm:$0xff]   ;;  %v13567_v19 = vld [vmem:[#allocation7 + $0x1e0] ss:$80 sps:$4 sm:$0xff]   ;;  %v15920_v51 = vld [vmem:[%s17165_s0 + $0x4] ss:$12 sps:$4 sm:$0xff]  }
  0x2f   :  { %3164 = vmatpush1.bf16.msra.mxu0 %v13555_v11  ;;  %v13568_v20 = vld [vmem:[#allocation7 + $0xbe0] ss:$80 sps:$4 sm:$0xff]   ;;  %v13569_v21 = vld [vmem:[#allocation7 + $0x144] ss:$80 sps:$4 sm:$0xff]   ;;  %v13616_v52 = vld [vmem:[#allocation7 + $0x1ec] ss:$80 sps:$4 sm:$0xff]   ;;  %3191 = vmatprep.mubr.bf16.mxu0 %v15920_v51 }
  0x30   :  { %3245 = vmatpush1.bf16.msra.mxu1 %v13556_v12  ;;  %3165 = vmatprep.subr.bf16.mxu0 %v13557_v13  ;;  %v13571_v22 = vld [vmem:[#allocation7 + $0xb44] ss:$80 sps:$4 sm:$0xff]   ;;  %v13573_v23 = vld [vmem:[#allocation7 + $0x140] ss:$80 sps:$4 sm:$0xff]   ;;  %v13614_v53 = vld [vmem:[#allocation7 + $0x1e8] ss:$80 sps:$4 sm:$0xff]  }
  0x31   :  { %3246 = vmatprep.subr.bf16.mxu1 %v13559_v14  ;;  %v13574_v24 = vld [vmem:[#allocation7 + $0xb40] ss:$80 sps:$4 sm:$0xff]   ;;  %v13575_v25 = vld [vmem:[#allocation7 + $0xa4] ss:$80 sps:$4 sm:$0xff]   ;;  %v13622_v57 = vld [vmem:[#allocation7 + $0x14c] ss:$80 sps:$4 sm:$0xff]  }
  0x32   :  { %v13577_v26 = vld [vmem:[#allocation7 + $0xaa4] ss:$80 sps:$4 sm:$0xff]   ;;  %v13579_v27 = vld [vmem:[#allocation7 + $0xa0] ss:$80 sps:$4 sm:$0xff]   ;;  %v13620_v58 = vld [vmem:[#allocation7 + $0x148] ss:$80 sps:$4 sm:$0xff]  }
  0x33   :  { %3166 = vmatpush1.bf16.msra.mxu0 %v13561_v15  ;;  %v13580_v28 = vld [vmem:[#allocation7 + $0xaa0] ss:$80 sps:$4 sm:$0xff]   ;;  %v13581_v29 = vld [vmem:[#allocation7 + $0x4] ss:$80 sps:$4 sm:$0xff]   ;;  %v13628_v61 = vld [vmem:[#allocation7 + $0xac] ss:$80 sps:$4 sm:$0xff]  }
  0x34   :  { %3247 = vmatpush1.bf16.msra.mxu1 %v13562_v16  ;;  %3167 = vmatprep.subr.bf16.mxu0 %v13563_v17  ;;  %v13583_v30 = vld [vmem:[#allocation7 + $0xa04] ss:$80 sps:$4 sm:$0xff]   ;;  %v13585_v31 = vld [vmem:[#allocation7] ss:$80 sps:$4 sm:$0xff]   ;;  %v13626_v63 = vld [vmem:[#allocation7 + $0xa8] ss:$80 sps:$4 sm:$0xff]  }
  0x35   :  { %3248 = vmatprep.subr.bf16.mxu1 %v13565_v18  ;;  %v13586_v32 = vld [vmem:[#allocation7 + $0xa00] ss:$80 sps:$4 sm:$0xff]   ;;  %v13587_v33 = vld [vmem:[#allocation7 + $0x964] ss:$80 sps:$4 sm:$0xff]   ;;  %v13634_v3 = vld [vmem:[#allocation7 + $0xc] ss:$80 sps:$4 sm:$0xff]  }
  0x36   :  { %v15913_v35 = vld [vmem:[%s17165_s0 + $0x8] ss:$12 sps:$4 sm:$0xff]   ;;  %v13594_v38 = vld [vmem:[#allocation7 + $0x8c4] ss:$80 sps:$4 sm:$0xff]   ;;  %v15933_v62 = vld [vmem:[%s17165_s0 + $0x38] ss:$12 sps:$4 sm:$0xff]  }
  0x37   :  { %3168 = vmatpush1.bf16.msra.mxu0 %v13567_v19  ;;  %v13592_v37 = vld [vmem:[#allocation7 + $0x960] ss:$80 sps:$4 sm:$0xff]   ;;  %v13600_v42 = vld [vmem:[#allocation7 + $0x824] ss:$80 sps:$4 sm:$0xff]   ;;  %v13632_v4 = vld [vmem:[#allocation7 + $0x8] ss:$80 sps:$4 sm:$0xff]  }
  0x38   :  { %3249 = vmatpush1.bf16.msra.mxu1 %v13568_v20  ;;  %3169 = vmatprep.subr.bf16.mxu0 %v13569_v21  ;;  %v13599_v41 = vld [vmem:[#allocation7 + $0x8c0] ss:$80 sps:$4 sm:$0xff]   ;;  %v13606_v46 = vld [vmem:[#allocation7 + $0x784] ss:$80 sps:$4 sm:$0xff]   ;;  %v13641_v7 = vld [vmem:[#allocation7 + $0x96c] ss:$80 sps:$4 sm:$0xff]  }
  0x39   :  { %3250 = vmatprep.subr.bf16.mxu1 %v13571_v22  ;;  %v13605_v45 = vld [vmem:[#allocation7 + $0x820] ss:$80 sps:$4 sm:$0xff]   ;;  %v13612_v50 = vld [vmem:[#allocation7 + $0x6e4] ss:$80 sps:$4 sm:$0xff]   ;;  %v13644_v8 = vld [vmem:[#allocation7 + $0xe6c] ss:$80 sps:$4 sm:$0xff]  }
  0x3a   :  { %v13611_v49 = vld [vmem:[#allocation7 + $0x780] ss:$80 sps:$4 sm:$0xff]   ;;  %v15926_v55 = vld [vmem:[%s17165_s0 + $0x20] ss:$12 sps:$4 sm:$0xff]   ;;  %v15945_v9 = vld [vmem:[%s17165_s0 + $0x50] ss:$12 sps:$4 sm:$0xff]  }
  0x3b   :  { %3170 = vmatpush1.bf16.msra.mxu0 %v13573_v23  ;;  %v13617_v54 = vld [vmem:[#allocation7 + $0x6e0] ss:$80 sps:$4 sm:$0xff]   ;;  %v13618_v56 = vld [vmem:[#allocation7 + $0x644] ss:$80 sps:$4 sm:$0xff]   ;;  %v13639_v10 = vld [vmem:[#allocation7 + $0x968] ss:$80 sps:$4 sm:$0xff]  }
  0x3c   :  { %3251 = vmatpush1.bf16.msra.mxu1 %v13574_v24  ;;  %3171 = vmatprep.subr.bf16.mxu0 %v13575_v25  ;;  %v13623_v59 = vld [vmem:[#allocation7 + $0x640] ss:$80 sps:$4 sm:$0xff]   ;;  %v13624_v60 = vld [vmem:[#allocation7 + $0x5a4] ss:$80 sps:$4 sm:$0xff]   ;;  %v13642_v11 = vld [vmem:[#allocation7 + $0xe68] ss:$80 sps:$4 sm:$0xff]  }
  0x3d   :  { %3252 = vmatprep.subr.bf16.mxu1 %v13577_v26  ;;  %v13629_v1 = vld [vmem:[#allocation7 + $0x5a0] ss:$80 sps:$4 sm:$0xff]   ;;  %v13630_v2 = vld [vmem:[#allocation7 + $0x504] ss:$80 sps:$4 sm:$0xff]   ;;  %v13648_v12 = vld [vmem:[#allocation7 + $0x8cc] ss:$80 sps:$4 sm:$0xff]  }
  0x3e   :  { %v13635_v5 = vld [vmem:[#allocation7 + $0x500] ss:$80 sps:$4 sm:$0xff]   ;;  %v15940_v6 = vld [vmem:[%s17165_s0] ss:$12 sps:$4 sm:$0xff]   ;;  %v13651_v13 = vld [vmem:[#allocation7 + $0xdcc] ss:$80 sps:$4 sm:$0xff]  }
  0x3f   :  { %3172 = vmatpush1.bf16.msra.mxu0 %v13579_v27  ;;  %v15950_v14 = vld [vmem:[%s17165_s0 + $0x1c] ss:$12 sps:$4 sm:$0xff]   ;;  %v13646_v15 = vld [vmem:[#allocation7 + $0x8c8] ss:$80 sps:$4 sm:$0xff]   ;;  %v13657_v17 = vld [vmem:[#allocation7 + $0x82c] ss:$80 sps:$4 sm:$0xff]  }
  0x40   :  { %3253 = vmatpush1.bf16.msra.mxu1 %v13580_v28  ;;  %3173 = vmatprep.subr.bf16.mxu0 %v13581_v29  ;;  %v13649_v16 = vld [vmem:[#allocation7 + $0xdc8] ss:$80 sps:$4 sm:$0xff]   ;;  %v13661_v18 = vld [vmem:[#allocation7 + $0xd2c] ss:$80 sps:$4 sm:$0xff]   ;;  %v15959_v19 = vld [vmem:[%s17165_s0 + $0x68] ss:$0 sps:$4 sm:$0xff]  }
  0x41   :  { %3254 = vmatprep.subr.bf16.mxu1 %v13583_v30  ;;  %v15964_v20 = vld [vmem:[%s17165_s0 + $0x18] ss:$12 sps:$4 sm:$0xff]   ;;  %v13655_v21 = vld [vmem:[#allocation7 + $0x828] ss:$80 sps:$4 sm:$0xff]   ;;  %s76_s1 = sshll.u32 %s15861_s13, 4  ;;  %s77_s1 = int_to_ptr.vmem [resolvable:$true] %s76_s1 }
  0x42   :  { %v13659_v22 = vld [vmem:[#allocation7 + $0xd28] ss:$80 sps:$4 sm:$0xff]   ;;  %v13664_v23 = vld [vmem:[#allocation7 + $0x78c] ss:$80 sps:$4 sm:$0xff]  }
  0x43   :  { %3174 = vmatpush1.bf16.msra.mxu0 %v13585_v31  ;;  %v15969_v24 = vld [vmem:[%s17165_s0 + $0x34] ss:$12 sps:$4 sm:$0xff]   ;;  %v15978_v30 = vld [vmem:[%s17165_s0 + $0x30] ss:$12 sps:$4 sm:$0xff]  }
  0x44   :  { %3255 = vmatpush1.bf16.msra.mxu1 %v13586_v32  ;;  %3175 = vmatprep.subr.bf16.mxu0 %v13587_v33  ;;  %v13669_v25 = vld [vmem:[#allocation7 + $0xc8c] ss:$80 sps:$4 sm:$0xff]   ;;  %v13662_v26 = vld [vmem:[#allocation7 + $0x788] ss:$80 sps:$4 sm:$0xff]  }
  0x45   :  { %3321 = vmatprep.subr.bf16.mxu1 %v13591_v34  ;;  %v13667_v27 = vld [vmem:[#allocation7 + $0xc88] ss:$80 sps:$4 sm:$0xff]   ;;  %v13673_v28 = vld [vmem:[#allocation7 + $0x6ec] ss:$80 sps:$4 sm:$0xff]   ;;  %v15983_v34 = vld [vmem:[%s17165_s0 + $0x4c] ss:$12 sps:$4 sm:$0xff]  }
  0x46   :  { %v13680_v29 = vld [vmem:[#allocation7 + $0xbec] ss:$80 sps:$4 sm:$0xff]   ;;  %v13671_v31 = vld [vmem:[#allocation7 + $0x6e8] ss:$80 sps:$4 sm:$0xff]  }
  0x47   :  { %3273 = vmatmul.mubr.bf16.vlgmr.msra.gmra.mxu1 %v15913_v35  ;;  %3176 = vmatpush2.bf16.msra.mxu0 %v13592_v37  ;;  %v13677_v32 = vld [vmem:[#allocation7 + $0x64c] ss:$80 sps:$4 sm:$0xff]   ;;  %v13678_v33 = vld [vmem:[#allocation7 + $0xbe8] ss:$80 sps:$4 sm:$0xff]  }
  0x48   :  { %3322 = vmatpush1.bf16.msra.mxu1 %v13589_v36  ;;  %3177 = vmatprep.subr.bf16.mxu0 %v13594_v38  ;;  %v13690_v36 = vld [vmem:[#allocation7 + $0xb4c] ss:$80 sps:$4 sm:$0xff]   ;;  %v13675_v37 = vld [vmem:[#allocation7 + $0x648] ss:$80 sps:$4 sm:$0xff]  }
  0x49   :  { %3323 = vmatprep.subr.bf16.mxu1 %v13598_v39  ;;  %3282 = vmatprep.mubr.bf16.mxu1 %v15859_v0  ;;  %v13686_v38 = vld [vmem:[#allocation7 + $0x5ac] ss:$80 sps:$4 sm:$0xff]   ;;  %v13688_v39 = vld [vmem:[#allocation7 + $0xb48] ss:$80 sps:$4 sm:$0xff]  }
  0x4b   :  { %3178 = vmatpush2.bf16.msra.mxu0 %v13599_v41  ;;  %v96_v41 = vld [vmem:[%s17165_s0 + $0x60] sm:$0xff] }
  0x4c   :  { %3324 = vmatpush1.bf16.msra.mxu1 %v13596_v40  ;;  %3179 = vmatprep.subr.bf16.mxu0 %v13600_v42  ;;  %v13696_v40 = vld [vmem:[#allocation7 + $0xaac] ss:$80 sps:$4 sm:$0xff]  }
  0x4d   :  { %3325 = vmatprep.subr.bf16.mxu1 %v13604_v43  ;;  %v15993_v42 = vld [vmem:[%s17165_s0 + $0x48] ss:$12 sps:$4 sm:$0xff]   ;;  %v13684_v43 = vld [vmem:[#allocation7 + $0x5a8] ss:$80 sps:$4 sm:$0xff]  }
  0x4f   :  { %3180 = vmatpush2.bf16.msra.mxu0 %v13605_v45  ;;  %3283 = vmatmul.mubr.bf16.gmra.mxu1 %v15926_v55  ;;  %v15995_v45 = vcombine.high %v96_v41, %v96_v41 }
  0x50   :  { %3326 = vmatpush1.bf16.msra.mxu1 %v13602_v44  ;;  %3181 = vmatprep.subr.bf16.mxu0 %v13606_v46  ;;  %v13693_v44 = vld [vmem:[#allocation7 + $0x50c] ss:$80 sps:$4 sm:$0xff]   ;;  %v13694_v46 = vld [vmem:[#allocation7 + $0xaa8] ss:$80 sps:$4 sm:$0xff]  }
  0x51   :  { %3327 = vmatprep.subr.bf16.mxu1 %v13610_v47  ;;  %3292 = vmatprep.mubr.bf16.mxu1 %v15859_v0  ;;  %v13704_v47 = vld [vmem:[#allocation7 + $0xa0c] ss:$80 sps:$4 sm:$0xff]  }
  0x53   :  { %3182 = vmatpush2.bf16.msra.mxu0 %v13611_v49  ;;  %v13701_v49 = vld [vmem:[#allocation7 + $0x474] ss:$80 sps:$4 sm:$0xff]  }
  0x54   :  { %3328 = vmatpush1.bf16.msra.mxu1 %v13608_v48  ;;  %3183 = vmatprep.subr.bf16.mxu0 %v13612_v50  ;;  %v13691_v48 = vld [vmem:[#allocation7 + $0x508] ss:$80 sps:$4 sm:$0xff]  }
  0x55   :  { %3329 = vmatprep.subr.bf16.mxu1 %v13616_v52  ;;  %v13702_v50 = vld [vmem:[#allocation7 + $0xa08] ss:$80 sps:$4 sm:$0xff]   ;;  %v13713_v52 = vld [vmem:[#allocation7 + $0xe74] ss:$80 sps:$4 sm:$0xff]  }
  0x57   :  { %3184 = vmatpush2.bf16.msra.mxu0 %v13617_v54  ;;  %3293 = vmatmul.mubr.bf16.gmra.mxu1 %v15933_v62  ;;  %v13699_v54 = vld [vmem:[#allocation7 + $0x470] ss:$80 sps:$4 sm:$0xff]  }
  0x58   :  { %3330 = vmatpush1.bf16.msra.mxu1 %v13614_v53  ;;  %3185 = vmatprep.subr.bf16.mxu0 %v13618_v56  ;;  %v15999_v53 = vcombine.low %v96_v41, %v96_v41  ;;  %v13707_v56 = vld [vmem:[#allocation7 + $0x3d4] ss:$80 sps:$4 sm:$0xff]  }
  0x59   :  { %3331 = vmatprep.subr.bf16.mxu1 %v13622_v57  ;;  %3302 = vmatprep.mubr.bf16.mxu1 %v15859_v0  ;;  %v13705_v57 = vld [vmem:[#allocation7 + $0x3d0] ss:$80 sps:$4 sm:$0xff]   ;;  %v13767_v41 = vld [vmem:[#allocation7 + $0x6f4] ss:$80 sps:$4 sm:$0xff]  }
  0x5b   :  { %3186 = vmatpush2.bf16.msra.mxu0 %v13623_v59  ;;  %v13708_v59 = vld [vmem:[#allocation7 + $0x330] ss:$80 sps:$4 sm:$0xff]  }
  0x5c   :  { %3332 = vmatpush1.bf16.msra.mxu1 %v13620_v58  ;;  %3187 = vmatprep.subr.bf16.mxu0 %v13624_v60  ;;  %v13710_v58 = vld [vmem:[#allocation7 + $0x334] ss:$80 sps:$4 sm:$0xff]   ;;  %v13711_v60 = vld [vmem:[#allocation7 + $0xe70] ss:$80 sps:$4 sm:$0xff]  }
  0x5d   :  { %3333 = vmatprep.subr.bf16.mxu1 %v13628_v61  ;;  %v13716_v61 = vld [vmem:[#allocation7 + $0x294] ss:$80 sps:$4 sm:$0xff]  }
  0x5f   :  { %3188 = vmatpush2.bf16.msra.mxu0 %v13629_v1  ;;  %3303 = vmatmul.mubr.bf16.gmra.mxu1 %v15945_v9  ;;  %v13714_v1 = vld [vmem:[#allocation7 + $0x290] ss:$80 sps:$4 sm:$0xff]  }
  0x60   :  { %3334 = vmatpush1.bf16.msra.mxu1 %v13626_v63  ;;  %3189 = vmatprep.subr.bf16.mxu0 %v13630_v2  ;;  %v13719_v63 = vld [vmem:[#allocation7 + $0xdd4] ss:$80 sps:$4 sm:$0xff]   ;;  %v13717_v2 = vld [vmem:[#allocation7 + $0xdd0] ss:$80 sps:$4 sm:$0xff]  }
  0x61   :  { %3335 = vmatprep.subr.bf16.mxu1 %v13634_v3  ;;  %3312 = vmatprep.mubr.bf16.mxu1 %v15859_v0  ;;  %v13722_v3 = vld [vmem:[#allocation7 + $0x1f4] ss:$80 sps:$4 sm:$0xff]  }
  0x63   :  { %3190 = vmatpush2.bf16.msra.mxu0 %v13635_v5  ;;  %v13720_v5 = vld [vmem:[#allocation7 + $0x1f0] ss:$80 sps:$4 sm:$0xff]  }
  0x64   :  { %3336 = vmatpush1.bf16.msra.mxu1 %v13632_v4  ;;  %3402 = vmatprep.subr.bf16.mxu0 %v13644_v8  ;;  %v13725_v4 = vld [vmem:[#allocation7 + $0xd34] ss:$80 sps:$4 sm:$0xff]  }
  0x65   :  { %3337 = vmatprep.subr.bf16.mxu1 %v13641_v7  ;;  %v13723_v7 = vld [vmem:[#allocation7 + $0xd30] ss:$80 sps:$4 sm:$0xff]   ;;  %v13728_v8 = vld [vmem:[#allocation7 + $0x154] ss:$80 sps:$4 sm:$0xff]  }
  0x66   :  { %3192 = vmatmul.mubr.bf16.vlgmr.msra.gmra.mxu0 %v15940_v6 }
  0x67   :  { %3403 = vmatpush1.bf16.msra.mxu0 %v13642_v11  ;;  %3201 = vmatprep.mubr.bf16.mxu0 %v15950_v14  ;;  %v13726_v11 = vld [vmem:[#allocation7 + $0x150] ss:$80 sps:$4 sm:$0xff]  }
  0x68   :  { %3338 = vmatpush2.bf16.msra.mxu1 %v13639_v10  ;;  %3404 = vmatprep.subr.bf16.mxu0 %v13651_v13  ;;  %v13731_v10 = vld [vmem:[#allocation7 + $0xc94] ss:$80 sps:$4 sm:$0xff]  }
  0x69   :  { %3339 = vmatprep.subr.bf16.mxu1 %v13648_v12  ;;  %3313 = vmatmul.mubr.bf16.gmra.mxu1 %v15959_v19  ;;  %v13729_v12 = vld [vmem:[#allocation7 + $0xc90] ss:$80 sps:$4 sm:$0xff]   ;;  %v13734_v13 = vld [vmem:[#allocation7 + $0xb4] ss:$80 sps:$4 sm:$0xff]  }
  0x6a   :  { %3353 = vmatprep.mubr.bf16.mxu1 %v15920_v51 }
  0x6b   :  { %3405 = vmatpush1.bf16.msra.mxu0 %v13649_v16  ;;  %v13732_v16 = vld [vmem:[#allocation7 + $0xb0] ss:$80 sps:$4 sm:$0xff]  }
  0x6c   :  { %3340 = vmatpush2.bf16.msra.mxu1 %v13646_v15  ;;  %3406 = vmatprep.subr.bf16.mxu0 %v13661_v18  ;;  %v13740_v15 = vld [vmem:[#allocation7 + $0xbf4] ss:$80 sps:$4 sm:$0xff]  }
  0x6d   :  { %3341 = vmatprep.subr.bf16.mxu1 %v13657_v17  ;;  %v13738_v17 = vld [vmem:[#allocation7 + $0xbf0] ss:$80 sps:$4 sm:$0xff]   ;;  %v13737_v18 = vld [vmem:[#allocation7 + $0x14] ss:$80 sps:$4 sm:$0xff]  }
  0x6e   :  { %3202 = vmatmul.mubr.bf16.gmra.mxu0 %v15964_v20 }
  0x6f   :  { %3407 = vmatpush1.bf16.msra.mxu0 %v13659_v22  ;;  %3211 = vmatprep.mubr.bf16.mxu0 %v15969_v24  ;;  %v13735_v22 = vld [vmem:[#allocation7 + $0x10] ss:$80 sps:$4 sm:$0xff]  }
  0x70   :  { %3342 = vmatpush2.bf16.msra.mxu1 %v13655_v21  ;;  %3408 = vmatprep.subr.bf16.mxu0 %v13669_v25  ;;  %v13746_v21 = vld [vmem:[#allocation7 + $0xb54] ss:$80 sps:$4 sm:$0xff]   ;;  %v13744_v25 = vld [vmem:[#allocation7 + $0xb50] ss:$80 sps:$4 sm:$0xff]  }
  0x71   :  { %3343 = vmatprep.subr.bf16.mxu1 %v13664_v23  ;;  %v13743_v23 = vld [vmem:[#allocation7 + $0x974] ss:$80 sps:$4 sm:$0xff]  }
  0x73   :  { %3409 = vmatpush1.bf16.msra.mxu0 %v13667_v27  ;;  %v13741_v27 = vld [vmem:[#allocation7 + $0x970] ss:$80 sps:$4 sm:$0xff]  }
  0x74   :  { %3344 = vmatpush2.bf16.msra.mxu1 %v13662_v26  ;;  %3410 = vmatprep.subr.bf16.mxu0 %v13680_v29  ;;  %v13752_v26 = vld [vmem:[#allocation7 + $0xab4] ss:$80 sps:$4 sm:$0xff]   ;;  %v13750_v29 = vld [vmem:[#allocation7 + $0xab0] ss:$80 sps:$4 sm:$0xff]  }
  0x75   :  { %3345 = vmatprep.subr.bf16.mxu1 %v13673_v28  ;;  %v13749_v28 = vld [vmem:[#allocation7 + $0x8d4] ss:$80 sps:$4 sm:$0xff]  }
  0x76   :  { %3212 = vmatmul.mubr.bf16.gmra.mxu0 %v15978_v30 }
  0x77   :  { %3411 = vmatpush1.bf16.msra.mxu0 %v13678_v33  ;;  %3221 = vmatprep.mubr.bf16.mxu0 %v15983_v34  ;;  %v13755_v33 = vld [vmem:[#allocation7 + $0x834] ss:$80 sps:$4 sm:$0xff]  }
  0x78   :  { %3346 = vmatpush2.bf16.msra.mxu1 %v13671_v31  ;;  %3412 = vmatprep.subr.bf16.mxu0 %v13690_v36  ;;  %v13758_v31 = vld [vmem:[#allocation7 + $0xa14] ss:$80 sps:$4 sm:$0xff]   ;;  %v13756_v36 = vld [vmem:[#allocation7 + $0xa10] ss:$80 sps:$4 sm:$0xff]  }
  0x79   :  { %3347 = vmatprep.subr.bf16.mxu1 %v13677_v32  ;;  %v13747_v32 = vld [vmem:[#allocation7 + $0x8d0] ss:$80 sps:$4 sm:$0xff]  }
  0x7b   :  { %3413 = vmatpush1.bf16.msra.mxu0 %v13688_v39  ;;  %v13761_v39 = vld [vmem:[#allocation7 + $0x794] ss:$80 sps:$4 sm:$0xff]  }
  0x7c   :  { %3348 = vmatpush2.bf16.msra.mxu1 %v13675_v37  ;;  %3414 = vmatprep.subr.bf16.mxu0 %v13696_v40  ;;  %v13764_v37 = vld [vmem:[#allocation7 + $0x47c] ss:$80 sps:$4 sm:$0xff]   ;;  %v13759_v40 = vld [vmem:[#allocation7 + $0x790] ss:$80 sps:$4 sm:$0xff]  }
  0x7d   :  { %3349 = vmatprep.subr.bf16.mxu1 %v13686_v38  ;;  %v13753_v38 = vld [vmem:[#allocation7 + $0x830] ss:$80 sps:$4 sm:$0xff]  }
  0x7e   :  { %3222 = vmatmul.mubr.bf16.gmra.mxu0 %v15993_v42 }
  0x7f   :  { %3231 = vmatprep.mubr.bf16.mxu0 %v15995_v45  ;;  %3415 = vmatpush1.bf16.msra.mxu0 %v13694_v46  ;;  %v13770_v46 = vld [vmem:[#allocation7 + $0x3dc] ss:$80 sps:$4 sm:$0xff]  }
  0x80   :  { %3350 = vmatpush2.bf16.msra.mxu1 %v13684_v43  ;;  %3416 = vmatprep.subr.bf16.mxu0 %v13704_v47  ;;  %v13762_v43 = vld [vmem:[#allocation7 + $0x478] ss:$80 sps:$4 sm:$0xff]  }
  0x81   :  { %3351 = vmatprep.subr.bf16.mxu1 %v13693_v44  ;;  %v13765_v44 = vld [vmem:[#allocation7 + $0x6f0] ss:$80 sps:$4 sm:$0xff]   ;;  %v13768_v47 = vld [vmem:[#allocation7 + $0x3d8] ss:$80 sps:$4 sm:$0xff]  }
  0x83   :  { %3417 = vmatpush1.bf16.msra.mxu0 %v13702_v50  ;;  %v13779_v50 = vld [vmem:[#allocation7 + $0x5b4] ss:$80 sps:$4 sm:$0xff]  }
  0x84   :  { %3352 = vmatpush2.bf16.msra.mxu1 %v13691_v48  ;;  %3564 = vmatprep.subr.bf16.mxu0 %v13713_v52  ;;  %v13771_v48 = vld [vmem:[#allocation7 + $0x650] ss:$80 sps:$4 sm:$0xff]   ;;  %v13774_v52 = vld [vmem:[#allocation7 + $0x338] ss:$80 sps:$4 sm:$0xff]  }
  0x85   :  { %3483 = vmatprep.subr.bf16.mxu1 %v13701_v49  ;;  %v13776_v49 = vld [vmem:[#allocation7 + $0x33c] ss:$80 sps:$4 sm:$0xff]  }
  0x86   :  { %3232 = vmatmul.mubr.bf16.gmra.mxu0 %v15999_v53 }
  0x87   :  { %3354 = vmatmul.mubr.bf16.vlgmr.msra.gmra.mxu1 %v15940_v6  ;;  %3434 = vmatprep.mubr.bf16.mxu0 %v15859_v0 }
  0x88   :  { %3484 = vmatpush1.bf16.msra.mxu1 %v13699_v54  ;;  %3363 = vmatprep.mubr.bf16.mxu1 %v15950_v14  ;;  %v13777_v54 = vld [vmem:[#allocation7 + $0x5b0] ss:$80 sps:$4 sm:$0xff]  }
  0x89   :  { %3485 = vmatprep.subr.bf16.mxu1 %v13707_v56  ;;  %v13782_v56 = vld [vmem:[#allocation7 + $0x29c] ss:$80 sps:$4 sm:$0xff]  }
  0x8c   :  { %3486 = vmatpush1.bf16.msra.mxu1 %v13705_v57  ;;  %v13785_v57 = vld [vmem:[#allocation7 + $0x514] ss:$80 sps:$4 sm:$0xff]  }
  0x8d   :  { %3487 = vmatprep.subr.bf16.mxu1 %v13710_v58  ;;  %v13780_v58 = vld [vmem:[#allocation7 + $0x298] ss:$80 sps:$4 sm:$0xff]  }
  0x8e   :  { %3435 = vmatmul.mubr.bf16.vlgmr.msra.gmra.mxu0 %v15913_v35 }
  0x8f   :  { %3364 = vmatmul.mubr.bf16.gmra.mxu1 %v15964_v20  ;;  %3565 = vmatpush1.bf16.msra.mxu0 %v13711_v60  ;;  %v13797_v60 = vld [vmem:[#allocation7 + $0xe7c] ss:$80 sps:$4 sm:$0xff]  }
  0x90   :  { %3488 = vmatpush1.bf16.msra.mxu1 %v13708_v59  ;;  %3566 = vmatprep.subr.bf16.mxu0 %v13719_v63  ;;  %v13788_v59 = vld [vmem:[#allocation7 + $0x1fc] ss:$80 sps:$4 sm:$0xff]  }
  0x91   :  { %3489 = vmatprep.subr.bf16.mxu1 %v13716_v61  ;;  %3444 = vmatprep.mubr.bf16.mxu0 %v15859_v0  ;;  %v13786_v61 = vld [vmem:[#allocation7 + $0x1f8] ss:$80 sps:$4 sm:$0xff]   ;;  %v13791_v63 = vld [vmem:[#allocation7 + $0x15c] ss:$80 sps:$4 sm:$0xff]  }
  0x92   :  { %3373 = vmatprep.mubr.bf16.mxu1 %v15969_v24 }
  0x93   :  { %3567 = vmatpush1.bf16.msra.mxu0 %v13717_v2  ;;  %v13803_v2 = vld [vmem:[#allocation7 + $0xddc] ss:$80 sps:$4 sm:$0xff]  }
  0x94   :  { %3490 = vmatpush1.bf16.msra.mxu1 %v13714_v1  ;;  %3568 = vmatprep.subr.bf16.mxu0 %v13725_v4  ;;  %v13795_v1 = vld [vmem:[#allocation7 + $0xe78] ss:$80 sps:$4 sm:$0xff]  }
  0x95   :  { %3491 = vmatprep.subr.bf16.mxu1 %v13722_v3  ;;  %v13794_v3 = vld [vmem:[#allocation7 + $0xbc] ss:$80 sps:$4 sm:$0xff]   ;;  %v13801_v4 = vld [vmem:[#allocation7 + $0xdd8] ss:$80 sps:$4 sm:$0xff]  }
  0x96   :  { %3445 = vmatmul.mubr.bf16.gmra.mxu0 %v15926_v55 }
  0x97   :  { %3374 = vmatmul.mubr.bf16.gmra.mxu1 %v15978_v30  ;;  %3569 = vmatpush1.bf16.msra.mxu0 %v13723_v7  ;;  %v13792_v7 = vld [vmem:[#allocation7 + $0xb8] ss:$80 sps:$4 sm:$0xff]  }
  0x98   :  { %3492 = vmatpush1.bf16.msra.mxu1 %v13720_v5  ;;  %3454 = vmatprep.mubr.bf16.mxu0 %v15859_v0  ;;  %v13809_v5 = vld [vmem:[#allocation7 + $0xd3c] ss:$80 sps:$4 sm:$0xff]  }
  0x99   :  { %3493 = vmatprep.subr.bf16.mxu1 %v13728_v8  ;;  %3570 = vmatprep.subr.bf16.mxu0 %v13731_v10  ;;  %v13800_v8 = vld [vmem:[#allocation7 + $0x1c] ss:$80 sps:$4 sm:$0xff]  }
  0x9a   :  { %3383 = vmatprep.mubr.bf16.mxu1 %v15983_v34  ;;  %v13806_v10 = vld [vmem:[#allocation7 + $0x97c] ss:$80 sps:$4 sm:$0xff]  }
  0x9b   :  { %3571 = vmatpush1.bf16.msra.mxu0 %v13729_v12  ;;  %v13821_v12 = vld [vmem:[#allocation7 + $0xbfc] ss:$80 sps:$4 sm:$0xff]  }
  0x9c   :  { %3494 = vmatpush1.bf16.msra.mxu1 %v13726_v11  ;;  %3572 = vmatprep.subr.bf16.mxu0 %v13740_v15  ;;  %v13813_v11 = vld [vmem:[#allocation7 + $0xc98] ss:$80 sps:$4 sm:$0xff]   ;;  %v13812_v15 = vld [vmem:[#allocation7 + $0x8dc] ss:$80 sps:$4 sm:$0xff]  }
  0x9d   :  { %3495 = vmatprep.subr.bf16.mxu1 %v13734_v13  ;;  %v13804_v13 = vld [vmem:[#allocation7 + $0x978] ss:$80 sps:$4 sm:$0xff]  }
  0x9e   :  { %3455 = vmatmul.mubr.bf16.gmra.mxu0 %v15933_v62 }
  0x9f   :  { %3384 = vmatmul.mubr.bf16.gmra.mxu1 %v15993_v42  ;;  %3573 = vmatpush1.bf16.msra.mxu0 %v13738_v17  ;;  %v13825_v17 = vld [vmem:[#allocation7 + $0xb58] ss:$80 sps:$4 sm:$0xff]  }
  0xa0   :  { %3496 = vmatpush1.bf16.msra.mxu1 %v13732_v16  ;;  %3464 = vmatprep.mubr.bf16.mxu0 %v15859_v0  ;;  %v13810_v16 = vld [vmem:[#allocation7 + $0x8d8] ss:$80 sps:$4 sm:$0xff]  }
  0xa1   :  { %3497 = vmatprep.subr.bf16.mxu1 %v13737_v18  ;;  %3574 = vmatprep.subr.bf16.mxu0 %v13746_v21  ;;  %v13833_v18 = vld [vmem:[#allocation7 + $0xabc] ss:$80 sps:$4 sm:$0xff]  }
  0xa2   :  { %3393 = vmatprep.mubr.bf16.mxu1 %v15995_v45  ;;  %v16041_v21 = vld [vmem:[%s17165_s0 + $0x4] ss:$12 sps:$4 sm:$0xff]  }
  0xa3   :  { %3575 = vmatpush1.bf16.msra.mxu0 %v13744_v25  ;;  %v13830_v25 = vld [vmem:[#allocation7 + $0x6fc] ss:$80 sps:$4 sm:$0xff]  }
  0xa4   :  { %3498 = vmatpush1.bf16.msra.mxu1 %v13735_v22  ;;  %3576 = vmatprep.subr.bf16.mxu0 %v13752_v26  ;;  %v13824_v22 = vld [vmem:[#allocation7 + $0x79c] ss:$80 sps:$4 sm:$0xff]   ;;  %v13837_v26 = vld [vmem:[#allocation7 + $0xa18] ss:$80 sps:$4 sm:$0xff]  }
  0xa5   :  { %3499 = vmatprep.subr.bf16.mxu1 %v13743_v23  ;;  %v13822_v23 = vld [vmem:[#allocation7 + $0x798] ss:$80 sps:$4 sm:$0xff]  }
  0xa6   :  { %3465 = vmatmul.mubr.bf16.gmra.mxu0 %v15945_v9 }
  0xa7   :  { %3394 = vmatmul.mubr.bf16.gmra.mxu1 %v15999_v53  ;;  %3474 = vmatprep.mubr.bf16.mxu0 %v15859_v0 }
  0xa8   :  { %3500 = vmatpush2.bf16.msra.mxu1 %v13741_v27  ;;  %3577 = vmatpush1.bf16.msra.mxu0 %v13750_v29  ;;  %v13845_v27 = vld [vmem:[#allocation7 + $0x484] ss:$80 sps:$4 sm:$0xff]   ;;  %v13836_v29 = vld [vmem:[#allocation7 + $0x65c] ss:$80 sps:$4 sm:$0xff]  }
  0xa9   :  { %3501 = vmatprep.subr.bf16.mxu1 %v13749_v28  ;;  %3578 = vmatprep.subr.bf16.mxu0 %v13758_v31  ;;  %v13828_v28 = vld [vmem:[#allocation7 + $0x6f8] ss:$80 sps:$4 sm:$0xff]   ;;  %v13842_v31 = vld [vmem:[#allocation7 + $0x5bc] ss:$80 sps:$4 sm:$0xff]  }
  0xaa   :  { %3515 = vmatprep.mubr.bf16.mxu1 %v15920_v51  ;;  %v13773_v51 = vld [vmem:[#allocation7 + $0x654] ss:$80 sps:$4 sm:$0xff]  }
  0xac   :  { %3502 = vmatpush2.bf16.msra.mxu1 %v13747_v32  ;;  %3579 = vmatpush1.bf16.msra.mxu0 %v13756_v36  ;;  %v13840_v32 = vld [vmem:[#allocation7 + $0x5b8] ss:$80 sps:$4 sm:$0xff]   ;;  %v13848_v36 = vld [vmem:[#allocation7 + $0x51c] ss:$80 sps:$4 sm:$0xff]  }
  0xad   :  { %3503 = vmatprep.subr.bf16.mxu1 %v13755_v33  ;;  %3645 = vmatprep.subr.bf16.mxu0 %v13764_v37  ;;  %v13843_v33 = vld [vmem:[#allocation7 + $0x480] ss:$80 sps:$4 sm:$0xff]   ;;  %v13851_v37 = vld [vmem:[#allocation7 + $0x3e4] ss:$80 sps:$4 sm:$0xff]  }
  0xae   :  { %3475 = vmatmul.mubr.bf16.gmra.mxu0 %v15959_v19 }
  0xaf   :  { %3596 = vmatprep.mubr.bf16.mxu0 %v15859_v0 }
  0xb0   :  { %3504 = vmatpush2.bf16.msra.mxu1 %v13753_v38  ;;  %v16051_v38 = vld [vmem:[%s17165_s0 + $0x8] ss:$12 sps:$4 sm:$0xff]  }
  0xb1   :  { %3505 = vmatprep.subr.bf16.mxu1 %v13761_v39  ;;  %v13846_v39 = vld [vmem:[#allocation7 + $0x518] ss:$80 sps:$4 sm:$0xff]  }
  0xb4   :  { %3506 = vmatpush2.bf16.msra.mxu1 %v13759_v40  ;;  %v13849_v40 = vld [vmem:[#allocation7 + $0x3e0] ss:$80 sps:$4 sm:$0xff]  }
  0xb5   :  { %3507 = vmatprep.subr.bf16.mxu1 %v13767_v41  ;;  %v13854_v41 = vld [vmem:[#allocation7 + $0x344] ss:$80 sps:$4 sm:$0xff]  }
  0xb6   :  { %3597 = vmatmul.mubr.bf16.vlgmr.msra.gmra.mxu0 %v15913_v35  ;;  %v13783_v35 = vld [vmem:[#allocation7 + $0x510] ss:$80 sps:$4 sm:$0xff]  }
  0xb7   :  { %3646 = vmatpush1.bf16.msra.mxu0 %v13762_v43  ;;  %3606 = vmatprep.mubr.bf16.mxu0 %v15859_v0  ;;  %v13857_v43 = vld [vmem:[#allocation7 + $0xe84] ss:$80 sps:$4 sm:$0xff]  }
  0xb8   :  { %3508 = vmatpush2.bf16.msra.mxu1 %v13765_v44  ;;  %3647 = vmatprep.subr.bf16.mxu0 %v13770_v46  ;;  %v13852_v44 = vld [vmem:[#allocation7 + $0x340] ss:$80 sps:$4 sm:$0xff]  }
  0xb9   :  { %3509 = vmatprep.subr.bf16.mxu1 %v13773_v51  ;;  %v13855_v46 = vld [vmem:[#allocation7 + $0xe80] ss:$80 sps:$4 sm:$0xff]   ;;  %v13860_v51 = vld [vmem:[#allocation7 + $0x2a4] ss:$80 sps:$4 sm:$0xff]  }
  0xbb   :  { %3648 = vmatpush1.bf16.msra.mxu0 %v13768_v47  ;;  %v13863_v47 = vld [vmem:[#allocation7 + $0xde4] ss:$80 sps:$4 sm:$0xff]  }
  0xbc   :  { %3510 = vmatpush2.bf16.msra.mxu1 %v13771_v48  ;;  %3649 = vmatprep.subr.bf16.mxu0 %v13776_v49  ;;  %v16058_v48 = vld [vmem:[%s17165_s0] ss:$12 sps:$4 sm:$0xff]   ;;  %v13858_v49 = vld [vmem:[#allocation7 + $0x2a0] ss:$80 sps:$4 sm:$0xff]  }
  0xbd   :  { %3511 = vmatprep.subr.bf16.mxu1 %v13779_v50  ;;  %v13861_v50 = vld [vmem:[#allocation7 + $0xde0] ss:$80 sps:$4 sm:$0xff]  }
  0xbe   :  { %3607 = vmatmul.mubr.bf16.gmra.mxu0 %v15926_v55  ;;  %v13789_v55 = vld [vmem:[#allocation7 + $0x158] ss:$80 sps:$4 sm:$0xff]  }
  0xbf   :  { %3650 = vmatpush1.bf16.msra.mxu0 %v13774_v52  ;;  %3616 = vmatprep.mubr.bf16.mxu0 %v15859_v0  ;;  %v16064_v52 = vld [vmem:[%s17165_s0 + $0x20] ss:$12 sps:$4 sm:$0xff]  }
  0xc0   :  { %3512 = vmatpush2.bf16.msra.mxu1 %v13777_v54  ;;  %3651 = vmatprep.subr.bf16.mxu0 %v13782_v56  ;;  %v13866_v54 = vld [vmem:[#allocation7 + $0x204] ss:$80 sps:$4 sm:$0xff]  }
  0xc1   :  { %3513 = vmatprep.subr.bf16.mxu1 %v13785_v57  ;;  %v13869_v56 = vld [vmem:[#allocation7 + $0xd44] ss:$80 sps:$4 sm:$0xff]  }
  0xc2   :  { %v16070_v57 = vld [vmem:[%s17165_s0 + $0x1c] ss:$12 sps:$4 sm:$0xff]  }
  0xc3   :  { %3652 = vmatpush1.bf16.msra.mxu0 %v13780_v58  ;;  %v13864_v58 = vld [vmem:[#allocation7 + $0x200] ss:$80 sps:$4 sm:$0xff]  }
  0xc4   :  { %3514 = vmatpush2.bf16.msra.mxu1 %v13783_v35  ;;  %3653 = vmatprep.subr.bf16.mxu0 %v13788_v59  ;;  %v13867_v35 = vld [vmem:[#allocation7 + $0xd40] ss:$80 sps:$4 sm:$0xff]   ;;  %v13872_v59 = vld [vmem:[#allocation7 + $0x164] ss:$80 sps:$4 sm:$0xff]  }
  0xc5   :  { %3726 = vmatprep.subr.bf16.mxu1 %v13797_v60  ;;  %v13875_v60 = vld [vmem:[#allocation7 + $0xca4] ss:$80 sps:$4 sm:$0xff]  }
  0xc6   :  { %3617 = vmatmul.mubr.bf16.gmra.mxu0 %v15933_v62  ;;  %v13815_v62 = vld [vmem:[#allocation7 + $0xc9c] ss:$80 sps:$4 sm:$0xff]  }
  0xc7   :  { %3516 = vmatmul.mubr.bf16.vlgmr.msra.gmra.mxu1 %v15940_v6  ;;  %3654 = vmatpush1.bf16.msra.mxu0 %v13786_v61  ;;  %v13807_v6 = vld [vmem:[#allocation7 + $0xd38] ss:$80 sps:$4 sm:$0xff]   ;;  %v16077_v61 = vld [vmem:[%s17165_s0 + $0x18] ss:$12 sps:$4 sm:$0xff]  }
  0xc8   :  { %3525 = vmatprep.mubr.bf16.mxu1 %v15950_v14  ;;  %3655 = vmatprep.subr.bf16.mxu0 %v13791_v63  ;;  %v13798_v14 = vld [vmem:[#allocation7 + $0x18] ss:$80 sps:$4 sm:$0xff]   ;;  %v13870_v63 = vld [vmem:[#allocation7 + $0x160] ss:$80 sps:$4 sm:$0xff]  }
  0xc9   :  { %3727 = vmatpush1.bf16.msra.mxu1 %v13795_v1  ;;  %3626 = vmatprep.mubr.bf16.mxu0 %v15859_v0  ;;  %v13873_v1 = vld [vmem:[#allocation7 + $0xca0] ss:$80 sps:$4 sm:$0xff]  }
  0xca   :  { %3728 = vmatprep.subr.bf16.mxu1 %v13803_v2  ;;  %v16083_v2 = vld [vmem:[%s17165_s0 + $0x38] ss:$12 sps:$4 sm:$0xff]  }
  0xcb   :  { %3656 = vmatpush1.bf16.msra.mxu0 %v13789_v55  ;;  %v13878_v55 = vld [vmem:[#allocation7 + $0xc4] ss:$80 sps:$4 sm:$0xff]  }
  0xcc   :  { %3657 = vmatprep.subr.bf16.mxu0 %v13794_v3  ;;  %v16089_v3 = vld [vmem:[%s17165_s0 + $0x34] ss:$12 sps:$4 sm:$0xff]  }
  0xcd   :  { %3729 = vmatpush1.bf16.msra.mxu1 %v13801_v4  ;;  %v13884_v4 = vld [vmem:[#allocation7 + $0xc04] ss:$80 sps:$4 sm:$0xff]  }
  0xce   :  { %3730 = vmatprep.subr.bf16.mxu1 %v13809_v5  ;;  %3627 = vmatmul.mubr.bf16.gmra.mxu0 %v15945_v9  ;;  %v13827_v9 = vld [vmem:[#allocation7 + $0xb5c] ss:$80 sps:$4 sm:$0xff]   ;;  %v13876_v5 = vld [vmem:[#allocation7 + $0xc0] ss:$80 sps:$4 sm:$0xff]  }
  0xcf   :  { %3526 = vmatmul.mubr.bf16.gmra.mxu1 %v15964_v20  ;;  %3658 = vmatpush1.bf16.msra.mxu0 %v13792_v7  ;;  %v13819_v20 = vld [vmem:[#allocation7 + $0xbf8] ss:$80 sps:$4 sm:$0xff]   ;;  %v13882_v7 = vld [vmem:[#allocation7 + $0xc00] ss:$80 sps:$4 sm:$0xff]  }
  0xd0   :  { %3535 = vmatprep.mubr.bf16.mxu1 %v15969_v24  ;;  %3659 = vmatprep.subr.bf16.mxu0 %v13800_v8  ;;  %v13818_v24 = vld [vmem:[#allocation7 + $0x83c] ss:$80 sps:$4 sm:$0xff]   ;;  %v13881_v8 = vld [vmem:[#allocation7 + $0x24] ss:$80 sps:$4 sm:$0xff]  }
  0xd1   :  { %3731 = vmatpush1.bf16.msra.mxu1 %v13807_v6  ;;  %3636 = vmatprep.mubr.bf16.mxu0 %v15859_v0  ;;  %v13890_v6 = vld [vmem:[#allocation7 + $0xb64] ss:$80 sps:$4 sm:$0xff]  }
  0xd2   :  { %3732 = vmatprep.subr.bf16.mxu1 %v13815_v62  ;;  %v16096_v62 = vld [vmem:[%s17165_s0 + $0x30] ss:$12 sps:$4 sm:$0xff]  }
  0xd3   :  { %3660 = vmatpush1.bf16.msra.mxu0 %v13798_v14  ;;  %v13879_v14 = vld [vmem:[#allocation7 + $0x20] ss:$80 sps:$4 sm:$0xff]  }
  0xd4   :  { %3661 = vmatprep.subr.bf16.mxu0 %v13806_v10  ;;  %v13887_v10 = vld [vmem:[#allocation7 + $0x984] ss:$80 sps:$4 sm:$0xff]  }
  0xd5   :  { %3733 = vmatpush1.bf16.msra.mxu1 %v13813_v11  ;;  %v16102_v11 = vld [vmem:[%s17165_s0 + $0x50] ss:$12 sps:$4 sm:$0xff]  }
  0xd6   :  { %3734 = vmatprep.subr.bf16.mxu1 %v13821_v12  ;;  %3637 = vmatmul.mubr.bf16.gmra.mxu0 %v15959_v19  ;;  %v13831_v19 = vld [vmem:[#allocation7 + $0xab8] ss:$80 sps:$4 sm:$0xff]  }
  0xd7   :  { %3536 = vmatmul.mubr.bf16.gmra.mxu1 %v15978_v30  ;;  %3662 = vmatpush2.bf16.msra.mxu0 %v13804_v13  ;;  %v13816_v30 = vld [vmem:[#allocation7 + $0x838] ss:$80 sps:$4 sm:$0xff]   ;;  %v13888_v13 = vld [vmem:[#allocation7 + $0xb60] ss:$80 sps:$4 sm:$0xff]  }
  0xd8   :  { %3545 = vmatprep.mubr.bf16.mxu1 %v15983_v34  ;;  %3663 = vmatprep.subr.bf16.mxu0 %v13812_v15  ;;  %v13839_v34 = vld [vmem:[#allocation7 + $0xa1c] ss:$80 sps:$4 sm:$0xff]   ;;  %v16110_v15 = vld [vmem:[%s17165_s0 + $0x4c] ss:$12 sps:$4 sm:$0xff]  }
  0xd9   :  { %3735 = vmatpush1.bf16.msra.mxu1 %v13819_v20  ;;  %3677 = vmatprep.mubr.bf16.mxu0 %v16041_v21  ;;  %v13896_v20 = vld [vmem:[#allocation7 + $0xac4] ss:$80 sps:$4 sm:$0xff]  }
  0xda   :  { %3736 = vmatprep.subr.bf16.mxu1 %v13827_v9  ;;  %v13885_v9 = vld [vmem:[#allocation7 + $0x980] ss:$80 sps:$4 sm:$0xff]  }
  0xdb   :  { %3664 = vmatpush2.bf16.msra.mxu0 %v13810_v16 }
  0xdc   :  { %3665 = vmatprep.subr.bf16.mxu0 %v13818_v24  ;;  %v13893_v24 = vld [vmem:[#allocation7 + $0x8e4] ss:$80 sps:$4 sm:$0xff]  }
  0xdd   :  { %3737 = vmatpush1.bf16.msra.mxu1 %v13825_v17  ;;  %v13894_v17 = vld [vmem:[#allocation7 + $0xac0] ss:$80 sps:$4 sm:$0xff]  }
  0xde   :  { %3738 = vmatprep.subr.bf16.mxu1 %v13833_v18  ;;  %v13902_v18 = vld [vmem:[#allocation7 + $0xa24] ss:$80 sps:$4 sm:$0xff]  }
  0xdf   :  { %3546 = vmatmul.mubr.bf16.gmra.mxu1 %v15993_v42  ;;  %3666 = vmatpush2.bf16.msra.mxu0 %v13816_v30  ;;  %v13834_v42 = vld [vmem:[#allocation7 + $0x658] ss:$80 sps:$4 sm:$0xff]   ;;  %v16119_v30 = vld [vmem:[%s17165_s0 + $0x48] ss:$12 sps:$4 sm:$0xff]  }
  0xe0   :  { %3555 = vmatprep.mubr.bf16.mxu1 %v15995_v45  ;;  %3667 = vmatprep.subr.bf16.mxu0 %v13824_v22  ;;  %v13891_v22 = vld [vmem:[#allocation7 + $0x8e0] ss:$80 sps:$4 sm:$0xff]  }
  0xe1   :  { %3739 = vmatpush1.bf16.msra.mxu1 %v13831_v19  ;;  %v16125_v19 = vld [vmem:[%s17165_s0 + $0x68] ss:$0 sps:$4 sm:$0xff]  }
  0xe2   :  { %3740 = vmatprep.subr.bf16.mxu1 %v13839_v34 }
  0xe3   :  { %3668 = vmatpush2.bf16.msra.mxu0 %v13822_v23  ;;  %v13899_v23 = vld [vmem:[#allocation7 + $0x844] ss:$80 sps:$4 sm:$0xff]  }
  0xe4   :  { %3669 = vmatprep.subr.bf16.mxu0 %v13830_v25  ;;  %v13900_v25 = vld [vmem:[#allocation7 + $0xa20] ss:$80 sps:$4 sm:$0xff]  }
  0xe5   :  { %3741 = vmatpush1.bf16.msra.mxu1 %v13837_v26  ;;  %v13908_v26 = vld [vmem:[#allocation7 + $0x48c] ss:$80 sps:$4 sm:$0xff]  }
  0xe6   :  { %3807 = vmatprep.subr.bf16.mxu1 %v13845_v27  ;;  %v13897_v27 = vld [vmem:[#allocation7 + $0x840] ss:$80 sps:$4 sm:$0xff]  }
  0xe7   :  { %3556 = vmatmul.mubr.bf16.gmra.mxu1 %v15999_v53  ;;  %3670 = vmatpush2.bf16.msra.mxu0 %v13828_v28 }
  0xe8   :  { %3758 = vmatprep.mubr.bf16.mxu1 %v15859_v0  ;;  %3671 = vmatprep.subr.bf16.mxu0 %v13836_v29  ;;  %v13905_v29 = vld [vmem:[#allocation7 + $0x7a4] ss:$80 sps:$4 sm:$0xff]  }
  0xeb   :  { %3672 = vmatpush2.bf16.msra.mxu0 %v13834_v42  ;;  %v13903_v42 = vld [vmem:[#allocation7 + $0x7a0] ss:$80 sps:$4 sm:$0xff]  }
  0xec   :  { %3673 = vmatprep.subr.bf16.mxu0 %v13842_v31 }
  0xef   :  { %3759 = vmatmul.mubr.bf16.vlgmr.msra.gmra.mxu1 %v16051_v38  ;;  %3674 = vmatpush2.bf16.msra.mxu0 %v13840_v32  ;;  %v584_v32 = vlaneseq }
  0xf0   :  { %3808 = vmatpush1.bf16.msra.mxu1 %v13843_v33  ;;  %3675 = vmatprep.subr.bf16.mxu0 %v13848_v36  ;;  %v13911_v36 = vld [vmem:[#allocation7 + $0x704] ss:$80 sps:$4 sm:$0xff]  }
  0xf1   :  { %3809 = vmatprep.subr.bf16.mxu1 %v13851_v37  ;;  %3768 = vmatprep.mubr.bf16.mxu1 %v15859_v0  ;;  %v13906_v37 = vld [vmem:[#allocation7 + $0x488] ss:$80 sps:$4 sm:$0xff]  }
  0xf3   :  { %3676 = vmatpush2.bf16.msra.mxu0 %v13846_v39  ;;  %v13909_v39 = vld [vmem:[#allocation7 + $0x700] ss:$80 sps:$4 sm:$0xff]  }
  0xf4   :  { %3810 = vmatpush1.bf16.msra.mxu1 %v13849_v40  ;;  %3888 = vmatprep.subr.bf16.mxu0 %v13857_v43 }
  0xf5   :  { %3811 = vmatprep.subr.bf16.mxu1 %v13854_v41  ;;  %v16142_v41 = vshrl.u32 %v584_v32, 7  ;;  %v13939_v32 = vld [vmem:[#allocation7 + $0xe88] ss:$80 sps:$4 sm:$0xff]  }
  0xf6   :  { %3678 = vmatmul.mubr.bf16.vlgmr.msra.gmra.mxu0 %v16058_v48 }
  0xf7   :  { %3769 = vmatmul.mubr.bf16.gmra.mxu1 %v16064_v52  ;;  %3889 = vmatpush1.bf16.msra.mxu0 %v13855_v46  ;;  %v13917_v46 = vld [vmem:[#allocation7 + $0x664] ss:$80 sps:$4 sm:$0xff]  }
  0xf8   :  { %3812 = vmatpush1.bf16.msra.mxu1 %v13852_v44  ;;  %3890 = vmatprep.subr.bf16.mxu0 %v13863_v47  ;;  %v13914_v44 = vld [vmem:[#allocation7 + $0x3ec] ss:$80 sps:$4 sm:$0xff]   ;;  %v13915_v47 = vld [vmem:[#allocation7 + $0x660] ss:$80 sps:$4 sm:$0xff]  }
  0xf9   :  { %3813 = vmatprep.subr.bf16.mxu1 %v13860_v51  ;;  %3687 = vmatprep.mubr.bf16.mxu0 %v16070_v57  ;;  %v13912_v51 = vld [vmem:[#allocation7 + $0x3e8] ss:$80 sps:$4 sm:$0xff]  }
  0xfa   :  { %3778 = vmatprep.mubr.bf16.mxu1 %v15859_v0 }
  0xfb   :  { %3891 = vmatpush1.bf16.msra.mxu0 %v13861_v50  ;;  %v13920_v50 = vld [vmem:[#allocation7 + $0x34c] ss:$80 sps:$4 sm:$0xff]  }
  0xfc   :  { %3814 = vmatpush1.bf16.msra.mxu1 %v13858_v49  ;;  %3892 = vmatprep.subr.bf16.mxu0 %v13869_v56 }
  0xfd   :  { %3815 = vmatprep.subr.bf16.mxu1 %v13866_v54  ;;  %v16150_v54 = vsub.s32 0, %v16142_v41 }
  0xfe   :  { %3688 = vmatmul.mubr.bf16.gmra.mxu0 %v16077_v61 }
  0xff   :  { %3779 = vmatmul.mubr.bf16.gmra.mxu1 %v16083_v2  ;;  %3893 = vmatpush1.bf16.msra.mxu0 %v13867_v35  ;;  %v16154_v35 = vld [vmem:[#allocation9] sm:$0xff] }
 0x100   :  { %3816 = vmatpush1.bf16.msra.mxu1 %v13864_v58  ;;  %3697 = vmatprep.mubr.bf16.mxu0 %v16089_v3  ;;  %v13923_v58 = vld [vmem:[#allocation7 + $0x5c4] ss:$80 sps:$4 sm:$0xff]  }
 0x101   :  { %3817 = vmatprep.subr.bf16.mxu1 %v13872_v59  ;;  %3894 = vmatprep.subr.bf16.mxu0 %v13875_v60  ;;  %v13918_v59 = vld [vmem:[#allocation7 + $0x348] ss:$80 sps:$4 sm:$0xff]   ;;  %v13921_v60 = vld [vmem:[#allocation7 + $0x5c0] ss:$80 sps:$4 sm:$0xff]  }
 0x102   :  { %3788 = vmatprep.mubr.bf16.mxu1 %v15859_v0 }
 0x103   :  { %3895 = vmatpush1.bf16.msra.mxu0 %v13873_v1 }
 0x104   :  { %3818 = vmatpush1.bf16.msra.mxu1 %v13870_v63  ;;  %3896 = vmatprep.subr.bf16.mxu0 %v13884_v4  ;;  %v16157_v63 = vsub.s32 1, %v16142_v41  ;;  %v13926_v4 = vld [vmem:[#allocation7 + $0x2ac] ss:$80 sps:$4 sm:$0xff]  }
 0x105   :  { %3819 = vmatprep.subr.bf16.mxu1 %v13878_v55 }
 0x106   :  { %3698 = vmatmul.mubr.bf16.gmra.mxu0 %v16096_v62 }
 0x107   :  { %3789 = vmatmul.mubr.bf16.gmra.mxu1 %v16102_v11  ;;  %v16105_v12 = vpop.f32.mrf.mxu1  ;;  %3897 = vmatpush1.bf16.msra.mxu0 %v13882_v7  ;;  %v16170_v7 = vrot.slane %v16154_v35, %v16157_v63 }
 0x108   :  { %3820 = vmatpush1.bf16.msra.mxu1 %v13876_v5  ;;  %3707 = vmatprep.mubr.bf16.mxu0 %v16110_v15  ;;  %v13929_v5 = vld [vmem:[#allocation7 + $0x524] ss:$80 sps:$4 sm:$0xff]  }
 0x109   :  { %3821 = vmatprep.subr.bf16.mxu1 %v13881_v8  ;;  %3898 = vmatprep.subr.bf16.mxu0 %v13890_v6  ;;  %v16114_v16 = vpop.f32.mrf.mxu1  ;;  %v13924_v8 = vld [vmem:[#allocation7 + $0x2a8] ss:$80 sps:$4 sm:$0xff]   ;;  %v13927_v6 = vld [vmem:[#allocation7 + $0x520] ss:$80 sps:$4 sm:$0xff]  }
 0x10a   :  { %3798 = vmatprep.mubr.bf16.mxu1 %v15859_v0 }
 0x10b   :  { %3899 = vmatpush1.bf16.msra.mxu0 %v13888_v13  ;;  %v16128_v34 = vpop.f32.mrf.mxu1 }
 0x10c   :  { %3822 = vmatpush1.bf16.msra.mxu1 %v13879_v14  ;;  %3900 = vmatprep.subr.bf16.mxu0 %v13896_v20 }
 0x10d   :  { %3823 = vmatprep.subr.bf16.mxu1 %v13887_v10  ;;  %v16132_v28 = vpop.f32.mrf.mxu1 }
 0x10e   :  { %3708 = vmatmul.mubr.bf16.gmra.mxu0 %v16119_v30 }
 0x10f   :  { %3799 = vmatmul.mubr.bf16.gmra.mxu1 %v16125_v19  ;;  %3717 = vmatprep.mubr.bf16.mxu0 %v15995_v45  ;;  %v16134_v31 = vpop.f32.mrf.mxu1 }
 0x110   :  { %3824 = vmatpush2.bf16.msra.mxu1 %v13885_v9  ;;  %3901 = vmatpush1.bf16.msra.mxu0 %v13894_v17  ;;  %v13941_v17 = vld [vmem:[#allocation7 + $0xe8c] ss:$80 sps:$4 sm:$0xff]  }
 0x111   :  { %3825 = vmatprep.subr.bf16.mxu1 %v13893_v24  ;;  %3902 = vmatprep.subr.bf16.mxu0 %v13902_v18  ;;  %v16138_v33 = vpop.f32.mrf.mxu1  ;;  %v13932_v24 = vld [vmem:[#allocation7 + $0x20c] ss:$80 sps:$4 sm:$0xff]  }
 0x112   :  { %3839 = vmatprep.mubr.bf16.mxu1 %v16041_v21 }
 0x113   :  { %v16140_v40 = vpop.f32.mrf.mxu1 }
 0x114   :  { %3826 = vmatpush2.bf16.msra.mxu1 %v13891_v22  ;;  %3903 = vmatpush1.bf16.msra.mxu0 %v13900_v25 }
 0x115   :  { %3827 = vmatprep.subr.bf16.mxu1 %v13899_v23  ;;  %3969 = vmatprep.subr.bf16.mxu0 %v13908_v26  ;;  %v16144_v43 = vpop.f32.mrf.mxu1  ;;  %v13930_v23 = vld [vmem:[#allocation7 + $0x208] ss:$80 sps:$4 sm:$0xff]  }
 0x116   :  { %3718 = vmatmul.mubr.bf16.gmra.mxu0 %v15999_v53 }
 0x117   :  { %3920 = vmatprep.mubr.bf16.mxu0 %v15859_v0  ;;  %v16146_v49 = vpop.f32.mrf.mxu1 }
 0x118   :  { %3828 = vmatpush2.bf16.msra.mxu1 %v13897_v27 }
 0x119   :  { %3829 = vmatprep.subr.bf16.mxu1 %v13905_v29  ;;  %v16152_v56 = vpop.f32.mrf.mxu1 }
 0x11b   :  { %v16159_v1 = vpop.f32.mrf.mxu1 }
 0x11c   :  { %3830 = vmatpush2.bf16.msra.mxu1 %v13903_v42 }
 0x11d   :  { %3831 = vmatprep.subr.bf16.mxu1 %v13911_v36  ;;  %v16166_v55 = vpop.f32.mrf.mxu1 }
 0x11e   :  { %3921 = vmatmul.mubr.bf16.vlgmr.msra.gmra.mxu0 %v16051_v38  ;;  %v16164_v38 = vrot.slane %v16154_v35, %v16150_v54 }
 0x11f   :  { %3970 = vmatpush1.bf16.msra.mxu0 %v13906_v37  ;;  %3930 = vmatprep.mubr.bf16.mxu0 %v15859_v0  ;;  %v16172_v14 = vpop.f32.mrf.mxu1 }
 0x120   :  { %3832 = vmatpush2.bf16.msra.mxu1 %v13909_v39  ;;  %3971 = vmatprep.subr.bf16.mxu0 %v13914_v44  ;;  %v13947_v39 = vld [vmem:[#allocation7 + $0xdec] ss:$80 sps:$4 sm:$0xff]  }
 0x121   :  { %3833 = vmatprep.subr.bf16.mxu1 %v13917_v46  ;;  %v16176_v20 = vpop.f32.mrf.mxu1 }
 0x123   :  { %3972 = vmatpush1.bf16.msra.mxu0 %v13912_v51  ;;  %v16180_v25 = vpop.f32.mrf.mxu1 }
 0x124   :  { %3834 = vmatpush2.bf16.msra.mxu1 %v13915_v47  ;;  %3973 = vmatprep.subr.bf16.mxu0 %v13920_v50  ;;  %v13933_v47 = vld [vmem:[#allocation7 + $0x168] ss:$80 sps:$4 sm:$0xff]  }
 0x125   :  { %3835 = vmatprep.subr.bf16.mxu1 %v13923_v58  ;;  %v16185_v29 = vpop.f32.mrf.mxu1 }
 0x126   :  { %v3193_v10 = vpop.f32.mrf.mxu0  ;;  %3931 = vmatmul.mubr.bf16.gmra.mxu0 %v16064_v52 }
 0x127   :  { %3974 = vmatpush1.bf16.msra.mxu0 %v13918_v59  ;;  %v3194_v13 = vadd.f32 %v3193_v10, %v16164_v38  ;;  %3940 = vmatprep.mubr.bf16.mxu0 %v15859_v0  ;;  %v13945_v59 = vld [vmem:[#allocation7 + $0xde8] ss:$80 sps:$4 sm:$0xff]  }
 0x128   :  { %3836 = vmatpush2.bf16.msra.mxu1 %v13921_v60  ;;  %v3195_v9 = vpop.f32.mrf.mxu0  ;;  %3975 = vmatprep.subr.bf16.mxu0 %v13926_v4 }
 0x129   :  { %3837 = vmatprep.subr.bf16.mxu1 %v13929_v5  ;;  %v3275_v18 = vadd.f32 %v16105_v12, %v3194_v13  ;;  %v3196_v22 = vadd.f32 %v3195_v9, %v16170_v7  ;;  %v13935_v12 = vld [vmem:[#allocation7 + $0x16c] ss:$80 sps:$4 sm:$0xff]   ;;  %v16189_v44 = vpop.f32.mrf.mxu1 }
 0x12a   :  { %v3197_v52 = vpop.f32.mrf.mxu0  ;;  %v13959_v9 = vld [vmem:[#allocation7 + $0xcac] ss:$80 sps:$4 sm:$0xff]  }
 0x12b   :  { %4779 = vst [vmem:[#allocation2] sm:$0xff] %v3275_v18  ;;  %v3277_v26 = vadd.f32 %v16114_v16, %v3196_v22  ;;  %3976 = vmatpush1.bf16.msra.mxu0 %v13924_v8  ;;  %v3198_v27 = vadd.f32 %v3197_v52, %v16164_v38  ;;  %v16196_v50 = vpop.f32.mrf.mxu1  ;;  %v13936_v8 = vld [vmem:[#allocation7 + $0xc8] ss:$80 sps:$4 sm:$0xff]  }
 0x12c   :  { %3838 = vmatpush2.bf16.msra.mxu1 %v13927_v6  ;;  %v3199_v42 = vpop.f32.mrf.mxu0  ;;  %3977 = vmatprep.subr.bf16.mxu0 %v13932_v24  ;;  %v13944_v6 = vld [vmem:[#allocation7 + $0x2c] ss:$80 sps:$4 sm:$0xff]   ;;  %v13942_v18 = vld [vmem:[#allocation7 + $0x28] ss:$80 sps:$4 sm:$0xff]  }
 0x12d   :  { %4050 = vmatprep.subr.bf16.mxu1 %v13941_v17  ;;  %4780 = vst [vmem:[#allocation2 + $0x8] sm:$0xff] %v3277_v26  ;;  %v3279_v36 = vadd.f32 %v16128_v34, %v3198_v27  ;;  %v3200_v37 = vadd.f32 %v3199_v42, %v16170_v7  ;;  %v13938_v34 = vld [vmem:[#allocation7 + $0xcc] ss:$80 sps:$4 sm:$0xff]   ;;  %v13957_v26 = vld [vmem:[#allocation7 + $0xca8] ss:$80 sps:$4 sm:$0xff]  }
 0x12e   :  { %v3203_v16 = vpop.f32.mrf.mxu0  ;;  %3941 = vmatmul.mubr.bf16.gmra.mxu0 %v16083_v2  ;;  %v13948_v42 = vld [vmem:[#allocation7 + $0x988] ss:$80 sps:$4 sm:$0xff]  }
 0x12f   :  { %3840 = vmatmul.mubr.bf16.vlgmr.msra.gmra.mxu1 %v16058_v48  ;;  %4799 = vst [vmem:[#allocation2 + $0xa0] sm:$0xff] %v3279_v36  ;;  %v3281_v46 = vadd.f32 %v16132_v28, %v3200_v37  ;;  %3978 = vmatpush1.bf16.msra.mxu0 %v13930_v23  ;;  %v3204_v51 = vadd.f32 %v3203_v16, %v16164_v38  ;;  %v13953_v48 = vld [vmem:[#allocation7 + $0xd4c] ss:$80 sps:$4 sm:$0xff]   ;;  %v3318_v28 = vpop.f32.mrf.mxu1  ;;  %v13963_v37 = vld [vmem:[#allocation7 + $0xc08] ss:$80 sps:$4 sm:$0xff]  }
 0x130   :  { %3849 = vmatprep.mubr.bf16.mxu1 %v16070_v57  ;;  %v3205_v58 = vpop.f32.mrf.mxu0  ;;  %3979 = vmatprep.subr.bf16.mxu0 %v13935_v12  ;;  %v13956_v36 = vld [vmem:[#allocation7 + $0x8ec] ss:$80 sps:$4 sm:$0xff]   ;;  %v13954_v16 = vld [vmem:[#allocation7 + $0x8e8] ss:$80 sps:$4 sm:$0xff]   ;;  %v16228_v28 = vsub.s32 2, %v16142_v41 }
 0x131   :  { %4051 = vmatpush1.bf16.msra.mxu1 %v13939_v32  ;;  %4800 = vst [vmem:[#allocation2 + $0xa8] sm:$0xff] %v3281_v46  ;;  %v3285_v2 = vadd.f32 %v16134_v31, %v3204_v51  ;;  %v3206_v60 = vadd.f32 %v3205_v58, %v16170_v7  ;;  %3950 = vmatprep.mubr.bf16.mxu0 %v15859_v0  ;;  %v3319_v10 = vpop.f32.mrf.mxu1  ;;  %v13951_v31 = vld [vmem:[#allocation7 + $0xd48] ss:$80 sps:$4 sm:$0xff]   ;;  %v13971_v46 = vld [vmem:[#allocation7 + $0xb6c] ss:$80 sps:$4 sm:$0xff]  }
 0x132   :  { %4052 = vmatprep.subr.bf16.mxu1 %v13947_v39  ;;  %v3207_v4 = vpop.f32.mrf.mxu0  ;;  %v13969_v58 = vld [vmem:[#allocation7 + $0xb68] ss:$80 sps:$4 sm:$0xff]  }
 0x133   :  { %4819 = vst [vmem:[#allocation2 + $0x140] sm:$0xff] %v3285_v2  ;;  %v3287_v57 = vadd.f32 %v16138_v33, %v3206_v60  ;;  %3980 = vmatpush1.bf16.msra.mxu0 %v13933_v47  ;;  %v3208_v5 = vadd.f32 %v3207_v4, %v16164_v38  ;;  %v13968_v2 = vld [vmem:[#allocation7 + $0x7ac] ss:$80 sps:$4 sm:$0xff]  }
 0x134   :  { %v3209_v13 = vpop.f32.mrf.mxu0  ;;  %3981 = vmatprep.subr.bf16.mxu0 %v13938_v34 }
 0x135   :  { %4053 = vmatpush1.bf16.msra.mxu1 %v13945_v59  ;;  %4820 = vst [vmem:[#allocation2 + $0x148] sm:$0xff] %v3287_v57  ;;  %v3289_v24 = vadd.f32 %v16140_v40, %v3208_v5  ;;  %v3210_v17 = vadd.f32 %v3209_v13, %v16170_v7  ;;  %v13950_v40 = vld [vmem:[#allocation7 + $0x98c] ss:$80 sps:$4 sm:$0xff]   ;;  %v16233_v5 = vsub.s32 3, %v16142_v41 }
 0x136   :  { %4054 = vmatprep.subr.bf16.mxu1 %v13953_v48  ;;  %v3213_v33 = vpop.f32.mrf.mxu0  ;;  %3951 = vmatmul.mubr.bf16.gmra.mxu0 %v16102_v11  ;;  %v13965_v11 = vld [vmem:[#allocation7 + $0xc0c] ss:$80 sps:$4 sm:$0xff]   ;;  %v13960_v48 = vld [vmem:[#allocation7 + $0x848] ss:$80 sps:$4 sm:$0xff]  }
 0x137   :  { %3850 = vmatmul.mubr.bf16.gmra.mxu1 %v16077_v61  ;;  %4839 = vst [vmem:[#allocation2 + $0x1e0] sm:$0xff] %v3289_v24  ;;  %v3291_v22 = vadd.f32 %v16144_v43, %v3210_v17  ;;  %3982 = vmatpush1.bf16.msra.mxu0 %v13936_v8  ;;  %v3214_v23 = vadd.f32 %v3213_v33, %v16164_v38  ;;  %v13989_v33 = vld [vmem:[#allocation7 + $0x494] ss:$80 sps:$4 sm:$0xff]  }
 0x138   :  { %3859 = vmatprep.mubr.bf16.mxu1 %v16089_v3  ;;  %v3215_v52 = vpop.f32.mrf.mxu0  ;;  %3983 = vmatprep.subr.bf16.mxu0 %v13944_v6 }
 0x139   :  { %4055 = vmatpush1.bf16.msra.mxu1 %v13951_v31  ;;  %4840 = vst [vmem:[#allocation2 + $0x1e8] sm:$0xff] %v3291_v22  ;;  %v3295_v27 = vadd.f32 %v16146_v49, %v3214_v23  ;;  %v3216_v61 = vadd.f32 %v3215_v52, %v16170_v7  ;;  %3960 = vmatprep.mubr.bf16.mxu0 %v15859_v0  ;;  %v13966_v31 = vld [vmem:[#allocation7 + $0x7a8] ss:$80 sps:$4 sm:$0xff]  }
 0x13a   :  { %4056 = vmatprep.subr.bf16.mxu1 %v13959_v9  ;;  %v3217_v43 = vpop.f32.mrf.mxu0  ;;  %v13974_v9 = vld [vmem:[#allocation7 + $0x70c] ss:$80 sps:$4 sm:$0xff]  }
 0x13b   :  { %4859 = vst [vmem:[#allocation2 + $0x280] sm:$0xff] %v3295_v27  ;;  %v3297_v12 = vadd.f32 %v16152_v56, %v3216_v61  ;;  %3984 = vmatpush1.bf16.msra.mxu0 %v13942_v18  ;;  %v3218_v3 = vadd.f32 %v3217_v43, %v16164_v38  ;;  %v13980_v61 = vld [vmem:[#allocation7 + $0x66c] ss:$80 sps:$4 sm:$0xff]  }
 0x13c   :  { %v3219_v32 = vpop.f32.mrf.mxu0  ;;  %3985 = vmatprep.subr.bf16.mxu0 %v13950_v40 }
 0x13d   :  { %4057 = vmatpush1.bf16.msra.mxu1 %v13957_v26  ;;  %4860 = vst [vmem:[#allocation2 + $0x288] sm:$0xff] %v3297_v12  ;;  %v3299_v49 = vadd.f32 %v16159_v1, %v3218_v3  ;;  %v3220_v39 = vadd.f32 %v3219_v32, %v16170_v7  ;;  %v13962_v1 = vld [vmem:[#allocation7 + $0x84c] ss:$80 sps:$4 sm:$0xff]   ;;  %v13972_v26 = vld [vmem:[#allocation7 + $0x708] ss:$80 sps:$4 sm:$0xff]  }
 0x13e   :  { %4058 = vmatprep.subr.bf16.mxu1 %v13965_v11  ;;  %v3223_v51 = vpop.f32.mrf.mxu0  ;;  %3961 = vmatmul.mubr.bf16.gmra.mxu0 %v16125_v19  ;;  %v13977_v19 = vld [vmem:[#allocation7 + $0xacc] ss:$80 sps:$4 sm:$0xff]  }
 0x13f   :  { %3860 = vmatmul.mubr.bf16.gmra.mxu1 %v16096_v62  ;;  %4879 = vst [vmem:[#allocation2 + $0x320] sm:$0xff] %v3299_v49  ;;  %v3301_v56 = vadd.f32 %v16166_v55, %v3220_v39  ;;  %3986 = vmatpush2.bf16.msra.mxu0 %v13948_v42  ;;  %v3224_v47 = vadd.f32 %v3223_v51, %v16164_v38  ;;  %v13986_v3 = vld [vmem:[#allocation7 + $0x5cc] ss:$80 sps:$4 sm:$0xff]  }
 0x140   :  { %3869 = vmatprep.mubr.bf16.mxu1 %v16110_v15  ;;  %v3225_v34 = vpop.f32.mrf.mxu0  ;;  %3987 = vmatprep.subr.bf16.mxu0 %v13956_v36 }
 0x141   :  { %4059 = vmatpush1.bf16.msra.mxu1 %v13963_v37  ;;  %4880 = vst [vmem:[#allocation2 + $0x328] sm:$0xff] %v3301_v56  ;;  %v3305_v59 = vadd.f32 %v16172_v14, %v3224_v47  ;;  %v3226_v62 = vadd.f32 %v3225_v34, %v16170_v7  ;;  %4001 = vmatprep.mubr.bf16.mxu0 %v16041_v21  ;;  %v13975_v14 = vld [vmem:[#allocation7 + $0xac8] ss:$80 sps:$4 sm:$0xff]   ;;  %v13987_v56 = vld [vmem:[#allocation7 + $0x490] ss:$80 sps:$4 sm:$0xff]  }
 0x142   :  { %4060 = vmatprep.subr.bf16.mxu1 %v13971_v46  ;;  %v3227_v55 = vpop.f32.mrf.mxu0  ;;  %v13984_v37 = vld [vmem:[#allocation7 + $0x5c8] ss:$80 sps:$4 sm:$0xff]   ;;  %v13992_v34 = vld [vmem:[#allocation7 + $0x52c] ss:$80 sps:$4 sm:$0xff]  }
 0x143   :  { %4899 = vst [vmem:[#allocation2 + $0x3c0] sm:$0xff] %v3305_v59  ;;  %v3307_v15 = vadd.f32 %v16176_v20, %v3226_v62  ;;  %3988 = vmatpush2.bf16.msra.mxu0 %v13954_v16  ;;  %v3228_v60 = vadd.f32 %v3227_v55, %v16164_v38  ;;  %v13983_v20 = vld [vmem:[#allocation7 + $0xa2c] ss:$80 sps:$4 sm:$0xff]  }
 0x144   :  { %v3229_v4 = vpop.f32.mrf.mxu0  ;;  %3989 = vmatprep.subr.bf16.mxu0 %v13962_v1  ;;  %v13995_v1 = vld [vmem:[#allocation7 + $0x3f4] ss:$80 sps:$4 sm:$0xff]  }
 0x145   :  { %4061 = vmatpush1.bf16.msra.mxu1 %v13969_v58  ;;  %4900 = vst [vmem:[#allocation2 + $0x3c8] sm:$0xff] %v3307_v15  ;;  %v3309_v57 = vadd.f32 %v16180_v25, %v3228_v60  ;;  %v3230_v21 = vadd.f32 %v3229_v4, %v16170_v7  ;;  %v16240_v25 = vrot.slane %v16154_v35, %v16228_v28  ;;  %v13990_v60 = vld [vmem:[#allocation7 + $0x528] ss:$80 sps:$4 sm:$0xff]   ;;  %v13993_v4 = vld [vmem:[#allocation7 + $0x3f0] ss:$80 sps:$4 sm:$0xff]  }
 0x146   :  { %4062 = vmatprep.subr.bf16.mxu1 %v13977_v19  ;;  %v3233_v8 = vpop.f32.mrf.mxu0 }
 0x147   :  { %3870 = vmatmul.mubr.bf16.gmra.mxu1 %v16119_v30  ;;  %v3355_v6 = vpop.f32.mrf.mxu1  ;;  %4919 = vst [vmem:[#allocation2 + $0x460] sm:$0xff] %v3309_v57  ;;  %v3311_v10 = vadd.f32 %v16185_v29, %v3230_v21  ;;  %3990 = vmatpush2.bf16.msra.mxu0 %v13960_v48  ;;  %v3234_v13 = vadd.f32 %v3233_v8, %v16164_v38  ;;  %v13981_v30 = vld [vmem:[#allocation7 + $0xa28] ss:$80 sps:$4 sm:$0xff]   ;;  %v16261_v48 = vld [vmem:[%s17165_s0 + $0x8] ss:$12 sps:$4 sm:$0xff]  }
 0x148   :  { %3879 = vmatprep.mubr.bf16.mxu1 %v15995_v45  ;;  %v3235_v24 = vpop.f32.mrf.mxu0  ;;  %3991 = vmatprep.subr.bf16.mxu0 %v13968_v2  ;;  %v16247_v38 = vrot.slane %v16154_v35, %v16233_v5  ;;  %v3356_v40 = vadd.f32 %v3355_v6, %v16240_v25  ;;  %v13998_v57 = vld [vmem:[#allocation7 + $0x354] ss:$80 sps:$4 sm:$0xff]  }
 0x149   :  { %v3357_v17 = vpop.f32.mrf.mxu1  ;;  %4063 = vmatpush1.bf16.msra.mxu1 %v13975_v14  ;;  %4920 = vst [vmem:[#allocation2 + $0x468] sm:$0xff] %v3311_v10  ;;  %v3315_v18 = vadd.f32 %v16189_v44, %v3234_v13  ;;  %v3236_v29 = vadd.f32 %v3235_v24, %v16170_v7  ;;  %v13978_v7 = vld [vmem:[#allocation7 + $0x668] ss:$80 sps:$4 sm:$0xff]   ;;  %v14001_v21 = vld [vmem:[#allocation7 + $0xe94] ss:$80 sps:$4 sm:$0xff]  }
 0x14a   :  { %4064 = vmatprep.subr.bf16.mxu1 %v13983_v20  ;;  %v3237_v22 = vpop.f32.mrf.mxu0  ;;  %v3358_v35 = vadd.f32 %v3357_v17, %v16247_v38  ;;  %v13996_v24 = vld [vmem:[#allocation7 + $0x350] ss:$80 sps:$4 sm:$0xff]  }
 0x14b   :  { %v3359_v23 = vpop.f32.mrf.mxu1  ;;  %4939 = vst [vmem:[#allocation2 + $0x500] sm:$0xff] %v3315_v18  ;;  %v3317_v52 = vadd.f32 %v16196_v50, %v3236_v29  ;;  %3992 = vmatpush2.bf16.msra.mxu0 %v13966_v31  ;;  %v13999_v17 = vld [vmem:[#allocation7 + $0xe90] ss:$80 sps:$4 sm:$0xff]   ;;  %v14004_v18 = vld [vmem:[#allocation7 + $0x2b4] ss:$80 sps:$4 sm:$0xff]  }
 0x14c   :  { %v3238_v27 = vpop.f32.mrf.mxu0  ;;  %3993 = vmatprep.subr.bf16.mxu0 %v13974_v9  ;;  %v3360_v50 = vadd.f32 %v3359_v23, %v16240_v25  ;;  %v14007_v29 = vld [vmem:[#allocation7 + $0xdf4] ss:$80 sps:$4 sm:$0xff]  }
 0x14d   :  { %v3361_v44 = vpop.f32.mrf.mxu1  ;;  %4065 = vmatpush1.bf16.msra.mxu1 %v13981_v30  ;;  %4940 = vst [vmem:[#allocation2 + $0x508] sm:$0xff] %v3317_v52  ;;  %v16272_v52 = vld [vmem:[%s17165_s0] ss:$12 sps:$4 sm:$0xff]  }
 0x14e   :  { %4131 = vmatprep.subr.bf16.mxu1 %v13989_v33  ;;  %v3436_v42 = vpop.f32.mrf.mxu0  ;;  %v3362_v16 = vadd.f32 %v3361_v44, %v16247_v38  ;;  %v16278_v27 = vld [vmem:[%s17165_s0 + $0x20] ss:$12 sps:$4 sm:$0xff]  }
 0x14f   :  { %3880 = vmatmul.mubr.bf16.gmra.mxu1 %v15999_v53  ;;  %v3365_v11 = vpop.f32.mrf.mxu1  ;;  %3994 = vmatpush2.bf16.msra.mxu0 %v13972_v26  ;;  %v3437_v43 = vadd.f32 %v3436_v42, %v3356_v40 }
 0x150   :  { %4082 = vmatprep.mubr.bf16.mxu1 %v15859_v0  ;;  %v3438_v12 = vpop.f32.mrf.mxu0  ;;  %3995 = vmatprep.subr.bf16.mxu0 %v13980_v61  ;;  %v3366_v51 = vadd.f32 %v3365_v11, %v16240_v25  ;;  %v14010_v11 = vld [vmem:[#allocation7 + $0x214] ss:$80 sps:$4 sm:$0xff]  }
 0x151   :  { %v3367_v32 = vpop.f32.mrf.mxu1  ;;  %4781 = vst [vmem:[#allocation2 + $0x10] sm:$0xff] %v3437_v43  ;;  %v3439_v36 = vadd.f32 %v3438_v12, %v3358_v35  ;;  %v14002_v35 = vld [vmem:[#allocation7 + $0x2b0] ss:$80 sps:$4 sm:$0xff]   ;;  %v14013_v43 = vld [vmem:[#allocation7 + $0xd54] ss:$80 sps:$4 sm:$0xff]  }
 0x152   :  { %v3440_v49 = vpop.f32.mrf.mxu0  ;;  %v3368_v62 = vadd.f32 %v3367_v32, %v16247_v38  ;;  %v16286_v32 = vld [vmem:[%s17165_s0 + $0x1c] ss:$12 sps:$4 sm:$0xff]  }
 0x153   :  { %v3369_v39 = vpop.f32.mrf.mxu1  ;;  %4782 = vst [vmem:[#allocation2 + $0x18] sm:$0xff] %v3439_v36  ;;  %3996 = vmatpush2.bf16.msra.mxu0 %v13978_v7  ;;  %v3441_v46 = vadd.f32 %v3440_v49, %v3360_v50  ;;  %v14005_v7 = vld [vmem:[#allocation7 + $0xdf0] ss:$80 sps:$4 sm:$0xff]  }
 0x154   :  { %v3442_v47 = vpop.f32.mrf.mxu0  ;;  %3997 = vmatprep.subr.bf16.mxu0 %v13986_v3  ;;  %v3370_v15 = vadd.f32 %v3369_v39, %v16240_v25 }
 0x155   :  { %v3371_v58 = vpop.f32.mrf.mxu1  ;;  %4801 = vst [vmem:[#allocation2 + $0xb0] sm:$0xff] %v3441_v46  ;;  %v3443_v59 = vadd.f32 %v3442_v47, %v3362_v16  ;;  %v14008_v16 = vld [vmem:[#allocation7 + $0x210] ss:$80 sps:$4 sm:$0xff]  }
 0x156   :  { %v3446_v19 = vpop.f32.mrf.mxu0  ;;  %v3372_v6 = vadd.f32 %v3371_v58, %v16247_v38  ;;  %v14011_v46 = vld [vmem:[#allocation7 + $0xd50] ss:$80 sps:$4 sm:$0xff]   ;;  %v14019_v58 = vld [vmem:[#allocation7 + $0xcb4] ss:$80 sps:$4 sm:$0xff]  }
 0x157   :  { %4083 = vmatmul.mubr.bf16.vlgmr.msra.gmra.mxu1 %v16261_v48  ;;  %v3375_v55 = vpop.f32.mrf.mxu1  ;;  %4802 = vst [vmem:[#allocation2 + $0xb8] sm:$0xff] %v3443_v59  ;;  %3998 = vmatpush2.bf16.msra.mxu0 %v13984_v37  ;;  %v3447_v2 = vadd.f32 %v3446_v19, %v3366_v51  ;;  %v16295_v59 = vld [vmem:[%s17165_s0 + $0x18] ss:$12 sps:$4 sm:$0xff]  }
 0x158   :  { %4132 = vmatpush1.bf16.msra.mxu1 %v13987_v56  ;;  %v3448_v14 = vpop.f32.mrf.mxu0  ;;  %3999 = vmatprep.subr.bf16.mxu0 %v13992_v34  ;;  %v3376_v9 = vadd.f32 %v3375_v55, %v16240_v25  ;;  %v14016_v56 = vld [vmem:[#allocation7 + $0x174] ss:$80 sps:$4 sm:$0xff]   ;;  %v16301_v55 = vld [vmem:[%s17165_s0 + $0x38] ss:$12 sps:$4 sm:$0xff]  }
 0x159   :  { %4133 = vmatprep.subr.bf16.mxu1 %v13995_v1  ;;  %v3377_v20 = vpop.f32.mrf.mxu1  ;;  %4821 = vst [vmem:[#allocation2 + $0x150] sm:$0xff] %v3447_v2  ;;  %v3449_v8 = vadd.f32 %v3448_v14, %v3368_v62  ;;  %4092 = vmatprep.mubr.bf16.mxu1 %v15859_v0 }
 0x15a   :  { %v3450_v10 = vpop.f32.mrf.mxu0  ;;  %v3378_v23 = vadd.f32 %v3377_v20, %v16247_v38 }
 0x15b   :  { %v3379_v13 = vpop.f32.mrf.mxu1  ;;  %4822 = vst [vmem:[#allocation2 + $0x158] sm:$0xff] %v3449_v8  ;;  %4000 = vmatpush2.bf16.msra.mxu0 %v13990_v60  ;;  %v3451_v31 = vadd.f32 %v3450_v10, %v3370_v15  ;;  %v14014_v60 = vld [vmem:[#allocation7 + $0x170] ss:$80 sps:$4 sm:$0xff]   ;;  %v14028_v8 = vld [vmem:[#allocation7 + $0xc14] ss:$80 sps:$4 sm:$0xff]  }
 0x15c   :  { %4134 = vmatpush1.bf16.msra.mxu1 %v13993_v4  ;;  %v3452_v30 = vpop.f32.mrf.mxu0  ;;  %4212 = vmatprep.subr.bf16.mxu0 %v14001_v21  ;;  %v3380_v61 = vadd.f32 %v3379_v13, %v16240_v25  ;;  %v14017_v4 = vld [vmem:[#allocation7 + $0xcb0] ss:$80 sps:$4 sm:$0xff]   ;;  %v14022_v21 = vld [vmem:[#allocation7 + $0xd4] ss:$80 sps:$4 sm:$0xff]  }
 0x15d   :  { %4135 = vmatprep.subr.bf16.mxu1 %v13998_v57  ;;  %v3381_v33 = vpop.f32.mrf.mxu1  ;;  %4841 = vst [vmem:[#allocation2 + $0x1f0] sm:$0xff] %v3451_v31  ;;  %v3453_v22 = vadd.f32 %v3452_v30, %v3372_v6  ;;  %v16308_v57 = vld [vmem:[%s17165_s0 + $0x34] ss:$12 sps:$4 sm:$0xff]   ;;  %v14026_v30 = vld [vmem:[#allocation7 + $0xc10] ss:$80 sps:$4 sm:$0xff]  }
 0x15e   :  { %4002 = vmatmul.mubr.bf16.vlgmr.msra.gmra.mxu0 %v16272_v52  ;;  %v3456_v40 = vpop.f32.mrf.mxu0  ;;  %v3382_v3 = vadd.f32 %v3381_v33, %v16247_v38 }
 0x15f   :  { %v3385_v26 = vpop.f32.mrf.mxu1  ;;  %4093 = vmatmul.mubr.bf16.gmra.mxu1 %v16278_v27  ;;  %4842 = vst [vmem:[#allocation2 + $0x1f8] sm:$0xff] %v3453_v22  ;;  %4213 = vmatpush1.bf16.msra.mxu0 %v13999_v17  ;;  %v3457_v44 = vadd.f32 %v3456_v40, %v3376_v9  ;;  %v14020_v17 = vld [vmem:[#allocation7 + $0xd0] ss:$80 sps:$4 sm:$0xff]   ;;  %v14034_v40 = vld [vmem:[#allocation7 + $0xb74] ss:$80 sps:$4 sm:$0xff]  }
 0x160   :  { %4136 = vmatpush1.bf16.msra.mxu1 %v13996_v24  ;;  %v3458_v42 = vpop.f32.mrf.mxu0  ;;  %4214 = vmatprep.subr.bf16.mxu0 %v14007_v29  ;;  %v3386_v39 = vadd.f32 %v3385_v26, %v16240_v25  ;;  %v14025_v29 = vld [vmem:[#allocation7 + $0x34] ss:$80 sps:$4 sm:$0xff]  }
 0x161   :  { %4137 = vmatprep.subr.bf16.mxu1 %v14004_v18  ;;  %v3387_v50 = vpop.f32.mrf.mxu1  ;;  %4861 = vst [vmem:[#allocation2 + $0x290] sm:$0xff] %v3457_v44  ;;  %v3459_v12 = vadd.f32 %v3458_v42, %v3378_v23  ;;  %4011 = vmatprep.mubr.bf16.mxu0 %v16286_v32  ;;  %v16318_v26 = vld [vmem:[%s17165_s0 + $0x30] ss:$12 sps:$4 sm:$0xff]   ;;  %v16330_v42 = vld [vmem:[%s17165_s0 + $0x4c] ss:$12 sps:$4 sm:$0xff]  }
 0x162   :  { %4102 = vmatprep.mubr.bf16.mxu1 %v15859_v0  ;;  %v3460_v36 = vpop.f32.mrf.mxu0  ;;  %v3388_v1 = vadd.f32 %v3387_v50, %v16247_v38  ;;  %v16324_v44 = vld [vmem:[%s17165_s0 + $0x50] ss:$12 sps:$4 sm:$0xff]  }
 0x163   :  { %v3389_v37 = vpop.f32.mrf.mxu1  ;;  %4862 = vst [vmem:[#allocation2 + $0x298] sm:$0xff] %v3459_v12  ;;  %v3461_v49 = vadd.f32 %v3460_v36, %v3380_v61  ;;  %4215 = vmatpush1.bf16.msra.mxu0 %v14005_v7  ;;  %v14040_v50 = vld [vmem:[#allocation7 + $0xad4] ss:$80 sps:$4 sm:$0xff]  }
 0x164   :  { %4138 = vmatpush1.bf16.msra.mxu1 %v14002_v35  ;;  %v3462_v51 = vpop.f32.mrf.mxu0  ;;  %4216 = vmatprep.subr.bf16.mxu0 %v14013_v43  ;;  %v3390_v15 = vadd.f32 %v3389_v37, %v16240_v25  ;;  %v14032_v35 = vld [vmem:[#allocation7 + $0xb70] ss:$80 sps:$4 sm:$0xff]   ;;  %v14037_v37 = vld [vmem:[#allocation7 + $0x8f4] ss:$80 sps:$4 sm:$0xff]  }
 0x165   :  { %4139 = vmatprep.subr.bf16.mxu1 %v14010_v11  ;;  %v3391_v47 = vpop.f32.mrf.mxu1  ;;  %4881 = vst [vmem:[#allocation2 + $0x330] sm:$0xff] %v3461_v49  ;;  %v3463_v34 = vadd.f32 %v3462_v51, %v3382_v3  ;;  %v14031_v11 = vld [vmem:[#allocation7 + $0x994] ss:$80 sps:$4 sm:$0xff]   ;;  %v14029_v3 = vld [vmem:[#allocation7 + $0x990] ss:$80 sps:$4 sm:$0xff]  }
 0x166   :  { %4012 = vmatmul.mubr.bf16.gmra.mxu0 %v16295_v59  ;;  %v3466_v62 = vpop.f32.mrf.mxu0  ;;  %v3392_v10 = vadd.f32 %v3391_v47, %v16247_v38  ;;  %v14038_v49 = vld [vmem:[#allocation7 + $0xad0] ss:$80 sps:$4 sm:$0xff]  }
 0x167   :  { %v3395_v19 = vpop.f32.mrf.mxu1  ;;  %4103 = vmatmul.mubr.bf16.gmra.mxu1 %v16301_v55  ;;  %4882 = vst [vmem:[#allocation2 + $0x338] sm:$0xff] %v3463_v34  ;;  %v3467_v2 = vadd.f32 %v3466_v62, %v3386_v39  ;;  %4217 = vmatpush1.bf16.msra.mxu0 %v14011_v46  ;;  %v14046_v39 = vld [vmem:[#allocation7 + $0xa34] ss:$80 sps:$4 sm:$0xff]   ;;  %v16343_v51 = vld [vmem:[%s17165_s0 + $0x68] ss:$0 sps:$4 sm:$0xff]  }
 0x168   :  { %4140 = vmatpush1.bf16.msra.mxu1 %v14008_v16  ;;  %v3468_v14 = vpop.f32.mrf.mxu0  ;;  %4021 = vmatprep.mubr.bf16.mxu0 %v16308_v57  ;;  %v3396_v24 = vadd.f32 %v3395_v19, %v16240_v25  ;;  %v16337_v16 = vld [vmem:[%s17165_s0 + $0x48] ss:$12 sps:$4 sm:$0xff]   ;;  %v14043_v34 = vld [vmem:[#allocation7 + $0x854] ss:$80 sps:$4 sm:$0xff]   ;;  %v16350_v62 = vld [vmem:[%s17165_s0 + $0x4] ss:$12 sps:$4 sm:$0xff]  }
 0x169   :  { %4141 = vmatprep.subr.bf16.mxu1 %v14016_v56  ;;  %v3397_v20 = vpop.f32.mrf.mxu1  ;;  %4901 = vst [vmem:[#allocation2 + $0x3d0] sm:$0xff] %v3467_v2  ;;  %v3469_v6 = vadd.f32 %v3468_v14, %v3388_v1  ;;  %4218 = vmatprep.subr.bf16.mxu0 %v14019_v58  ;;  %v14035_v56 = vld [vmem:[#allocation7 + $0x8f0] ss:$80 sps:$4 sm:$0xff]   ;;  %v14052_v58 = vld [vmem:[#allocation7 + $0x49c] ss:$80 sps:$4 sm:$0xff]  }
 0x16a   :  { %4112 = vmatprep.mubr.bf16.mxu1 %v15859_v0  ;;  %v3470_v13 = vpop.f32.mrf.mxu0  ;;  %v3398_v23 = vadd.f32 %v3397_v20, %v16247_v38  ;;  %v14023_v38 = vld [vmem:[#allocation7 + $0x30] ss:$80 sps:$4 sm:$0xff]   ;;  %v14055_v20 = vld [vmem:[#allocation7 + $0x714] ss:$80 sps:$4 sm:$0xff]  }
 0x16b   :  { %v3399_v31 = vpop.f32.mrf.mxu1  ;;  %4902 = vst [vmem:[#allocation2 + $0x3d8] sm:$0xff] %v3469_v6  ;;  %v3471_v9 = vadd.f32 %v3470_v13, %v3390_v15  ;;  %4219 = vmatpush1.bf16.msra.mxu0 %v14017_v4  ;;  %v14044_v1 = vld [vmem:[#allocation7 + $0xa30] ss:$80 sps:$4 sm:$0xff]   ;;  %v606_v6 = vsub.s32 5, %v16142_v41  ;;  %v14050_v13 = vld [vmem:[#allocation7 + $0x498] ss:$80 sps:$4 sm:$0xff]  }
 0x16c   :  { %4142 = vmatpush1.bf16.msra.mxu1 %v14014_v60  ;;  %v3472_v18 = vpop.f32.mrf.mxu0  ;;  %4220 = vmatprep.subr.bf16.mxu0 %v14028_v8  ;;  %v14041_v2 = vld [vmem:[#allocation7 + $0x850] ss:$80 sps:$4 sm:$0xff]   ;;  %v14049_v60 = vld [vmem:[#allocation7 + $0x7b4] ss:$80 sps:$4 sm:$0xff]  }
 0x16d   :  { %4143 = vmatprep.subr.bf16.mxu1 %v14022_v21  ;;  %v3400_v33 = vpop.f32.mrf.mxu1  ;;  %4921 = vst [vmem:[#allocation2 + $0x470] sm:$0xff] %v3471_v9  ;;  %v3473_v22 = vadd.f32 %v3472_v18, %v3392_v10  ;;  %v14047_v14 = vld [vmem:[#allocation7 + $0x7b0] ss:$80 sps:$4 sm:$0xff]   ;;  %v602_v21 = vsub.s32 4, %v16142_v41 }
 0x16e   :  { %4022 = vmatmul.mubr.bf16.gmra.mxu0 %v16318_v26  ;;  %v3476_v25 = vpop.f32.mrf.mxu0  ;;  %v14053_v31 = vld [vmem:[#allocation7 + $0x710] ss:$80 sps:$4 sm:$0xff]  }
 0x16f   :  { %4113 = vmatmul.mubr.bf16.gmra.mxu1 %v16324_v44  ;;  %4922 = vst [vmem:[#allocation2 + $0x478] sm:$0xff] %v3473_v22  ;;  %v3477_v61 = vadd.f32 %v3476_v25, %v3396_v24  ;;  %4221 = vmatpush1.bf16.msra.mxu0 %v14026_v30  ;;  %v16365_v9 = vld [vmem:[#allocation9] sm:$0xff] }
 0x170   :  { %4144 = vmatpush1.bf16.msra.mxu1 %v14020_v17  ;;  %v3478_v7 = vpop.f32.mrf.mxu0  ;;  %4031 = vmatprep.mubr.bf16.mxu0 %v16330_v42  ;;  %v16370_v24 = vrot.slane %v16365_v9, %v602_v21  ;;  %v14058_v17 = vld [vmem:[#allocation7 + $0x3fc] ss:$80 sps:$4 sm:$0xff]   ;;  %v14061_v30 = vld [vmem:[#allocation7 + $0x674] ss:$80 sps:$4 sm:$0xff]   ;;  %v14059_v25 = vld [vmem:[#allocation7 + $0x670] ss:$80 sps:$4 sm:$0xff]  }
 0x171   :  { %4145 = vmatprep.subr.bf16.mxu1 %v14025_v29  ;;  %4941 = vst [vmem:[#allocation2 + $0x510] sm:$0xff] %v3477_v61  ;;  %v3479_v43 = vadd.f32 %v3478_v7, %v3398_v23  ;;  %4222 = vmatprep.subr.bf16.mxu0 %v14034_v40  ;;  %v16377_v29 = vrot.slane %v16365_v9, %v606_v6  ;;  %v14056_v40 = vld [vmem:[#allocation7 + $0x3f8] ss:$80 sps:$4 sm:$0xff]  }
 0x172   :  { %4122 = vmatprep.mubr.bf16.mxu1 %v15859_v0  ;;  %v3480_v12 = vpop.f32.mrf.mxu0 }
 0x173   :  { %4942 = vst [vmem:[#allocation2 + $0x518] sm:$0xff] %v3479_v43  ;;  %4223 = vmatpush1.bf16.msra.mxu0 %v14032_v35  ;;  %v14067_v35 = vld [vmem:[#allocation7 + $0x5d4] ss:$80 sps:$4 sm:$0xff]  }
 0x174   :  { %4146 = vmatpush1.bf16.msra.mxu1 %v14023_v38  ;;  %v3481_v36 = vpop.f32.mrf.mxu0  ;;  %4224 = vmatprep.subr.bf16.mxu0 %v14040_v50  ;;  %v14064_v38 = vld [vmem:[#allocation7 + $0x35c] ss:$80 sps:$4 sm:$0xff]  }
 0x175   :  { %4147 = vmatprep.subr.bf16.mxu1 %v14031_v11 }
 0x176   :  { %4032 = vmatmul.mubr.bf16.gmra.mxu0 %v16337_v16  ;;  %v3598_v46 = vpop.f32.mrf.mxu0 }
 0x177   :  { %4123 = vmatmul.mubr.bf16.gmra.mxu1 %v16343_v51  ;;  %4041 = vmatprep.mubr.bf16.mxu0 %v15995_v45 }
 0x178   :  { %4148 = vmatpush2.bf16.msra.mxu1 %v14029_v3  ;;  %v3600_v47 = vpop.f32.mrf.mxu0  ;;  %4225 = vmatpush1.bf16.msra.mxu0 %v14038_v49  ;;  %v14065_v49 = vld [vmem:[#allocation7 + $0x5d0] ss:$80 sps:$4 sm:$0xff]  }
 0x179   :  { %4149 = vmatprep.subr.bf16.mxu1 %v14037_v37  ;;  %4226 = vmatprep.subr.bf16.mxu0 %v14046_v39  ;;  %v14062_v37 = vld [vmem:[#allocation7 + $0x358] ss:$80 sps:$4 sm:$0xff]  }
 0x17a   :  { %4163 = vmatprep.mubr.bf16.mxu1 %v16350_v62  ;;  %v3602_v19 = vpop.f32.mrf.mxu0 }
 0x17c   :  { %4150 = vmatpush2.bf16.msra.mxu1 %v14035_v56  ;;  %v16353_v15 = vpop.f32.mrf.mxu0  ;;  %4227 = vmatpush1.bf16.msra.mxu0 %v14044_v1  ;;  %v14070_v56 = vld [vmem:[#allocation7 + $0x2bc] ss:$80 sps:$4 sm:$0xff]  }
 0x17d   :  { %4151 = vmatprep.subr.bf16.mxu1 %v14043_v34  ;;  %4293 = vmatprep.subr.bf16.mxu0 %v14052_v58 }
 0x17e   :  { %4042 = vmatmul.mubr.bf16.gmra.mxu0 %v15999_v53  ;;  %v16356_v4 = vpop.f32.mrf.mxu0 }
 0x17f   :  { %4244 = vmatprep.mubr.bf16.mxu0 %v15859_v0 }
 0x180   :  { %4152 = vmatpush2.bf16.msra.mxu1 %v14041_v2  ;;  %v16360_v8 = vpop.f32.mrf.mxu0 }
 0x181   :  { %4153 = vmatprep.subr.bf16.mxu1 %v14049_v60 }
 0x182   :  { %v16363_v10 = vpop.f32.mrf.mxu0 }
 0x184   :  { %4154 = vmatpush2.bf16.msra.mxu1 %v14047_v14  ;;  %v16372_v18 = vpop.f32.mrf.mxu0 }
 0x185   :  { %4155 = vmatprep.subr.bf16.mxu1 %v14055_v20  ;;  %v14068_v20 = vld [vmem:[#allocation7 + $0x2b8] ss:$80 sps:$4 sm:$0xff]  }
 0x186   :  { %4245 = vmatmul.mubr.bf16.vlgmr.msra.gmra.mxu0 %v16261_v48  ;;  %v16380_v22 = vpop.f32.mrf.mxu0 }
 0x187   :  { %v3517_v33 = vpop.f32.mrf.mxu1  ;;  %4294 = vmatpush1.bf16.msra.mxu0 %v14050_v13  ;;  %4254 = vmatprep.mubr.bf16.mxu0 %v15859_v0  ;;  %v14071_v13 = vld [vmem:[#allocation7 + $0x530] ss:$80 sps:$4 sm:$0xff]  }
 0x188   :  { %4156 = vmatpush2.bf16.msra.mxu1 %v14053_v31  ;;  %v3518_v23 = vadd.f32 %v3517_v33, %v16370_v24  ;;  %4295 = vmatprep.subr.bf16.mxu0 %v14058_v17  ;;  %v16383_v7 = vpop.f32.mrf.mxu0  ;;  %v14085_v17 = vld [vmem:[#allocation7 + $0xe9c] ss:$80 sps:$4 sm:$0xff]  }
 0x189   :  { %v3519_v61 = vpop.f32.mrf.mxu1  ;;  %4157 = vmatprep.subr.bf16.mxu1 %v14061_v30 }
 0x18a   :  { %v3599_v11 = vadd.f32 %v3598_v46, %v3518_v23  ;;  %v3520_v50 = vadd.f32 %v3519_v61, %v16377_v29  ;;  %v16387_v12 = vpop.f32.mrf.mxu0  ;;  %v14073_v46 = vld [vmem:[#allocation7 + $0x534] ss:$80 sps:$4 sm:$0xff]  }
 0x18b   :  { %v3521_v43 = vpop.f32.mrf.mxu1  ;;  %4296 = vmatpush1.bf16.msra.mxu0 %v14056_v40 }
 0x18c   :  { %4783 = vst [vmem:[#allocation2 + $0x20] sm:$0xff] %v3599_v11  ;;  %v3601_v3 = vadd.f32 %v3600_v47, %v3520_v50  ;;  %4158 = vmatpush2.bf16.msra.mxu1 %v14059_v25  ;;  %v3522_v36 = vadd.f32 %v3521_v43, %v16370_v24  ;;  %4297 = vmatprep.subr.bf16.mxu0 %v14064_v38  ;;  %v16390_v34 = vpop.f32.mrf.mxu0  ;;  %v14074_v38 = vld [vmem:[#allocation7 + $0x218] ss:$80 sps:$4 sm:$0xff]   ;;  %v14079_v11 = vld [vmem:[#allocation7 + $0x17c] ss:$80 sps:$4 sm:$0xff]  }
 0x18d   :  { %v3523_v39 = vpop.f32.mrf.mxu1  ;;  %4159 = vmatprep.subr.bf16.mxu1 %v14067_v35  ;;  %v14083_v50 = vld [vmem:[#allocation7 + $0xe98] ss:$80 sps:$4 sm:$0xff]  }
 0x18e   :  { %4784 = vst [vmem:[#allocation2 + $0x28] sm:$0xff] %v3601_v3  ;;  %v3603_v1 = vadd.f32 %v3602_v19, %v3522_v36  ;;  %v3524_v58 = vadd.f32 %v3523_v39, %v16377_v29  ;;  %4255 = vmatmul.mubr.bf16.gmra.mxu0 %v16278_v27  ;;  %v16394_v47 = vpop.f32.mrf.mxu0  ;;  %v14076_v19 = vld [vmem:[#allocation7 + $0x21c] ss:$80 sps:$4 sm:$0xff]  }
 0x18f   :  { %v3527_v2 = vpop.f32.mrf.mxu1  ;;  %4298 = vmatpush1.bf16.msra.mxu0 %v14062_v37  ;;  %4264 = vmatprep.mubr.bf16.mxu0 %v15859_v0  ;;  %v14091_v36 = vld [vmem:[#allocation7 + $0xdfc] ss:$80 sps:$4 sm:$0xff]  }
 0x190   :  { %4803 = vst [vmem:[#allocation2 + $0xc0] sm:$0xff] %v3603_v1  ;;  %v3605_v60 = vadd.f32 %v16353_v15, %v3524_v58  ;;  %4160 = vmatpush2.bf16.msra.mxu1 %v14065_v49  ;;  %v3528_v14 = vadd.f32 %v3527_v2, %v16370_v24  ;;  %4299 = vmatprep.subr.bf16.mxu0 %v14070_v56  ;;  %v16398_v30 = vpop.f32.mrf.mxu0  ;;  %v14077_v56 = vld [vmem:[#allocation7 + $0x178] ss:$80 sps:$4 sm:$0xff]  }
 0x191   :  { %v3529_v31 = vpop.f32.mrf.mxu1  ;;  %4161 = vmatprep.subr.bf16.mxu1 %v14073_v46  ;;  %v14082_v46 = vld [vmem:[#allocation7 + $0xdc] ss:$80 sps:$4 sm:$0xff]   ;;  %v14089_v1 = vld [vmem:[#allocation7 + $0xdf8] ss:$80 sps:$4 sm:$0xff]  }
 0x192   :  { %4804 = vst [vmem:[#allocation2 + $0xc8] sm:$0xff] %v3605_v60  ;;  %v3609_v33 = vadd.f32 %v16356_v4, %v3528_v14  ;;  %v3530_v23 = vadd.f32 %v3529_v31, %v16377_v29  ;;  %v16403_v40 = vpop.f32.mrf.mxu0  ;;  %v14097_v14 = vld [vmem:[#allocation7 + $0xd5c] ss:$80 sps:$4 sm:$0xff]  }
 0x193   :  { %v3531_v15 = vpop.f32.mrf.mxu1  ;;  %4300 = vmatpush1.bf16.msra.mxu0 %v14068_v20 }
 0x194   :  { %4823 = vst [vmem:[#allocation2 + $0x160] sm:$0xff] %v3609_v33  ;;  %v3611_v25 = vadd.f32 %v16360_v8, %v3530_v23  ;;  %4162 = vmatpush2.bf16.msra.mxu1 %v14071_v13  ;;  %v3532_v61 = vadd.f32 %v3531_v15, %v16370_v24  ;;  %4301 = vmatprep.subr.bf16.mxu0 %v14076_v19  ;;  %v16407_v4 = vpop.f32.mrf.mxu0  ;;  %v14080_v19 = vld [vmem:[#allocation7 + $0xd8] ss:$80 sps:$4 sm:$0xff]   ;;  %v14088_v33 = vld [vmem:[#allocation7 + $0x3c] ss:$80 sps:$4 sm:$0xff]  }
 0x195   :  { %v3533_v35 = vpop.f32.mrf.mxu1  ;;  %4374 = vmatprep.subr.bf16.mxu1 %v14085_v17 }
 0x196   :  { %4824 = vst [vmem:[#allocation2 + $0x168] sm:$0xff] %v3611_v25  ;;  %v3613_v43 = vadd.f32 %v16363_v10, %v3532_v61  ;;  %v3534_v3 = vadd.f32 %v3533_v35, %v16377_v29  ;;  %4265 = vmatmul.mubr.bf16.gmra.mxu0 %v16301_v55  ;;  %v16413_v37 = vpop.f32.mrf.mxu0  ;;  %v14103_v61 = vld [vmem:[#allocation7 + $0xcbc] ss:$80 sps:$4 sm:$0xff]  }
 0x197   :  { %4164 = vmatmul.mubr.bf16.vlgmr.msra.gmra.mxu1 %v16272_v52  ;;  %v3537_v8 = vpop.f32.mrf.mxu1  ;;  %4302 = vmatpush1.bf16.msra.mxu0 %v14074_v38 }
 0x198   :  { %4843 = vst [vmem:[#allocation2 + $0x200] sm:$0xff] %v3613_v43  ;;  %v3615_v49 = vadd.f32 %v16372_v18, %v3534_v3  ;;  %v3538_v39 = vadd.f32 %v3537_v8, %v16370_v24  ;;  %4173 = vmatprep.mubr.bf16.mxu1 %v16286_v32  ;;  %4303 = vmatprep.subr.bf16.mxu0 %v14079_v11  ;;  %v16418_v58 = vpop.f32.mrf.mxu0  ;;  %v14086_v11 = vld [vmem:[#allocation7 + $0x38] ss:$80 sps:$4 sm:$0xff]   ;;  %v14109_v8 = vld [vmem:[#allocation7 + $0xc1c] ss:$80 sps:$4 sm:$0xff]  }
 0x199   :  { %v3539_v10 = vpop.f32.mrf.mxu1  ;;  %4375 = vmatpush1.bf16.msra.mxu1 %v14083_v50  ;;  %4274 = vmatprep.mubr.bf16.mxu0 %v15859_v0  ;;  %v14094_v50 = vld [vmem:[#allocation7 + $0x99c] ss:$80 sps:$4 sm:$0xff]   ;;  %v14101_v43 = vld [vmem:[#allocation7 + $0xcb8] ss:$80 sps:$4 sm:$0xff]  }
 0x19a   :  { %4844 = vst [vmem:[#allocation2 + $0x208] sm:$0xff] %v3615_v49  ;;  %v3619_v2 = vadd.f32 %v16380_v22, %v3538_v39  ;;  %v3540_v60 = vadd.f32 %v3539_v10, %v16377_v29  ;;  %4376 = vmatprep.subr.bf16.mxu1 %v14091_v36  ;;  %v3642_v20 = vpop.f32.mrf.mxu0  ;;  %v14095_v22 = vld [vmem:[#allocation7 + $0xd58] ss:$80 sps:$4 sm:$0xff]  }
 0x19b   :  { %v3541_v18 = vpop.f32.mrf.mxu1  ;;  %4304 = vmatpush1.bf16.msra.mxu0 %v14077_v56  ;;  %v14092_v56 = vld [vmem:[#allocation7 + $0x998] ss:$80 sps:$4 sm:$0xff]  }
 0x19c   :  { %4863 = vst [vmem:[#allocation2 + $0x2a0] sm:$0xff] %v3619_v2  ;;  %v3621_v13 = vadd.f32 %v16383_v7, %v3540_v60  ;;  %v3542_v31 = vadd.f32 %v3541_v18, %v16370_v24  ;;  %4305 = vmatprep.subr.bf16.mxu0 %v14082_v46  ;;  %v3643_v23 = vpop.f32.mrf.mxu0  ;;  %v14100_v46 = vld [vmem:[#allocation7 + $0x8fc] ss:$80 sps:$4 sm:$0xff]   ;;  %v14098_v18 = vld [vmem:[#allocation7 + $0x8f8] ss:$80 sps:$4 sm:$0xff]  }
 0x19d   :  { %v3543_v17 = vpop.f32.mrf.mxu1  ;;  %4377 = vmatpush1.bf16.msra.mxu1 %v14089_v1  ;;  %v14107_v1 = vld [vmem:[#allocation7 + $0xc18] ss:$80 sps:$4 sm:$0xff]   ;;  %v14115_v60 = vld [vmem:[#allocation7 + $0xb7c] ss:$80 sps:$4 sm:$0xff]  }
 0x19e   :  { %4864 = vst [vmem:[#allocation2 + $0x2a8] sm:$0xff] %v3621_v13  ;;  %v3623_v15 = vadd.f32 %v16387_v12, %v3542_v31  ;;  %v3544_v25 = vadd.f32 %v3543_v17, %v16377_v29  ;;  %4378 = vmatprep.subr.bf16.mxu1 %v14097_v14  ;;  %4275 = vmatmul.mubr.bf16.gmra.mxu0 %v16324_v44  ;;  %v14106_v13 = vld [vmem:[#allocation7 + $0x85c] ss:$80 sps:$4 sm:$0xff]   ;;  %v14113_v31 = vld [vmem:[#allocation7 + $0xb78] ss:$80 sps:$4 sm:$0xff]  }
 0x19f   :  { %4174 = vmatmul.mubr.bf16.gmra.mxu1 %v16295_v59  ;;  %v3547_v38 = vpop.f32.mrf.mxu1  ;;  %4306 = vmatpush1.bf16.msra.mxu0 %v14080_v19 }
 0x1a0   :  { %4883 = vst [vmem:[#allocation2 + $0x340] sm:$0xff] %v3623_v15  ;;  %v3625_v7 = vadd.f32 %v16390_v34, %v3544_v25  ;;  %v3548_v35 = vadd.f32 %v3547_v38, %v16370_v24  ;;  %4183 = vmatprep.mubr.bf16.mxu1 %v16308_v57  ;;  %4307 = vmatprep.subr.bf16.mxu0 %v14088_v33  ;;  %v14121_v33 = vld [vmem:[#allocation7 + $0xadc] ss:$80 sps:$4 sm:$0xff]   ;;  %v14119_v25 = vld [vmem:[#allocation7 + $0xad8] ss:$80 sps:$4 sm:$0xff]   ;;  %v610_v38 = vsub.s32 6, %v16142_v41 }
 0x1a1   :  { %v3549_v12 = vpop.f32.mrf.mxu1  ;;  %4379 = vmatpush1.bf16.msra.mxu1 %v14095_v22  ;;  %4284 = vmatprep.mubr.bf16.mxu0 %v15859_v0  ;;  %v14104_v22 = vld [vmem:[#allocation7 + $0x858] ss:$80 sps:$4 sm:$0xff]   ;;  %v14112_v15 = vld [vmem:[#allocation7 + $0x7bc] ss:$80 sps:$4 sm:$0xff]  }
 0x1a2   :  { %4884 = vst [vmem:[#allocation2 + $0x348] sm:$0xff] %v3625_v7  ;;  %v3629_v3 = vadd.f32 %v16394_v47, %v3548_v35  ;;  %v3550_v36 = vadd.f32 %v3549_v12, %v16377_v29  ;;  %4380 = vmatprep.subr.bf16.mxu1 %v14103_v61  ;;  %v14110_v61 = vld [vmem:[#allocation7 + $0x7b8] ss:$80 sps:$4 sm:$0xff]   ;;  %v14118_v7 = vld [vmem:[#allocation7 + $0x71c] ss:$80 sps:$4 sm:$0xff]  }
 0x1a3   :  { %v3551_v34 = vpop.f32.mrf.mxu1  ;;  %4308 = vmatpush1.bf16.msra.mxu0 %v14086_v11  ;;  %v14125_v35 = vld [vmem:[#allocation7 + $0xa38] ss:$80 sps:$4 sm:$0xff]   ;;  %v614_v11 = vsub.s32 7, %v16142_v41  ;;  %v14133_v12 = vld [vmem:[#allocation7 + $0x4a4] ss:$80 sps:$4 sm:$0xff]  }
 0x1a4   :  { %4903 = vst [vmem:[#allocation2 + $0x3e0] sm:$0xff] %v3629_v3  ;;  %v3631_v49 = vadd.f32 %v16398_v30, %v3550_v36  ;;  %v3552_v39 = vadd.f32 %v3551_v34, %v16370_v24  ;;  %4309 = vmatprep.subr.bf16.mxu0 %v14094_v50  ;;  %v16455_v3 = vrot.slane %v16365_v9, %v610_v38 }
 0x1a5   :  { %v3553_v10 = vpop.f32.mrf.mxu1  ;;  %4381 = vmatpush1.bf16.msra.mxu1 %v14101_v43  ;;  %v14116_v43 = vld [vmem:[#allocation7 + $0x718] ss:$80 sps:$4 sm:$0xff]   ;;  %v16460_v34 = vrot.slane %v16365_v9, %v614_v11 }
 0x1a6   :  { %4904 = vst [vmem:[#allocation2 + $0x3e8] sm:$0xff] %v3631_v49  ;;  %v3633_v47 = vadd.f32 %v16403_v40, %v3552_v39  ;;  %v3554_v2 = vadd.f32 %v3553_v10, %v16377_v29  ;;  %4382 = vmatprep.subr.bf16.mxu1 %v14109_v8  ;;  %4285 = vmatmul.mubr.bf16.gmra.mxu0 %v16343_v51  ;;  %v14124_v8 = vld [vmem:[#allocation7 + $0x67c] ss:$80 sps:$4 sm:$0xff]   ;;  %v14122_v10 = vld [vmem:[#allocation7 + $0x678] ss:$80 sps:$4 sm:$0xff]  }
 0x1a7   :  { %4184 = vmatmul.mubr.bf16.gmra.mxu1 %v16318_v26  ;;  %v3557_v14 = vpop.f32.mrf.mxu1  ;;  %4310 = vmatpush2.bf16.msra.mxu0 %v14092_v56 }
 0x1a8   :  { %4923 = vst [vmem:[#allocation2 + $0x480] sm:$0xff] %v3633_v47  ;;  %v3635_v30 = vadd.f32 %v16407_v4, %v3554_v2  ;;  %v3558_v20 = vadd.f32 %v3557_v14, %v16370_v24  ;;  %4193 = vmatprep.mubr.bf16.mxu1 %v16330_v42  ;;  %4311 = vmatprep.subr.bf16.mxu0 %v14100_v46 }
 0x1a9   :  { %v3559_v40 = vpop.f32.mrf.mxu1  ;;  %4383 = vmatpush1.bf16.msra.mxu1 %v14107_v1  ;;  %4325 = vmatprep.mubr.bf16.mxu0 %v16350_v62  ;;  %v14130_v1 = vld [vmem:[#allocation7 + $0x5dc] ss:$80 sps:$4 sm:$0xff]  }
 0x1aa   :  { %4924 = vst [vmem:[#allocation2 + $0x488] sm:$0xff] %v3635_v30  ;;  %v3639_v19 = vadd.f32 %v16413_v37, %v3558_v20  ;;  %v3560_v17 = vadd.f32 %v3559_v40, %v16377_v29  ;;  %4384 = vmatprep.subr.bf16.mxu1 %v14115_v60  ;;  %v14127_v37 = vld [vmem:[#allocation7 + $0xa3c] ss:$80 sps:$4 sm:$0xff]   ;;  %v14128_v20 = vld [vmem:[#allocation7 + $0x5d8] ss:$80 sps:$4 sm:$0xff]  }
 0x1ab   :  { %v3561_v4 = vpop.f32.mrf.mxu1  ;;  %4312 = vmatpush2.bf16.msra.mxu0 %v14098_v18  ;;  %v14131_v40 = vld [vmem:[#allocation7 + $0x4a0] ss:$80 sps:$4 sm:$0xff]  }
 0x1ac   :  { %4943 = vst [vmem:[#allocation2 + $0x520] sm:$0xff] %v3639_v19  ;;  %v3641_v24 = vadd.f32 %v16418_v58, %v3560_v17  ;;  %4313 = vmatprep.subr.bf16.mxu0 %v14106_v13  ;;  %v14139_v19 = vld [vmem:[#allocation7 + $0x404] ss:$80 sps:$4 sm:$0xff]  }
 0x1ad   :  { %v3562_v23 = vpop.f32.mrf.mxu1  ;;  %4385 = vmatpush1.bf16.msra.mxu1 %v14113_v31  ;;  %v14136_v31 = vld [vmem:[#allocation7 + $0x53c] ss:$80 sps:$4 sm:$0xff]  }
 0x1ae   :  { %4944 = vst [vmem:[#allocation2 + $0x528] sm:$0xff] %v3641_v24  ;;  %4386 = vmatprep.subr.bf16.mxu1 %v14121_v33 }
 0x1af   :  { %4194 = vmatmul.mubr.bf16.gmra.mxu1 %v16337_v16  ;;  %v3760_v29 = vpop.f32.mrf.mxu1  ;;  %4314 = vmatpush2.bf16.msra.mxu0 %v14104_v22 }
 0x1b0   :  { %4203 = vmatprep.mubr.bf16.mxu1 %v15995_v45  ;;  %4315 = vmatprep.subr.bf16.mxu0 %v14112_v15 }
 0x1b1   :  { %v3762_v58 = vpop.f32.mrf.mxu1  ;;  %4387 = vmatpush1.bf16.msra.mxu1 %v14119_v25  ;;  %v14134_v25 = vld [vmem:[#allocation7 + $0x538] ss:$80 sps:$4 sm:$0xff]  }
 0x1b2   :  { %4388 = vmatprep.subr.bf16.mxu1 %v14127_v37  ;;  %v14137_v37 = vld [vmem:[#allocation7 + $0x400] ss:$80 sps:$4 sm:$0xff]  }
 0x1b3   :  { %v3764_v50 = vpop.f32.mrf.mxu1  ;;  %4316 = vmatpush2.bf16.msra.mxu0 %v14110_v61  ;;  %v14142_v61 = vld [vmem:[#allocation7 + $0x364] ss:$80 sps:$4 sm:$0xff]  }
 0x1b4   :  { %4317 = vmatprep.subr.bf16.mxu0 %v14118_v7 }
 0x1b5   :  { %v3766_v36 = vpop.f32.mrf.mxu1  ;;  %4389 = vmatpush1.bf16.msra.mxu1 %v14125_v35 }
 0x1b6   :  { %4455 = vmatprep.subr.bf16.mxu1 %v14133_v12  ;;  %v3679_v49 = vpop.f32.mrf.mxu0 }
 0x1b7   :  { %4204 = vmatmul.mubr.bf16.gmra.mxu1 %v15999_v53  ;;  %v3770_v39 = vpop.f32.mrf.mxu1  ;;  %4318 = vmatpush2.bf16.msra.mxu0 %v14116_v43  ;;  %v3680_v56 = vadd.f32 %v3679_v49, %v16455_v3  ;;  %v14143_v49 = vld [vmem:[#allocation7 + $0xea0] ss:$80 sps:$4 sm:$0xff]  }
 0x1b8   :  { %4406 = vmatprep.mubr.bf16.mxu1 %v15859_v0  ;;  %v3681_v46 = vpop.f32.mrf.mxu0  ;;  %4319 = vmatprep.subr.bf16.mxu0 %v14124_v8  ;;  %v14140_v8 = vld [vmem:[#allocation7 + $0x360] ss:$80 sps:$4 sm:$0xff]  }
 0x1b9   :  { %v3772_v47 = vpop.f32.mrf.mxu1  ;;  %v3761_v2 = vadd.f32 %v3760_v29, %v3680_v56  ;;  %v3682_v60 = vadd.f32 %v3681_v46, %v16460_v34  ;;  %v14151_v46 = vld [vmem:[#allocation7 + $0xe04] ss:$80 sps:$4 sm:$0xff]  }
 0x1ba   :  { %v3683_v9 = vpop.f32.mrf.mxu0 }
 0x1bb   :  { %v3774_v14 = vpop.f32.mrf.mxu1  ;;  %4785 = vst [vmem:[#allocation2 + $0x30] sm:$0xff] %v3761_v2  ;;  %v3763_v30 = vadd.f32 %v3762_v58, %v3682_v60  ;;  %4320 = vmatpush2.bf16.msra.mxu0 %v14122_v10  ;;  %v3684_v18 = vadd.f32 %v3683_v9, %v16455_v3  ;;  %v14145_v58 = vld [vmem:[#allocation7 + $0xea4] ss:$80 sps:$4 sm:$0xff]  }
 0x1bc   :  { %v3685_v13 = vpop.f32.mrf.mxu0  ;;  %4321 = vmatprep.subr.bf16.mxu0 %v14130_v1  ;;  %v14148_v10 = vld [vmem:[#allocation7 + $0x2c4] ss:$80 sps:$4 sm:$0xff]  }
 0x1bd   :  { %v3776_v17 = vpop.f32.mrf.mxu1  ;;  %4786 = vst [vmem:[#allocation2 + $0x38] sm:$0xff] %v3763_v30  ;;  %v3765_v33 = vadd.f32 %v3764_v50, %v3684_v18  ;;  %v3686_v4 = vadd.f32 %v3685_v13, %v16460_v34  ;;  %v14146_v18 = vld [vmem:[#allocation7 + $0x2c0] ss:$80 sps:$4 sm:$0xff]   ;;  %v14154_v13 = vld [vmem:[#allocation7 + $0x224] ss:$80 sps:$4 sm:$0xff]  }
 0x1be   :  { %v3689_v24 = vpop.f32.mrf.mxu0 }
 0x1bf   :  { %4407 = vmatmul.mubr.bf16.vlgmr.msra.gmra.mxu1 %v16261_v48  ;;  %v3780_v22 = vpop.f32.mrf.mxu1  ;;  %4805 = vst [vmem:[#allocation2 + $0xd0] sm:$0xff] %v3765_v33  ;;  %v3767_v23 = vadd.f32 %v3766_v36, %v3686_v4  ;;  %4322 = vmatpush2.bf16.msra.mxu0 %v14128_v20  ;;  %v3690_v15 = vadd.f32 %v3689_v24, %v16455_v3  ;;  %v14149_v20 = vld [vmem:[#allocation7 + $0xe00] ss:$80 sps:$4 sm:$0xff]  }
 0x1c0   :  { %4456 = vmatpush1.bf16.msra.mxu1 %v14131_v40  ;;  %v3691_v29 = vpop.f32.mrf.mxu0  ;;  %4323 = vmatprep.subr.bf16.mxu0 %v14136_v31  ;;  %v14157_v31 = vld [vmem:[#allocation7 + $0xd64] ss:$80 sps:$4 sm:$0xff]   ;;  %v14152_v24 = vld [vmem:[#allocation7 + $0x220] ss:$80 sps:$4 sm:$0xff]  }
 0x1c1   :  { %4457 = vmatprep.subr.bf16.mxu1 %v14139_v19  ;;  %v3782_v7 = vpop.f32.mrf.mxu1  ;;  %4806 = vst [vmem:[#allocation2 + $0xd8] sm:$0xff] %v3767_v23  ;;  %v3692_v35 = vadd.f32 %v3691_v29, %v16460_v34  ;;  %v3771_v48 = vadd.f32 %v3770_v39, %v3690_v15  ;;  %4416 = vmatprep.mubr.bf16.mxu1 %v15859_v0  ;;  %v14155_v23 = vld [vmem:[#allocation7 + $0xd60] ss:$80 sps:$4 sm:$0xff]   ;;  %v14163_v29 = vld [vmem:[#allocation7 + $0xcc4] ss:$80 sps:$4 sm:$0xff]  }
 0x1c2   :  { %v3693_v12 = vpop.f32.mrf.mxu0 }
 0x1c3   :  { %v3784_v50 = vpop.f32.mrf.mxu1  ;;  %4825 = vst [vmem:[#allocation2 + $0x170] sm:$0xff] %v3771_v48  ;;  %4324 = vmatpush2.bf16.msra.mxu0 %v14134_v25  ;;  %v3694_v43 = vadd.f32 %v3693_v12, %v16455_v3  ;;  %v3773_v36 = vadd.f32 %v3772_v47, %v3692_v35  ;;  %v14160_v25 = vld [vmem:[#allocation7 + $0x184] ss:$80 sps:$4 sm:$0xff]   ;;  %v14158_v48 = vld [vmem:[#allocation7 + $0x180] ss:$80 sps:$4 sm:$0xff]  }
 0x1c4   :  { %4458 = vmatpush1.bf16.msra.mxu1 %v14137_v37  ;;  %v3695_v56 = vpop.f32.mrf.mxu0  ;;  %4536 = vmatprep.subr.bf16.mxu0 %v14145_v58  ;;  %v14161_v12 = vld [vmem:[#allocation7 + $0xcc0] ss:$80 sps:$4 sm:$0xff]  }
 0x1c5   :  { %4459 = vmatprep.subr.bf16.mxu1 %v14142_v61  ;;  %v3786_v1 = vpop.f32.mrf.mxu1  ;;  %4826 = vst [vmem:[#allocation2 + $0x178] sm:$0xff] %v3773_v36  ;;  %v3696_v39 = vadd.f32 %v3695_v56, %v16460_v34  ;;  %v3775_v2 = vadd.f32 %v3774_v14, %v3694_v43  ;;  %v14172_v36 = vld [vmem:[#allocation7 + $0xc24] ss:$80 sps:$4 sm:$0xff]  }
 0x1c6   :  { %4326 = vmatmul.mubr.bf16.vlgmr.msra.gmra.mxu0 %v16272_v52  ;;  %v3699_v60 = vpop.f32.mrf.mxu0 }
 0x1c7   :  { %4417 = vmatmul.mubr.bf16.gmra.mxu1 %v16278_v27  ;;  %v3790_v9 = vpop.f32.mrf.mxu1  ;;  %4845 = vst [vmem:[#allocation2 + $0x210] sm:$0xff] %v3775_v2  ;;  %4537 = vmatpush1.bf16.msra.mxu0 %v14143_v49  ;;  %v3700_v47 = vadd.f32 %v3699_v60, %v16455_v3  ;;  %v3777_v30 = vadd.f32 %v3776_v17, %v3696_v39  ;;  %v14169_v2 = vld [vmem:[#allocation7 + $0x44] ss:$80 sps:$4 sm:$0xff]  }
 0x1c8   :  { %4460 = vmatpush1.bf16.msra.mxu1 %v14140_v8  ;;  %v3701_v40 = vpop.f32.mrf.mxu0  ;;  %4538 = vmatprep.subr.bf16.mxu0 %v14151_v46 }
 0x1c9   :  { %4461 = vmatprep.subr.bf16.mxu1 %v14148_v10  ;;  %v3792_v14 = vpop.f32.mrf.mxu1  ;;  %4846 = vst [vmem:[#allocation2 + $0x218] sm:$0xff] %v3777_v30  ;;  %v3702_v52 = vadd.f32 %v3701_v40, %v16460_v34  ;;  %v3781_v19 = vadd.f32 %v3780_v22, %v3700_v47  ;;  %4335 = vmatprep.mubr.bf16.mxu0 %v16286_v32  ;;  %v14178_v30 = vld [vmem:[#allocation7 + $0xb84] ss:$80 sps:$4 sm:$0xff]  }
 0x1ca   :  { %4426 = vmatprep.mubr.bf16.mxu1 %v15859_v0  ;;  %v3703_v27 = vpop.f32.mrf.mxu0 }
 0x1cb   :  { %v3794_v33 = vpop.f32.mrf.mxu1  ;;  %4865 = vst [vmem:[#allocation2 + $0x2b0] sm:$0xff] %v3781_v19  ;;  %v3704_v17 = vadd.f32 %v3703_v27, %v16455_v3  ;;  %v3783_v4 = vadd.f32 %v3782_v7, %v3702_v52  ;;  %4539 = vmatpush1.bf16.msra.mxu0 %v14149_v20  ;;  %v14175_v52 = vld [vmem:[#allocation7 + $0x9a4] ss:$80 sps:$4 sm:$0xff]  }
 0x1cc   :  { %4462 = vmatpush1.bf16.msra.mxu1 %v14146_v18  ;;  %v3705_v15 = vpop.f32.mrf.mxu0  ;;  %4540 = vmatprep.subr.bf16.mxu0 %v14157_v31  ;;  %v14176_v31 = vld [vmem:[#allocation7 + $0xb80] ss:$80 sps:$4 sm:$0xff]   ;;  %v14184_v19 = vld [vmem:[#allocation7 + $0xae4] ss:$80 sps:$4 sm:$0xff]  }
 0x1cd   :  { %4463 = vmatprep.subr.bf16.mxu1 %v14154_v13  ;;  %v3796_v37 = vpop.f32.mrf.mxu1  ;;  %4866 = vst [vmem:[#allocation2 + $0x2b8] sm:$0xff] %v3783_v4  ;;  %v3706_v32 = vadd.f32 %v3705_v15, %v16460_v34  ;;  %v3785_v22 = vadd.f32 %v3784_v50, %v3704_v17  ;;  %v14166_v50 = vld [vmem:[#allocation7 + $0xe4] ss:$80 sps:$4 sm:$0xff]   ;;  %v14167_v13 = vld [vmem:[#allocation7 + $0x40] ss:$80 sps:$4 sm:$0xff]  }
 0x1ce   :  { %4336 = vmatmul.mubr.bf16.gmra.mxu0 %v16295_v59  ;;  %v3709_v61 = vpop.f32.mrf.mxu0  ;;  %v14181_v4 = vld [vmem:[#allocation7 + $0x904] ss:$80 sps:$4 sm:$0xff]  }
 0x1cf   :  { %4427 = vmatmul.mubr.bf16.gmra.mxu1 %v16301_v55  ;;  %v3800_v58 = vpop.f32.mrf.mxu1  ;;  %4885 = vst [vmem:[#allocation2 + $0x350] sm:$0xff] %v3785_v22  ;;  %v3710_v7 = vadd.f32 %v3709_v61, %v16455_v3  ;;  %v3787_v35 = vadd.f32 %v3786_v1, %v3706_v32  ;;  %4541 = vmatpush1.bf16.msra.mxu0 %v14155_v23  ;;  %v14164_v1 = vld [vmem:[#allocation7 + $0xe0] ss:$80 sps:$4 sm:$0xff]   ;;  %v14196_v32 = vld [vmem:[#allocation7 + $0x4ac] ss:$80 sps:$4 sm:$0xff]  }
 0x1d0   :  { %4464 = vmatpush1.bf16.msra.mxu1 %v14152_v24  ;;  %v3711_v43 = vpop.f32.mrf.mxu0  ;;  %4345 = vmatprep.mubr.bf16.mxu0 %v16308_v57  ;;  %v14170_v57 = vld [vmem:[#allocation7 + $0xc20] ss:$80 sps:$4 sm:$0xff]  }
 0x1d1   :  { %4465 = vmatprep.subr.bf16.mxu1 %v14160_v25  ;;  %v3802_v8 = vpop.f32.mrf.mxu1  ;;  %4886 = vst [vmem:[#allocation2 + $0x358] sm:$0xff] %v3787_v35  ;;  %v3712_v59 = vadd.f32 %v3711_v43, %v16460_v34  ;;  %v3791_v55 = vadd.f32 %v3790_v9, %v3710_v7  ;;  %4542 = vmatprep.subr.bf16.mxu0 %v14163_v29  ;;  %v14182_v24 = vld [vmem:[#allocation7 + $0xae0] ss:$80 sps:$4 sm:$0xff]   ;;  %v14187_v25 = vld [vmem:[#allocation7 + $0x864] ss:$80 sps:$4 sm:$0xff]  }
 0x1d2   :  { %4436 = vmatprep.mubr.bf16.mxu1 %v15859_v0  ;;  %v3713_v49 = vpop.f32.mrf.mxu0  ;;  %v14179_v23 = vld [vmem:[#allocation7 + $0x900] ss:$80 sps:$4 sm:$0xff]   ;;  %v14199_v7 = vld [vmem:[#allocation7 + $0x724] ss:$80 sps:$4 sm:$0xff]  }
 0x1d3   :  { %v3804_v56 = vpop.f32.mrf.mxu1  ;;  %4905 = vst [vmem:[#allocation2 + $0x3f0] sm:$0xff] %v3791_v55  ;;  %v3714_v10 = vadd.f32 %v3713_v49, %v16455_v3  ;;  %v3793_v46 = vadd.f32 %v3792_v14, %v3712_v59  ;;  %4543 = vmatpush1.bf16.msra.mxu0 %v14161_v12  ;;  %v14185_v29 = vld [vmem:[#allocation7 + $0x860] ss:$80 sps:$4 sm:$0xff]   ;;  %v14194_v12 = vld [vmem:[#allocation7 + $0x4a8] ss:$80 sps:$4 sm:$0xff]  }
 0x1d4   :  { %4466 = vmatpush1.bf16.msra.mxu1 %v14158_v48  ;;  %v3715_v39 = vpop.f32.mrf.mxu0  ;;  %4544 = vmatprep.subr.bf16.mxu0 %v14172_v36  ;;  %v14197_v43 = vld [vmem:[#allocation7 + $0x720] ss:$80 sps:$4 sm:$0xff]   ;;  %v14202_v36 = vld [vmem:[#allocation7 + $0x40c] ss:$80 sps:$4 sm:$0xff]  }
 0x1d5   :  { %4467 = vmatprep.subr.bf16.mxu1 %v14166_v50  ;;  %v3805_v60 = vpop.f32.mrf.mxu1  ;;  %4906 = vst [vmem:[#allocation2 + $0x3f8] sm:$0xff] %v3793_v46  ;;  %v3716_v9 = vadd.f32 %v3715_v39, %v16460_v34  ;;  %v3795_v47 = vadd.f32 %v3794_v33, %v3714_v10  ;;  %v14173_v33 = vld [vmem:[#allocation7 + $0x9a0] ss:$80 sps:$4 sm:$0xff]  }
 0x1d6   :  { %4346 = vmatmul.mubr.bf16.gmra.mxu0 %v16318_v26  ;;  %v3719_v18 = vpop.f32.mrf.mxu0  ;;  %v16525_v49 = vld [vmem:[%s17165_s0 + $0x8] ss:$12 sps:$4 sm:$0xff]   ;;  %v14211_v60 = vld [vmem:[#allocation7 + $0x5e4] ss:$80 sps:$4 sm:$0xff]  }
 0x1d7   :  { %4437 = vmatmul.mubr.bf16.gmra.mxu1 %v16324_v44  ;;  %4925 = vst [vmem:[#allocation2 + $0x490] sm:$0xff] %v3795_v47  ;;  %v3720_v20 = vadd.f32 %v3719_v18, %v16455_v3  ;;  %v3797_v40 = vadd.f32 %v3796_v37, %v3716_v9  ;;  %4545 = vmatpush1.bf16.msra.mxu0 %v14170_v57  ;;  %v14188_v37 = vld [vmem:[#allocation7 + $0xa40] ss:$80 sps:$4 sm:$0xff]  }
 0x1d8   :  { %4468 = vmatpush1.bf16.msra.mxu1 %v14164_v1  ;;  %v3721_v14 = vpop.f32.mrf.mxu0  ;;  %4355 = vmatprep.mubr.bf16.mxu0 %v16330_v42  ;;  %v14190_v42 = vld [vmem:[#allocation7 + $0xa44] ss:$80 sps:$4 sm:$0xff]   ;;  %v14200_v1 = vld [vmem:[#allocation7 + $0x408] ss:$80 sps:$4 sm:$0xff]   ;;  %v14203_v57 = vld [vmem:[#allocation7 + $0x680] ss:$80 sps:$4 sm:$0xff]  }
 0x1d9   :  { %4469 = vmatprep.subr.bf16.mxu1 %v14169_v2  ;;  %4926 = vst [vmem:[#allocation2 + $0x498] sm:$0xff] %v3797_v40  ;;  %v3722_v26 = vadd.f32 %v3721_v14, %v16460_v34  ;;  %v3801_v27 = vadd.f32 %v3800_v58, %v3720_v20  ;;  %4546 = vmatprep.subr.bf16.mxu0 %v14178_v30  ;;  %v14191_v58 = vld [vmem:[#allocation7 + $0x7c0] ss:$80 sps:$4 sm:$0xff]   ;;  %v14208_v2 = vld [vmem:[#allocation7 + $0x36c] ss:$80 sps:$4 sm:$0xff]  }
 0x1da   :  { %4446 = vmatprep.mubr.bf16.mxu1 %v15859_v0  ;;  %v3723_v44 = vpop.f32.mrf.mxu0  ;;  %v14209_v14 = vld [vmem:[#allocation7 + $0x5e0] ss:$80 sps:$4 sm:$0xff]  }
 0x1db   :  { %4945 = vst [vmem:[#allocation2 + $0x530] sm:$0xff] %v3801_v27  ;;  %v3803_v3 = vadd.f32 %v3802_v8, %v3722_v26  ;;  %4547 = vmatpush1.bf16.msra.mxu0 %v14176_v31  ;;  %v14205_v8 = vld [vmem:[#allocation7 + $0x684] ss:$80 sps:$4 sm:$0xff]   ;;  %v14206_v31 = vld [vmem:[#allocation7 + $0x368] ss:$80 sps:$4 sm:$0xff]  }
 0x1dc   :  { %4470 = vmatpush1.bf16.msra.mxu1 %v14167_v13  ;;  %v3724_v17 = vpop.f32.mrf.mxu0  ;;  %4548 = vmatprep.subr.bf16.mxu0 %v14184_v19  ;;  %v14214_v19 = vld [vmem:[#allocation7 + $0x2cc] ss:$80 sps:$4 sm:$0xff]   ;;  %v14217_v26 = vld [vmem:[#allocation7 + $0x544] ss:$80 sps:$4 sm:$0xff]  }
 0x1dd   :  { %4471 = vmatprep.subr.bf16.mxu1 %v14175_v52  ;;  %4946 = vst [vmem:[#allocation2 + $0x538] sm:$0xff] %v3803_v3  ;;  %v16544_v17 = vld [vmem:[%s17165_s0 + $0x20] ss:$12 sps:$4 sm:$0xff]  }
 0x1de   :  { %4356 = vmatmul.mubr.bf16.gmra.mxu0 %v16337_v16  ;;  %v3922_v34 = vpop.f32.mrf.mxu0 }
 0x1df   :  { %4447 = vmatmul.mubr.bf16.gmra.mxu1 %v16343_v51  ;;  %4365 = vmatprep.mubr.bf16.mxu0 %v15995_v45  ;;  %v14193_v51 = vld [vmem:[#allocation7 + $0x7c4] ss:$80 sps:$4 sm:$0xff]  }
 0x1e0   :  { %4472 = vmatpush2.bf16.msra.mxu1 %v14173_v33  ;;  %v3924_v15 = vpop.f32.mrf.mxu0  ;;  %4549 = vmatpush1.bf16.msra.mxu0 %v14182_v24 }
 0x1e1   :  { %4473 = vmatprep.subr.bf16.mxu1 %v14181_v4  ;;  %4550 = vmatprep.subr.bf16.mxu0 %v14190_v42 }
 0x1e2   :  { %4487 = vmatprep.mubr.bf16.mxu1 %v16350_v62  ;;  %v3926_v22 = vpop.f32.mrf.mxu0  ;;  %v16506_v62 = vld [vmem:[#allocation9 + $0x8] sm:$0xff] }
 0x1e3   :  { %v16514_v50 = vrot.slane %v16506_v62, %v16150_v54  ;;  %v16520_v55 = vrot.slane %v16506_v62, %v16157_v63 }
 0x1e4   :  { %4474 = vmatpush2.bf16.msra.mxu1 %v14179_v23  ;;  %v16500_v16 = vpop.f32.mrf.mxu0  ;;  %4551 = vmatpush1.bf16.msra.mxu0 %v14188_v37  ;;  %v14215_v23 = vld [vmem:[#allocation7 + $0x540] ss:$80 sps:$4 sm:$0xff]   ;;  %v14229_v37 = vld [vmem:[#allocation7 + $0xeac] ss:$80 sps:$4 sm:$0xff]  }
 0x1e5   :  { %4475 = vmatprep.subr.bf16.mxu1 %v14187_v25  ;;  %4617 = vmatprep.subr.bf16.mxu0 %v14196_v32  ;;  %v14220_v25 = vld [vmem:[#allocation7 + $0x22c] ss:$80 sps:$4 sm:$0xff]  }
 0x1e6   :  { %4366 = vmatmul.mubr.bf16.gmra.mxu0 %v15999_v53  ;;  %v16503_v61 = vpop.f32.mrf.mxu0 }
 0x1e7   :  { %4568 = vmatprep.mubr.bf16.mxu0 %v15859_v0 }
 0x1e8   :  { %4476 = vmatpush2.bf16.msra.mxu1 %v14185_v29  ;;  %v16508_v35 = vpop.f32.mrf.mxu0 }
 0x1e9   :  { %4477 = vmatprep.subr.bf16.mxu1 %v14193_v51 }
 0x1ea   :  { %v16510_v48 = vpop.f32.mrf.mxu0 }
 0x1ec   :  { %4478 = vmatpush2.bf16.msra.mxu1 %v14191_v58  ;;  %v16516_v59 = vpop.f32.mrf.mxu0 }
 0x1ed   :  { %4479 = vmatprep.subr.bf16.mxu1 %v14199_v7 }
 0x1ee   :  { %4569 = vmatmul.mubr.bf16.vlgmr.msra.gmra.mxu0 %v16525_v49  ;;  %v16528_v10 = vpop.f32.mrf.mxu0 }
 0x1ef   :  { %v3841_v56 = vpop.f32.mrf.mxu1  ;;  %4618 = vmatpush1.bf16.msra.mxu0 %v14194_v12  ;;  %4578 = vmatprep.mubr.bf16.mxu0 %v15859_v0  ;;  %v14218_v12 = vld [vmem:[#allocation7 + $0x228] ss:$80 sps:$4 sm:$0xff]  }
 0x1f0   :  { %4480 = vmatpush2.bf16.msra.mxu1 %v14197_v43  ;;  %v3842_v46 = vadd.f32 %v3841_v56, %v16514_v50  ;;  %4619 = vmatprep.subr.bf16.mxu0 %v14202_v36  ;;  %v16531_v9 = vpop.f32.mrf.mxu0  ;;  %v14223_v36 = vld [vmem:[#allocation7 + $0x18c] ss:$80 sps:$4 sm:$0xff]  }
 0x1f1   :  { %v3843_v39 = vpop.f32.mrf.mxu1  ;;  %4481 = vmatprep.subr.bf16.mxu1 %v14205_v8  ;;  %v14227_v8 = vld [vmem:[#allocation7 + $0xea8] ss:$80 sps:$4 sm:$0xff]  }
 0x1f2   :  { %v3923_v47 = vadd.f32 %v3922_v34, %v3842_v46  ;;  %v3844_v30 = vadd.f32 %v3843_v39, %v16520_v55  ;;  %v16535_v20 = vpop.f32.mrf.mxu0  ;;  %v14212_v34 = vld [vmem:[#allocation7 + $0x2c8] ss:$80 sps:$4 sm:$0xff]   ;;  %v16573_v39 = vld [vmem:[%s17165_s0 + $0x38] ss:$12 sps:$4 sm:$0xff]  }
 0x1f3   :  { %v3845_v18 = vpop.f32.mrf.mxu1  ;;  %4620 = vmatpush1.bf16.msra.mxu0 %v14200_v1  ;;  %v14235_v1 = vld [vmem:[#allocation7 + $0xe0c] ss:$80 sps:$4 sm:$0xff]  }
 0x1f4   :  { %4787 = vst [vmem:[#allocation2 + $0x40] sm:$0xff] %v3923_v47  ;;  %v3925_v40 = vadd.f32 %v3924_v15, %v3844_v30  ;;  %4482 = vmatpush2.bf16.msra.mxu1 %v14203_v57  ;;  %v3846_v13 = vadd.f32 %v3845_v18, %v16514_v50  ;;  %4621 = vmatprep.subr.bf16.mxu0 %v14208_v2  ;;  %v16538_v27 = vpop.f32.mrf.mxu0  ;;  %v14221_v47 = vld [vmem:[#allocation7 + $0x188] ss:$80 sps:$4 sm:$0xff]   ;;  %v16583_v30 = vld [vmem:[%s17165_s0 + $0x1c] ss:$12 sps:$4 sm:$0xff]  }
 0x1f5   :  { %v3847_v52 = vpop.f32.mrf.mxu1  ;;  %4483 = vmatprep.subr.bf16.mxu1 %v14211_v60 }
 0x1f6   :  { %4788 = vst [vmem:[#allocation2 + $0x48] sm:$0xff] %v3925_v40  ;;  %v3927_v44 = vadd.f32 %v3926_v22, %v3846_v13  ;;  %v3848_v3 = vadd.f32 %v3847_v52, %v16520_v55  ;;  %4579 = vmatmul.mubr.bf16.gmra.mxu0 %v16544_v17  ;;  %v16547_v4 = vpop.f32.mrf.mxu0  ;;  %v14226_v40 = vld [vmem:[#allocation7 + $0xec] ss:$80 sps:$4 sm:$0xff]   ;;  %v14233_v13 = vld [vmem:[#allocation7 + $0xe08] ss:$80 sps:$4 sm:$0xff]  }
 0x1f7   :  { %v3851_v33 = vpop.f32.mrf.mxu1  ;;  %4622 = vmatpush1.bf16.msra.mxu0 %v14206_v31  ;;  %4588 = vmatprep.mubr.bf16.mxu0 %v15859_v0  ;;  %v14241_v52 = vld [vmem:[#allocation7 + $0xd6c] ss:$80 sps:$4 sm:$0xff]  }
 0x1f8   :  { %4807 = vst [vmem:[#allocation2 + $0xe0] sm:$0xff] %v3927_v44  ;;  %v3929_v24 = vadd.f32 %v16500_v16, %v3848_v3  ;;  %4484 = vmatpush2.bf16.msra.mxu1 %v14209_v14  ;;  %v3852_v42 = vadd.f32 %v3851_v33, %v16514_v50  ;;  %4623 = vmatprep.subr.bf16.mxu0 %v14214_v19  ;;  %v16551_v32 = vpop.f32.mrf.mxu0  ;;  %v14224_v33 = vld [vmem:[#allocation7 + $0xe8] ss:$80 sps:$4 sm:$0xff]  }
 0x1f9   :  { %v3853_v15 = vpop.f32.mrf.mxu1  ;;  %4485 = vmatprep.subr.bf16.mxu1 %v14217_v26 }
 0x1fa   :  { %4808 = vst [vmem:[#allocation2 + $0xe8] sm:$0xff] %v3929_v24  ;;  %v3933_v22 = vadd.f32 %v16503_v61, %v3852_v42  ;;  %v3854_v29 = vadd.f32 %v3853_v15, %v16520_v55  ;;  %v16556_v51 = vpop.f32.mrf.mxu0  ;;  %v14232_v42 = vld [vmem:[#allocation7 + $0x4c] ss:$80 sps:$4 sm:$0xff]  }
 0x1fb   :  { %v3855_v16 = vpop.f32.mrf.mxu1  ;;  %4624 = vmatpush1.bf16.msra.mxu0 %v14212_v34 }
 0x1fc   :  { %4827 = vst [vmem:[#allocation2 + $0x180] sm:$0xff] %v3933_v22  ;;  %v3935_v58 = vadd.f32 %v16508_v35, %v3854_v29  ;;  %4486 = vmatpush2.bf16.msra.mxu1 %v14215_v23  ;;  %v3856_v7 = vadd.f32 %v3855_v16, %v16514_v50  ;;  %4625 = vmatprep.subr.bf16.mxu0 %v14220_v25  ;;  %v16560_v61 = vpop.f32.mrf.mxu0  ;;  %v16567_v35 = vld [vmem:[%s17165_s0] ss:$12 sps:$4 sm:$0xff]   ;;  %v14250_v25 = vld [vmem:[#allocation7 + $0xccc] ss:$80 sps:$4 sm:$0xff]  }
 0x1fd   :  { %v3857_v43 = vpop.f32.mrf.mxu1  ;;  %4698 = vmatprep.subr.bf16.mxu1 %v14229_v37  ;;  %v16604_v22 = vld [vmem:[%s17165_s0 + $0x50] ss:$12 sps:$4 sm:$0xff]  }
 0x1fe   :  { %4828 = vst [vmem:[#allocation2 + $0x188] sm:$0xff] %v3935_v58  ;;  %v3937_v56 = vadd.f32 %v16510_v48, %v3856_v7  ;;  %v3858_v46 = vadd.f32 %v3857_v43, %v16520_v55  ;;  %4589 = vmatmul.mubr.bf16.gmra.mxu0 %v16573_v39  ;;  %v16576_v2 = vpop.f32.mrf.mxu0  ;;  %v14230_v16 = vld [vmem:[#allocation7 + $0x48] ss:$80 sps:$4 sm:$0xff]  }
 0x1ff   :  { %4488 = vmatmul.mubr.bf16.vlgmr.msra.gmra.mxu1 %v16567_v35  ;;  %v3861_v57 = vpop.f32.mrf.mxu1  ;;  %4626 = vmatpush1.bf16.msra.mxu0 %v14218_v12  ;;  %v16612_v58 = vld [vmem:[%s17165_s0 + $0x34] ss:$12 sps:$4 sm:$0xff]  }
 0x200   :  { %4847 = vst [vmem:[#allocation2 + $0x220] sm:$0xff] %v3937_v56  ;;  %v3939_v48 = vadd.f32 %v16516_v59, %v3858_v46  ;;  %v3862_v60 = vadd.f32 %v3861_v57, %v16514_v50  ;;  %4497 = vmatprep.mubr.bf16.mxu1 %v16583_v30  ;;  %4627 = vmatprep.subr.bf16.mxu0 %v14223_v36  ;;  %v16586_v31 = vpop.f32.mrf.mxu0  ;;  %v14238_v12 = vld [vmem:[#allocation7 + $0x9ac] ss:$80 sps:$4 sm:$0xff]   ;;  %v14248_v43 = vld [vmem:[#allocation7 + $0xcc8] ss:$80 sps:$4 sm:$0xff]  }
 0x201   :  { %v3863_v18 = vpop.f32.mrf.mxu1  ;;  %4699 = vmatpush1.bf16.msra.mxu1 %v14227_v8  ;;  %4598 = vmatprep.mubr.bf16.mxu0 %v15859_v0  ;;  %v14256_v8 = vld [vmem:[#allocation7 + $0xc2c] ss:$80 sps:$4 sm:$0xff]   ;;  %v14236_v57 = vld [vmem:[#allocation7 + $0x9a8] ss:$80 sps:$4 sm:$0xff]  }
 0x202   :  { %4848 = vst [vmem:[#allocation2 + $0x228] sm:$0xff] %v3939_v48  ;;  %v3943_v59 = vadd.f32 %v16528_v10, %v3862_v60  ;;  %v3864_v14 = vadd.f32 %v3863_v18, %v16520_v55  ;;  %4700 = vmatprep.subr.bf16.mxu1 %v14235_v1  ;;  %v3966_v26 = vpop.f32.mrf.mxu0  ;;  %v14239_v10 = vld [vmem:[#allocation7 + $0xd68] ss:$80 sps:$4 sm:$0xff]   ;;  %v14244_v60 = vld [vmem:[#allocation7 + $0x90c] ss:$80 sps:$4 sm:$0xff]  }
 0x203   :  { %v3865_v19 = vpop.f32.mrf.mxu1  ;;  %4628 = vmatpush1.bf16.msra.mxu0 %v14221_v47  ;;  %v14254_v47 = vld [vmem:[#allocation7 + $0xc28] ss:$80 sps:$4 sm:$0xff]  }
 0x204   :  { %4867 = vst [vmem:[#allocation2 + $0x2c0] sm:$0xff] %v3943_v59  ;;  %v3945_v44 = vadd.f32 %v16531_v9, %v3864_v14  ;;  %v3866_v3 = vadd.f32 %v3865_v19, %v16514_v50  ;;  %4629 = vmatprep.subr.bf16.mxu0 %v14226_v40  ;;  %v3967_v34 = vpop.f32.mrf.mxu0  ;;  %v16598_v9 = vld [vmem:[%s17165_s0 + $0x18] ss:$12 sps:$4 sm:$0xff]   ;;  %v16631_v59 = vld [vmem:[%s17165_s0 + $0x68] ss:$0 sps:$4 sm:$0xff]  }
 0x205   :  { %v3867_v24 = vpop.f32.mrf.mxu1  ;;  %4701 = vmatpush1.bf16.msra.mxu1 %v14233_v13  ;;  %v14262_v40 = vld [vmem:[#allocation7 + $0xb8c] ss:$80 sps:$4 sm:$0xff]   ;;  %v16625_v13 = vld [vmem:[%s17165_s0 + $0x30] ss:$12 sps:$4 sm:$0xff]   ;;  %v16639_v19 = vld [vmem:[%s17165_s0 + $0x4c] ss:$12 sps:$4 sm:$0xff]  }
 0x206   :  { %4868 = vst [vmem:[#allocation2 + $0x2c8] sm:$0xff] %v3945_v44  ;;  %v3947_v23 = vadd.f32 %v16535_v20, %v3866_v3  ;;  %v3868_v15 = vadd.f32 %v3867_v24, %v16520_v55  ;;  %4702 = vmatprep.subr.bf16.mxu1 %v14241_v52  ;;  %4599 = vmatmul.mubr.bf16.gmra.mxu0 %v16604_v22  ;;  %v14242_v14 = vld [vmem:[#allocation7 + $0x908] ss:$80 sps:$4 sm:$0xff]   ;;  %v14247_v44 = vld [vmem:[#allocation7 + $0x86c] ss:$80 sps:$4 sm:$0xff]  }
 0x207   :  { %4498 = vmatmul.mubr.bf16.gmra.mxu1 %v16598_v9  ;;  %v3871_v37 = vpop.f32.mrf.mxu1  ;;  %4630 = vmatpush1.bf16.msra.mxu0 %v14224_v33  ;;  %v14260_v3 = vld [vmem:[#allocation7 + $0xb88] ss:$80 sps:$4 sm:$0xff]   ;;  %v14268_v24 = vld [vmem:[#allocation7 + $0xaec] ss:$80 sps:$4 sm:$0xff]  }
 0x208   :  { %4887 = vst [vmem:[#allocation2 + $0x360] sm:$0xff] %v3947_v23  ;;  %v3949_v20 = vadd.f32 %v16538_v27, %v3868_v15  ;;  %v3872_v29 = vadd.f32 %v3871_v37, %v16514_v50  ;;  %4507 = vmatprep.mubr.bf16.mxu1 %v16612_v58  ;;  %4631 = vmatprep.subr.bf16.mxu0 %v14232_v42  ;;  %v14245_v34 = vld [vmem:[#allocation7 + $0x868] ss:$80 sps:$4 sm:$0xff]   ;;  %v14253_v15 = vld [vmem:[#allocation7 + $0x7cc] ss:$80 sps:$4 sm:$0xff]  }
 0x209   :  { %v3873_v7 = vpop.f32.mrf.mxu1  ;;  %4703 = vmatpush1.bf16.msra.mxu1 %v14239_v10  ;;  %4608 = vmatprep.mubr.bf16.mxu0 %v15859_v0 }
 0x20a   :  { %4888 = vst [vmem:[#allocation2 + $0x368] sm:$0xff] %v3949_v20  ;;  %v3953_v36 = vadd.f32 %v16547_v4, %v3872_v29  ;;  %v3874_v27 = vadd.f32 %v3873_v7, %v16520_v55  ;;  %4704 = vmatprep.subr.bf16.mxu1 %v14250_v25  ;;  %v16651_v25 = vld [vmem:[%s17165_s0 + $0x48] ss:$12 sps:$4 sm:$0xff]   ;;  %v14251_v20 = vld [vmem:[#allocation7 + $0x7c8] ss:$80 sps:$4 sm:$0xff]  }
 0x20b   :  { %v3875_v56 = vpop.f32.mrf.mxu1  ;;  %4632 = vmatpush1.bf16.msra.mxu0 %v14230_v16  ;;  %v14259_v29 = vld [vmem:[#allocation7 + $0x72c] ss:$80 sps:$4 sm:$0xff]   ;;  %v14272_v16 = vld [vmem:[#allocation7 + $0xa48] ss:$80 sps:$4 sm:$0xff]  }
 0x20c   :  { %4907 = vst [vmem:[#allocation2 + $0x400] sm:$0xff] %v3953_v36  ;;  %v3955_v46 = vadd.f32 %v16551_v32, %v3874_v27  ;;  %v3876_v1 = vadd.f32 %v3875_v56, %v16514_v50  ;;  %4633 = vmatprep.subr.bf16.mxu0 %v14238_v12  ;;  %v14257_v12 = vld [vmem:[#allocation7 + $0x728] ss:$80 sps:$4 sm:$0xff]   ;;  %v14265_v27 = vld [vmem:[#allocation7 + $0x68c] ss:$80 sps:$4 sm:$0xff]  }
 0x20d   :  { %v3877_v48 = vpop.f32.mrf.mxu1  ;;  %4705 = vmatpush1.bf16.msra.mxu1 %v14248_v43  ;;  %v16657_v43 = vrot.slane %v16506_v62, %v16228_v28 }
 0x20e   :  { %4908 = vst [vmem:[#allocation2 + $0x408] sm:$0xff] %v3955_v46  ;;  %v3957_v4 = vadd.f32 %v16556_v51, %v3876_v1  ;;  %v3878_v18 = vadd.f32 %v3877_v48, %v16520_v55  ;;  %4706 = vmatprep.subr.bf16.mxu1 %v14256_v8  ;;  %4609 = vmatmul.mubr.bf16.gmra.mxu0 %v16631_v59 }
 0x20f   :  { %4508 = vmatmul.mubr.bf16.gmra.mxu1 %v16625_v13  ;;  %v3881_v32 = vpop.f32.mrf.mxu1  ;;  %4634 = vmatpush2.bf16.msra.mxu0 %v14236_v57  ;;  %v16661_v8 = vrot.slane %v16506_v62, %v16233_v5  ;;  %v14263_v57 = vld [vmem:[#allocation7 + $0x688] ss:$80 sps:$4 sm:$0xff]  }
 0x210   :  { %4927 = vst [vmem:[#allocation2 + $0x4a0] sm:$0xff] %v3957_v4  ;;  %v3959_v51 = vadd.f32 %v16560_v61, %v3878_v18  ;;  %v3882_v52 = vadd.f32 %v3881_v32, %v16514_v50  ;;  %4517 = vmatprep.mubr.bf16.mxu1 %v16639_v19  ;;  %4635 = vmatprep.subr.bf16.mxu0 %v14244_v60  ;;  %v14316_v50 = vld [vmem:[%s17165_s0 + $0x4] ss:$12 sps:$4 sm:$0xff]   ;;  %s15860_s0 = smov [#allocation4]  }
 0x211   :  { %v3883_v26 = vpop.f32.mrf.mxu1  ;;  %4707 = vmatpush1.bf16.msra.mxu1 %v14254_v47  ;;  %4649 = vmatprep.mubr.bf16.mxu0 %v14316_v50  ;;  %v14271_v60 = vld [vmem:[#allocation7 + $0x5ec] ss:$80 sps:$4 sm:$0xff]   ;;  %s64_s2 = sshll.u32 %s15860_s0, 4  ;;  %s65_s2 = int_to_ptr.vmem [resolvable:$true] %s64_s2 }
 0x212   :  { %4928 = vst [vmem:[#allocation2 + $0x4a8] sm:$0xff] %v3959_v51  ;;  %v3963_v33 = vadd.f32 %v16576_v2, %v3882_v52  ;;  %v3884_v61 = vadd.f32 %v3883_v26, %v16520_v55  ;;  %4708 = vmatprep.subr.bf16.mxu1 %v14262_v40  ;;  %v14266_v2 = vld [vmem:[#allocation7 + $0xae8] ss:$80 sps:$4 sm:$0xff]   ;;  %v14274_v55 = vld [vmem:[#allocation7 + $0xa4c] ss:$80 sps:$4 sm:$0xff]   ;;  %s15726_s3 = scalar_lea.vmem %s65_s2, 102400  ;;  %p15731_p2 = scmp.lt.s32.totalorder %s65_s2, %s65_s2 }
 0x213   :  { %v3885_v42 = vpop.f32.mrf.mxu1  ;;  %4636 = vmatpush2.bf16.msra.mxu0 %v14242_v14  ;;  %v14269_v52 = vld [vmem:[#allocation7 + $0x5e8] ss:$80 sps:$4 sm:$0xff]   ;;  %p15727_p1 = scmp.ne.s32.totalorder %s65_s2, %s15726_s3  ;;  %p15732_p3 = scmp.lt.s32.totalorder %s15726_s3, %s15726_s3 }
 0x214   :  { %4947 = vst [vmem:[#allocation2 + $0x540] sm:$0xff] %v3963_v33  ;;  %v3965_v10 = vadd.f32 %v16586_v31, %v3884_v61  ;;  %4637 = vmatprep.subr.bf16.mxu0 %v14247_v44  ;;  %v14277_v44 = vld [vmem:[#allocation7 + $0x54c] ss:$80 sps:$4 sm:$0xff]  }
 0x215   :  { %v3886_v23 = vpop.f32.mrf.mxu1  ;;  %4709 = vmatpush1.bf16.msra.mxu1 %v14260_v3  ;;  %p15733_p4 = por %p15732_p3, %p15731_p2 }
 0x216   :  { %4948 = vst [vmem:[#allocation2 + $0x548] sm:$0xff] %v3965_v10  ;;  %4710 = vmatprep.subr.bf16.mxu1 %v14268_v24 }
 0x217   :  { %4518 = vmatmul.mubr.bf16.gmra.mxu1 %v16651_v25  ;;  %v4084_v37 = vpop.f32.mrf.mxu1  ;;  %4638 = vmatpush2.bf16.msra.mxu0 %v14245_v34  ;;  %v14275_v34 = vld [vmem:[#allocation7 + $0x548] ss:$80 sps:$4 sm:$0xff]   ;;  %p15734_p5 = pnand %p15733_p4, %p15727_p1 }
 0x218   :  { %4527 = vmatprep.mubr.bf16.mxu1 %v15995_v45  ;;  %4639 = vmatprep.subr.bf16.mxu0 %v14253_v15 }
 0x219   :  { %v4086_v31 = vpop.f32.mrf.mxu1  ;;  %4711 = vmatpush1.bf16.msra.mxu1 %v14266_v2 }
 0x21a   :  { %4712 = vmatprep.subr.bf16.mxu1 %v14274_v55 }
 0x21b   :  { %v4088_v7 = vpop.f32.mrf.mxu1  ;;  %4640 = vmatpush2.bf16.msra.mxu0 %v14251_v20 }
 0x21c   :  { %4641 = vmatprep.subr.bf16.mxu0 %v14259_v29 }
 0x21d   :  { %v4090_v36 = vpop.f32.mrf.mxu1  ;;  %4713 = vmatpush1.bf16.msra.mxu1 %v14272_v16 }
 0x21e   :  { %v4003_v56 = vpop.f32.mrf.mxu0 }
 0x21f   :  { %4528 = vmatmul.mubr.bf16.gmra.mxu1 %v15999_v53  ;;  %v4094_v46 = vpop.f32.mrf.mxu1  ;;  %4642 = vmatpush2.bf16.msra.mxu0 %v14257_v12  ;;  %v4004_v1 = vadd.f32 %v4003_v56, %v16657_v43 }
 0x220   :  { %4730 = vmatprep.mubr.bf16.mxu1 %v15859_v0  ;;  %v4005_v48 = vpop.f32.mrf.mxu0  ;;  %4643 = vmatprep.subr.bf16.mxu0 %v14265_v27 }
 0x221   :  { %v4096_v47 = vpop.f32.mrf.mxu1  ;;  %v4085_v4 = vadd.f32 %v4084_v37, %v4004_v1  ;;  %v4006_v18 = vadd.f32 %v4005_v48, %v16661_v8 }
 0x222   :  { %v4007_v40 = vpop.f32.mrf.mxu0 }
 0x223   :  { %v4098_v32 = vpop.f32.mrf.mxu1  ;;  %4789 = vst [vmem:[#allocation2 + $0x50] sm:$0xff] %v4085_v4  ;;  %v4087_v51 = vadd.f32 %v4086_v31, %v4006_v18  ;;  %4644 = vmatpush2.bf16.msra.mxu0 %v14263_v57  ;;  %v4008_v14 = vadd.f32 %v4007_v40, %v16657_v43 }
 0x224   :  { %v4009_v26 = vpop.f32.mrf.mxu0  ;;  %4645 = vmatprep.subr.bf16.mxu0 %v14271_v60 }
 0x225   :  { %v4100_v3 = vpop.f32.mrf.mxu1  ;;  %4790 = vst [vmem:[#allocation2 + $0x58] sm:$0xff] %v4087_v51  ;;  %v4089_v33 = vadd.f32 %v4088_v7, %v4008_v14  ;;  %v4010_v61 = vadd.f32 %v4009_v26, %v16661_v8 }
 0x226   :  { %v4013_v24 = vpop.f32.mrf.mxu0 }
 0x227   :  { %4731 = vmatmul.mubr.bf16.vlgmr.msra.gmra.mxu1 %v16525_v49  ;;  %v4104_v50 = vpop.f32.mrf.mxu1  ;;  %4809 = vst [vmem:[#allocation2 + $0xf0] sm:$0xff] %v4089_v33  ;;  %v4091_v42 = vadd.f32 %v4090_v36, %v4010_v61  ;;  %4646 = vmatpush2.bf16.msra.mxu0 %v14269_v52  ;;  %v4014_v10 = vadd.f32 %v4013_v24, %v16657_v43 }
 0x228   :  { %4740 = vmatprep.mubr.bf16.mxu1 %v15859_v0  ;;  %v4015_v23 = vpop.f32.mrf.mxu0  ;;  %4647 = vmatprep.subr.bf16.mxu0 %v14277_v44 }
 0x229   :  { %v4106_v15 = vpop.f32.mrf.mxu1  ;;  %4810 = vst [vmem:[#allocation2 + $0xf8] sm:$0xff] %v4091_v42  ;;  %v4016_v2 = vadd.f32 %v4015_v23, %v16661_v8  ;;  %v4095_v55 = vadd.f32 %v4094_v46, %v4014_v10 }
 0x22a   :  { %v4017_v37 = vpop.f32.mrf.mxu0 }
 0x22b   :  { %v4108_v20 = vpop.f32.mrf.mxu1  ;;  %4829 = vst [vmem:[#allocation2 + $0x190] sm:$0xff] %v4095_v55  ;;  %4648 = vmatpush2.bf16.msra.mxu0 %v14275_v34  ;;  %v4018_v49 = vadd.f32 %v4017_v37, %v16657_v43  ;;  %v4097_v31 = vadd.f32 %v4096_v47, %v4016_v2 }
 0x22c   :  { %v4019_v29 = vpop.f32.mrf.mxu0 }
 0x22d   :  { %v4110_v16 = vpop.f32.mrf.mxu1  ;;  %4830 = vst [vmem:[#allocation2 + $0x198] sm:$0xff] %v4097_v31  ;;  %v4020_v7 = vadd.f32 %v4019_v29, %v16661_v8  ;;  %v4099_v12 = vadd.f32 %v4098_v32, %v4018_v49 }
 0x22e   :  { %4650 = vmatmul.mubr.bf16.vlgmr.msra.gmra.mxu0 %v16567_v35  ;;  %v4023_v36 = vpop.f32.mrf.mxu0 }
 0x22f   :  { %4741 = vmatmul.mubr.bf16.gmra.mxu1 %v16544_v17  ;;  %v4114_v27 = vpop.f32.mrf.mxu1  ;;  %4849 = vst [vmem:[#allocation2 + $0x230] sm:$0xff] %v4099_v12  ;;  %v4024_v56 = vadd.f32 %v4023_v36, %v16657_v43  ;;  %v4101_v46 = vadd.f32 %v4100_v3, %v4020_v7  ;;  %4659 = vmatprep.mubr.bf16.mxu0 %v16583_v30 }
 0x230   :  { %4750 = vmatprep.mubr.bf16.mxu1 %v15859_v0  ;;  %v4025_v1 = vpop.f32.mrf.mxu0  ;;  %v16704_v7 = vrot.slane %v16506_v62, %v602_v21 }
 0x231   :  { %v4116_v57 = vpop.f32.mrf.mxu1  ;;  %4850 = vst [vmem:[#allocation2 + $0x238] sm:$0xff] %v4101_v46  ;;  %v4026_v48 = vadd.f32 %v4025_v1, %v16661_v8  ;;  %v4105_v60 = vadd.f32 %v4104_v50, %v4024_v56 }
 0x232   :  { %v4027_v47 = vpop.f32.mrf.mxu0 }
 0x233   :  { %v4118_v35 = vpop.f32.mrf.mxu1  ;;  %4869 = vst [vmem:[#allocation2 + $0x2d0] sm:$0xff] %v4105_v60  ;;  %v4028_v17 = vadd.f32 %v4027_v47, %v16657_v43  ;;  %v4107_v4 = vadd.f32 %v4106_v15, %v4026_v48 }
 0x234   :  { %v4029_v18 = vpop.f32.mrf.mxu0 }
 0x235   :  { %v4120_v40 = vpop.f32.mrf.mxu1  ;;  %4870 = vst [vmem:[#allocation2 + $0x2d8] sm:$0xff] %v4107_v4  ;;  %v4030_v32 = vadd.f32 %v4029_v18, %v16661_v8  ;;  %v4109_v30 = vadd.f32 %v4108_v20, %v4028_v17 }
 0x236   :  { %4660 = vmatmul.mubr.bf16.gmra.mxu0 %v16598_v9  ;;  %v4033_v51 = vpop.f32.mrf.mxu0 }
 0x237   :  { %4751 = vmatmul.mubr.bf16.gmra.mxu1 %v16573_v39  ;;  %v4124_v14 = vpop.f32.mrf.mxu1  ;;  %4889 = vst [vmem:[#allocation2 + $0x370] sm:$0xff] %v4109_v30  ;;  %v4034_v52 = vadd.f32 %v4033_v51, %v16657_v43  ;;  %v4111_v26 = vadd.f32 %v4110_v16, %v4030_v32  ;;  %4669 = vmatprep.mubr.bf16.mxu0 %v16612_v58 }
 0x238   :  { %4760 = vmatprep.mubr.bf16.mxu1 %v15859_v0  ;;  %v4035_v44 = vpop.f32.mrf.mxu0 }
 0x239   :  { %v4126_v3 = vpop.f32.mrf.mxu1  ;;  %4890 = vst [vmem:[#allocation2 + $0x378] sm:$0xff] %v4111_v26  ;;  %v4036_v33 = vadd.f32 %v4035_v44, %v16661_v8  ;;  %v4115_v61 = vadd.f32 %v4114_v27, %v4034_v52 }
 0x23a   :  { %v4037_v24 = vpop.f32.mrf.mxu0 }
 0x23b   :  { %v4128_v9 = vpop.f32.mrf.mxu1  ;;  %4909 = vst [vmem:[#allocation2 + $0x410] sm:$0xff] %v4115_v61  ;;  %v4038_v39 = vadd.f32 %v4037_v24, %v16657_v43  ;;  %v4117_v50 = vadd.f32 %v4116_v57, %v4036_v33 }
 0x23c   :  { %v4039_v42 = vpop.f32.mrf.mxu0 }
 0x23d   :  { %v4129_v10 = vpop.f32.mrf.mxu1  ;;  %4910 = vst [vmem:[#allocation2 + $0x418] sm:$0xff] %v4117_v50  ;;  %v4040_v34 = vadd.f32 %v4039_v42, %v16661_v8  ;;  %v4119_v58 = vadd.f32 %v4118_v35, %v4038_v39 }
 0x23e   :  { %4670 = vmatmul.mubr.bf16.gmra.mxu0 %v16625_v13  ;;  %v4043_v23 = vpop.f32.mrf.mxu0 }
 0x23f   :  { %4761 = vmatmul.mubr.bf16.gmra.mxu1 %v16604_v22  ;;  %4929 = vst [vmem:[#allocation2 + $0x4b0] sm:$0xff] %v4119_v58  ;;  %v4044_v15 = vadd.f32 %v4043_v23, %v16657_v43  ;;  %v4121_v2 = vadd.f32 %v4120_v40, %v4040_v34  ;;  %4679 = vmatprep.mubr.bf16.mxu0 %v16639_v19 }
 0x240   :  { %4770 = vmatprep.mubr.bf16.mxu1 %v15859_v0  ;;  %v4045_v55 = vpop.f32.mrf.mxu0 }
 0x241   :  { %4930 = vst [vmem:[#allocation2 + $0x4b8] sm:$0xff] %v4121_v2  ;;  %v4046_v37 = vadd.f32 %v4045_v55, %v16661_v8  ;;  %v4125_v20 = vadd.f32 %v4124_v14, %v4044_v15 }
 0x242   :  { %v4047_v49 = vpop.f32.mrf.mxu0 }
 0x243   :  { %4949 = vst [vmem:[#allocation2 + $0x550] sm:$0xff] %v4125_v20  ;;  %v4127_v31 = vadd.f32 %v4126_v3, %v4046_v37 }
 0x244   :  { %v4048_v13 = vpop.f32.mrf.mxu0 }
 0x245   :  { %4950 = vst [vmem:[#allocation2 + $0x558] sm:$0xff] %v4127_v31 }
 0x246   :  { %4680 = vmatmul.mubr.bf16.gmra.mxu0 %v16651_v25  ;;  %v4246_v22 = vpop.f32.mrf.mxu0 }
 0x247   :  { %4771 = vmatmul.mubr.bf16.gmra.mxu1 %v16631_v59  ;;  %4689 = vmatprep.mubr.bf16.mxu0 %v15995_v45  ;;  %v16709_v59 = vrot.slane %v16506_v62, %v606_v6 }
 0x248   :  { %v4248_v19 = vpop.f32.mrf.mxu0 }
 0x24a   :  { %v4250_v43 = vpop.f32.mrf.mxu0 }
 0x24c   :  { %v4252_v0 = vpop.f32.mrf.mxu0 }
 0x24e   :  { %4690 = vmatmul.mubr.bf16.gmra.mxu0 %v15999_v53  ;;  %v4256_v29 = vpop.f32.mrf.mxu0 }
 0x250   :  { %v4258_v8 = vpop.f32.mrf.mxu0 }
 0x252   :  { %v4260_v16 = vpop.f32.mrf.mxu0 }
 0x254   :  { %v4262_v12 = vpop.f32.mrf.mxu0 }
 0x256   :  { %v4266_v25 = vpop.f32.mrf.mxu0 }
 0x257   :  { %v4165_v45 = vpop.f32.mrf.mxu1 }
 0x258   :  { %v4166_v36 = vadd.f32 %v4165_v45, %v16704_v7  ;;  %v4268_v53 = vpop.f32.mrf.mxu0 }
 0x259   :  { %v4167_v27 = vpop.f32.mrf.mxu1 }
 0x25a   :  { %v4247_v56 = vadd.f32 %v4246_v22, %v4166_v36  ;;  %v4168_v46 = vadd.f32 %v4167_v27, %v16709_v59  ;;  %v4270_v57 = vpop.f32.mrf.mxu0 }
 0x25b   :  { %v4169_v1 = vpop.f32.mrf.mxu1 }
 0x25c   :  { %4791 = vst [vmem:[#allocation2 + $0x60] sm:$0xff] %v4247_v56  ;;  %v4249_v21 = vadd.f32 %v4248_v19, %v4168_v46  ;;  %v4170_v48 = vadd.f32 %v4169_v1, %v16704_v7  ;;  %v4272_v47 = vpop.f32.mrf.mxu0 }
 0x25d   :  { %v4171_v60 = vpop.f32.mrf.mxu1 }
 0x25e   :  { %4792 = vst [vmem:[#allocation2 + $0x68] sm:$0xff] %v4249_v21  ;;  %v4251_v6 = vadd.f32 %v4250_v43, %v4170_v48  ;;  %v4172_v35 = vadd.f32 %v4171_v60, %v16709_v59  ;;  %v4276_v4 = vpop.f32.mrf.mxu0 }
 0x25f   :  { %v4175_v17 = vpop.f32.mrf.mxu1 }
 0x260   :  { %4811 = vst [vmem:[#allocation2 + $0x100] sm:$0xff] %v4251_v6  ;;  %v4253_v18 = vadd.f32 %v4252_v0, %v4172_v35  ;;  %v4176_v40 = vadd.f32 %v4175_v17, %v16704_v7  ;;  %v4278_v30 = vpop.f32.mrf.mxu0 }
 0x261   :  { %v4177_v32 = vpop.f32.mrf.mxu1 }
 0x262   :  { %4812 = vst [vmem:[#allocation2 + $0x108] sm:$0xff] %v4253_v18  ;;  %v4178_v51 = vadd.f32 %v4177_v32, %v16709_v59  ;;  %v4257_v14 = vadd.f32 %v4256_v29, %v4176_v40  ;;  %v4280_v26 = vpop.f32.mrf.mxu0  ;;  %v16732_v18 = vrot.slane %v16506_v62, %v610_v38 }
 0x263   :  { %v4179_v52 = vpop.f32.mrf.mxu1 }
 0x264   :  { %4831 = vst [vmem:[#allocation2 + $0x1a0] sm:$0xff] %v4257_v14  ;;  %v4180_v44 = vadd.f32 %v4179_v52, %v16704_v7  ;;  %v4259_v3 = vadd.f32 %v4258_v8, %v4178_v51  ;;  %v4282_v61 = vpop.f32.mrf.mxu0 }
 0x265   :  { %v4181_v33 = vpop.f32.mrf.mxu1 }
 0x266   :  { %4832 = vst [vmem:[#allocation2 + $0x1a8] sm:$0xff] %v4259_v3  ;;  %v4182_v24 = vadd.f32 %v4181_v33, %v16709_v59  ;;  %v4261_v9 = vadd.f32 %v4260_v16, %v4180_v44  ;;  %v4286_v50 = vpop.f32.mrf.mxu0 }
 0x267   :  { %v4185_v39 = vpop.f32.mrf.mxu1 }
 0x268   :  { %4851 = vst [vmem:[#allocation2 + $0x240] sm:$0xff] %v4261_v9  ;;  %v4186_v42 = vadd.f32 %v4185_v39, %v16704_v7  ;;  %v4263_v10 = vadd.f32 %v4262_v12, %v4182_v24  ;;  %v4288_v58 = vpop.f32.mrf.mxu0 }
 0x269   :  { %v4187_v34 = vpop.f32.mrf.mxu1 }
 0x26a   :  { %4852 = vst [vmem:[#allocation2 + $0x248] sm:$0xff] %v4263_v10  ;;  %v4188_v23 = vadd.f32 %v4187_v34, %v16709_v59  ;;  %v4267_v15 = vadd.f32 %v4266_v25, %v4186_v42  ;;  %v4290_v55 = vpop.f32.mrf.mxu0 }
 0x26b   :  { %v4189_v2 = vpop.f32.mrf.mxu1 }
 0x26c   :  { %4871 = vst [vmem:[#allocation2 + $0x2e0] sm:$0xff] %v4267_v15  ;;  %v4190_v37 = vadd.f32 %v4189_v2, %v16704_v7  ;;  %v4269_v20 = vadd.f32 %v4268_v53, %v4188_v23  ;;  %v4291_v31 = vpop.f32.mrf.mxu0 }
 0x26d   :  { %v4191_v49 = vpop.f32.mrf.mxu1 }
 0x26e   :  { %4872 = vst [vmem:[#allocation2 + $0x2e8] sm:$0xff] %v4269_v20  ;;  %v4192_v13 = vadd.f32 %v4191_v49, %v16709_v59  ;;  %v4271_v22 = vadd.f32 %v4270_v57, %v4190_v37 }
 0x26f   :  { %v4195_v19 = vpop.f32.mrf.mxu1 }
 0x270   :  { %4891 = vst [vmem:[#allocation2 + $0x380] sm:$0xff] %v4271_v22  ;;  %v4196_v43 = vadd.f32 %v4195_v19, %v16704_v7  ;;  %v4273_v0 = vadd.f32 %v4272_v47, %v4192_v13 }
 0x271   :  { %v4197_v29 = vpop.f32.mrf.mxu1 }
 0x272   :  { %4892 = vst [vmem:[#allocation2 + $0x388] sm:$0xff] %v4273_v0  ;;  %v4198_v8 = vadd.f32 %v4197_v29, %v16709_v59  ;;  %v4277_v16 = vadd.f32 %v4276_v4, %v4196_v43 }
 0x273   :  { %v4199_v12 = vpop.f32.mrf.mxu1 }
 0x274   :  { %4911 = vst [vmem:[#allocation2 + $0x420] sm:$0xff] %v4277_v16  ;;  %v4200_v45 = vadd.f32 %v4199_v12, %v16704_v7  ;;  %v4279_v25 = vadd.f32 %v4278_v30, %v4198_v8 }
 0x275   :  { %v4201_v36 = vpop.f32.mrf.mxu1 }
 0x276   :  { %4912 = vst [vmem:[#allocation2 + $0x428] sm:$0xff] %v4279_v25  ;;  %v4202_v27 = vadd.f32 %v4201_v36, %v16709_v59  ;;  %v4281_v53 = vadd.f32 %v4280_v26, %v4200_v45 }
 0x277   :  { %v4205_v56 = vpop.f32.mrf.mxu1 }
 0x278   :  { %4931 = vst [vmem:[#allocation2 + $0x4c0] sm:$0xff] %v4281_v53  ;;  %v4283_v46 = vadd.f32 %v4282_v61, %v4202_v27  ;;  %v4206_v1 = vadd.f32 %v4205_v56, %v16704_v7  ;;  %v16737_v7 = vrot.slane %v16506_v62, %v614_v11 }
 0x279   :  { %v4207_v57 = vpop.f32.mrf.mxu1 }
 0x27a   :  { %4932 = vst [vmem:[#allocation2 + $0x4c8] sm:$0xff] %v4283_v46  ;;  %v4287_v21 = vadd.f32 %v4286_v50, %v4206_v1  ;;  %v4208_v48 = vadd.f32 %v4207_v57, %v16709_v59 }
 0x27b   :  { %v4209_v60 = vpop.f32.mrf.mxu1 }
 0x27c   :  { %4951 = vst [vmem:[#allocation2 + $0x560] sm:$0xff] %v4287_v21  ;;  %v4289_v47 = vadd.f32 %v4288_v58, %v4208_v48 }
 0x27d   :  { %v4210_v6 = vpop.f32.mrf.mxu1 }
 0x27e   :  { %4952 = vst [vmem:[#allocation2 + $0x568] sm:$0xff] %v4289_v47 }
 0x27f   :  { %v4408_v35 = vpop.f32.mrf.mxu1 }
 0x281   :  { %v4410_v17 = vpop.f32.mrf.mxu1 }
 0x283   :  { %v4412_v4 = vpop.f32.mrf.mxu1 }
 0x285   :  { %v4414_v40 = vpop.f32.mrf.mxu1 }
 0x286   :  { %v4327_v59 = vpop.f32.mrf.mxu0 }
 0x287   :  { %v4418_v32 = vpop.f32.mrf.mxu1  ;;  %v4328_v30 = vadd.f32 %v4327_v59, %v16732_v18 }
 0x288   :  { %v4329_v51 = vpop.f32.mrf.mxu0 }
 0x289   :  { %v4420_v14 = vpop.f32.mrf.mxu1  ;;  %v4409_v52 = vadd.f32 %v4408_v35, %v4328_v30  ;;  %v4330_v26 = vadd.f32 %v4329_v51, %v16737_v7 }
 0x28a   :  { %v4331_v44 = vpop.f32.mrf.mxu0 }
 0x28b   :  { %v4422_v3 = vpop.f32.mrf.mxu1  ;;  %4793 = vst [vmem:[#allocation2 + $0x70] sm:$0xff] %v4409_v52  ;;  %v4411_v38 = vadd.f32 %v4410_v17, %v4330_v26  ;;  %v4332_v33 = vadd.f32 %v4331_v44, %v16732_v18 }
 0x28c   :  { %v4333_v61 = vpop.f32.mrf.mxu0 }
 0x28d   :  { %v4424_v41 = vpop.f32.mrf.mxu1  ;;  %4794 = vst [vmem:[#allocation2 + $0x78] sm:$0xff] %v4411_v38  ;;  %v4413_v11 = vadd.f32 %v4412_v4, %v4332_v33  ;;  %v4334_v62 = vadd.f32 %v4333_v61, %v16737_v7 }
 0x28e   :  { %v4337_v24 = vpop.f32.mrf.mxu0 }
 0x28f   :  { %v4428_v9 = vpop.f32.mrf.mxu1  ;;  %4813 = vst [vmem:[#allocation2 + $0x110] sm:$0xff] %v4413_v11  ;;  %v4415_v39 = vadd.f32 %v4414_v40, %v4334_v62  ;;  %v4338_v50 = vadd.f32 %v4337_v24, %v16732_v18 }
 0x290   :  { %v4339_v42 = vpop.f32.mrf.mxu0 }
 0x291   :  { %v4430_v10 = vpop.f32.mrf.mxu1  ;;  %4814 = vst [vmem:[#allocation2 + $0x118] sm:$0xff] %v4415_v39  ;;  %v4340_v34 = vadd.f32 %v4339_v42, %v16737_v7  ;;  %v4419_v58 = vadd.f32 %v4418_v32, %v4338_v50 }
 0x292   :  { %v4341_v23 = vpop.f32.mrf.mxu0 }
 0x293   :  { %v4432_v15 = vpop.f32.mrf.mxu1  ;;  %4833 = vst [vmem:[#allocation2 + $0x1b0] sm:$0xff] %v4419_v58  ;;  %v4342_v2 = vadd.f32 %v4341_v23, %v16732_v18  ;;  %v4421_v55 = vadd.f32 %v4420_v14, %v4340_v34 }
 0x294   :  { %v4343_v37 = vpop.f32.mrf.mxu0 }
 0x295   :  { %v4434_v20 = vpop.f32.mrf.mxu1 }
 0x296   :  { %15737 = shalt.err (!%p15734_p5)  }
 0x297   :  { %67 = dma.hbm_to_vmem [thread:$0]  %s17169_s4, 102400, %s65_s2, [#allocation6]  ;;  %4834 = vst [vmem:[#allocation2 + $0x1b8] sm:$0xff] %v4421_v55  ;;  %v4344_v49 = vadd.f32 %v4343_v37, %v16737_v7  ;;  %v4423_v31 = vadd.f32 %v4422_v3, %v4342_v2  ;;  %v4347_v13 = vpop.f32.mrf.mxu0  ;;  %v4438_v22 = vpop.f32.mrf.mxu1 }
 0x298   :  { %s15746_s16 = scalar_lea.vmem %s77_s1, 5120  ;;  %p15751_p7 = scmp.lt.s32.totalorder %s77_s1, %s77_s1 }
 0x299   :  { %p15747_p6 = scmp.ne.s32.totalorder %s77_s1, %s15746_s16  ;;  %p15752_p8 = scmp.lt.s32.totalorder %s15746_s16, %s15746_s16 }
 0x29b   :  { %p15753_p9 = por %p15752_p8, %p15751_p7 }
 0x29d   :  { %p15754_p10 = pnand %p15753_p9, %p15747_p6 }
 0x29f   :  { %15757 = shalt.err (!%p15754_p10)  }
 0x2a0   :  { %79 = dma.hbm_to_vmem [thread:$0]  %s17170_s5, 5120, %s77_s1, [#allocation6 + $0x1]  ;;  %4853 = vst [vmem:[#allocation2 + $0x250] sm:$0xff] %v4423_v31  ;;  %v4348_v19 = vadd.f32 %v4347_v13, %v16732_v18  ;;  %v4425_v43 = vadd.f32 %v4424_v41, %v4344_v49  ;;  %v4349_v0 = vpop.f32.mrf.mxu0  ;;  %v4440_v29 = vpop.f32.mrf.mxu1  ;;  %v16763_v42 = vld [vmem:[#allocation9 + $0x10] sm:$0xf] }
 0x2a1   :  { %v4350_v8 = vadd.f32 %v4349_v0, %v16737_v7  ;;  %v16767_v34 = vrot.slane %v16763_v42, %v16150_v54  ;;  %v16771_v58 = vrot.slane %v16763_v42, %v16157_v63 }
 0x2a2   :  { %4854 = vst [vmem:[#allocation2 + $0x258] sm:$0xff] %v4425_v43  ;;  %v4429_v16 = vadd.f32 %v4428_v9, %v4348_v19  ;;  %v4351_v12 = vpop.f32.mrf.mxu0  ;;  %v4442_v45 = vpop.f32.mrf.mxu1 }
 0x2a3   :  { %v4352_v25 = vadd.f32 %v4351_v12, %v16732_v18  ;;  %v4431_v36 = vadd.f32 %v4430_v10, %v4350_v8 }
 0x2a4   :  { %4873 = vst [vmem:[#allocation2 + $0x2f0] sm:$0xff] %v4429_v16  ;;  %v4353_v27 = vpop.f32.mrf.mxu0  ;;  %v4444_v53 = vpop.f32.mrf.mxu1 }
 0x2a5   :  { %4874 = vst [vmem:[#allocation2 + $0x2f8] sm:$0xff] %v4431_v36  ;;  %v4354_v56 = vadd.f32 %v4353_v27, %v16737_v7  ;;  %v4433_v46 = vadd.f32 %v4432_v15, %v4352_v25 }
 0x2a6   :  { %v4357_v1 = vpop.f32.mrf.mxu0  ;;  %v4448_v57 = vpop.f32.mrf.mxu1 }
 0x2a7   :  { %4893 = vst [vmem:[#allocation2 + $0x390] sm:$0xff] %v4433_v46  ;;  %v4358_v21 = vadd.f32 %v4357_v1, %v16732_v18  ;;  %v4435_v48 = vadd.f32 %v4434_v20, %v4354_v56 }
 0x2a8   :  { %v4359_v60 = vpop.f32.mrf.mxu0  ;;  %v4450_v47 = vpop.f32.mrf.mxu1 }
 0x2a9   :  { %4894 = vst [vmem:[#allocation2 + $0x398] sm:$0xff] %v4435_v48  ;;  %v4360_v6 = vadd.f32 %v4359_v60, %v16737_v7  ;;  %v4439_v35 = vadd.f32 %v4438_v22, %v4358_v21 }
 0x2aa   :  { %v4361_v17 = vpop.f32.mrf.mxu0  ;;  %v4452_v4 = vpop.f32.mrf.mxu1 }
 0x2ab   :  { %4913 = vst [vmem:[#allocation2 + $0x430] sm:$0xff] %v4439_v35  ;;  %v4362_v40 = vadd.f32 %v4361_v17, %v16732_v18  ;;  %v4441_v59 = vadd.f32 %v4440_v29, %v4360_v6 }
 0x2ac   :  { %v4363_v32 = vpop.f32.mrf.mxu0  ;;  %v4453_v30 = vpop.f32.mrf.mxu1 }
 0x2ad   :  { %4914 = vst [vmem:[#allocation2 + $0x438] sm:$0xff] %v4441_v59  ;;  %v4364_v51 = vadd.f32 %v4363_v32, %v16737_v7  ;;  %v4443_v14 = vadd.f32 %v4442_v45, %v4362_v40 }
 0x2ae   :  { %v4367_v52 = vpop.f32.mrf.mxu0 }
 0x2af   :  { %4933 = vst [vmem:[#allocation2 + $0x4d0] sm:$0xff] %v4443_v14  ;;  %v4368_v26 = vadd.f32 %v4367_v52, %v16732_v18  ;;  %v4445_v44 = vadd.f32 %v4444_v53, %v4364_v51 }
 0x2b0   :  { %v4369_v3 = vpop.f32.mrf.mxu0 }
 0x2b1   :  { %4934 = vst [vmem:[#allocation2 + $0x4d8] sm:$0xff] %v4445_v44  ;;  %v4370_v38 = vadd.f32 %v4369_v3, %v16737_v7  ;;  %v4449_v33 = vadd.f32 %v4448_v57, %v4368_v26 }
 0x2b2   :  { %v4371_v61 = vpop.f32.mrf.mxu0 }
 0x2b3   :  { %4953 = vst [vmem:[#allocation2 + $0x570] sm:$0xff] %v4449_v33  ;;  %v4451_v41 = vadd.f32 %v4450_v47, %v4370_v38 }
 0x2b4   :  { %v4372_v11 = vpop.f32.mrf.mxu0 }
 0x2b5   :  { %4954 = vst [vmem:[#allocation2 + $0x578] sm:$0xff] %v4451_v41 }
 0x2b6   :  { %v4570_v62 = vpop.f32.mrf.mxu0 }
 0x2b8   :  { %v4572_v24 = vpop.f32.mrf.mxu0 }
 0x2ba   :  { %v4574_v9 = vpop.f32.mrf.mxu0 }
 0x2bc   :  { %v4576_v39 = vpop.f32.mrf.mxu0 }
 0x2be   :  { %v4580_v50 = vpop.f32.mrf.mxu0 }
 0x2bf   :  { %v4489_v23 = vpop.f32.mrf.mxu1 }
 0x2c0   :  { %v4582_v10 = vpop.f32.mrf.mxu0  ;;  %v4490_v2 = vadd.f32 %v4489_v23, %v16767_v34 }
 0x2c1   :  { %v4491_v55 = vpop.f32.mrf.mxu1 }
 0x2c2   :  { %v4584_v18 = vpop.f32.mrf.mxu0  ;;  %v4571_v20 = vadd.f32 %v4570_v62, %v4490_v2  ;;  %v4492_v49 = vadd.f32 %v4491_v55, %v16771_v58 }
 0x2c3   :  { %v4493_v31 = vpop.f32.mrf.mxu1 }
 0x2c4   :  { %v4586_v7 = vpop.f32.mrf.mxu0  ;;  %4795 = vst [vmem:[#allocation2 + $0x80] sm:$0xff] %v4571_v20  ;;  %v4573_v22 = vadd.f32 %v4572_v24, %v4492_v49  ;;  %v4494_v54 = vadd.f32 %v4493_v31, %v16767_v34 }
 0x2c5   :  { %v4495_v19 = vpop.f32.mrf.mxu1 }
 0x2c6   :  { %v4590_v15 = vpop.f32.mrf.mxu0  ;;  %4796 = vst [vmem:[#allocation2 + $0x88] sm:$0xff] %v4573_v22  ;;  %v4575_v63 = vadd.f32 %v4574_v9, %v4494_v54  ;;  %v4496_v0 = vadd.f32 %v4495_v19, %v16771_v58 }
 0x2c7   :  { %v4499_v29 = vpop.f32.mrf.mxu1 }
 0x2c8   :  { %v4592_v37 = vpop.f32.mrf.mxu0  ;;  %4815 = vst [vmem:[#allocation2 + $0x120] sm:$0xff] %v4575_v63  ;;  %v4577_v16 = vadd.f32 %v4576_v39, %v4496_v0  ;;  %v4500_v12 = vadd.f32 %v4499_v29, %v16767_v34 }
 0x2c9   :  { %v4501_v45 = vpop.f32.mrf.mxu1 }
 0x2ca   :  { %v4594_v13 = vpop.f32.mrf.mxu0  ;;  %4816 = vst [vmem:[#allocation2 + $0x128] sm:$0xff] %v4577_v16  ;;  %v4502_v36 = vadd.f32 %v4501_v45, %v16771_v58  ;;  %v4581_v27 = vadd.f32 %v4580_v50, %v4500_v12 }
 0x2cb   :  { %v4503_v53 = vpop.f32.mrf.mxu1 }
 0x2cc   :  { %v4596_v43 = vpop.f32.mrf.mxu0  ;;  %4835 = vst [vmem:[#allocation2 + $0x1c0] sm:$0xff] %v4581_v27  ;;  %v4504_v46 = vadd.f32 %v4503_v53, %v16767_v34  ;;  %v4583_v1 = vadd.f32 %v4582_v10, %v4502_v36 }
 0x2cd   :  { %v4505_v57 = vpop.f32.mrf.mxu1 }
 0x2ce   :  { %v4600_v8 = vpop.f32.mrf.mxu0  ;;  %4836 = vst [vmem:[#allocation2 + $0x1c8] sm:$0xff] %v4583_v1  ;;  %v4506_v48 = vadd.f32 %v4505_v57, %v16771_v58  ;;  %v4585_v60 = vadd.f32 %v4584_v18, %v4504_v46 }
 0x2cf   :  { %v4509_v47 = vpop.f32.mrf.mxu1 }
 0x2d0   :  { %v4602_v25 = vpop.f32.mrf.mxu0  ;;  %4855 = vst [vmem:[#allocation2 + $0x260] sm:$0xff] %v4585_v60  ;;  %v4510_v35 = vadd.f32 %v4509_v47, %v16767_v34  ;;  %v4587_v17 = vadd.f32 %v4586_v7, %v4506_v48 }
 0x2d1   :  { %v4511_v4 = vpop.f32.mrf.mxu1 }
 0x2d2   :  { %v4604_v56 = vpop.f32.mrf.mxu0  ;;  %4856 = vst [vmem:[#allocation2 + $0x268] sm:$0xff] %v4587_v17  ;;  %v4512_v59 = vadd.f32 %v4511_v4, %v16771_v58  ;;  %v4591_v32 = vadd.f32 %v4590_v15, %v4510_v35 }
 0x2d3   :  { %v4513_v30 = vpop.f32.mrf.mxu1 }
 0x2d4   :  { %v4606_v21 = vpop.f32.mrf.mxu0  ;;  %4875 = vst [vmem:[#allocation2 + $0x300] sm:$0xff] %v4591_v32  ;;  %v4514_v14 = vadd.f32 %v4513_v30, %v16767_v34  ;;  %v4593_v52 = vadd.f32 %v4592_v37, %v4512_v59 }
 0x2d5   :  { %v4515_v26 = vpop.f32.mrf.mxu1 }
 0x2d6   :  { %v4610_v6 = vpop.f32.mrf.mxu0  ;;  %4876 = vst [vmem:[#allocation2 + $0x308] sm:$0xff] %v4593_v52  ;;  %v4516_v3 = vadd.f32 %v4515_v26, %v16771_v58  ;;  %v4595_v38 = vadd.f32 %v4594_v13, %v4514_v14 }
 0x2d7   :  { %v4519_v33 = vpop.f32.mrf.mxu1 }
 0x2d8   :  { %v4612_v40 = vpop.f32.mrf.mxu0  ;;  %4895 = vst [vmem:[#allocation2 + $0x3a0] sm:$0xff] %v4595_v38  ;;  %v4520_v61 = vadd.f32 %v4519_v33, %v16767_v34  ;;  %v4597_v41 = vadd.f32 %v4596_v43, %v4516_v3  ;;  %v16793_v43 = vrot.slane %v16763_v42, %v16228_v28 }
 0x2d9   :  { %v4521_v11 = vpop.f32.mrf.mxu1 }
 0x2da   :  { %v4614_v51 = vpop.f32.mrf.mxu0  ;;  %4896 = vst [vmem:[#allocation2 + $0x3a8] sm:$0xff] %v4597_v41  ;;  %v4522_v62 = vadd.f32 %v4521_v11, %v16771_v58  ;;  %v4601_v24 = vadd.f32 %v4600_v8, %v4520_v61 }
 0x2db   :  { %v4523_v9 = vpop.f32.mrf.mxu1 }
 0x2dc   :  { %v4615_v44 = vpop.f32.mrf.mxu0  ;;  %4915 = vst [vmem:[#allocation2 + $0x440] sm:$0xff] %v4601_v24  ;;  %v4524_v39 = vadd.f32 %v4523_v9, %v16767_v34  ;;  %v4603_v50 = vadd.f32 %v4602_v25, %v4522_v62 }
 0x2dd   :  { %v4525_v10 = vpop.f32.mrf.mxu1 }
 0x2de   :  { %4916 = vst [vmem:[#allocation2 + $0x448] sm:$0xff] %v4603_v50  ;;  %v4526_v18 = vadd.f32 %v4525_v10, %v16771_v58  ;;  %v4605_v7 = vadd.f32 %v4604_v56, %v4524_v39 }
 0x2df   :  { %v4529_v23 = vpop.f32.mrf.mxu1 }
 0x2e0   :  { %4935 = vst [vmem:[#allocation2 + $0x4e0] sm:$0xff] %v4605_v7  ;;  %v4607_v15 = vadd.f32 %v4606_v21, %v4526_v18  ;;  %v4530_v2 = vadd.f32 %v4529_v23, %v16767_v34  ;;  %v16797_v34 = vrot.slane %v16763_v42, %v16233_v5 }
 0x2e1   :  { %v4531_v55 = vpop.f32.mrf.mxu1 }
 0x2e2   :  { %4936 = vst [vmem:[#allocation2 + $0x4e8] sm:$0xff] %v4607_v15  ;;  %v4611_v37 = vadd.f32 %v4610_v6, %v4530_v2  ;;  %v4532_v20 = vadd.f32 %v4531_v55, %v16771_v58 }
 0x2e3   :  { %v4533_v49 = vpop.f32.mrf.mxu1 }
 0x2e4   :  { %4955 = vst [vmem:[#allocation2 + $0x580] sm:$0xff] %v4611_v37  ;;  %v4613_v31 = vadd.f32 %v4612_v40, %v4532_v20 }
 0x2e5   :  { %v4534_v13 = vpop.f32.mrf.mxu1 }
 0x2e6   :  { %4956 = vst [vmem:[#allocation2 + $0x588] sm:$0xff] %v4613_v31 }
 0x2e7   :  { %v4732_v22 = vpop.f32.mrf.mxu1 }
 0x2e9   :  { %v4734_v54 = vpop.f32.mrf.mxu1 }
 0x2eb   :  { %v4736_v19 = vpop.f32.mrf.mxu1 }
 0x2ed   :  { %v4738_v63 = vpop.f32.mrf.mxu1 }
 0x2ee   :  { %v4651_v0 = vpop.f32.mrf.mxu0 }
 0x2ef   :  { %v4742_v29 = vpop.f32.mrf.mxu1  ;;  %v4652_v58 = vadd.f32 %v4651_v0, %v16793_v43 }
 0x2f0   :  { %v4653_v8 = vpop.f32.mrf.mxu0 }
 0x2f1   :  { %v4744_v16 = vpop.f32.mrf.mxu1  ;;  %v4733_v12 = vadd.f32 %v4732_v22, %v4652_v58  ;;  %v4654_v45 = vadd.f32 %v4653_v8, %v16797_v34 }
 0x2f2   :  { %v4655_v25 = vpop.f32.mrf.mxu0 }
 0x2f3   :  { %v4746_v36 = vpop.f32.mrf.mxu1  ;;  %4797 = vst [vmem:[#allocation2 + $0x90] sm:$0xff] %v4733_v12  ;;  %v4735_v27 = vadd.f32 %v4734_v54, %v4654_v45  ;;  %v4656_v28 = vadd.f32 %v4655_v25, %v16793_v43 }
 0x2f4   :  { %v4657_v53 = vpop.f32.mrf.mxu0 }
 0x2f5   :  { %v4748_v56 = vpop.f32.mrf.mxu1  ;;  %4798 = vst [vmem:[#allocation2 + $0x98] sm:$0xff] %v4735_v27  ;;  %v4737_v5 = vadd.f32 %v4736_v19, %v4656_v28  ;;  %v4658_v42 = vadd.f32 %v4657_v53, %v16797_v34 }
 0x2f6   :  { %v4661_v46 = vpop.f32.mrf.mxu0 }
 0x2f7   :  { %v4752_v1 = vpop.f32.mrf.mxu1  ;;  %4817 = vst [vmem:[#allocation2 + $0x130] sm:$0xff] %v4737_v5  ;;  %v4739_v57 = vadd.f32 %v4738_v63, %v4658_v42  ;;  %v4662_v21 = vadd.f32 %v4661_v46, %v16793_v43 }
 0x2f8   :  { %v4663_v48 = vpop.f32.mrf.mxu0 }
 0x2f9   :  { %v4754_v60 = vpop.f32.mrf.mxu1  ;;  %4818 = vst [vmem:[#allocation2 + $0x138] sm:$0xff] %v4739_v57  ;;  %v4743_v47 = vadd.f32 %v4742_v29, %v4662_v21  ;;  %v4664_v6 = vadd.f32 %v4663_v48, %v16797_v34 }
 0x2fa   :  { %v4665_v35 = vpop.f32.mrf.mxu0 }
 0x2fb   :  { %v4756_v17 = vpop.f32.mrf.mxu1  ;;  %4837 = vst [vmem:[#allocation2 + $0x1d0] sm:$0xff] %v4743_v47  ;;  %v4745_v4 = vadd.f32 %v4744_v16, %v4664_v6  ;;  %v4666_v40 = vadd.f32 %v4665_v35, %v16793_v43 }
 0x2fc   :  { %v4667_v59 = vpop.f32.mrf.mxu0 }
 0x2fd   :  { %v4758_v32 = vpop.f32.mrf.mxu1  ;;  %4838 = vst [vmem:[#allocation2 + $0x1d8] sm:$0xff] %v4745_v4  ;;  %v4747_v30 = vadd.f32 %v4746_v36, %v4666_v40  ;;  %v4668_v51 = vadd.f32 %v4667_v59, %v16797_v34 }
 0x2fe   :  { %v4671_v14 = vpop.f32.mrf.mxu0 }
 0x2ff   :  { %v4762_v52 = vpop.f32.mrf.mxu1  ;;  %4857 = vst [vmem:[#allocation2 + $0x270] sm:$0xff] %v4747_v30  ;;  %v4749_v26 = vadd.f32 %v4748_v56, %v4668_v51  ;;  %v4672_v44 = vadd.f32 %v4671_v14, %v16793_v43 }
 0x300   :  { %v4673_v3 = vpop.f32.mrf.mxu0 }
 0x301   :  { %v4764_v38 = vpop.f32.mrf.mxu1  ;;  %4858 = vst [vmem:[#allocation2 + $0x278] sm:$0xff] %v4749_v26  ;;  %v4753_v33 = vadd.f32 %v4752_v1, %v4672_v44  ;;  %v4674_v61 = vadd.f32 %v4673_v3, %v16797_v34 }
 0x302   :  { %v4675_v41 = vpop.f32.mrf.mxu0 }
 0x303   :  { %v4766_v11 = vpop.f32.mrf.mxu1  ;;  %4877 = vst [vmem:[#allocation2 + $0x310] sm:$0xff] %v4753_v33  ;;  %v4755_v62 = vadd.f32 %v4754_v60, %v4674_v61  ;;  %v4676_v24 = vadd.f32 %v4675_v41, %v16793_v43 }
 0x304   :  { %v4677_v9 = vpop.f32.mrf.mxu0 }
 0x305   :  { %v4768_v39 = vpop.f32.mrf.mxu1  ;;  %4878 = vst [vmem:[#allocation2 + $0x318] sm:$0xff] %v4755_v62  ;;  %v4757_v50 = vadd.f32 %v4756_v17, %v4676_v24  ;;  %v4678_v10 = vadd.f32 %v4677_v9, %v16797_v34 }
 0x306   :  { %v4681_v18 = vpop.f32.mrf.mxu0 }
 0x307   :  { %v4772_v7 = vpop.f32.mrf.mxu1  ;;  %4897 = vst [vmem:[#allocation2 + $0x3b0] sm:$0xff] %v4757_v50  ;;  %v4759_v23 = vadd.f32 %v4758_v32, %v4678_v10  ;;  %v4682_v15 = vadd.f32 %v4681_v18, %v16793_v43 }
 0x308   :  { %v4683_v2 = vpop.f32.mrf.mxu0 }
 0x309   :  { %v4774_v55 = vpop.f32.mrf.mxu1  ;;  %4898 = vst [vmem:[#allocation2 + $0x3b8] sm:$0xff] %v4759_v23  ;;  %v4763_v37 = vadd.f32 %v4762_v52, %v4682_v15  ;;  %v4684_v20 = vadd.f32 %v4683_v2, %v16797_v34 }
 0x30a   :  { %v4685_v49 = vpop.f32.mrf.mxu0 }
 0x30b   :  { %v4776_v31 = vpop.f32.mrf.mxu1  ;;  %4917 = vst [vmem:[#allocation2 + $0x450] sm:$0xff] %v4763_v37  ;;  %v4765_v13 = vadd.f32 %v4764_v38, %v4684_v20  ;;  %v4686_v22 = vadd.f32 %v4685_v49, %v16793_v43 }
 0x30c   :  { %v4687_v54 = vpop.f32.mrf.mxu0 }
 0x30d   :  { %v4777_v19 = vpop.f32.mrf.mxu1  ;;  %4918 = vst [vmem:[#allocation2 + $0x458] sm:$0xff] %v4765_v13  ;;  %v4767_v63 = vadd.f32 %v4766_v11, %v4686_v22  ;;  %v4688_v0 = vadd.f32 %v4687_v54, %v16797_v34 }
 0x30e   :  { %v4691_v29 = vpop.f32.mrf.mxu0 }
 0x30f   :  { %4937 = vst [vmem:[#allocation2 + $0x4f0] sm:$0xff] %v4767_v63  ;;  %v4769_v58 = vadd.f32 %v4768_v39, %v4688_v0  ;;  %v4692_v8 = vadd.f32 %v4691_v29, %v16793_v43 }
 0x310   :  { %v4693_v16 = vpop.f32.mrf.mxu0 }
 0x311   :  { %4938 = vst [vmem:[#allocation2 + $0x4f8] sm:$0xff] %v4769_v58  ;;  %v4773_v12 = vadd.f32 %v4772_v7, %v4692_v8  ;;  %v4694_v45 = vadd.f32 %v4693_v16, %v16797_v34 }
 0x312   :  { %v4695_v25 = vpop.f32.mrf.mxu0 }
 0x313   :  { %4957 = vst [vmem:[#allocation2 + $0x590] sm:$0xff] %v4773_v12  ;;  %v4775_v36 = vadd.f32 %v4774_v55, %v4694_v45 }
 0x314   :  { %v4696_v27 = vpop.f32.mrf.mxu0 }
 0x315   :  { %4958 = vst [vmem:[#allocation2 + $0x598] sm:$0xff] %v4775_v36 }
 0x316   :  { %15806 = dma.done.wait [#allocation6], 102400 }
 0x317   :  { %15807 = vsyncadd [#allocation6], 4294864896  ;;  %v16817_v28 = vmov 0.0   ;;  %v16819_v53 = vmov 0.0   ;;  %v16821_v56 = vmov 0.0   ;;  %v16823_v5 = vmov 0.0  }
 0x318   :  { %v16825_v43 = vmov 0.0   ;;  %v16827_v42 = vmov 0   ;;  %v16829_v34 = vmov 0   ;;  %v16831_v46 = vmov 0   ;;  %s16837_s4 = smov 0  }
 0x319   :  { %v16833_v1 = vmov 0   ;;  %v16835_v57 = vmov 0  }
 0x31a LB: > { %v14318_v21 = vld [vmem:[#allocation4 + $0x464] ss:$80 sps:$4 sm:$0xff]   ;;  %v14322_v60 = vld [vmem:[#allocation4 + $0x460] ss:$80 sps:$4 sm:$0xff]   ;;  %9837 = vmatprep.mubr.bf16.mxu0 %v15844_v1  ;;  %9878 = vmatprep.mubr.bf16.mxu1 %v15836_v34  ;;  %s12420_s5 = sshll.u32 %s15852_s4, 3  ;;  %s4968_s4 = sadd.s32 1, %s15852_s4   ;;  %s15852_s4 = sphi %s16837_s4, %s4968_s4   ;;  %v15848_v57 = vphi %v16835_v57, %v17172_v57   ;;  %v15844_v1 = vphi %v16833_v1, %v11184_v1   ;;  %v15840_v46 = vphi %v16831_v46, %v11185_v46   ;;  %v15836_v34 = vphi %v16829_v34, %v11186_v34   ;;  %v15832_v42 = vphi %v16827_v42, %v11187_v42   ;;  %v15828_v43 = vphi %v16825_v43, %v16995_v43   ;;  %v15824_v5 = vphi %v16823_v5, %v16998_v5   ;;  %v15820_v56 = vphi %v16821_v56, %v17025_v56   ;;  %v15816_v53 = vphi %v16819_v53, %v17028_v53   ;;  %v15812_v28 = vphi %v16817_v28, %v17039_v28  }
 0x31b   : > { %v14320_v48 = vld [vmem:[#allocation4 + $0xe64] ss:$80 sps:$4 sm:$0xff]   ;;  %9805 = vmatprep.subr.bf16.mxu0 %v14318_v21  ;;  %v14323_v47 = vld [vmem:[#allocation4 + $0xe60] ss:$80 sps:$4 sm:$0xff]   ;;  %s16969_s19 = sshra.s32 %s12420_s5, 3  ;;  %p4965_p11 = scmp.ge.s32.totalorder %s4968_s4, 9  }
 0x31c   : > { %9846 = vmatprep.subr.bf16.mxu1 %v14320_v48  ;;  %v14324_v6 = vld [vmem:[#allocation4 + $0x3c4] ss:$80 sps:$4 sm:$0xff]   ;;  %9806 = vmatpush1.bf16.msra.mxu0 %v14322_v60  ;;  %v14328_v17 = vld [vmem:[#allocation4 + $0x3c0] ss:$80 sps:$4 sm:$0xff]   ;;  %s13281_s20 = smul.u32 160, %s16969_s19 }
 0x31d   : > { %9847 = vmatpush1.bf16.msra.mxu1 %v14323_v47  ;;  %v14326_v35 = vld [vmem:[#allocation4 + $0xdc4] ss:$80 sps:$4 sm:$0xff]   ;;  %9807 = vmatprep.subr.bf16.mxu0 %v14324_v6  ;;  %v14329_v4 = vld [vmem:[#allocation4 + $0xdc0] ss:$80 sps:$4 sm:$0xff]   ;;  %s13282_s22 = smul.u32 40, %s16969_s19 }
 0x31e   : > { %9848 = vmatprep.subr.bf16.mxu1 %v14326_v35  ;;  %v14330_v40 = vld [vmem:[#allocation4 + $0x324] ss:$80 sps:$4 sm:$0xff]   ;;  %v14334_v32 = vld [vmem:[#allocation4 + $0x320] ss:$80 sps:$4 sm:$0xff]   ;;  %s16980_s21 = scalar_lea.vmem [#allocation2], %s13281_s20 }
 0x31f   : > { %v14332_v59 = vld [vmem:[#allocation4 + $0xd24] ss:$80 sps:$4 sm:$0xff]   ;;  %v14335_v30 = vld [vmem:[#allocation4 + $0xd20] ss:$80 sps:$4 sm:$0xff]   ;;  %s17045_s23 = scalar_lea.vmem [#allocation3], %s13282_s22 }
 0x320   : > { %9808 = vmatpush1.bf16.msra.mxu0 %v14328_v17  ;;  %v14336_v51 = vld [vmem:[#allocation4 + $0x284] ss:$80 sps:$4 sm:$0xff]   ;;  %v14340_v52 = vld [vmem:[#allocation4 + $0x280] ss:$80 sps:$4 sm:$0xff]  }
 0x321   : > { %9849 = vmatpush1.bf16.msra.mxu1 %v14329_v4  ;;  %9809 = vmatprep.subr.bf16.mxu0 %v14330_v40  ;;  %v14338_v14 = vld [vmem:[#allocation4 + $0xc84] ss:$80 sps:$4 sm:$0xff]   ;;  %v14341_v26 = vld [vmem:[#allocation4 + $0xc80] ss:$80 sps:$4 sm:$0xff]  }
 0x322   : > { %9850 = vmatprep.subr.bf16.mxu1 %v14332_v59  ;;  %v14342_v44 = vld [vmem:[#allocation4 + $0x1e4] ss:$80 sps:$4 sm:$0xff]   ;;  %v14346_v38 = vld [vmem:[#allocation4 + $0x1e0] ss:$80 sps:$4 sm:$0xff]  }
 0x323   : > { %v14344_v3 = vld [vmem:[#allocation4 + $0xbe4] ss:$80 sps:$4 sm:$0xff]   ;;  %v14347_v33 = vld [vmem:[#allocation4 + $0xbe0] ss:$80 sps:$4 sm:$0xff]  }
 0x324   : > { %9810 = vmatpush1.bf16.msra.mxu0 %v14334_v32  ;;  %v14348_v61 = vld [vmem:[#allocation4 + $0x144] ss:$80 sps:$4 sm:$0xff]   ;;  %v14352_v11 = vld [vmem:[#allocation4 + $0x140] ss:$80 sps:$4 sm:$0xff]  }
 0x325   : > { %9851 = vmatpush1.bf16.msra.mxu1 %v14335_v30  ;;  %9811 = vmatprep.subr.bf16.mxu0 %v14336_v51  ;;  %v14350_v41 = vld [vmem:[#allocation4 + $0xb44] ss:$80 sps:$4 sm:$0xff]   ;;  %v14353_v62 = vld [vmem:[#allocation4 + $0xb40] ss:$80 sps:$4 sm:$0xff]   ;;  %v14419_v30 = vld [vmem:[#allocation4 + $0x46c] ss:$80 sps:$4 sm:$0xff]  }
 0x326   : > { %9852 = vmatprep.subr.bf16.mxu1 %v14338_v14  ;;  %v14354_v24 = vld [vmem:[#allocation4 + $0xa4] ss:$80 sps:$4 sm:$0xff]   ;;  %v14358_v39 = vld [vmem:[#allocation4 + $0xa0] ss:$80 sps:$4 sm:$0xff]   ;;  %v14417_v14 = vld [vmem:[#allocation4 + $0x468] ss:$80 sps:$4 sm:$0xff]  }
 0x327   : > { %v14356_v9 = vld [vmem:[#allocation4 + $0xaa4] ss:$80 sps:$4 sm:$0xff]   ;;  %v14359_v50 = vld [vmem:[#allocation4 + $0xaa0] ss:$80 sps:$4 sm:$0xff]  }
 0x328   : > { %9812 = vmatpush1.bf16.msra.mxu0 %v14340_v52  ;;  %v14360_v10 = vld [vmem:[#allocation4 + $0x4] ss:$80 sps:$4 sm:$0xff]   ;;  %v14364_v7 = vld [vmem:[#allocation4] ss:$80 sps:$4 sm:$0xff]  }
 0x329   : > { %9853 = vmatpush1.bf16.msra.mxu1 %v14341_v26  ;;  %9813 = vmatprep.subr.bf16.mxu0 %v14342_v44  ;;  %v14362_v18 = vld [vmem:[#allocation4 + $0xa04] ss:$80 sps:$4 sm:$0xff]   ;;  %v14365_v23 = vld [vmem:[#allocation4 + $0xa00] ss:$80 sps:$4 sm:$0xff]   ;;  %v14425_v26 = vld [vmem:[#allocation4 + $0x3cc] ss:$80 sps:$4 sm:$0xff]  }
 0x32a   : > { %9854 = vmatprep.subr.bf16.mxu1 %v14344_v3  ;;  %v14366_v15 = vld [vmem:[#allocation4 + $0x964] ss:$80 sps:$4 sm:$0xff]   ;;  %v14370_v55 = vld [vmem:[#allocation4 + $0x960] ss:$80 sps:$4 sm:$0xff]   ;;  %v14423_v3 = vld [vmem:[#allocation4 + $0x3c8] ss:$80 sps:$4 sm:$0xff]  }
 0x32b   : > { %v14368_v2 = vld [vmem:[#allocation4 + $0x1364] ss:$80 sps:$4 sm:$0xff]   ;;  %v14371_v37 = vld [vmem:[#allocation4 + $0x1360] ss:$80 sps:$4 sm:$0xff]  }
 0x32c   : > { %9814 = vmatpush1.bf16.msra.mxu0 %v14346_v38  ;;  %v14372_v20 = vld [vmem:[#allocation4 + $0x8c4] ss:$80 sps:$4 sm:$0xff]   ;;  %v14376_v31 = vld [vmem:[#allocation4 + $0x8c0] ss:$80 sps:$4 sm:$0xff]  }
 0x32d   : > { %9855 = vmatpush1.bf16.msra.mxu1 %v14347_v33  ;;  %9815 = vmatprep.subr.bf16.mxu0 %v14348_v61  ;;  %v14374_v49 = vld [vmem:[#allocation4 + $0x12c4] ss:$80 sps:$4 sm:$0xff]   ;;  %v14377_v13 = vld [vmem:[#allocation4 + $0x12c0] ss:$80 sps:$4 sm:$0xff]   ;;  %v14431_v33 = vld [vmem:[#allocation4 + $0x32c] ss:$80 sps:$4 sm:$0xff]  }
 0x32e   : > { %9856 = vmatprep.subr.bf16.mxu1 %v14350_v41  ;;  %v14378_v22 = vld [vmem:[#allocation4 + $0x824] ss:$80 sps:$4 sm:$0xff]   ;;  %v14382_v19 = vld [vmem:[#allocation4 + $0x820] ss:$80 sps:$4 sm:$0xff]   ;;  %v15862_v61 = vmov 0  }
 0x32f   : > { %v14380_v54 = vld [vmem:[#allocation4 + $0x1224] ss:$80 sps:$4 sm:$0xff]   ;;  %v14383_v63 = vld [vmem:[#allocation4 + $0x1220] ss:$80 sps:$4 sm:$0xff]  }
 0x330   : > { %9816 = vmatpush1.bf16.msra.mxu0 %v14352_v11  ;;  %v14384_v0 = vld [vmem:[#allocation4 + $0x784] ss:$80 sps:$4 sm:$0xff]   ;;  %v14388_v58 = vld [vmem:[#allocation4 + $0x780] ss:$80 sps:$4 sm:$0xff]   ;;  %v14429_v11 = vld [vmem:[#allocation4 + $0x328] ss:$80 sps:$4 sm:$0xff]  }
 0x331   : > { %9857 = vmatpush1.bf16.msra.mxu1 %v14353_v62  ;;  %9817 = vmatprep.subr.bf16.mxu0 %v14354_v24  ;;  %v14386_v29 = vld [vmem:[#allocation4 + $0x1184] ss:$80 sps:$4 sm:$0xff]   ;;  %v14389_v8 = vld [vmem:[#allocation4 + $0x1180] ss:$80 sps:$4 sm:$0xff]   ;;  %v14437_v24 = vld [vmem:[#allocation4 + $0x28c] ss:$80 sps:$4 sm:$0xff]  }
 0x332   : > { %9858 = vmatprep.subr.bf16.mxu1 %v14356_v9  ;;  %v14390_v16 = vld [vmem:[#allocation4 + $0x6e4] ss:$80 sps:$4 sm:$0xff]   ;;  %v14394_v45 = vld [vmem:[#allocation4 + $0x6e0] ss:$80 sps:$4 sm:$0xff]  }
 0x333   : > { %v14392_v12 = vld [vmem:[#allocation4 + $0x10e4] ss:$80 sps:$4 sm:$0xff]   ;;  %v14395_v25 = vld [vmem:[#allocation4 + $0x10e0] ss:$80 sps:$4 sm:$0xff]  }
 0x334   : > { %9818 = vmatpush1.bf16.msra.mxu0 %v14358_v39  ;;  %v14396_v36 = vld [vmem:[#allocation4 + $0x644] ss:$80 sps:$4 sm:$0xff]   ;;  %v14400_v21 = vld [vmem:[#allocation4 + $0x640] ss:$80 sps:$4 sm:$0xff]   ;;  %v14435_v39 = vld [vmem:[#allocation4 + $0x288] ss:$80 sps:$4 sm:$0xff]  }
 0x335   : > { %9859 = vmatpush1.bf16.msra.mxu1 %v14359_v50  ;;  %9819 = vmatprep.subr.bf16.mxu0 %v14360_v10  ;;  %v14398_v27 = vld [vmem:[#allocation4 + $0x1044] ss:$80 sps:$4 sm:$0xff]   ;;  %v14401_v48 = vld [vmem:[#allocation4 + $0x1040] ss:$80 sps:$4 sm:$0xff]   ;;  %v14443_v10 = vld [vmem:[#allocation4 + $0x1ec] ss:$80 sps:$4 sm:$0xff]  }
 0x336   : > { %9860 = vmatprep.subr.bf16.mxu1 %v14362_v18  ;;  %v14402_v60 = vld [vmem:[#allocation4 + $0x5a4] ss:$80 sps:$4 sm:$0xff]   ;;  %v14406_v6 = vld [vmem:[#allocation4 + $0x5a0] ss:$80 sps:$4 sm:$0xff]  }
 0x337   : > { %v14404_v47 = vld [vmem:[#allocation4 + $0xfa4] ss:$80 sps:$4 sm:$0xff]   ;;  %v14407_v35 = vld [vmem:[#allocation4 + $0xfa0] ss:$80 sps:$4 sm:$0xff]  }
 0x338   : > { %9820 = vmatpush1.bf16.msra.mxu0 %v14364_v7  ;;  %v14408_v17 = vld [vmem:[#allocation4 + $0x504] ss:$80 sps:$4 sm:$0xff]   ;;  %v14412_v40 = vld [vmem:[#allocation4 + $0x500] ss:$80 sps:$4 sm:$0xff]   ;;  %v14441_v7 = vld [vmem:[#allocation4 + $0x1e8] ss:$80 sps:$4 sm:$0xff]  }
 0x339   : > { %9861 = vmatpush1.bf16.msra.mxu1 %v14365_v23  ;;  %9821 = vmatprep.subr.bf16.mxu0 %v14366_v15  ;;  %v14410_v4 = vld [vmem:[#allocation4 + $0xf04] ss:$80 sps:$4 sm:$0xff]   ;;  %v14413_v59 = vld [vmem:[#allocation4 + $0xf00] ss:$80 sps:$4 sm:$0xff]   ;;  %v14449_v15 = vld [vmem:[#allocation4 + $0x14c] ss:$80 sps:$4 sm:$0xff]  }
 0x33a   : > { %9862 = vmatprep.subr.bf16.mxu1 %v14368_v2  ;;  %v14416_v32 = vld [vmem:[#allocation4 + $0x1864] ss:$80 sps:$4 sm:$0xff]   ;;  %v14414_v51 = vld [vmem:[#allocation4 + $0x1860] ss:$80 sps:$4 sm:$0xff]  }
 0x33b   : > { %v14422_v52 = vld [vmem:[#allocation4 + $0x17c4] ss:$80 sps:$4 sm:$0xff]   ;;  %v14420_v44 = vld [vmem:[#allocation4 + $0x17c0] ss:$80 sps:$4 sm:$0xff]  }
 0x33c   : > { %9822 = vmatpush2.bf16.msra.mxu0 %v14370_v55  ;;  %v14428_v38 = vld [vmem:[#allocation4 + $0x1724] ss:$80 sps:$4 sm:$0xff]   ;;  %v14426_v41 = vld [vmem:[#allocation4 + $0x1720] ss:$80 sps:$4 sm:$0xff]   ;;  %v14447_v55 = vld [vmem:[#allocation4 + $0x148] ss:$80 sps:$4 sm:$0xff]  }
 0x33d   : > { %9863 = vmatpush2.bf16.msra.mxu1 %v14371_v37  ;;  %9823 = vmatprep.subr.bf16.mxu0 %v14372_v20  ;;  %v14434_v62 = vld [vmem:[#allocation4 + $0x1684] ss:$80 sps:$4 sm:$0xff]   ;;  %v14432_v9 = vld [vmem:[#allocation4 + $0x1680] ss:$80 sps:$4 sm:$0xff]   ;;  %v14455_v20 = vld [vmem:[#allocation4 + $0xac] ss:$80 sps:$4 sm:$0xff]  }
 0x33e   : > { %9864 = vmatprep.subr.bf16.mxu1 %v14374_v49  ;;  %v14440_v50 = vld [vmem:[#allocation4 + $0x15e4] ss:$80 sps:$4 sm:$0xff]   ;;  %v14438_v18 = vld [vmem:[#allocation4 + $0x15e0] ss:$80 sps:$4 sm:$0xff]  }
 0x33f   : > { %v14446_v23 = vld [vmem:[#allocation4 + $0x1544] ss:$80 sps:$4 sm:$0xff]   ;;  %v14444_v2 = vld [vmem:[#allocation4 + $0x1540] ss:$80 sps:$4 sm:$0xff]  }
 0x340   : > { %9824 = vmatpush2.bf16.msra.mxu0 %v14376_v31  ;;  %v14452_v37 = vld [vmem:[#allocation4 + $0x14a4] ss:$80 sps:$4 sm:$0xff]   ;;  %v14450_v49 = vld [vmem:[#allocation4 + $0x14a0] ss:$80 sps:$4 sm:$0xff]   ;;  %v14453_v31 = vld [vmem:[#allocation4 + $0xa8] ss:$80 sps:$4 sm:$0xff]  }
 0x341   : > { %9865 = vmatpush2.bf16.msra.mxu1 %v14377_v13  ;;  %9825 = vmatprep.subr.bf16.mxu0 %v14378_v22  ;;  %v14458_v13 = vld [vmem:[#allocation4 + $0x1404] ss:$80 sps:$4 sm:$0xff]   ;;  %v14461_v22 = vld [vmem:[#allocation4 + $0xc] ss:$80 sps:$4 sm:$0xff]  }
 0x342   : > { %9866 = vmatprep.subr.bf16.mxu1 %v14380_v54  ;;  %v14456_v54 = vld [vmem:[#allocation4 + $0x1400] ss:$80 sps:$4 sm:$0xff]  }
 0x344   : > { %9826 = vmatpush2.bf16.msra.mxu0 %v14382_v19  ;;  %v14459_v19 = vld [vmem:[#allocation4 + $0x8] ss:$80 sps:$4 sm:$0xff]  }
 0x345   : > { %9867 = vmatpush2.bf16.msra.mxu1 %v14383_v63  ;;  %9827 = vmatprep.subr.bf16.mxu0 %v14384_v0  ;;  %v14464_v63 = vld [vmem:[#allocation4 + $0x96c] ss:$80 sps:$4 sm:$0xff]  }
 0x346   : > { %9868 = vmatprep.subr.bf16.mxu1 %v14386_v29  ;;  %v14467_v0 = vld [vmem:[#allocation4 + $0xe6c] ss:$80 sps:$4 sm:$0xff]   ;;  %v14462_v29 = vld [vmem:[#allocation4 + $0x968] ss:$80 sps:$4 sm:$0xff]  }
 0x348   : > { %9828 = vmatpush2.bf16.msra.mxu0 %v14388_v58  ;;  %v14465_v58 = vld [vmem:[#allocation4 + $0xe68] ss:$80 sps:$4 sm:$0xff]  }
 0x349   : > { %9869 = vmatpush2.bf16.msra.mxu1 %v14389_v8  ;;  %9829 = vmatprep.subr.bf16.mxu0 %v14390_v16  ;;  %v14470_v8 = vld [vmem:[#allocation4 + $0x8cc] ss:$80 sps:$4 sm:$0xff]  }
 0x34a   : > { %9870 = vmatprep.subr.bf16.mxu1 %v14392_v12  ;;  %v14473_v16 = vld [vmem:[#allocation4 + $0xdcc] ss:$80 sps:$4 sm:$0xff]   ;;  %v14468_v12 = vld [vmem:[#allocation4 + $0x8c8] ss:$80 sps:$4 sm:$0xff]  }
 0x34c   : > { %9830 = vmatpush2.bf16.msra.mxu0 %v14394_v45  ;;  %v14471_v45 = vld [vmem:[#allocation4 + $0xdc8] ss:$80 sps:$4 sm:$0xff]  }
 0x34d   : > { %9871 = vmatpush2.bf16.msra.mxu1 %v14395_v25  ;;  %9831 = vmatprep.subr.bf16.mxu0 %v14396_v36  ;;  %v14476_v25 = vld [vmem:[#allocation4 + $0x82c] ss:$80 sps:$4 sm:$0xff]  }
 0x34e   : > { %9872 = vmatprep.subr.bf16.mxu1 %v14398_v27  ;;  %v14479_v36 = vld [vmem:[#allocation4 + $0xd2c] ss:$80 sps:$4 sm:$0xff]   ;;  %v14474_v27 = vld [vmem:[#allocation4 + $0x828] ss:$80 sps:$4 sm:$0xff]  }
 0x350   : > { %9832 = vmatpush2.bf16.msra.mxu0 %v14400_v21  ;;  %v14477_v21 = vld [vmem:[#allocation4 + $0xd28] ss:$80 sps:$4 sm:$0xff]  }
 0x351   : > { %9873 = vmatpush2.bf16.msra.mxu1 %v14401_v48  ;;  %9833 = vmatprep.subr.bf16.mxu0 %v14402_v60  ;;  %v14482_v48 = vld [vmem:[#allocation4 + $0x78c] ss:$80 sps:$4 sm:$0xff]  }
 0x352   : > { %9874 = vmatprep.subr.bf16.mxu1 %v14404_v47  ;;  %v14485_v60 = vld [vmem:[#allocation4 + $0xc8c] ss:$80 sps:$4 sm:$0xff]   ;;  %v14480_v47 = vld [vmem:[#allocation4 + $0x788] ss:$80 sps:$4 sm:$0xff]  }
 0x354   : > { %9834 = vmatpush2.bf16.msra.mxu0 %v14406_v6  ;;  %v14483_v6 = vld [vmem:[#allocation4 + $0xc88] ss:$80 sps:$4 sm:$0xff]  }
 0x355   : > { %9875 = vmatpush2.bf16.msra.mxu1 %v14407_v35  ;;  %9835 = vmatprep.subr.bf16.mxu0 %v14408_v17  ;;  %v14488_v35 = vld [vmem:[#allocation4 + $0x6ec] ss:$80 sps:$4 sm:$0xff]  }
 0x356   : > { %9876 = vmatprep.subr.bf16.mxu1 %v14410_v4  ;;  %v14491_v17 = vld [vmem:[#allocation4 + $0xbec] ss:$80 sps:$4 sm:$0xff]   ;;  %v14486_v4 = vld [vmem:[#allocation4 + $0x6e8] ss:$80 sps:$4 sm:$0xff]  }
 0x358   : > { %9836 = vmatpush2.bf16.msra.mxu0 %v14412_v40  ;;  %v14489_v40 = vld [vmem:[#allocation4 + $0xbe8] ss:$80 sps:$4 sm:$0xff]  }
 0x359   : > { %9877 = vmatpush2.bf16.msra.mxu1 %v14413_v59  ;;  %9887 = vmatprep.subr.bf16.mxu0 %v14416_v32  ;;  %v14494_v59 = vld [vmem:[#allocation4 + $0x64c] ss:$80 sps:$4 sm:$0xff]  }
 0x35a   : > { %9928 = vmatprep.subr.bf16.mxu1 %v14419_v30  ;;  %v14497_v32 = vld [vmem:[#allocation4 + $0xb4c] ss:$80 sps:$4 sm:$0xff]   ;;  %v14492_v30 = vld [vmem:[#allocation4 + $0x648] ss:$80 sps:$4 sm:$0xff]  }
 0x35b   : > { %9838 = vmatmul.mubr.bf16.vlgmr.msra.gmra.mxu0 %v15848_v57 }
 0x35c   : > { %9879 = vmatmul.mubr.bf16.vlgmr.msra.gmra.mxu1 %v15840_v46  ;;  %9888 = vmatpush1.bf16.msra.mxu0 %v14414_v51  ;;  %v14495_v51 = vld [vmem:[#allocation4 + $0xb48] ss:$80 sps:$4 sm:$0xff]  }
 0x35d   : > { %9929 = vmatpush1.bf16.msra.mxu1 %v14417_v14  ;;  %9889 = vmatprep.subr.bf16.mxu0 %v14422_v52  ;;  %v14500_v14 = vld [vmem:[#allocation4 + $0x5ac] ss:$80 sps:$4 sm:$0xff]  }
 0x35e   : > { %9930 = vmatprep.subr.bf16.mxu1 %v14425_v26  ;;  %9919 = vmatprep.mubr.bf16.mxu0 %v15862_v61  ;;  %v14503_v52 = vld [vmem:[#allocation4 + $0xaac] ss:$80 sps:$4 sm:$0xff]   ;;  %v14498_v26 = vld [vmem:[#allocation4 + $0x5a8] ss:$80 sps:$4 sm:$0xff]  }
 0x35f   : > { %9960 = vmatprep.mubr.bf16.mxu1 %v15844_v1 }
 0x360   : > { %9890 = vmatpush1.bf16.msra.mxu0 %v14420_v44  ;;  %v14501_v44 = vld [vmem:[#allocation4 + $0xaa8] ss:$80 sps:$4 sm:$0xff]  }
 0x361   : > { %9931 = vmatpush1.bf16.msra.mxu1 %v14423_v3  ;;  %9891 = vmatprep.subr.bf16.mxu0 %v14428_v38  ;;  %v14506_v3 = vld [vmem:[#allocation4 + $0x50c] ss:$80 sps:$4 sm:$0xff]  }
 0x362   : > { %9932 = vmatprep.subr.bf16.mxu1 %v14431_v33  ;;  %v14509_v38 = vld [vmem:[#allocation4 + $0xa0c] ss:$80 sps:$4 sm:$0xff]   ;;  %v14504_v33 = vld [vmem:[#allocation4 + $0x508] ss:$80 sps:$4 sm:$0xff]  }
 0x364   : > { %9892 = vmatpush1.bf16.msra.mxu0 %v14426_v41  ;;  %v14507_v41 = vld [vmem:[#allocation4 + $0xa08] ss:$80 sps:$4 sm:$0xff]  }
 0x365   : > { %9933 = vmatpush1.bf16.msra.mxu1 %v14429_v11  ;;  %9893 = vmatprep.subr.bf16.mxu0 %v14434_v62  ;;  %v14512_v11 = vld [vmem:[#allocation4 + $0x136c] ss:$80 sps:$4 sm:$0xff]  }
 0x366   : > { %9934 = vmatprep.subr.bf16.mxu1 %v14437_v24  ;;  %v14515_v62 = vld [vmem:[#allocation4 + $0x186c] ss:$80 sps:$4 sm:$0xff]   ;;  %v14510_v24 = vld [vmem:[#allocation4 + $0x1368] ss:$80 sps:$4 sm:$0xff]  }
 0x368   : > { %9894 = vmatpush1.bf16.msra.mxu0 %v14432_v9  ;;  %v14513_v9 = vld [vmem:[#allocation4 + $0x1868] ss:$80 sps:$4 sm:$0xff]  }
 0x369   : > { %9935 = vmatpush1.bf16.msra.mxu1 %v14435_v39  ;;  %9895 = vmatprep.subr.bf16.mxu0 %v14440_v50  ;;  %v14518_v39 = vld [vmem:[#allocation4 + $0x12cc] ss:$80 sps:$4 sm:$0xff]  }
 0x36a   : > { %9936 = vmatprep.subr.bf16.mxu1 %v14443_v10  ;;  %v14521_v50 = vld [vmem:[#allocation4 + $0x17cc] ss:$80 sps:$4 sm:$0xff]   ;;  %v14516_v10 = vld [vmem:[#allocation4 + $0x12c8] ss:$80 sps:$4 sm:$0xff]  }
 0x36c   : > { %9896 = vmatpush1.bf16.msra.mxu0 %v14438_v18  ;;  %v14519_v18 = vld [vmem:[#allocation4 + $0x17c8] ss:$80 sps:$4 sm:$0xff]  }
 0x36d   : > { %9937 = vmatpush1.bf16.msra.mxu1 %v14441_v7  ;;  %9897 = vmatprep.subr.bf16.mxu0 %v14446_v23  ;;  %v14524_v7 = vld [vmem:[#allocation4 + $0x122c] ss:$80 sps:$4 sm:$0xff]  }
 0x36e   : > { %9938 = vmatprep.subr.bf16.mxu1 %v14449_v15  ;;  %v14527_v23 = vld [vmem:[#allocation4 + $0x172c] ss:$80 sps:$4 sm:$0xff]   ;;  %v14522_v15 = vld [vmem:[#allocation4 + $0x1228] ss:$80 sps:$4 sm:$0xff]  }
 0x370   : > { %9898 = vmatpush1.bf16.msra.mxu0 %v14444_v2  ;;  %v14525_v2 = vld [vmem:[#allocation4 + $0x1728] ss:$80 sps:$4 sm:$0xff]  }
 0x371   : > { %9939 = vmatpush1.bf16.msra.mxu1 %v14447_v55  ;;  %9899 = vmatprep.subr.bf16.mxu0 %v14452_v37  ;;  %v14530_v55 = vld [vmem:[#allocation4 + $0x118c] ss:$80 sps:$4 sm:$0xff]  }
 0x372   : > { %9940 = vmatprep.subr.bf16.mxu1 %v14455_v20  ;;  %v14533_v37 = vld [vmem:[#allocation4 + $0x168c] ss:$80 sps:$4 sm:$0xff]   ;;  %v14528_v20 = vld [vmem:[#allocation4 + $0x1188] ss:$80 sps:$4 sm:$0xff]  }
 0x374   : > { %9900 = vmatpush1.bf16.msra.mxu0 %v14450_v49  ;;  %v14531_v49 = vld [vmem:[#allocation4 + $0x1688] ss:$80 sps:$4 sm:$0xff]  }
 0x375   : > { %9941 = vmatpush1.bf16.msra.mxu1 %v14453_v31  ;;  %9901 = vmatprep.subr.bf16.mxu0 %v14458_v13  ;;  %v14536_v31 = vld [vmem:[#allocation4 + $0x10ec] ss:$80 sps:$4 sm:$0xff]  }
 0x376   : > { %9942 = vmatprep.subr.bf16.mxu1 %v14461_v22  ;;  %v14539_v13 = vld [vmem:[#allocation4 + $0x15ec] ss:$80 sps:$4 sm:$0xff]   ;;  %v14534_v22 = vld [vmem:[#allocation4 + $0x10e8] ss:$80 sps:$4 sm:$0xff]  }
 0x378   : > { %9902 = vmatpush1.bf16.msra.mxu0 %v14456_v54  ;;  %v14537_v54 = vld [vmem:[#allocation4 + $0x15e8] ss:$80 sps:$4 sm:$0xff]  }
 0x379   : > { %9943 = vmatpush1.bf16.msra.mxu1 %v14459_v19  ;;  %9969 = vmatprep.subr.bf16.mxu0 %v14467_v0  ;;  %v14542_v19 = vld [vmem:[#allocation4 + $0x104c] ss:$80 sps:$4 sm:$0xff]   ;;  %v14540_v0 = vld [vmem:[#allocation4 + $0x1048] ss:$80 sps:$4 sm:$0xff]  }
 0x37a   : > { %9944 = vmatprep.subr.bf16.mxu1 %v14464_v63  ;;  %v14545_v63 = vld [vmem:[#allocation4 + $0x154c] ss:$80 sps:$4 sm:$0xff]  }
 0x37b   : > { %9920 = vmatmul.mubr.bf16.vlgmr.msra.gmra.mxu0 %v15832_v42 }
 0x37c   : > { %9970 = vmatpush1.bf16.msra.mxu0 %v14465_v58  ;;  %10001 = vmatprep.mubr.bf16.mxu0 %v15836_v34  ;;  %v14548_v58 = vld [vmem:[#allocation4 + $0xfac] ss:$80 sps:$4 sm:$0xff]  }
 0x37d   : > { %9945 = vmatpush2.bf16.msra.mxu1 %v14462_v29  ;;  %9971 = vmatprep.subr.bf16.mxu0 %v14473_v16  ;;  %v14543_v29 = vld [vmem:[#allocation4 + $0x1548] ss:$80 sps:$4 sm:$0xff]  }
 0x37e   : > { %9946 = vmatprep.subr.bf16.mxu1 %v14470_v8  ;;  %v14551_v8 = vld [vmem:[#allocation4 + $0x14ac] ss:$80 sps:$4 sm:$0xff]   ;;  %v14546_v16 = vld [vmem:[#allocation4 + $0xfa8] ss:$80 sps:$4 sm:$0xff]  }
 0x380   : > { %9972 = vmatpush1.bf16.msra.mxu0 %v14471_v45  ;;  %v14554_v45 = vld [vmem:[#allocation4 + $0xf0c] ss:$80 sps:$4 sm:$0xff]  }
 0x381   : > { %9947 = vmatpush2.bf16.msra.mxu1 %v14468_v12  ;;  %9973 = vmatprep.subr.bf16.mxu0 %v14479_v36  ;;  %v14549_v12 = vld [vmem:[#allocation4 + $0x14a8] ss:$80 sps:$4 sm:$0xff]  }
 0x382   : > { %9948 = vmatprep.subr.bf16.mxu1 %v14476_v25  ;;  %v14557_v25 = vld [vmem:[#allocation4 + $0x140c] ss:$80 sps:$4 sm:$0xff]   ;;  %v14552_v36 = vld [vmem:[#allocation4 + $0xf08] ss:$80 sps:$4 sm:$0xff]  }
 0x384   : > { %9974 = vmatpush1.bf16.msra.mxu0 %v14477_v21  ;;  %v14560_v21 = vld [vmem:[#allocation4 + $0x474] ss:$80 sps:$4 sm:$0xff]  }
 0x385   : > { %9949 = vmatpush2.bf16.msra.mxu1 %v14474_v27  ;;  %9975 = vmatprep.subr.bf16.mxu0 %v14485_v60  ;;  %v14555_v27 = vld [vmem:[#allocation4 + $0x1408] ss:$80 sps:$4 sm:$0xff]   ;;  %v14558_v60 = vld [vmem:[#allocation4 + $0x470] ss:$80 sps:$4 sm:$0xff]  }
 0x386   : > { %9950 = vmatprep.subr.bf16.mxu1 %v14482_v48  ;;  %v14563_v48 = vld [vmem:[#allocation4 + $0xe74] ss:$80 sps:$4 sm:$0xff]  }
 0x388   : > { %9976 = vmatpush1.bf16.msra.mxu0 %v14483_v6  ;;  %v14566_v6 = vld [vmem:[#allocation4 + $0x3d4] ss:$80 sps:$4 sm:$0xff]  }
 0x389   : > { %9951 = vmatpush2.bf16.msra.mxu1 %v14480_v47  ;;  %9977 = vmatprep.subr.bf16.mxu0 %v14491_v17  ;;  %v14561_v47 = vld [vmem:[#allocation4 + $0xe70] ss:$80 sps:$4 sm:$0xff]  }
 0x38a   : > { %9952 = vmatprep.subr.bf16.mxu1 %v14488_v35  ;;  %v14569_v35 = vld [vmem:[#allocation4 + $0xdd4] ss:$80 sps:$4 sm:$0xff]   ;;  %v14564_v17 = vld [vmem:[#allocation4 + $0x3d0] ss:$80 sps:$4 sm:$0xff]  }
 0x38c   : > { %9978 = vmatpush1.bf16.msra.mxu0 %v14489_v40  ;;  %v14572_v40 = vld [vmem:[#allocation4 + $0x334] ss:$80 sps:$4 sm:$0xff]  }
 0x38d   : > { %9953 = vmatpush2.bf16.msra.mxu1 %v14486_v4  ;;  %9979 = vmatprep.subr.bf16.mxu0 %v14497_v32  ;;  %v14567_v4 = vld [vmem:[#allocation4 + $0xdd0] ss:$80 sps:$4 sm:$0xff]  }
 0x38e   : > { %9954 = vmatprep.subr.bf16.mxu1 %v14494_v59  ;;  %v14575_v59 = vld [vmem:[#allocation4 + $0xd34] ss:$80 sps:$4 sm:$0xff]   ;;  %v14570_v32 = vld [vmem:[#allocation4 + $0x330] ss:$80 sps:$4 sm:$0xff]  }
 0x390   : > { %9980 = vmatpush1.bf16.msra.mxu0 %v14495_v51  ;;  %v14578_v51 = vld [vmem:[#allocation4 + $0x294] ss:$80 sps:$4 sm:$0xff]  }
 0x391   : > { %9955 = vmatpush2.bf16.msra.mxu1 %v14492_v30  ;;  %9981 = vmatprep.subr.bf16.mxu0 %v14503_v52  ;;  %v14573_v30 = vld [vmem:[#allocation4 + $0xd30] ss:$80 sps:$4 sm:$0xff]  }
 0x392   : > { %9956 = vmatprep.subr.bf16.mxu1 %v14500_v14  ;;  %v14581_v14 = vld [vmem:[#allocation4 + $0xc94] ss:$80 sps:$4 sm:$0xff]   ;;  %v14576_v52 = vld [vmem:[#allocation4 + $0x290] ss:$80 sps:$4 sm:$0xff]  }
 0x394   : > { %9982 = vmatpush1.bf16.msra.mxu0 %v14501_v44  ;;  %v14584_v44 = vld [vmem:[#allocation4 + $0x1f4] ss:$80 sps:$4 sm:$0xff]  }
 0x395   : > { %9957 = vmatpush2.bf16.msra.mxu1 %v14498_v26  ;;  %9983 = vmatprep.subr.bf16.mxu0 %v14509_v38  ;;  %v14579_v26 = vld [vmem:[#allocation4 + $0xc90] ss:$80 sps:$4 sm:$0xff]  }
 0x396   : > { %9958 = vmatprep.subr.bf16.mxu1 %v14506_v3  ;;  %v14587_v3 = vld [vmem:[#allocation4 + $0xbf4] ss:$80 sps:$4 sm:$0xff]   ;;  %v14582_v38 = vld [vmem:[#allocation4 + $0x1f0] ss:$80 sps:$4 sm:$0xff]  }
 0x398   : > { %9984 = vmatpush1.bf16.msra.mxu0 %v14507_v41  ;;  %v14590_v41 = vld [vmem:[#allocation4 + $0x154] ss:$80 sps:$4 sm:$0xff]  }
 0x399   : > { %9959 = vmatpush2.bf16.msra.mxu1 %v14504_v33  ;;  %9985 = vmatprep.subr.bf16.mxu0 %v14512_v11  ;;  %v14585_v33 = vld [vmem:[#allocation4 + $0xbf0] ss:$80 sps:$4 sm:$0xff]   ;;  %v14593_v11 = vld [vmem:[#allocation4 + $0xb54] ss:$80 sps:$4 sm:$0xff]  }
 0x39a   : > { %10010 = vmatprep.subr.bf16.mxu1 %v14515_v62  ;;  %v14588_v62 = vld [vmem:[#allocation4 + $0x150] ss:$80 sps:$4 sm:$0xff]  }
 0x39c   : > { %9961 = vmatmul.mubr.bf16.vlgmr.msra.gmra.mxu1 %v15848_v57  ;;  %9986 = vmatpush2.bf16.msra.mxu0 %v14510_v24  ;;  %v14591_v24 = vld [vmem:[#allocation4 + $0xb50] ss:$80 sps:$4 sm:$0xff]  }
 0x39d   : > { %10011 = vmatpush1.bf16.msra.mxu1 %v14513_v9  ;;  %9987 = vmatprep.subr.bf16.mxu0 %v14518_v39  ;;  %v14596_v9 = vld [vmem:[#allocation4 + $0xb4] ss:$80 sps:$4 sm:$0xff]  }
 0x39e   : > { %10012 = vmatprep.subr.bf16.mxu1 %v14521_v50  ;;  %10042 = vmatprep.mubr.bf16.mxu1 %v15862_v61  ;;  %v14599_v39 = vld [vmem:[#allocation4 + $0xab4] ss:$80 sps:$4 sm:$0xff]   ;;  %v14594_v50 = vld [vmem:[#allocation4 + $0xb0] ss:$80 sps:$4 sm:$0xff]  }
 0x3a0   : > { %9988 = vmatpush2.bf16.msra.mxu0 %v14516_v10  ;;  %v14597_v10 = vld [vmem:[#allocation4 + $0xab0] ss:$80 sps:$4 sm:$0xff]  }
 0x3a1   : > { %10013 = vmatpush1.bf16.msra.mxu1 %v14519_v18  ;;  %9989 = vmatprep.subr.bf16.mxu0 %v14524_v7  ;;  %v14602_v18 = vld [vmem:[#allocation4 + $0x14] ss:$80 sps:$4 sm:$0xff]  }
 0x3a2   : > { %10014 = vmatprep.subr.bf16.mxu1 %v14527_v23  ;;  %v14605_v7 = vld [vmem:[#allocation4 + $0xa14] ss:$80 sps:$4 sm:$0xff]   ;;  %v14600_v23 = vld [vmem:[#allocation4 + $0x10] ss:$80 sps:$4 sm:$0xff]  }
 0x3a4   : > { %9990 = vmatpush2.bf16.msra.mxu0 %v14522_v15  ;;  %v14603_v15 = vld [vmem:[#allocation4 + $0xa10] ss:$80 sps:$4 sm:$0xff]  }
 0x3a5   : > { %10015 = vmatpush1.bf16.msra.mxu1 %v14525_v2  ;;  %9991 = vmatprep.subr.bf16.mxu0 %v14530_v55  ;;  %v14608_v2 = vld [vmem:[#allocation4 + $0x974] ss:$80 sps:$4 sm:$0xff]  }
 0x3a6   : > { %10016 = vmatprep.subr.bf16.mxu1 %v14533_v37  ;;  %v14611_v55 = vld [vmem:[#allocation4 + $0x1374] ss:$80 sps:$4 sm:$0xff]   ;;  %v14606_v37 = vld [vmem:[#allocation4 + $0x970] ss:$80 sps:$4 sm:$0xff]  }
 0x3a8   : > { %9992 = vmatpush2.bf16.msra.mxu0 %v14528_v20  ;;  %v14609_v20 = vld [vmem:[#allocation4 + $0x1370] ss:$80 sps:$4 sm:$0xff]  }
 0x3a9   : > { %10017 = vmatpush1.bf16.msra.mxu1 %v14531_v49  ;;  %9993 = vmatprep.subr.bf16.mxu0 %v14536_v31  ;;  %v14614_v49 = vld [vmem:[#allocation4 + $0x8d4] ss:$80 sps:$4 sm:$0xff]  }
 0x3aa   : > { %10018 = vmatprep.subr.bf16.mxu1 %v14539_v13  ;;  %v14617_v31 = vld [vmem:[#allocation4 + $0x12d4] ss:$80 sps:$4 sm:$0xff]   ;;  %v14612_v13 = vld [vmem:[#allocation4 + $0x8d0] ss:$80 sps:$4 sm:$0xff]  }
 0x3ac   : > { %9994 = vmatpush2.bf16.msra.mxu0 %v14534_v22  ;;  %v14615_v22 = vld [vmem:[#allocation4 + $0x12d0] ss:$80 sps:$4 sm:$0xff]  }
 0x3ad   : > { %10019 = vmatpush1.bf16.msra.mxu1 %v14537_v54  ;;  %9995 = vmatprep.subr.bf16.mxu0 %v14542_v19  ;;  %v14620_v54 = vld [vmem:[#allocation4 + $0x834] ss:$80 sps:$4 sm:$0xff]  }
 0x3ae   : > { %10020 = vmatprep.subr.bf16.mxu1 %v14545_v63  ;;  %v14623_v19 = vld [vmem:[#allocation4 + $0x1234] ss:$80 sps:$4 sm:$0xff]   ;;  %v14618_v63 = vld [vmem:[#allocation4 + $0x830] ss:$80 sps:$4 sm:$0xff]  }
 0x3b0   : > { %9996 = vmatpush2.bf16.msra.mxu0 %v14540_v0  ;;  %v14621_v0 = vld [vmem:[#allocation4 + $0x1230] ss:$80 sps:$4 sm:$0xff]  }
 0x3b1   : > { %10021 = vmatpush1.bf16.msra.mxu1 %v14543_v29  ;;  %9997 = vmatprep.subr.bf16.mxu0 %v14548_v58  ;;  %v14626_v29 = vld [vmem:[#allocation4 + $0x794] ss:$80 sps:$4 sm:$0xff]  }
 0x3b2   : > { %10022 = vmatprep.subr.bf16.mxu1 %v14551_v8  ;;  %v14629_v58 = vld [vmem:[#allocation4 + $0x1194] ss:$80 sps:$4 sm:$0xff]   ;;  %v14624_v8 = vld [vmem:[#allocation4 + $0x790] ss:$80 sps:$4 sm:$0xff]  }
 0x3b4   : > { %9998 = vmatpush2.bf16.msra.mxu0 %v14546_v16  ;;  %v14627_v16 = vld [vmem:[#allocation4 + $0x1190] ss:$80 sps:$4 sm:$0xff]  }
 0x3b5   : > { %10023 = vmatpush1.bf16.msra.mxu1 %v14549_v12  ;;  %9999 = vmatprep.subr.bf16.mxu0 %v14554_v45  ;;  %v14632_v12 = vld [vmem:[#allocation4 + $0x6f4] ss:$80 sps:$4 sm:$0xff]  }
 0x3b6   : > { %10024 = vmatprep.subr.bf16.mxu1 %v14557_v25  ;;  %v14635_v45 = vld [vmem:[#allocation4 + $0x10f4] ss:$80 sps:$4 sm:$0xff]   ;;  %v14630_v25 = vld [vmem:[#allocation4 + $0x6f0] ss:$80 sps:$4 sm:$0xff]  }
 0x3b8   : > { %10000 = vmatpush2.bf16.msra.mxu0 %v14552_v36  ;;  %v14633_v36 = vld [vmem:[#allocation4 + $0x10f0] ss:$80 sps:$4 sm:$0xff]  }
 0x3b9   : > { %10025 = vmatpush1.bf16.msra.mxu1 %v14555_v27  ;;  %10051 = vmatprep.subr.bf16.mxu0 %v14560_v21  ;;  %v14638_v27 = vld [vmem:[#allocation4 + $0x654] ss:$80 sps:$4 sm:$0xff]  }
 0x3ba   : > { %10092 = vmatprep.subr.bf16.mxu1 %v14563_v48  ;;  %v14641_v21 = vld [vmem:[#allocation4 + $0x1054] ss:$80 sps:$4 sm:$0xff]   ;;  %v14636_v48 = vld [vmem:[#allocation4 + $0x650] ss:$80 sps:$4 sm:$0xff]  }
 0x3bb   : > { %10002 = vmatmul.mubr.bf16.vlgmr.msra.gmra.mxu0 %v15840_v46 }
 0x3bc   : > { %10043 = vmatmul.mubr.bf16.vlgmr.msra.gmra.mxu1 %v15832_v42  ;;  %10052 = vmatpush1.bf16.msra.mxu0 %v14558_v60  ;;  %v14639_v60 = vld [vmem:[#allocation4 + $0x1050] ss:$80 sps:$4 sm:$0xff]  }
 0x3bd   : > { %10093 = vmatpush1.bf16.msra.mxu1 %v14561_v47  ;;  %10053 = vmatprep.subr.bf16.mxu0 %v14566_v6  ;;  %v14644_v47 = vld [vmem:[#allocation4 + $0x5b4] ss:$80 sps:$4 sm:$0xff]  }
 0x3be   : > { %10094 = vmatprep.subr.bf16.mxu1 %v14569_v35  ;;  %10083 = vmatprep.mubr.bf16.mxu0 %v15844_v1  ;;  %v14647_v6 = vld [vmem:[#allocation4 + $0xfb4] ss:$80 sps:$4 sm:$0xff]   ;;  %v14642_v35 = vld [vmem:[#allocation4 + $0x5b0] ss:$80 sps:$4 sm:$0xff]  }
 0x3bf   : > { %10124 = vmatprep.mubr.bf16.mxu1 %v15836_v34 }
 0x3c0   : > { %10054 = vmatpush1.bf16.msra.mxu0 %v14564_v17  ;;  %v14645_v17 = vld [vmem:[#allocation4 + $0xfb0] ss:$80 sps:$4 sm:$0xff]  }
 0x3c1   : > { %10095 = vmatpush1.bf16.msra.mxu1 %v14567_v4  ;;  %10055 = vmatprep.subr.bf16.mxu0 %v14572_v40  ;;  %v14650_v4 = vld [vmem:[#allocation4 + $0x514] ss:$80 sps:$4 sm:$0xff]  }
 0x3c2   : > { %10096 = vmatprep.subr.bf16.mxu1 %v14575_v59  ;;  %v14653_v40 = vld [vmem:[#allocation4 + $0xf14] ss:$80 sps:$4 sm:$0xff]   ;;  %v14648_v59 = vld [vmem:[#allocation4 + $0x510] ss:$80 sps:$4 sm:$0xff]  }
 0x3c4   : > { %10056 = vmatpush1.bf16.msra.mxu0 %v14570_v32  ;;  %v14651_v32 = vld [vmem:[#allocation4 + $0xf10] ss:$80 sps:$4 sm:$0xff]  }
 0x3c5   : > { %10097 = vmatpush1.bf16.msra.mxu1 %v14573_v30  ;;  %10057 = vmatprep.subr.bf16.mxu0 %v14578_v51  ;;  %v14656_v30 = vld [vmem:[#allocation4 + $0x1874] ss:$80 sps:$4 sm:$0xff]   ;;  %v14659_v51 = vld [vmem:[#allocation4 + $0x47c] ss:$80 sps:$4 sm:$0xff]  }
 0x3c6   : > { %10098 = vmatprep.subr.bf16.mxu1 %v14581_v14  ;;  %v14654_v14 = vld [vmem:[#allocation4 + $0x1870] ss:$80 sps:$4 sm:$0xff]  }
 0x3c8   : > { %10058 = vmatpush1.bf16.msra.mxu0 %v14576_v52  ;;  %v14657_v52 = vld [vmem:[#allocation4 + $0x478] ss:$80 sps:$4 sm:$0xff]  }
 0x3c9   : > { %10099 = vmatpush1.bf16.msra.mxu1 %v14579_v26  ;;  %10059 = vmatprep.subr.bf16.mxu0 %v14584_v44  ;;  %v14662_v26 = vld [vmem:[#allocation4 + $0x17d4] ss:$80 sps:$4 sm:$0xff]   ;;  %v14665_v44 = vld [vmem:[#allocation4 + $0x3dc] ss:$80 sps:$4 sm:$0xff]  }
 0x3ca   : > { %10100 = vmatprep.subr.bf16.mxu1 %v14587_v3  ;;  %v14660_v3 = vld [vmem:[#allocation4 + $0x17d0] ss:$80 sps:$4 sm:$0xff]  }
 0x3cc   : > { %10060 = vmatpush1.bf16.msra.mxu0 %v14582_v38  ;;  %v14663_v38 = vld [vmem:[#allocation4 + $0x3d8] ss:$80 sps:$4 sm:$0xff]  }
 0x3cd   : > { %10101 = vmatpush1.bf16.msra.mxu1 %v14585_v33  ;;  %10061 = vmatprep.subr.bf16.mxu0 %v14590_v41  ;;  %v14668_v33 = vld [vmem:[#allocation4 + $0x1734] ss:$80 sps:$4 sm:$0xff]   ;;  %v14671_v41 = vld [vmem:[#allocation4 + $0x33c] ss:$80 sps:$4 sm:$0xff]  }
 0x3ce   : > { %10102 = vmatprep.subr.bf16.mxu1 %v14593_v11  ;;  %v14666_v11 = vld [vmem:[#allocation4 + $0x1730] ss:$80 sps:$4 sm:$0xff]  }
 0x3d0   : > { %10062 = vmatpush1.bf16.msra.mxu0 %v14588_v62  ;;  %v14669_v62 = vld [vmem:[#allocation4 + $0x338] ss:$80 sps:$4 sm:$0xff]  }
 0x3d1   : > { %10103 = vmatpush1.bf16.msra.mxu1 %v14591_v24  ;;  %10063 = vmatprep.subr.bf16.mxu0 %v14596_v9  ;;  %v14674_v24 = vld [vmem:[#allocation4 + $0x1694] ss:$80 sps:$4 sm:$0xff]   ;;  %v14677_v9 = vld [vmem:[#allocation4 + $0x29c] ss:$80 sps:$4 sm:$0xff]  }
 0x3d2   : > { %10104 = vmatprep.subr.bf16.mxu1 %v14599_v39  ;;  %v14672_v39 = vld [vmem:[#allocation4 + $0x1690] ss:$80 sps:$4 sm:$0xff]  }
 0x3d4   : > { %10064 = vmatpush1.bf16.msra.mxu0 %v14594_v50  ;;  %v14675_v50 = vld [vmem:[#allocation4 + $0x298] ss:$80 sps:$4 sm:$0xff]  }
 0x3d5   : > { %10105 = vmatpush1.bf16.msra.mxu1 %v14597_v10  ;;  %10065 = vmatprep.subr.bf16.mxu0 %v14602_v18  ;;  %v14680_v10 = vld [vmem:[#allocation4 + $0x15f4] ss:$80 sps:$4 sm:$0xff]   ;;  %v14683_v18 = vld [vmem:[#allocation4 + $0x1fc] ss:$80 sps:$4 sm:$0xff]  }
 0x3d6   : > { %10106 = vmatprep.subr.bf16.mxu1 %v14605_v7  ;;  %v14678_v7 = vld [vmem:[#allocation4 + $0x15f0] ss:$80 sps:$4 sm:$0xff]  }
 0x3d8   : > { %10066 = vmatpush1.bf16.msra.mxu0 %v14600_v23  ;;  %v14681_v23 = vld [vmem:[#allocation4 + $0x1f8] ss:$80 sps:$4 sm:$0xff]  }
 0x3d9   : > { %10107 = vmatpush1.bf16.msra.mxu1 %v14603_v15  ;;  %10067 = vmatprep.subr.bf16.mxu0 %v14608_v2  ;;  %v14686_v15 = vld [vmem:[#allocation4 + $0x1554] ss:$80 sps:$4 sm:$0xff]   ;;  %v14689_v2 = vld [vmem:[#allocation4 + $0x15c] ss:$80 sps:$4 sm:$0xff]  }
 0x3da   : > { %10108 = vmatprep.subr.bf16.mxu1 %v14611_v55  ;;  %v14684_v55 = vld [vmem:[#allocation4 + $0x1550] ss:$80 sps:$4 sm:$0xff]  }
 0x3dc   : > { %10068 = vmatpush2.bf16.msra.mxu0 %v14606_v37  ;;  %v14687_v37 = vld [vmem:[#allocation4 + $0x158] ss:$80 sps:$4 sm:$0xff]  }
 0x3dd   : > { %10109 = vmatpush2.bf16.msra.mxu1 %v14609_v20  ;;  %10069 = vmatprep.subr.bf16.mxu0 %v14614_v49  ;;  %v14692_v20 = vld [vmem:[#allocation4 + $0x14b4] ss:$80 sps:$4 sm:$0xff]   ;;  %v14695_v49 = vld [vmem:[#allocation4 + $0xbc] ss:$80 sps:$4 sm:$0xff]  }
 0x3de   : > { %10110 = vmatprep.subr.bf16.mxu1 %v14617_v31  ;;  %v14690_v31 = vld [vmem:[#allocation4 + $0x14b0] ss:$80 sps:$4 sm:$0xff]  }
 0x3e0   : > { %10070 = vmatpush2.bf16.msra.mxu0 %v14612_v13  ;;  %v14693_v13 = vld [vmem:[#allocation4 + $0xb8] ss:$80 sps:$4 sm:$0xff]  }
 0x3e1   : > { %10111 = vmatpush2.bf16.msra.mxu1 %v14615_v22  ;;  %10071 = vmatprep.subr.bf16.mxu0 %v14620_v54  ;;  %v14698_v22 = vld [vmem:[#allocation4 + $0x1414] ss:$80 sps:$4 sm:$0xff]   ;;  %v14701_v54 = vld [vmem:[#allocation4 + $0x1c] ss:$80 sps:$4 sm:$0xff]  }
 0x3e2   : > { %10112 = vmatprep.subr.bf16.mxu1 %v14623_v19  ;;  %v14696_v19 = vld [vmem:[#allocation4 + $0x1410] ss:$80 sps:$4 sm:$0xff]  }
 0x3e4   : > { %10072 = vmatpush2.bf16.msra.mxu0 %v14618_v63  ;;  %v14699_v63 = vld [vmem:[#allocation4 + $0x18] ss:$80 sps:$4 sm:$0xff]  }
 0x3e5   : > { %10113 = vmatpush2.bf16.msra.mxu1 %v14621_v0  ;;  %10073 = vmatprep.subr.bf16.mxu0 %v14626_v29  ;;  %v14704_v0 = vld [vmem:[#allocation4 + $0x97c] ss:$80 sps:$4 sm:$0xff]  }
 0x3e6   : > { %10114 = vmatprep.subr.bf16.mxu1 %v14629_v58  ;;  %v14707_v29 = vld [vmem:[#allocation4 + $0xe7c] ss:$80 sps:$4 sm:$0xff]   ;;  %v14702_v58 = vld [vmem:[#allocation4 + $0x978] ss:$80 sps:$4 sm:$0xff]  }
 0x3e8   : > { %10074 = vmatpush2.bf16.msra.mxu0 %v14624_v8  ;;  %v14705_v8 = vld [vmem:[#allocation4 + $0xe78] ss:$80 sps:$4 sm:$0xff]  }
 0x3e9   : > { %10115 = vmatpush2.bf16.msra.mxu1 %v14627_v16  ;;  %10075 = vmatprep.subr.bf16.mxu0 %v14632_v12  ;;  %v14710_v16 = vld [vmem:[#allocation4 + $0x8dc] ss:$80 sps:$4 sm:$0xff]  }
 0x3ea   : > { %10116 = vmatprep.subr.bf16.mxu1 %v14635_v45  ;;  %v14713_v12 = vld [vmem:[#allocation4 + $0xddc] ss:$80 sps:$4 sm:$0xff]  }
 0x3ec   : > { %10076 = vmatpush2.bf16.msra.mxu0 %v14630_v25 }
 0x3ed   : > { %10117 = vmatpush2.bf16.msra.mxu1 %v14633_v36  ;;  %10077 = vmatprep.subr.bf16.mxu0 %v14638_v27  ;;  %v14708_v36 = vld [vmem:[#allocation4 + $0x8d8] ss:$80 sps:$4 sm:$0xff]  }
 0x3ee   : > { %10118 = vmatprep.subr.bf16.mxu1 %v14641_v21  ;;  %v14711_v27 = vld [vmem:[#allocation4 + $0xdd8] ss:$80 sps:$4 sm:$0xff]  }
 0x3f0   : > { %10078 = vmatpush2.bf16.msra.mxu0 %v14636_v48  ;;  %v14716_v48 = vld [vmem:[#allocation4 + $0x83c] ss:$80 sps:$4 sm:$0xff]  }
 0x3f1   : > { %10119 = vmatpush2.bf16.msra.mxu1 %v14639_v60  ;;  %10079 = vmatprep.subr.bf16.mxu0 %v14644_v47 }
 0x3f2   : > { %10120 = vmatprep.subr.bf16.mxu1 %v14647_v6  ;;  %v14719_v6 = vld [vmem:[#allocation4 + $0xd3c] ss:$80 sps:$4 sm:$0xff]  }
 0x3f4   : > { %10080 = vmatpush2.bf16.msra.mxu0 %v14642_v35 }
 0x3f5   : > { %10121 = vmatpush2.bf16.msra.mxu1 %v14645_v17  ;;  %10081 = vmatprep.subr.bf16.mxu0 %v14650_v4 }
 0x3f6   : > { %10122 = vmatprep.subr.bf16.mxu1 %v14653_v40  ;;  %v14714_v40 = vld [vmem:[#allocation4 + $0x838] ss:$80 sps:$4 sm:$0xff]  }
 0x3f8   : > { %10082 = vmatpush2.bf16.msra.mxu0 %v14648_v59  ;;  %v14717_v59 = vld [vmem:[#allocation4 + $0xd38] ss:$80 sps:$4 sm:$0xff]  }
 0x3f9   : > { %10123 = vmatpush2.bf16.msra.mxu1 %v14651_v32  ;;  %10133 = vmatprep.subr.bf16.mxu0 %v14656_v30 }
 0x3fa   : > { %10174 = vmatprep.subr.bf16.mxu1 %v14659_v51  ;;  %v14722_v51 = vld [vmem:[#allocation4 + $0x79c] ss:$80 sps:$4 sm:$0xff]  }
 0x3fb   : > { %10084 = vmatmul.mubr.bf16.vlgmr.msra.gmra.mxu0 %v15848_v57 }
 0x3fc   : > { %10125 = vmatmul.mubr.bf16.vlgmr.msra.gmra.mxu1 %v15840_v46  ;;  %10134 = vmatpush1.bf16.msra.mxu0 %v14654_v14  ;;  %v14725_v14 = vld [vmem:[#allocation4 + $0xc9c] ss:$80 sps:$4 sm:$0xff]  }
 0x3fd   : > { %10175 = vmatpush1.bf16.msra.mxu1 %v14657_v52  ;;  %10135 = vmatprep.subr.bf16.mxu0 %v14662_v26  ;;  %v14720_v52 = vld [vmem:[#allocation4 + $0x798] ss:$80 sps:$4 sm:$0xff]  }
 0x3fe   : > { %10176 = vmatprep.subr.bf16.mxu1 %v14665_v44  ;;  %10165 = vmatprep.mubr.bf16.mxu0 %v15862_v61  ;;  %v14723_v26 = vld [vmem:[#allocation4 + $0xc98] ss:$80 sps:$4 sm:$0xff]   ;;  %v14728_v44 = vld [vmem:[#allocation4 + $0x6fc] ss:$80 sps:$4 sm:$0xff]  }
 0x3ff   : > { %10206 = vmatprep.mubr.bf16.mxu1 %v15844_v1 }
 0x400   : > { %10136 = vmatpush1.bf16.msra.mxu0 %v14660_v3  ;;  %v14731_v3 = vld [vmem:[#allocation4 + $0xbfc] ss:$80 sps:$4 sm:$0xff]  }
 0x401   : > { %10177 = vmatpush1.bf16.msra.mxu1 %v14663_v38  ;;  %10137 = vmatprep.subr.bf16.mxu0 %v14668_v33  ;;  %v14726_v38 = vld [vmem:[#allocation4 + $0x6f8] ss:$80 sps:$4 sm:$0xff]  }
 0x402   : > { %10178 = vmatprep.subr.bf16.mxu1 %v14671_v41  ;;  %v14729_v33 = vld [vmem:[#allocation4 + $0xbf8] ss:$80 sps:$4 sm:$0xff]   ;;  %v14734_v41 = vld [vmem:[#allocation4 + $0x65c] ss:$80 sps:$4 sm:$0xff]  }
 0x404   : > { %10138 = vmatpush1.bf16.msra.mxu0 %v14666_v11  ;;  %v14737_v11 = vld [vmem:[#allocation4 + $0xb5c] ss:$80 sps:$4 sm:$0xff]  }
 0x405   : > { %10179 = vmatpush1.bf16.msra.mxu1 %v14669_v62  ;;  %10139 = vmatprep.subr.bf16.mxu0 %v14674_v24  ;;  %v14732_v62 = vld [vmem:[#allocation4 + $0x658] ss:$80 sps:$4 sm:$0xff]  }
 0x406   : > { %10180 = vmatprep.subr.bf16.mxu1 %v14677_v9  ;;  %v14735_v24 = vld [vmem:[#allocation4 + $0xb58] ss:$80 sps:$4 sm:$0xff]   ;;  %v14740_v9 = vld [vmem:[#allocation4 + $0x5bc] ss:$80 sps:$4 sm:$0xff]  }
 0x408   : > { %10140 = vmatpush1.bf16.msra.mxu0 %v14672_v39  ;;  %v14743_v39 = vld [vmem:[#allocation4 + $0xabc] ss:$80 sps:$4 sm:$0xff]  }
 0x409   : > { %10181 = vmatpush1.bf16.msra.mxu1 %v14675_v50  ;;  %10141 = vmatprep.subr.bf16.mxu0 %v14680_v10  ;;  %v14738_v50 = vld [vmem:[#allocation4 + $0x5b8] ss:$80 sps:$4 sm:$0xff]  }
 0x40a   : > { %10182 = vmatprep.subr.bf16.mxu1 %v14683_v18  ;;  %v14741_v10 = vld [vmem:[#allocation4 + $0xab8] ss:$80 sps:$4 sm:$0xff]   ;;  %v14746_v18 = vld [vmem:[#allocation4 + $0x51c] ss:$80 sps:$4 sm:$0xff]  }
 0x40c   : > { %10142 = vmatpush1.bf16.msra.mxu0 %v14678_v7  ;;  %v14749_v7 = vld [vmem:[#allocation4 + $0xa1c] ss:$80 sps:$4 sm:$0xff]  }
 0x40d   : > { %10183 = vmatpush1.bf16.msra.mxu1 %v14681_v23  ;;  %10143 = vmatprep.subr.bf16.mxu0 %v14686_v15  ;;  %v14744_v23 = vld [vmem:[#allocation4 + $0x518] ss:$80 sps:$4 sm:$0xff]  }
 0x40e   : > { %10184 = vmatprep.subr.bf16.mxu1 %v14689_v2  ;;  %v14747_v15 = vld [vmem:[#allocation4 + $0xa18] ss:$80 sps:$4 sm:$0xff]   ;;  %v14752_v2 = vld [vmem:[#allocation4 + $0x137c] ss:$80 sps:$4 sm:$0xff]  }
 0x410   : > { %10144 = vmatpush1.bf16.msra.mxu0 %v14684_v55  ;;  %v14755_v55 = vld [vmem:[#allocation4 + $0x187c] ss:$80 sps:$4 sm:$0xff]  }
 0x411   : > { %10185 = vmatpush1.bf16.msra.mxu1 %v14687_v37  ;;  %10145 = vmatprep.subr.bf16.mxu0 %v14692_v20  ;;  %v14750_v37 = vld [vmem:[#allocation4 + $0x1378] ss:$80 sps:$4 sm:$0xff]  }
 0x412   : > { %10186 = vmatprep.subr.bf16.mxu1 %v14695_v49  ;;  %v14753_v20 = vld [vmem:[#allocation4 + $0x1878] ss:$80 sps:$4 sm:$0xff]   ;;  %v14758_v49 = vld [vmem:[#allocation4 + $0x12dc] ss:$80 sps:$4 sm:$0xff]  }
 0x414   : > { %10146 = vmatpush1.bf16.msra.mxu0 %v14690_v31  ;;  %v14761_v31 = vld [vmem:[#allocation4 + $0x17dc] ss:$80 sps:$4 sm:$0xff]  }
 0x415   : > { %10187 = vmatpush1.bf16.msra.mxu1 %v14693_v13  ;;  %10147 = vmatprep.subr.bf16.mxu0 %v14698_v22  ;;  %v14756_v13 = vld [vmem:[#allocation4 + $0x12d8] ss:$80 sps:$4 sm:$0xff]  }
 0x416   : > { %10188 = vmatprep.subr.bf16.mxu1 %v14701_v54  ;;  %v14759_v22 = vld [vmem:[#allocation4 + $0x17d8] ss:$80 sps:$4 sm:$0xff]  }
 0x418   : > { %10148 = vmatpush1.bf16.msra.mxu0 %v14696_v19 }
 0x419   : > { %10189 = vmatpush1.bf16.msra.mxu1 %v14699_v63  ;;  %10215 = vmatprep.subr.bf16.mxu0 %v14707_v29  ;;  %v14767_v29 = vld [vmem:[#allocation4 + $0x173c] ss:$80 sps:$4 sm:$0xff]  }
 0x41a   : > { %10190 = vmatprep.subr.bf16.mxu1 %v14704_v0  ;;  %v14764_v0 = vld [vmem:[#allocation4 + $0x123c] ss:$80 sps:$4 sm:$0xff]  }
 0x41b   : > { %v9839_v45 = vpop.f32.mrf.mxu0  ;;  %10166 = vmatmul.mubr.bf16.vlgmr.msra.gmra.mxu0 %v15832_v42 }
 0x41c   : > { %v9880_v25 = vpop.f32.mrf.mxu1  ;;  %10216 = vmatpush1.bf16.msra.mxu0 %v14705_v8  ;;  %10247 = vmatprep.mubr.bf16.mxu0 %v15836_v34  ;;  %v14762_v8 = vld [vmem:[#allocation4 + $0x1238] ss:$80 sps:$4 sm:$0xff]  }
 0x41d   : > { %v16891_v21 = vadd.f32 %v9880_v25, %v9839_v45  ;;  %10191 = vmatpush2.bf16.msra.mxu1 %v14702_v58  ;;  %v9841_v60 = vpop.f32.mrf.mxu0  ;;  %10217 = vmatprep.subr.bf16.mxu0 %v14713_v12  ;;  %v14770_v25 = vld [vmem:[#allocation4 + $0x119c] ss:$80 sps:$4 sm:$0xff]  }
 0x41e   : > { %v9882_v47 = vpop.f32.mrf.mxu1  ;;  %10192 = vmatprep.subr.bf16.mxu1 %v14710_v16  ;;  %v14765_v16 = vld [vmem:[#allocation4 + $0x1738] ss:$80 sps:$4 sm:$0xff]  }
 0x41f   : > { %v16893_v35 = vadd.f32 %v9882_v47, %v9841_v60  ;;  %v9843_v17 = vpop.f32.mrf.mxu0  ;;  %v14779_v60 = vld [vmem:[#allocation4 + $0x15fc] ss:$80 sps:$4 sm:$0xff]   ;;  %v14774_v47 = vld [vmem:[#allocation4 + $0x10f8] ss:$80 sps:$4 sm:$0xff]  }
 0x420   : > { %v9884_v4 = vpop.f32.mrf.mxu1  ;;  %10218 = vmatpush1.bf16.msra.mxu0 %v14711_v27  ;;  %v14768_v27 = vld [vmem:[#allocation4 + $0x1198] ss:$80 sps:$4 sm:$0xff]   ;;  %v14785_v17 = vld [vmem:[#allocation4 + $0x155c] ss:$80 sps:$4 sm:$0xff]  }
 0x421   : > { %10193 = vmatpush2.bf16.msra.mxu1 %v14708_v36  ;;  %v9844_v32 = vpop.f32.mrf.mxu0  ;;  %10219 = vmatprep.subr.bf16.mxu0 %v14719_v6  ;;  %v14773_v36 = vld [vmem:[#allocation4 + $0x169c] ss:$80 sps:$4 sm:$0xff]   ;;  %v14777_v6 = vld [vmem:[#allocation4 + $0x15f8] ss:$80 sps:$4 sm:$0xff]  }
 0x422   : > { %v9885_v30 = vpop.f32.mrf.mxu1  ;;  %10194 = vmatprep.subr.bf16.mxu1 %v14716_v48  ;;  %v14776_v48 = vld [vmem:[#allocation4 + $0x10fc] ss:$80 sps:$4 sm:$0xff]   ;;  %v14780_v4 = vld [vmem:[#allocation4 + $0x1058] ss:$80 sps:$4 sm:$0xff]  }
 0x423   : > { %v14791_v32 = vld [vmem:[#allocation4 + $0x14bc] ss:$80 sps:$4 sm:$0xff]   ;;  %v14786_v30 = vld [vmem:[#allocation4 + $0xfb8] ss:$80 sps:$4 sm:$0xff]  }
 0x424   : > { %10220 = vmatpush1.bf16.msra.mxu0 %v14717_v59  ;;  %v14788_v59 = vld [vmem:[#allocation4 + $0xfbc] ss:$80 sps:$4 sm:$0xff]  }
 0x425   : > { %10195 = vmatpush2.bf16.msra.mxu1 %v14714_v40  ;;  %10221 = vmatprep.subr.bf16.mxu0 %v14725_v14  ;;  %v14783_v40 = vld [vmem:[#allocation4 + $0x1558] ss:$80 sps:$4 sm:$0xff]   ;;  %v14794_v14 = vld [vmem:[#allocation4 + $0xf1c] ss:$80 sps:$4 sm:$0xff]  }
 0x426   : > { %10196 = vmatprep.subr.bf16.mxu1 %v14722_v51  ;;  %v14789_v51 = vld [vmem:[#allocation4 + $0x14b8] ss:$80 sps:$4 sm:$0xff]  }
 0x428   : > { %10222 = vmatpush1.bf16.msra.mxu0 %v14723_v26  ;;  %v14792_v26 = vld [vmem:[#allocation4 + $0xf18] ss:$80 sps:$4 sm:$0xff]  }
 0x429   : > { %10197 = vmatpush2.bf16.msra.mxu1 %v14720_v52  ;;  %10223 = vmatprep.subr.bf16.mxu0 %v14731_v3  ;;  %v14797_v52 = vld [vmem:[#allocation4 + $0x141c] ss:$80 sps:$4 sm:$0xff]   ;;  %v14800_v3 = vld [vmem:[#allocation4 + $0x484] ss:$80 sps:$4 sm:$0xff]  }
 0x42a   : > { %10198 = vmatprep.subr.bf16.mxu1 %v14728_v44  ;;  %v14795_v44 = vld [vmem:[#allocation4 + $0x1418] ss:$80 sps:$4 sm:$0xff]  }
 0x42c   : > { %10224 = vmatpush1.bf16.msra.mxu0 %v14729_v33  ;;  %v14798_v33 = vld [vmem:[#allocation4 + $0x480] ss:$80 sps:$4 sm:$0xff]  }
 0x42d   : > { %10199 = vmatpush2.bf16.msra.mxu1 %v14726_v38  ;;  %10225 = vmatprep.subr.bf16.mxu0 %v14737_v11  ;;  %v14803_v38 = vld [vmem:[#allocation4 + $0xe84] ss:$80 sps:$4 sm:$0xff]  }
 0x42e   : > { %10200 = vmatprep.subr.bf16.mxu1 %v14734_v41  ;;  %v14801_v41 = vld [vmem:[#allocation4 + $0xe80] ss:$80 sps:$4 sm:$0xff]   ;;  %v14806_v11 = vld [vmem:[#allocation4 + $0x3e4] ss:$80 sps:$4 sm:$0xff]  }
 0x430   : > { %10226 = vmatpush1.bf16.msra.mxu0 %v14735_v24  ;;  %v14804_v24 = vld [vmem:[#allocation4 + $0x3e0] ss:$80 sps:$4 sm:$0xff]  }
 0x431   : > { %10201 = vmatpush2.bf16.msra.mxu1 %v14732_v62  ;;  %10227 = vmatprep.subr.bf16.mxu0 %v14743_v39  ;;  %v14809_v62 = vld [vmem:[#allocation4 + $0xde4] ss:$80 sps:$4 sm:$0xff]  }
 0x432   : > { %10202 = vmatprep.subr.bf16.mxu1 %v14740_v9  ;;  %v14807_v9 = vld [vmem:[#allocation4 + $0xde0] ss:$80 sps:$4 sm:$0xff]  }
 0x434   : > { %10228 = vmatpush1.bf16.msra.mxu0 %v14741_v10  ;;  %v14812_v10 = vld [vmem:[#allocation4 + $0x344] ss:$80 sps:$4 sm:$0xff]  }
 0x435   : > { %10203 = vmatpush2.bf16.msra.mxu1 %v14738_v50  ;;  %10229 = vmatprep.subr.bf16.mxu0 %v14749_v7  ;;  %v14810_v7 = vld [vmem:[#allocation4 + $0x340] ss:$80 sps:$4 sm:$0xff]  }
 0x436   : > { %10204 = vmatprep.subr.bf16.mxu1 %v14746_v18  ;;  %v14815_v18 = vld [vmem:[#allocation4 + $0xd44] ss:$80 sps:$4 sm:$0xff]  }
 0x438   : > { %10230 = vmatpush1.bf16.msra.mxu0 %v14747_v15  ;;  %v14813_v15 = vld [vmem:[#allocation4 + $0xd40] ss:$80 sps:$4 sm:$0xff]  }
 0x439   : > { %10205 = vmatpush2.bf16.msra.mxu1 %v14744_v23  ;;  %10231 = vmatprep.subr.bf16.mxu0 %v14752_v2 }
 0x43a   : > { %10256 = vmatprep.subr.bf16.mxu1 %v14755_v55  ;;  %v14818_v55 = vld [vmem:[#allocation4 + $0x2a4] ss:$80 sps:$4 sm:$0xff]  }
 0x43b   : > { %v9921_v54 = vpop.f32.mrf.mxu0 }
 0x43c   : > { %10207 = vmatmul.mubr.bf16.vlgmr.msra.gmra.mxu1 %v15848_v57  ;;  %v16898_v19 = vadd.f32 %v9921_v54, %v16891_v21  ;;  %10232 = vmatpush2.bf16.msra.mxu0 %v14750_v37  ;;  %v14771_v21 = vld [vmem:[#allocation4 + $0x1698] ss:$80 sps:$4 sm:$0xff]   ;;  %v14821_v37 = vld [vmem:[#allocation4 + $0xca4] ss:$80 sps:$4 sm:$0xff]   ;;  %v14825_v54 = vld [vmem:[#allocation4 + $0xc00] ss:$80 sps:$4 sm:$0xff]  }
 0x43d   : > { %10257 = vmatpush1.bf16.msra.mxu1 %v14753_v20  ;;  %v9923_v63 = vpop.f32.mrf.mxu0  ;;  %10233 = vmatprep.subr.bf16.mxu0 %v14758_v49  ;;  %v14816_v20 = vld [vmem:[#allocation4 + $0x2a0] ss:$80 sps:$4 sm:$0xff]  }
 0x43e   : > { %10258 = vmatprep.subr.bf16.mxu1 %v14761_v31  ;;  %v16901_v58 = vadd.f32 %v9923_v63, %v16893_v35  ;;  %10288 = vmatprep.mubr.bf16.mxu1 %v15862_v61  ;;  %v14782_v35 = vld [vmem:[#allocation4 + $0x105c] ss:$80 sps:$4 sm:$0xff]   ;;  %v14819_v49 = vld [vmem:[#allocation4 + $0xca0] ss:$80 sps:$4 sm:$0xff]   ;;  %v14824_v31 = vld [vmem:[#allocation4 + $0x204] ss:$80 sps:$4 sm:$0xff]  }
 0x43f   : > { %v9925_v12 = vpop.f32.mrf.mxu0  ;;  %v14830_v63 = vld [vmem:[#allocation4 + $0x164] ss:$80 sps:$4 sm:$0xff]  }
 0x440   : > { %10234 = vmatpush2.bf16.msra.mxu0 %v14756_v13  ;;  %v14827_v13 = vld [vmem:[#allocation4 + $0xc04] ss:$80 sps:$4 sm:$0xff]  }
 0x441   : > { %10259 = vmatpush1.bf16.msra.mxu1 %v14759_v22  ;;  %v9926_v45 = vpop.f32.mrf.mxu0  ;;  %10235 = vmatprep.subr.bf16.mxu0 %v14764_v0  ;;  %v14822_v22 = vld [vmem:[#allocation4 + $0x200] ss:$80 sps:$4 sm:$0xff]   ;;  %v14833_v0 = vld [vmem:[#allocation4 + $0xb64] ss:$80 sps:$4 sm:$0xff]  }
 0x442   : > { %10260 = vmatprep.subr.bf16.mxu1 %v14767_v29  ;;  %v14828_v29 = vld [vmem:[#allocation4 + $0x160] ss:$80 sps:$4 sm:$0xff]   ;;  %v14839_v12 = vld [vmem:[#allocation4 + $0xac4] ss:$80 sps:$4 sm:$0xff]  }
 0x443   : > { %v14834_v45 = vld [vmem:[#allocation4 + $0xc0] ss:$80 sps:$4 sm:$0xff]  }
 0x444   : > { %10236 = vmatpush2.bf16.msra.mxu0 %v14762_v8  ;;  %v14831_v8 = vld [vmem:[#allocation4 + $0xb60] ss:$80 sps:$4 sm:$0xff]  }
 0x445   : > { %10261 = vmatpush1.bf16.msra.mxu1 %v14765_v16  ;;  %10237 = vmatprep.subr.bf16.mxu0 %v14770_v25  ;;  %v14836_v16 = vld [vmem:[#allocation4 + $0xc4] ss:$80 sps:$4 sm:$0xff]   ;;  %v14837_v25 = vld [vmem:[#allocation4 + $0xac0] ss:$80 sps:$4 sm:$0xff]  }
 0x446   : > { %10262 = vmatprep.subr.bf16.mxu1 %v14773_v36  ;;  %v14842_v36 = vld [vmem:[#allocation4 + $0x24] ss:$80 sps:$4 sm:$0xff]  }
 0x448   : > { %10238 = vmatpush2.bf16.msra.mxu0 %v14768_v27  ;;  %v14845_v27 = vld [vmem:[#allocation4 + $0xa24] ss:$80 sps:$4 sm:$0xff]  }
 0x449   : > { %10263 = vmatpush1.bf16.msra.mxu1 %v14771_v21  ;;  %10239 = vmatprep.subr.bf16.mxu0 %v14776_v48  ;;  %v14840_v21 = vld [vmem:[#allocation4 + $0x20] ss:$80 sps:$4 sm:$0xff]  }
 0x44a   : > { %10264 = vmatprep.subr.bf16.mxu1 %v14779_v60  ;;  %v14843_v48 = vld [vmem:[#allocation4 + $0xa20] ss:$80 sps:$4 sm:$0xff]   ;;  %v14848_v60 = vld [vmem:[#allocation4 + $0x984] ss:$80 sps:$4 sm:$0xff]  }
 0x44c   : > { %10240 = vmatpush2.bf16.msra.mxu0 %v14774_v47  ;;  %v14851_v47 = vld [vmem:[#allocation4 + $0x1384] ss:$80 sps:$4 sm:$0xff]  }
 0x44d   : > { %10265 = vmatpush1.bf16.msra.mxu1 %v14777_v6  ;;  %10241 = vmatprep.subr.bf16.mxu0 %v14782_v35  ;;  %v14846_v6 = vld [vmem:[#allocation4 + $0x980] ss:$80 sps:$4 sm:$0xff]  }
 0x44e   : > { %10266 = vmatprep.subr.bf16.mxu1 %v14785_v17  ;;  %v14849_v35 = vld [vmem:[#allocation4 + $0x1380] ss:$80 sps:$4 sm:$0xff]   ;;  %v14854_v17 = vld [vmem:[#allocation4 + $0x8e4] ss:$80 sps:$4 sm:$0xff]  }
 0x450   : > { %10242 = vmatpush2.bf16.msra.mxu0 %v14780_v4  ;;  %v14857_v4 = vld [vmem:[#allocation4 + $0x12e4] ss:$80 sps:$4 sm:$0xff]  }
 0x451   : > { %10267 = vmatpush1.bf16.msra.mxu1 %v14783_v40  ;;  %10243 = vmatprep.subr.bf16.mxu0 %v14788_v59  ;;  %v14852_v40 = vld [vmem:[#allocation4 + $0x8e0] ss:$80 sps:$4 sm:$0xff]  }
 0x452   : > { %10268 = vmatprep.subr.bf16.mxu1 %v14791_v32  ;;  %v14855_v59 = vld [vmem:[#allocation4 + $0x12e0] ss:$80 sps:$4 sm:$0xff]  }
 0x454   : > { %10244 = vmatpush2.bf16.msra.mxu0 %v14786_v30 }
 0x455   : > { %10269 = vmatpush1.bf16.msra.mxu1 %v14789_v51  ;;  %10245 = vmatprep.subr.bf16.mxu0 %v14794_v14 }
 0x456   : > { %10270 = vmatprep.subr.bf16.mxu1 %v14797_v52 }
 0x458   : > { %10246 = vmatpush2.bf16.msra.mxu0 %v14792_v26  ;;  %v14860_v26 = vld [vmem:[#allocation4 + $0x844] ss:$80 sps:$4 sm:$0xff]  }
 0x459   : > { %10271 = vmatpush1.bf16.msra.mxu1 %v14795_v44  ;;  %10297 = vmatprep.subr.bf16.mxu0 %v14800_v3  ;;  %v14863_v44 = vld [vmem:[#allocation4 + $0x1244] ss:$80 sps:$4 sm:$0xff]  }
 0x45a   : > { %10338 = vmatprep.subr.bf16.mxu1 %v14803_v38 }
 0x45b   : > { %10248 = vmatmul.mubr.bf16.vlgmr.msra.gmra.mxu0 %v15840_v46 }
 0x45c   : > { %v16904_v39 = vpop.f32.mrf.mxu1  ;;  %10289 = vmatmul.mubr.bf16.vlgmr.msra.gmra.mxu1 %v15832_v42  ;;  %10298 = vmatpush1.bf16.msra.mxu0 %v14798_v33  ;;  %v14858_v33 = vld [vmem:[#allocation4 + $0x840] ss:$80 sps:$4 sm:$0xff]  }
 0x45d   : > { %10339 = vmatpush1.bf16.msra.mxu1 %v14801_v41  ;;  %10299 = vmatprep.subr.bf16.mxu0 %v14806_v11  ;;  %v14861_v41 = vld [vmem:[#allocation4 + $0x1240] ss:$80 sps:$4 sm:$0xff]  }
 0x45e   : > { %v16908_v50 = vpop.f32.mrf.mxu1  ;;  %10340 = vmatprep.subr.bf16.mxu1 %v14809_v62  ;;  %10329 = vmatprep.mubr.bf16.mxu0 %v15844_v1 }
 0x45f   : > { %10370 = vmatprep.mubr.bf16.mxu1 %v15836_v34 }
 0x460   : > { %v9966_v23 = vpop.f32.mrf.mxu1  ;;  %10300 = vmatpush1.bf16.msra.mxu0 %v14804_v24 }
 0x461   : > { %10341 = vmatpush1.bf16.msra.mxu1 %v14807_v9  ;;  %10301 = vmatprep.subr.bf16.mxu0 %v14812_v10  ;;  %v14866_v10 = vld [vmem:[#allocation4 + $0x7a4] ss:$80 sps:$4 sm:$0xff]   ;;  %v14867_v23 = vld [vmem:[#allocation4 + $0x11a0] ss:$80 sps:$4 sm:$0xff]  }
 0x462   : > { %v9967_v2 = vpop.f32.mrf.mxu1  ;;  %10342 = vmatprep.subr.bf16.mxu1 %v14815_v18  ;;  %v14869_v18 = vld [vmem:[#allocation4 + $0x11a4] ss:$80 sps:$4 sm:$0xff]  }
 0x463   : > { %v14870_v2 = vld [vmem:[#allocation4 + $0x700] ss:$80 sps:$4 sm:$0xff]  }
 0x464   : > { %10302 = vmatpush1.bf16.msra.mxu0 %v14810_v7  ;;  %v14864_v7 = vld [vmem:[#allocation4 + $0x7a0] ss:$80 sps:$4 sm:$0xff]  }
 0x465   : > { %10343 = vmatpush1.bf16.msra.mxu1 %v14813_v15  ;;  %10303 = vmatprep.subr.bf16.mxu0 %v14818_v55  ;;  %v14875_v15 = vld [vmem:[#allocation4 + $0x1104] ss:$80 sps:$4 sm:$0xff]   ;;  %v14873_v55 = vld [vmem:[#allocation4 + $0x1100] ss:$80 sps:$4 sm:$0xff]  }
 0x466   : > { %10344 = vmatprep.subr.bf16.mxu1 %v14821_v37  ;;  %v14878_v37 = vld [vmem:[#allocation4 + $0x664] ss:$80 sps:$4 sm:$0xff]  }
 0x468   : > { %10304 = vmatpush1.bf16.msra.mxu0 %v14816_v20  ;;  %v14881_v20 = vld [vmem:[#allocation4 + $0x1064] ss:$80 sps:$4 sm:$0xff]  }
 0x469   : > { %10345 = vmatpush1.bf16.msra.mxu1 %v14819_v49  ;;  %10305 = vmatprep.subr.bf16.mxu0 %v14824_v31  ;;  %v14876_v49 = vld [vmem:[#allocation4 + $0x660] ss:$80 sps:$4 sm:$0xff]  }
 0x46a   : > { %10346 = vmatprep.subr.bf16.mxu1 %v14827_v13  ;;  %v14879_v31 = vld [vmem:[#allocation4 + $0x1060] ss:$80 sps:$4 sm:$0xff]   ;;  %v14884_v13 = vld [vmem:[#allocation4 + $0x5c4] ss:$80 sps:$4 sm:$0xff]  }
 0x46c   : > { %10306 = vmatpush1.bf16.msra.mxu0 %v14822_v22  ;;  %v14887_v22 = vld [vmem:[#allocation4 + $0xfc4] ss:$80 sps:$4 sm:$0xff]  }
 0x46d   : > { %10347 = vmatpush1.bf16.msra.mxu1 %v14825_v54  ;;  %10307 = vmatprep.subr.bf16.mxu0 %v14830_v63  ;;  %v14882_v54 = vld [vmem:[#allocation4 + $0x5c0] ss:$80 sps:$4 sm:$0xff]  }
 0x46e   : > { %10348 = vmatprep.subr.bf16.mxu1 %v14833_v0  ;;  %v14885_v63 = vld [vmem:[#allocation4 + $0xfc0] ss:$80 sps:$4 sm:$0xff]   ;;  %v14890_v0 = vld [vmem:[#allocation4 + $0x524] ss:$80 sps:$4 sm:$0xff]  }
 0x470   : > { %10308 = vmatpush1.bf16.msra.mxu0 %v14828_v29  ;;  %v14893_v29 = vld [vmem:[#allocation4 + $0xf24] ss:$80 sps:$4 sm:$0xff]  }
 0x471   : > { %10349 = vmatpush1.bf16.msra.mxu1 %v14831_v8  ;;  %10309 = vmatprep.subr.bf16.mxu0 %v14836_v16  ;;  %v14888_v8 = vld [vmem:[#allocation4 + $0x520] ss:$80 sps:$4 sm:$0xff]  }
 0x472   : > { %10350 = vmatprep.subr.bf16.mxu1 %v14839_v12  ;;  %v14891_v16 = vld [vmem:[#allocation4 + $0xf20] ss:$80 sps:$4 sm:$0xff]   ;;  %v14896_v12 = vld [vmem:[#allocation4 + $0x1884] ss:$80 sps:$4 sm:$0xff]  }
 0x474   : > { %10310 = vmatpush1.bf16.msra.mxu0 %v14834_v45  ;;  %v14899_v45 = vld [vmem:[#allocation4 + $0x48c] ss:$80 sps:$4 sm:$0xff]  }
 0x475   : > { %10351 = vmatpush1.bf16.msra.mxu1 %v14837_v25  ;;  %10311 = vmatprep.subr.bf16.mxu0 %v14842_v36  ;;  %v14894_v25 = vld [vmem:[#allocation4 + $0x1880] ss:$80 sps:$4 sm:$0xff]   ;;  %v14897_v36 = vld [vmem:[#allocation4 + $0x488] ss:$80 sps:$4 sm:$0xff]  }
 0x476   : > { %10352 = vmatprep.subr.bf16.mxu1 %v14845_v27  ;;  %v14902_v27 = vld [vmem:[#allocation4 + $0x17e4] ss:$80 sps:$4 sm:$0xff]  }
 0x478   : > { %10312 = vmatpush1.bf16.msra.mxu0 %v14840_v21  ;;  %v14905_v21 = vld [vmem:[#allocation4 + $0x3ec] ss:$80 sps:$4 sm:$0xff]  }
 0x479   : > { %10353 = vmatpush1.bf16.msra.mxu1 %v14843_v48  ;;  %10313 = vmatprep.subr.bf16.mxu0 %v14848_v60  ;;  %v14900_v48 = vld [vmem:[#allocation4 + $0x17e0] ss:$80 sps:$4 sm:$0xff]   ;;  %v14903_v60 = vld [vmem:[#allocation4 + $0x3e8] ss:$80 sps:$4 sm:$0xff]  }
 0x47a   : > { %10354 = vmatprep.subr.bf16.mxu1 %v14851_v47  ;;  %v14908_v47 = vld [vmem:[#allocation4 + $0x1744] ss:$80 sps:$4 sm:$0xff]  }
 0x47b   : > { %v10003_v32 = vpop.f32.mrf.mxu0 }
 0x47c   : > { %v10044_v30 = vpop.f32.mrf.mxu1  ;;  %v10004_v51 = vadd.f32 %v10003_v32, %v16904_v39  ;;  %10314 = vmatpush2.bf16.msra.mxu0 %v14846_v6  ;;  %v14911_v6 = vld [vmem:[#allocation4 + $0x34c] ss:$80 sps:$4 sm:$0xff]   ;;  %v14915_v32 = vld [vmem:[#allocation4 + $0x2a8] ss:$80 sps:$4 sm:$0xff]  }
 0x47d   : > { %10355 = vmatpush2.bf16.msra.mxu1 %v14849_v35  ;;  %v10005_v14 = vpop.f32.mrf.mxu0  ;;  %10315 = vmatprep.subr.bf16.mxu0 %v14854_v17  ;;  %v14906_v35 = vld [vmem:[#allocation4 + $0x1740] ss:$80 sps:$4 sm:$0xff]   ;;  %v14909_v17 = vld [vmem:[#allocation4 + $0x348] ss:$80 sps:$4 sm:$0xff]  }
 0x47e   : > { %v10046_v52 = vpop.f32.mrf.mxu1  ;;  %10356 = vmatprep.subr.bf16.mxu1 %v14857_v4  ;;  %v16913_v3 = vadd.f32 %v10044_v30, %v10004_v51  ;;  %v10006_v38 = vadd.f32 %v10005_v14, %v16908_v50  ;;  %v14872_v50 = vld [vmem:[#allocation4 + $0x704] ss:$80 sps:$4 sm:$0xff]   ;;  %v14923_v51 = vld [vmem:[#allocation4 + $0x20c] ss:$80 sps:$4 sm:$0xff]   ;;  %v14918_v14 = vld [vmem:[#allocation4 + $0x1600] ss:$80 sps:$4 sm:$0xff]  }
 0x47f   : > { %v10007_v11 = vpop.f32.mrf.mxu0  ;;  %v14914_v4 = vld [vmem:[#allocation4 + $0x16a4] ss:$80 sps:$4 sm:$0xff]  }
 0x480   : > { %v10048_v62 = vpop.f32.mrf.mxu1  ;;  %v16916_v24 = vadd.f32 %v10046_v52, %v10006_v38  ;;  %10316 = vmatpush2.bf16.msra.mxu0 %v14852_v40  ;;  %v14917_v40 = vld [vmem:[#allocation4 + $0x2ac] ss:$80 sps:$4 sm:$0xff]   ;;  %v14920_v30 = vld [vmem:[#allocation4 + $0x1604] ss:$80 sps:$4 sm:$0xff]   ;;  %v14921_v52 = vld [vmem:[#allocation4 + $0x208] ss:$80 sps:$4 sm:$0xff]  }
 0x481   : > { %10357 = vmatpush2.bf16.msra.mxu1 %v14855_v59  ;;  %v10008_v9 = vpop.f32.mrf.mxu0  ;;  %10317 = vmatprep.subr.bf16.mxu0 %v14860_v26  ;;  %v14912_v59 = vld [vmem:[#allocation4 + $0x16a0] ss:$80 sps:$4 sm:$0xff]   ;;  %v14926_v26 = vld [vmem:[#allocation4 + $0x1564] ss:$80 sps:$4 sm:$0xff]   ;;  %v14935_v11 = vld [vmem:[#allocation4 + $0xcc] ss:$80 sps:$4 sm:$0xff]  }
 0x482   : > { %v10049_v39 = vpop.f32.mrf.mxu1  ;;  %10358 = vmatprep.subr.bf16.mxu1 %v14863_v44  ;;  %v14929_v44 = vld [vmem:[#allocation4 + $0x16c] ss:$80 sps:$4 sm:$0xff]   ;;  %v14924_v38 = vld [vmem:[#allocation4 + $0x1560] ss:$80 sps:$4 sm:$0xff]   ;;  %v14933_v9 = vld [vmem:[#allocation4 + $0xc8] ss:$80 sps:$4 sm:$0xff]  }
 0x483   : > { %v14930_v62 = vld [vmem:[#allocation4 + $0x14c0] ss:$80 sps:$4 sm:$0xff]   ;;  %v14938_v39 = vld [vmem:[#allocation4 + $0x1424] ss:$80 sps:$4 sm:$0xff]  }
 0x484   : > { %10318 = vmatpush2.bf16.msra.mxu0 %v14858_v33  ;;  %v14927_v33 = vld [vmem:[#allocation4 + $0x168] ss:$80 sps:$4 sm:$0xff]  }
 0x485   : > { %10359 = vmatpush2.bf16.msra.mxu1 %v14861_v41  ;;  %10319 = vmatprep.subr.bf16.mxu0 %v14866_v10  ;;  %v14932_v41 = vld [vmem:[#allocation4 + $0x14c4] ss:$80 sps:$4 sm:$0xff]   ;;  %v14941_v10 = vld [vmem:[#allocation4 + $0x2c] ss:$80 sps:$4 sm:$0xff]  }
 0x486   : > { %10360 = vmatprep.subr.bf16.mxu1 %v14869_v18  ;;  %v14936_v18 = vld [vmem:[#allocation4 + $0x1420] ss:$80 sps:$4 sm:$0xff]  }
 0x488   : > { %10320 = vmatpush2.bf16.msra.mxu0 %v14864_v7  ;;  %v14939_v7 = vld [vmem:[#allocation4 + $0x28] ss:$80 sps:$4 sm:$0xff]  }
 0x489   : > { %10361 = vmatpush2.bf16.msra.mxu1 %v14867_v23  ;;  %10321 = vmatprep.subr.bf16.mxu0 %v14872_v50  ;;  %v14944_v23 = vld [vmem:[#allocation4 + $0x98c] ss:$80 sps:$4 sm:$0xff]  }
 0x48a   : > { %10362 = vmatprep.subr.bf16.mxu1 %v14875_v15  ;;  %v14947_v50 = vld [vmem:[#allocation4 + $0xe8c] ss:$80 sps:$4 sm:$0xff]   ;;  %v14942_v15 = vld [vmem:[#allocation4 + $0x988] ss:$80 sps:$4 sm:$0xff]  }
 0x48c   : > { %10322 = vmatpush2.bf16.msra.mxu0 %v14870_v2  ;;  %v14945_v2 = vld [vmem:[#allocation4 + $0xe88] ss:$80 sps:$4 sm:$0xff]  }
 0x48d   : > { %10363 = vmatpush2.bf16.msra.mxu1 %v14873_v55  ;;  %10323 = vmatprep.subr.bf16.mxu0 %v14878_v37  ;;  %v14950_v55 = vld [vmem:[#allocation4 + $0x8ec] ss:$80 sps:$4 sm:$0xff]  }
 0x48e   : > { %10364 = vmatprep.subr.bf16.mxu1 %v14881_v20  ;;  %v14953_v37 = vld [vmem:[#allocation4 + $0xdec] ss:$80 sps:$4 sm:$0xff]  }
 0x490   : > { %10324 = vmatpush2.bf16.msra.mxu0 %v14876_v49 }
 0x491   : > { %10365 = vmatpush2.bf16.msra.mxu1 %v14879_v31  ;;  %10325 = vmatprep.subr.bf16.mxu0 %v14884_v13  ;;  %v14948_v13 = vld [vmem:[#allocation4 + $0x8e8] ss:$80 sps:$4 sm:$0xff]  }
 0x492   : > { %10366 = vmatprep.subr.bf16.mxu1 %v14887_v22  ;;  %v14951_v22 = vld [vmem:[#allocation4 + $0xde8] ss:$80 sps:$4 sm:$0xff]  }
 0x494   : > { %10326 = vmatpush2.bf16.msra.mxu0 %v14882_v54 }
 0x495   : > { %10367 = vmatpush2.bf16.msra.mxu1 %v14885_v63  ;;  %10327 = vmatprep.subr.bf16.mxu0 %v14890_v0  ;;  %v14956_v0 = vld [vmem:[#allocation4 + $0x84c] ss:$80 sps:$4 sm:$0xff]  }
 0x496   : > { %10368 = vmatprep.subr.bf16.mxu1 %v14893_v29  ;;  %v14959_v29 = vld [vmem:[#allocation4 + $0xd4c] ss:$80 sps:$4 sm:$0xff]  }
 0x498   : > { %10328 = vmatpush2.bf16.msra.mxu0 %v14888_v8 }
 0x499   : > { %10369 = vmatpush2.bf16.msra.mxu1 %v14891_v16  ;;  %10379 = vmatprep.subr.bf16.mxu0 %v14896_v12 }
 0x49a   : > { %10420 = vmatprep.subr.bf16.mxu1 %v14899_v45  ;;  %v14954_v45 = vld [vmem:[#allocation4 + $0x848] ss:$80 sps:$4 sm:$0xff]  }
 0x49b   : > { %10330 = vmatmul.mubr.bf16.vlgmr.msra.gmra.mxu0 %v15848_v57 }
 0x49c   : > { %10371 = vmatmul.mubr.bf16.vlgmr.msra.gmra.mxu1 %v15840_v46  ;;  %10380 = vmatpush1.bf16.msra.mxu0 %v14894_v25  ;;  %v14957_v25 = vld [vmem:[#allocation4 + $0xd48] ss:$80 sps:$4 sm:$0xff]  }
 0x49d   : > { %10421 = vmatpush1.bf16.msra.mxu1 %v14897_v36  ;;  %10381 = vmatprep.subr.bf16.mxu0 %v14902_v27 }
 0x49e   : > { %10422 = vmatprep.subr.bf16.mxu1 %v14905_v21  ;;  %10411 = vmatprep.mubr.bf16.mxu0 %v15862_v61  ;;  %v14962_v21 = vld [vmem:[#allocation4 + $0x7ac] ss:$80 sps:$4 sm:$0xff]  }
 0x49f   : > { %10452 = vmatprep.mubr.bf16.mxu1 %v15844_v1 }
 0x4a0   : > { %10382 = vmatpush1.bf16.msra.mxu0 %v14900_v48  ;;  %v14965_v48 = vld [vmem:[#allocation4 + $0xcac] ss:$80 sps:$4 sm:$0xff]  }
 0x4a1   : > { %10423 = vmatpush1.bf16.msra.mxu1 %v14903_v60  ;;  %10383 = vmatprep.subr.bf16.mxu0 %v14908_v47  ;;  %v14960_v60 = vld [vmem:[#allocation4 + $0x7a8] ss:$80 sps:$4 sm:$0xff]  }
 0x4a2   : > { %10424 = vmatprep.subr.bf16.mxu1 %v14911_v6  ;;  %v14963_v47 = vld [vmem:[#allocation4 + $0xca8] ss:$80 sps:$4 sm:$0xff]   ;;  %v14968_v6 = vld [vmem:[#allocation4 + $0x70c] ss:$80 sps:$4 sm:$0xff]  }
 0x4a4   : > { %10384 = vmatpush1.bf16.msra.mxu0 %v14906_v35  ;;  %v14971_v35 = vld [vmem:[#allocation4 + $0xc0c] ss:$80 sps:$4 sm:$0xff]  }
 0x4a5   : > { %10425 = vmatpush1.bf16.msra.mxu1 %v14909_v17  ;;  %10385 = vmatprep.subr.bf16.mxu0 %v14914_v4  ;;  %v14966_v17 = vld [vmem:[#allocation4 + $0x708] ss:$80 sps:$4 sm:$0xff]  }
 0x4a6   : > { %10426 = vmatprep.subr.bf16.mxu1 %v14917_v40  ;;  %v14969_v4 = vld [vmem:[#allocation4 + $0xc08] ss:$80 sps:$4 sm:$0xff]   ;;  %v14974_v40 = vld [vmem:[#allocation4 + $0x66c] ss:$80 sps:$4 sm:$0xff]  }
 0x4a8   : > { %10386 = vmatpush1.bf16.msra.mxu0 %v14912_v59  ;;  %v14977_v59 = vld [vmem:[#allocation4 + $0xb6c] ss:$80 sps:$4 sm:$0xff]  }
 0x4a9   : > { %10427 = vmatpush1.bf16.msra.mxu1 %v14915_v32  ;;  %10387 = vmatprep.subr.bf16.mxu0 %v14920_v30  ;;  %v14972_v32 = vld [vmem:[#allocation4 + $0x668] ss:$80 sps:$4 sm:$0xff]  }
 0x4aa   : > { %10428 = vmatprep.subr.bf16.mxu1 %v14923_v51  ;;  %v14975_v30 = vld [vmem:[#allocation4 + $0xb68] ss:$80 sps:$4 sm:$0xff]   ;;  %v14980_v51 = vld [vmem:[#allocation4 + $0x5cc] ss:$80 sps:$4 sm:$0xff]  }
 0x4ac   : > { %10388 = vmatpush1.bf16.msra.mxu0 %v14918_v14  ;;  %v14983_v14 = vld [vmem:[#allocation4 + $0xacc] ss:$80 sps:$4 sm:$0xff]  }
 0x4ad   : > { %10429 = vmatpush1.bf16.msra.mxu1 %v14921_v52  ;;  %10389 = vmatprep.subr.bf16.mxu0 %v14926_v26  ;;  %v14978_v52 = vld [vmem:[#allocation4 + $0x5c8] ss:$80 sps:$4 sm:$0xff]  }
 0x4ae   : > { %10430 = vmatprep.subr.bf16.mxu1 %v14929_v44  ;;  %v14981_v26 = vld [vmem:[#allocation4 + $0xac8] ss:$80 sps:$4 sm:$0xff]   ;;  %v14986_v44 = vld [vmem:[#allocation4 + $0x52c] ss:$80 sps:$4 sm:$0xff]  }
 0x4b0   : > { %10390 = vmatpush1.bf16.msra.mxu0 %v14924_v38  ;;  %v14989_v38 = vld [vmem:[#allocation4 + $0xa2c] ss:$80 sps:$4 sm:$0xff]  }
 0x4b1   : > { %10431 = vmatpush1.bf16.msra.mxu1 %v14927_v33  ;;  %10391 = vmatprep.subr.bf16.mxu0 %v14932_v41  ;;  %v14984_v33 = vld [vmem:[#allocation4 + $0x528] ss:$80 sps:$4 sm:$0xff]  }
 0x4b2   : > { %10432 = vmatprep.subr.bf16.mxu1 %v14935_v11  ;;  %v14987_v41 = vld [vmem:[#allocation4 + $0xa28] ss:$80 sps:$4 sm:$0xff]   ;;  %v14992_v11 = vld [vmem:[#allocation4 + $0x138c] ss:$80 sps:$4 sm:$0xff]  }
 0x4b4   : > { %10392 = vmatpush1.bf16.msra.mxu0 %v14930_v62  ;;  %v14995_v62 = vld [vmem:[#allocation4 + $0x188c] ss:$80 sps:$4 sm:$0xff]  }
 0x4b5   : > { %10433 = vmatpush1.bf16.msra.mxu1 %v14933_v9  ;;  %10393 = vmatprep.subr.bf16.mxu0 %v14938_v39  ;;  %v14990_v9 = vld [vmem:[#allocation4 + $0x1388] ss:$80 sps:$4 sm:$0xff]  }
 0x4b6   : > { %10434 = vmatprep.subr.bf16.mxu1 %v14941_v10  ;;  %v14993_v39 = vld [vmem:[#allocation4 + $0x1888] ss:$80 sps:$4 sm:$0xff]   ;;  %v14998_v10 = vld [vmem:[#allocation4 + $0x12ec] ss:$80 sps:$4 sm:$0xff]  }
 0x4b8   : > { %10394 = vmatpush1.bf16.msra.mxu0 %v14936_v18  ;;  %v15001_v18 = vld [vmem:[#allocation4 + $0x17ec] ss:$80 sps:$4 sm:$0xff]  }
 0x4b9   : > { %10435 = vmatpush1.bf16.msra.mxu1 %v14939_v7  ;;  %10461 = vmatprep.subr.bf16.mxu0 %v14947_v50  ;;  %v14996_v7 = vld [vmem:[#allocation4 + $0x12e8] ss:$80 sps:$4 sm:$0xff]  }
 0x4ba   : > { %10436 = vmatprep.subr.bf16.mxu1 %v14944_v23  ;;  %v14999_v23 = vld [vmem:[#allocation4 + $0x17e8] ss:$80 sps:$4 sm:$0xff]  }
 0x4bb   : > { %v10085_v20 = vpop.f32.mrf.mxu0  ;;  %10412 = vmatmul.mubr.bf16.vlgmr.msra.gmra.mxu0 %v15832_v42 }
 0x4bc   : > { %v10126_v49 = vpop.f32.mrf.mxu1  ;;  %10462 = vmatpush1.bf16.msra.mxu0 %v14945_v2  ;;  %10493 = vmatprep.mubr.bf16.mxu0 %v15836_v34 }
 0x4bd   : > { %v16923_v31 = vadd.f32 %v10126_v49, %v10085_v20  ;;  %10437 = vmatpush2.bf16.msra.mxu1 %v14942_v15  ;;  %v10087_v54 = vpop.f32.mrf.mxu0  ;;  %10463 = vmatprep.subr.bf16.mxu0 %v14953_v37  ;;  %v15007_v37 = vld [vmem:[#allocation4 + $0x174c] ss:$80 sps:$4 sm:$0xff]   ;;  %v15002_v49 = vld [vmem:[#allocation4 + $0x1248] ss:$80 sps:$4 sm:$0xff]  }
 0x4be   : > { %v10128_v63 = vpop.f32.mrf.mxu1  ;;  %10438 = vmatprep.subr.bf16.mxu1 %v14950_v55  ;;  %v15004_v55 = vld [vmem:[#allocation4 + $0x124c] ss:$80 sps:$4 sm:$0xff]  }
 0x4bf   : > { %v16925_v8 = vadd.f32 %v10128_v63, %v10087_v54  ;;  %v10089_v16 = vpop.f32.mrf.mxu0  ;;  %v15013_v63 = vld [vmem:[#allocation4 + $0x16ac] ss:$80 sps:$4 sm:$0xff]  }
 0x4c0   : > { %v10130_v12 = vpop.f32.mrf.mxu1  ;;  %10464 = vmatpush1.bf16.msra.mxu0 %v14951_v22  ;;  %v15019_v16 = vld [vmem:[#allocation4 + $0x160c] ss:$80 sps:$4 sm:$0xff]  }
 0x4c1   : > { %10439 = vmatpush2.bf16.msra.mxu1 %v14948_v13  ;;  %v10090_v36 = vpop.f32.mrf.mxu0  ;;  %10465 = vmatprep.subr.bf16.mxu0 %v14959_v29  ;;  %v15005_v13 = vld [vmem:[#allocation4 + $0x1748] ss:$80 sps:$4 sm:$0xff]  }
 0x4c2   : > { %v10131_v27 = vpop.f32.mrf.mxu1  ;;  %10440 = vmatprep.subr.bf16.mxu1 %v14956_v0  ;;  %v15008_v0 = vld [vmem:[#allocation4 + $0x11a8] ss:$80 sps:$4 sm:$0xff]   ;;  %v15025_v36 = vld [vmem:[#allocation4 + $0x156c] ss:$80 sps:$4 sm:$0xff]  }
 0x4c3   : > { %v15011_v29 = vld [vmem:[#allocation4 + $0x16a8] ss:$80 sps:$4 sm:$0xff]  }
 0x4c4   : > { %10466 = vmatpush1.bf16.msra.mxu0 %v14957_v25  ;;  %v15014_v12 = vld [vmem:[#allocation4 + $0x1108] ss:$80 sps:$4 sm:$0xff]   ;;  %v15022_v25 = vld [vmem:[#allocation4 + $0x106c] ss:$80 sps:$4 sm:$0xff]  }
 0x4c5   : > { %10441 = vmatpush2.bf16.msra.mxu1 %v14954_v45  ;;  %10467 = vmatprep.subr.bf16.mxu0 %v14965_v48  ;;  %v15017_v45 = vld [vmem:[#allocation4 + $0x1608] ss:$80 sps:$4 sm:$0xff]   ;;  %v15028_v48 = vld [vmem:[#allocation4 + $0xfcc] ss:$80 sps:$4 sm:$0xff]  }
 0x4c6   : > { %10442 = vmatprep.subr.bf16.mxu1 %v14962_v21  ;;  %v15020_v27 = vld [vmem:[#allocation4 + $0x1068] ss:$80 sps:$4 sm:$0xff]  }
 0x4c7   : > { %v15023_v21 = vld [vmem:[#allocation4 + $0x1568] ss:$80 sps:$4 sm:$0xff]  }
 0x4c8   : > { %10468 = vmatpush1.bf16.msra.mxu0 %v14963_v47  ;;  %v15026_v47 = vld [vmem:[#allocation4 + $0xfc8] ss:$80 sps:$4 sm:$0xff]  }
 0x4c9   : > { %10443 = vmatpush2.bf16.msra.mxu1 %v14960_v60  ;;  %10469 = vmatprep.subr.bf16.mxu0 %v14971_v35  ;;  %v15031_v60 = vld [vmem:[#allocation4 + $0x14cc] ss:$80 sps:$4 sm:$0xff]  }
 0x4ca   : > { %10444 = vmatprep.subr.bf16.mxu1 %v14968_v6  ;;  %v15029_v6 = vld [vmem:[#allocation4 + $0x14c8] ss:$80 sps:$4 sm:$0xff]   ;;  %v15034_v35 = vld [vmem:[#allocation4 + $0xf2c] ss:$80 sps:$4 sm:$0xff]  }
 0x4cc   : > { %10470 = vmatpush1.bf16.msra.mxu0 %v14969_v4  ;;  %v15032_v4 = vld [vmem:[#allocation4 + $0xf28] ss:$80 sps:$4 sm:$0xff]  }
 0x4cd   : > { %10445 = vmatpush2.bf16.msra.mxu1 %v14966_v17  ;;  %10471 = vmatprep.subr.bf16.mxu0 %v14977_v59  ;;  %v15037_v17 = vld [vmem:[#allocation4 + $0x142c] ss:$80 sps:$4 sm:$0xff]   ;;  %v15040_v59 = vld [vmem:[#allocation4 + $0x494] ss:$80 sps:$4 sm:$0xff]  }
 0x4ce   : > { %10446 = vmatprep.subr.bf16.mxu1 %v14974_v40  ;;  %v15035_v40 = vld [vmem:[#allocation4 + $0x1428] ss:$80 sps:$4 sm:$0xff]  }
 0x4d0   : > { %10472 = vmatpush1.bf16.msra.mxu0 %v14975_v30  ;;  %v15038_v30 = vld [vmem:[#allocation4 + $0x490] ss:$80 sps:$4 sm:$0xff]  }
 0x4d1   : > { %10447 = vmatpush2.bf16.msra.mxu1 %v14972_v32  ;;  %10473 = vmatprep.subr.bf16.mxu0 %v14983_v14  ;;  %v15043_v32 = vld [vmem:[#allocation4 + $0xe94] ss:$80 sps:$4 sm:$0xff]  }
 0x4d2   : > { %10448 = vmatprep.subr.bf16.mxu1 %v14980_v51  ;;  %v15041_v51 = vld [vmem:[#allocation4 + $0xe90] ss:$80 sps:$4 sm:$0xff]   ;;  %v15046_v14 = vld [vmem:[#allocation4 + $0x3f4] ss:$80 sps:$4 sm:$0xff]  }
 0x4d4   : > { %10474 = vmatpush1.bf16.msra.mxu0 %v14981_v26 }
 0x4d5   : > { %10449 = vmatpush2.bf16.msra.mxu1 %v14978_v52  ;;  %10475 = vmatprep.subr.bf16.mxu0 %v14989_v38  ;;  %v15049_v52 = vld [vmem:[#allocation4 + $0xdf4] ss:$80 sps:$4 sm:$0xff]   ;;  %v15047_v38 = vld [vmem:[#allocation4 + $0xdf0] ss:$80 sps:$4 sm:$0xff]  }
 0x4d6   : > { %10450 = vmatprep.subr.bf16.mxu1 %v14986_v44  ;;  %v15044_v44 = vld [vmem:[#allocation4 + $0x3f0] ss:$80 sps:$4 sm:$0xff]  }
 0x4d8   : > { %10476 = vmatpush1.bf16.msra.mxu0 %v14987_v41  ;;  %v15052_v41 = vld [vmem:[#allocation4 + $0x354] ss:$80 sps:$4 sm:$0xff]  }
 0x4d9   : > { %10451 = vmatpush2.bf16.msra.mxu1 %v14984_v33  ;;  %10477 = vmatprep.subr.bf16.mxu0 %v14992_v11  ;;  %v15055_v11 = vld [vmem:[#allocation4 + $0xd54] ss:$80 sps:$4 sm:$0xff]  }
 0x4da   : > { %10502 = vmatprep.subr.bf16.mxu1 %v14995_v62 }
 0x4db   : > { %v10167_v50 = vpop.f32.mrf.mxu0 }
 0x4dc   : > { %10453 = vmatmul.mubr.bf16.vlgmr.msra.gmra.mxu1 %v15848_v57  ;;  %v16930_v15 = vadd.f32 %v10167_v50, %v16923_v31  ;;  %10478 = vmatpush2.bf16.msra.mxu0 %v14990_v9  ;;  %v15010_v31 = vld [vmem:[#allocation4 + $0x11ac] ss:$80 sps:$4 sm:$0xff]   ;;  %v15050_v9 = vld [vmem:[#allocation4 + $0x350] ss:$80 sps:$4 sm:$0xff]  }
 0x4dd   : > { %10503 = vmatpush1.bf16.msra.mxu1 %v14993_v39  ;;  %v10169_v2 = vpop.f32.mrf.mxu0  ;;  %10479 = vmatprep.subr.bf16.mxu0 %v14998_v10  ;;  %v15053_v39 = vld [vmem:[#allocation4 + $0xd50] ss:$80 sps:$4 sm:$0xff]  }
 0x4de   : > { %10504 = vmatprep.subr.bf16.mxu1 %v15001_v18  ;;  %v16933_v20 = vadd.f32 %v10169_v2, %v16925_v8  ;;  %10534 = vmatprep.mubr.bf16.mxu1 %v15862_v61  ;;  %v15016_v8 = vld [vmem:[#allocation4 + $0x110c] ss:$80 sps:$4 sm:$0xff]   ;;  %v15058_v18 = vld [vmem:[#allocation4 + $0x2b4] ss:$80 sps:$4 sm:$0xff]   ;;  %v15059_v50 = vld [vmem:[#allocation4 + $0xcb0] ss:$80 sps:$4 sm:$0xff]  }
 0x4df   : > { %v10171_v22 = vpop.f32.mrf.mxu0  ;;  %v15064_v2 = vld [vmem:[#allocation4 + $0x214] ss:$80 sps:$4 sm:$0xff]  }
 0x4e0   : > { %10480 = vmatpush2.bf16.msra.mxu0 %v14996_v7  ;;  %v15061_v7 = vld [vmem:[#allocation4 + $0xcb4] ss:$80 sps:$4 sm:$0xff]  }
 0x4e1   : > { %10505 = vmatpush1.bf16.msra.mxu1 %v14999_v23  ;;  %v10172_v54 = vpop.f32.mrf.mxu0  ;;  %10481 = vmatprep.subr.bf16.mxu0 %v15004_v55  ;;  %v15056_v23 = vld [vmem:[#allocation4 + $0x2b0] ss:$80 sps:$4 sm:$0xff]   ;;  %v15067_v55 = vld [vmem:[#allocation4 + $0xc14] ss:$80 sps:$4 sm:$0xff]  }
 0x4e2   : > { %10506 = vmatprep.subr.bf16.mxu1 %v15007_v37  ;;  %v15062_v37 = vld [vmem:[#allocation4 + $0x210] ss:$80 sps:$4 sm:$0xff]   ;;  %v15073_v22 = vld [vmem:[#allocation4 + $0xb74] ss:$80 sps:$4 sm:$0xff]  }
 0x4e3   : > { %v15068_v54 = vld [vmem:[#allocation4 + $0x170] ss:$80 sps:$4 sm:$0xff]  }
 0x4e4   : > { %10482 = vmatpush2.bf16.msra.mxu0 %v15002_v49  ;;  %v15065_v49 = vld [vmem:[#allocation4 + $0xc10] ss:$80 sps:$4 sm:$0xff]  }
 0x4e5   : > { %10507 = vmatpush1.bf16.msra.mxu1 %v15005_v13  ;;  %10483 = vmatprep.subr.bf16.mxu0 %v15010_v31  ;;  %v15070_v13 = vld [vmem:[#allocation4 + $0x174] ss:$80 sps:$4 sm:$0xff]   ;;  %v15071_v31 = vld [vmem:[#allocation4 + $0xb70] ss:$80 sps:$4 sm:$0xff]  }
 0x4e6   : > { %10508 = vmatprep.subr.bf16.mxu1 %v15013_v63  ;;  %v15076_v63 = vld [vmem:[#allocation4 + $0xd4] ss:$80 sps:$4 sm:$0xff]  }
 0x4e8   : > { %10484 = vmatpush2.bf16.msra.mxu0 %v15008_v0  ;;  %v15079_v0 = vld [vmem:[#allocation4 + $0xad4] ss:$80 sps:$4 sm:$0xff]  }
 0x4e9   : > { %10509 = vmatpush1.bf16.msra.mxu1 %v15011_v29  ;;  %10485 = vmatprep.subr.bf16.mxu0 %v15016_v8  ;;  %v15074_v29 = vld [vmem:[#allocation4 + $0xd0] ss:$80 sps:$4 sm:$0xff]  }
 0x4ea   : > { %10510 = vmatprep.subr.bf16.mxu1 %v15019_v16  ;;  %v15077_v8 = vld [vmem:[#allocation4 + $0xad0] ss:$80 sps:$4 sm:$0xff]   ;;  %v15082_v16 = vld [vmem:[#allocation4 + $0x34] ss:$80 sps:$4 sm:$0xff]  }
 0x4ec   : > { %10486 = vmatpush2.bf16.msra.mxu0 %v15014_v12  ;;  %v15085_v12 = vld [vmem:[#allocation4 + $0xa34] ss:$80 sps:$4 sm:$0xff]  }
 0x4ed   : > { %10511 = vmatpush1.bf16.msra.mxu1 %v15017_v45  ;;  %10487 = vmatprep.subr.bf16.mxu0 %v15022_v25  ;;  %v15080_v45 = vld [vmem:[#allocation4 + $0x30] ss:$80 sps:$4 sm:$0xff]  }
 0x4ee   : > { %10512 = vmatprep.subr.bf16.mxu1 %v15025_v36  ;;  %v15083_v25 = vld [vmem:[#allocation4 + $0xa30] ss:$80 sps:$4 sm:$0xff]   ;;  %v15088_v36 = vld [vmem:[#allocation4 + $0x994] ss:$80 sps:$4 sm:$0xff]  }
 0x4f0   : > { %10488 = vmatpush2.bf16.msra.mxu0 %v15020_v27  ;;  %v15091_v27 = vld [vmem:[#allocation4 + $0x1394] ss:$80 sps:$4 sm:$0xff]  }
 0x4f1   : > { %10513 = vmatpush1.bf16.msra.mxu1 %v15023_v21  ;;  %10489 = vmatprep.subr.bf16.mxu0 %v15028_v48  ;;  %v15086_v21 = vld [vmem:[#allocation4 + $0x990] ss:$80 sps:$4 sm:$0xff]  }
 0x4f2   : > { %10514 = vmatprep.subr.bf16.mxu1 %v15031_v60  ;;  %v15089_v48 = vld [vmem:[#allocation4 + $0x1390] ss:$80 sps:$4 sm:$0xff]   ;;  %v15094_v60 = vld [vmem:[#allocation4 + $0x8f4] ss:$80 sps:$4 sm:$0xff]  }
 0x4f4   : > { %10490 = vmatpush2.bf16.msra.mxu0 %v15026_v47  ;;  %v15097_v47 = vld [vmem:[#allocation4 + $0x12f4] ss:$80 sps:$4 sm:$0xff]  }
 0x4f5   : > { %10515 = vmatpush1.bf16.msra.mxu1 %v15029_v6  ;;  %10491 = vmatprep.subr.bf16.mxu0 %v15034_v35 }
 0x4f6   : > { %10516 = vmatprep.subr.bf16.mxu1 %v15037_v17 }
 0x4f8   : > { %10492 = vmatpush2.bf16.msra.mxu0 %v15032_v4  ;;  %v15092_v4 = vld [vmem:[#allocation4 + $0x8f0] ss:$80 sps:$4 sm:$0xff]  }
 0x4f9   : > { %10517 = vmatpush1.bf16.msra.mxu1 %v15035_v40  ;;  %10543 = vmatprep.subr.bf16.mxu0 %v15040_v59  ;;  %v15095_v40 = vld [vmem:[#allocation4 + $0x12f0] ss:$80 sps:$4 sm:$0xff]  }
 0x4fa   : > { %10584 = vmatprep.subr.bf16.mxu1 %v15043_v32 }
 0x4fb   : > { %10494 = vmatmul.mubr.bf16.vlgmr.msra.gmra.mxu0 %v15840_v46 }
 0x4fc   : > { %v16936_v26 = vpop.f32.mrf.mxu1  ;;  %10535 = vmatmul.mubr.bf16.vlgmr.msra.gmra.mxu1 %v15832_v42  ;;  %10544 = vmatpush1.bf16.msra.mxu0 %v15038_v30  ;;  %v15100_v30 = vld [vmem:[#allocation4 + $0x854] ss:$80 sps:$4 sm:$0xff]  }
 0x4fd   : > { %10585 = vmatpush1.bf16.msra.mxu1 %v15041_v51  ;;  %10545 = vmatprep.subr.bf16.mxu0 %v15046_v14  ;;  %v15103_v51 = vld [vmem:[#allocation4 + $0x1254] ss:$80 sps:$4 sm:$0xff]  }
 0x4fe   : > { %v16940_v33 = vpop.f32.mrf.mxu1  ;;  %10586 = vmatprep.subr.bf16.mxu1 %v15049_v52  ;;  %10575 = vmatprep.mubr.bf16.mxu0 %v15844_v1 }
 0x4ff   : > { %10616 = vmatprep.mubr.bf16.mxu1 %v15836_v34 }
 0x500   : > { %v10212_v62 = vpop.f32.mrf.mxu1  ;;  %10546 = vmatpush1.bf16.msra.mxu0 %v15044_v44 }
 0x501   : > { %10587 = vmatpush1.bf16.msra.mxu1 %v15047_v38  ;;  %10547 = vmatprep.subr.bf16.mxu0 %v15052_v41 }
 0x502   : > { %v10213_v10 = vpop.f32.mrf.mxu1  ;;  %10588 = vmatprep.subr.bf16.mxu1 %v15055_v11  ;;  %v15101_v11 = vld [vmem:[#allocation4 + $0x1250] ss:$80 sps:$4 sm:$0xff]  }
 0x503   : > { %v15109_v10 = vld [vmem:[#allocation4 + $0x11b4] ss:$80 sps:$4 sm:$0xff]  }
 0x504   : > { %10548 = vmatpush1.bf16.msra.mxu0 %v15050_v9 }
 0x505   : > { %10589 = vmatpush1.bf16.msra.mxu1 %v15053_v39  ;;  %10549 = vmatprep.subr.bf16.mxu0 %v15058_v18  ;;  %v15106_v39 = vld [vmem:[#allocation4 + $0x7b4] ss:$80 sps:$4 sm:$0xff]   ;;  %v15104_v18 = vld [vmem:[#allocation4 + $0x7b0] ss:$80 sps:$4 sm:$0xff]  }
 0x506   : > { %10590 = vmatprep.subr.bf16.mxu1 %v15061_v7  ;;  %v15107_v7 = vld [vmem:[#allocation4 + $0x11b0] ss:$80 sps:$4 sm:$0xff]  }
 0x508   : > { %10550 = vmatpush1.bf16.msra.mxu0 %v15056_v23  ;;  %v15115_v23 = vld [vmem:[#allocation4 + $0x1114] ss:$80 sps:$4 sm:$0xff]  }
 0x509   : > { %10591 = vmatpush1.bf16.msra.mxu1 %v15059_v50  ;;  %10551 = vmatprep.subr.bf16.mxu0 %v15064_v2  ;;  %v15110_v50 = vld [vmem:[#allocation4 + $0x710] ss:$80 sps:$4 sm:$0xff]  }
 0x50a   : > { %10592 = vmatprep.subr.bf16.mxu1 %v15067_v55  ;;  %v15113_v2 = vld [vmem:[#allocation4 + $0x1110] ss:$80 sps:$4 sm:$0xff]   ;;  %v15118_v55 = vld [vmem:[#allocation4 + $0x674] ss:$80 sps:$4 sm:$0xff]  }
 0x50c   : > { %10552 = vmatpush1.bf16.msra.mxu0 %v15062_v37  ;;  %v15121_v37 = vld [vmem:[#allocation4 + $0x1074] ss:$80 sps:$4 sm:$0xff]  }
 0x50d   : > { %10593 = vmatpush1.bf16.msra.mxu1 %v15065_v49  ;;  %10553 = vmatprep.subr.bf16.mxu0 %v15070_v13  ;;  %v15116_v49 = vld [vmem:[#allocation4 + $0x670] ss:$80 sps:$4 sm:$0xff]  }
 0x50e   : > { %10594 = vmatprep.subr.bf16.mxu1 %v15073_v22  ;;  %v15119_v13 = vld [vmem:[#allocation4 + $0x1070] ss:$80 sps:$4 sm:$0xff]   ;;  %v15124_v22 = vld [vmem:[#allocation4 + $0x5d4] ss:$80 sps:$4 sm:$0xff]  }
 0x510   : > { %10554 = vmatpush1.bf16.msra.mxu0 %v15068_v54  ;;  %v15127_v54 = vld [vmem:[#allocation4 + $0xfd4] ss:$80 sps:$4 sm:$0xff]  }
 0x511   : > { %10595 = vmatpush1.bf16.msra.mxu1 %v15071_v31  ;;  %10555 = vmatprep.subr.bf16.mxu0 %v15076_v63  ;;  %v15122_v31 = vld [vmem:[#allocation4 + $0x5d0] ss:$80 sps:$4 sm:$0xff]  }
 0x512   : > { %10596 = vmatprep.subr.bf16.mxu1 %v15079_v0  ;;  %v15125_v63 = vld [vmem:[#allocation4 + $0xfd0] ss:$80 sps:$4 sm:$0xff]   ;;  %v15130_v0 = vld [vmem:[#allocation4 + $0x534] ss:$80 sps:$4 sm:$0xff]  }
 0x514   : > { %10556 = vmatpush1.bf16.msra.mxu0 %v15074_v29  ;;  %v15133_v29 = vld [vmem:[#allocation4 + $0xf34] ss:$80 sps:$4 sm:$0xff]  }
 0x515   : > { %10597 = vmatpush1.bf16.msra.mxu1 %v15077_v8  ;;  %10557 = vmatprep.subr.bf16.mxu0 %v15082_v16  ;;  %v15128_v8 = vld [vmem:[#allocation4 + $0x530] ss:$80 sps:$4 sm:$0xff]  }
 0x516   : > { %10598 = vmatprep.subr.bf16.mxu1 %v15085_v12  ;;  %v15131_v16 = vld [vmem:[#allocation4 + $0xf30] ss:$80 sps:$4 sm:$0xff]   ;;  %v15136_v12 = vld [vmem:[#allocation4 + $0x1894] ss:$80 sps:$4 sm:$0xff]  }
 0x518   : > { %10558 = vmatpush1.bf16.msra.mxu0 %v15080_v45  ;;  %v15139_v45 = vld [vmem:[#allocation4 + $0x49c] ss:$80 sps:$4 sm:$0xff]  }
 0x519   : > { %10599 = vmatpush1.bf16.msra.mxu1 %v15083_v25  ;;  %10559 = vmatprep.subr.bf16.mxu0 %v15088_v36  ;;  %v15134_v25 = vld [vmem:[#allocation4 + $0x1890] ss:$80 sps:$4 sm:$0xff]   ;;  %v15137_v36 = vld [vmem:[#allocation4 + $0x498] ss:$80 sps:$4 sm:$0xff]  }
 0x51a   : > { %10600 = vmatprep.subr.bf16.mxu1 %v15091_v27  ;;  %v15142_v27 = vld [vmem:[#allocation4 + $0x17f4] ss:$80 sps:$4 sm:$0xff]  }
 0x51b   : > { %v10249_v6 = vpop.f32.mrf.mxu0 }
 0x51c   : > { %v10290_v35 = vpop.f32.mrf.mxu1  ;;  %v10250_v17 = vadd.f32 %v10249_v6, %v16936_v26  ;;  %10560 = vmatpush2.bf16.msra.mxu0 %v15086_v21  ;;  %v15098_v26 = vld [vmem:[#allocation4 + $0x850] ss:$80 sps:$4 sm:$0xff]   ;;  %v15145_v21 = vld [vmem:[#allocation4 + $0x3fc] ss:$80 sps:$4 sm:$0xff]  }
 0x51d   : > { %10601 = vmatpush2.bf16.msra.mxu1 %v15089_v48  ;;  %v10251_v59 = vpop.f32.mrf.mxu0  ;;  %10561 = vmatprep.subr.bf16.mxu0 %v15094_v60  ;;  %v15140_v48 = vld [vmem:[#allocation4 + $0x17f0] ss:$80 sps:$4 sm:$0xff]   ;;  %v15143_v60 = vld [vmem:[#allocation4 + $0x3f8] ss:$80 sps:$4 sm:$0xff]   ;;  %v15151_v6 = vld [vmem:[#allocation4 + $0x35c] ss:$80 sps:$4 sm:$0xff]  }
 0x51e   : > { %v10292_v32 = vpop.f32.mrf.mxu1  ;;  %10602 = vmatprep.subr.bf16.mxu1 %v15097_v47  ;;  %v16945_v14 = vadd.f32 %v10290_v35, %v10250_v17  ;;  %v10252_v52 = vadd.f32 %v10251_v59, %v16940_v33  ;;  %v15112_v33 = vld [vmem:[#allocation4 + $0x714] ss:$80 sps:$4 sm:$0xff]   ;;  %v15146_v35 = vld [vmem:[#allocation4 + $0x1750] ss:$80 sps:$4 sm:$0xff]   ;;  %v15149_v17 = vld [vmem:[#allocation4 + $0x358] ss:$80 sps:$4 sm:$0xff]  }
 0x51f   : > { %v10253_v44 = vpop.f32.mrf.mxu0  ;;  %v15148_v47 = vld [vmem:[#allocation4 + $0x1754] ss:$80 sps:$4 sm:$0xff]   ;;  %v15152_v59 = vld [vmem:[#allocation4 + $0x16b0] ss:$80 sps:$4 sm:$0xff]  }
 0x520   : > { %v10294_v38 = vpop.f32.mrf.mxu1  ;;  %v16948_v41 = vadd.f32 %v10292_v32, %v10252_v52  ;;  %10562 = vmatpush2.bf16.msra.mxu0 %v15092_v4  ;;  %v15154_v4 = vld [vmem:[#allocation4 + $0x16b4] ss:$80 sps:$4 sm:$0xff]   ;;  %v15155_v32 = vld [vmem:[#allocation4 + $0x2b8] ss:$80 sps:$4 sm:$0xff]   ;;  %v15158_v52 = vld [vmem:[#allocation4 + $0x1610] ss:$80 sps:$4 sm:$0xff]  }
 0x521   : > { %10603 = vmatpush2.bf16.msra.mxu1 %v15095_v40  ;;  %v10254_v62 = vpop.f32.mrf.mxu0  ;;  %10563 = vmatprep.subr.bf16.mxu0 %v15100_v30  ;;  %v15157_v40 = vld [vmem:[#allocation4 + $0x2bc] ss:$80 sps:$4 sm:$0xff]   ;;  %v15160_v30 = vld [vmem:[#allocation4 + $0x1614] ss:$80 sps:$4 sm:$0xff]   ;;  %v15161_v44 = vld [vmem:[#allocation4 + $0x218] ss:$80 sps:$4 sm:$0xff]  }
 0x522   : > { %v10295_v9 = vpop.f32.mrf.mxu1  ;;  %10604 = vmatprep.subr.bf16.mxu1 %v15103_v51  ;;  %v15163_v51 = vld [vmem:[#allocation4 + $0x21c] ss:$80 sps:$4 sm:$0xff]   ;;  %v15166_v38 = vld [vmem:[#allocation4 + $0x1574] ss:$80 sps:$4 sm:$0xff]   ;;  %v15167_v62 = vld [vmem:[#allocation4 + $0x178] ss:$80 sps:$4 sm:$0xff]  }
 0x523   : > { %v15172_v9 = vld [vmem:[#allocation4 + $0x14d4] ss:$80 sps:$4 sm:$0xff]  }
 0x524   : > { %10564 = vmatpush2.bf16.msra.mxu0 %v15098_v26  ;;  %v15169_v26 = vld [vmem:[#allocation4 + $0x17c] ss:$80 sps:$4 sm:$0xff]  }
 0x525   : > { %10605 = vmatpush2.bf16.msra.mxu1 %v15101_v11  ;;  %10565 = vmatprep.subr.bf16.mxu0 %v15106_v39  ;;  %v15164_v11 = vld [vmem:[#allocation4 + $0x1570] ss:$80 sps:$4 sm:$0xff]   ;;  %v15175_v39 = vld [vmem:[#allocation4 + $0xdc] ss:$80 sps:$4 sm:$0xff]  }
 0x526   : > { %10606 = vmatprep.subr.bf16.mxu1 %v15109_v10  ;;  %v15170_v10 = vld [vmem:[#allocation4 + $0x14d0] ss:$80 sps:$4 sm:$0xff]  }
 0x528   : > { %10566 = vmatpush2.bf16.msra.mxu0 %v15104_v18  ;;  %v15173_v18 = vld [vmem:[#allocation4 + $0xd8] ss:$80 sps:$4 sm:$0xff]  }
 0x529   : > { %10607 = vmatpush2.bf16.msra.mxu1 %v15107_v7  ;;  %10567 = vmatprep.subr.bf16.mxu0 %v15112_v33  ;;  %v15178_v7 = vld [vmem:[#allocation4 + $0x1434] ss:$80 sps:$4 sm:$0xff]   ;;  %v15181_v33 = vld [vmem:[#allocation4 + $0x3c] ss:$80 sps:$4 sm:$0xff]  }
 0x52a   : > { %10608 = vmatprep.subr.bf16.mxu1 %v15115_v23  ;;  %v15176_v23 = vld [vmem:[#allocation4 + $0x1430] ss:$80 sps:$4 sm:$0xff]  }
 0x52c   : > { %10568 = vmatpush2.bf16.msra.mxu0 %v15110_v50  ;;  %v15179_v50 = vld [vmem:[#allocation4 + $0x38] ss:$80 sps:$4 sm:$0xff]  }
 0x52d   : > { %10609 = vmatpush2.bf16.msra.mxu1 %v15113_v2  ;;  %10569 = vmatprep.subr.bf16.mxu0 %v15118_v55  ;;  %v15184_v2 = vld [vmem:[#allocation4 + $0x99c] ss:$80 sps:$4 sm:$0xff]  }
 0x52e   : > { %10610 = vmatprep.subr.bf16.mxu1 %v15121_v37  ;;  %v15187_v55 = vld [vmem:[#allocation4 + $0xe9c] ss:$80 sps:$4 sm:$0xff]   ;;  %v15182_v37 = vld [vmem:[#allocation4 + $0x998] ss:$80 sps:$4 sm:$0xff]  }
 0x530   : > { %10570 = vmatpush2.bf16.msra.mxu0 %v15116_v49  ;;  %v15185_v49 = vld [vmem:[#allocation4 + $0xe98] ss:$80 sps:$4 sm:$0xff]  }
 0x531   : > { %10611 = vmatpush2.bf16.msra.mxu1 %v15119_v13  ;;  %10571 = vmatprep.subr.bf16.mxu0 %v15124_v22  ;;  %v15190_v13 = vld [vmem:[#allocation4 + $0x8fc] ss:$80 sps:$4 sm:$0xff]  }
 0x532   : > { %10612 = vmatprep.subr.bf16.mxu1 %v15127_v54  ;;  %v15193_v22 = vld [vmem:[#allocation4 + $0xdfc] ss:$80 sps:$4 sm:$0xff]  }
 0x534   : > { %10572 = vmatpush2.bf16.msra.mxu0 %v15122_v31 }
 0x535   : > { %10613 = vmatpush2.bf16.msra.mxu1 %v15125_v63  ;;  %10573 = vmatprep.subr.bf16.mxu0 %v15130_v0  ;;  %v15188_v0 = vld [vmem:[#allocation4 + $0x8f8] ss:$80 sps:$4 sm:$0xff]  }
 0x536   : > { %10614 = vmatprep.subr.bf16.mxu1 %v15133_v29  ;;  %v15191_v29 = vld [vmem:[#allocation4 + $0xdf8] ss:$80 sps:$4 sm:$0xff]  }
 0x538   : > { %10574 = vmatpush2.bf16.msra.mxu0 %v15128_v8 }
 0x539   : > { %10615 = vmatpush2.bf16.msra.mxu1 %v15131_v16  ;;  %10625 = vmatprep.subr.bf16.mxu0 %v15136_v12  ;;  %v15196_v12 = vld [vmem:[#allocation4 + $0x85c] ss:$80 sps:$4 sm:$0xff]  }
 0x53a   : > { %10666 = vmatprep.subr.bf16.mxu1 %v15139_v45  ;;  %v15199_v45 = vld [vmem:[#allocation4 + $0xd5c] ss:$80 sps:$4 sm:$0xff]  }
 0x53b   : > { %10576 = vmatmul.mubr.bf16.vlgmr.msra.gmra.mxu0 %v15848_v57 }
 0x53c   : > { %10617 = vmatmul.mubr.bf16.vlgmr.msra.gmra.mxu1 %v15840_v46  ;;  %10626 = vmatpush1.bf16.msra.mxu0 %v15134_v25 }
 0x53d   : > { %10667 = vmatpush1.bf16.msra.mxu1 %v15137_v36  ;;  %10627 = vmatprep.subr.bf16.mxu0 %v15142_v27 }
 0x53e   : > { %10668 = vmatprep.subr.bf16.mxu1 %v15145_v21  ;;  %10657 = vmatprep.mubr.bf16.mxu0 %v15862_v61  ;;  %v15194_v21 = vld [vmem:[#allocation4 + $0x858] ss:$80 sps:$4 sm:$0xff]  }
 0x53f   : > { %10698 = vmatprep.mubr.bf16.mxu1 %v15844_v1 }
 0x540   : > { %10628 = vmatpush1.bf16.msra.mxu0 %v15140_v48  ;;  %v15197_v48 = vld [vmem:[#allocation4 + $0xd58] ss:$80 sps:$4 sm:$0xff]  }
 0x541   : > { %10669 = vmatpush1.bf16.msra.mxu1 %v15143_v60  ;;  %10629 = vmatprep.subr.bf16.mxu0 %v15148_v47 }
 0x542   : > { %10670 = vmatprep.subr.bf16.mxu1 %v15151_v6  ;;  %v15202_v6 = vld [vmem:[#allocation4 + $0x7bc] ss:$80 sps:$4 sm:$0xff]  }
 0x544   : > { %10630 = vmatpush1.bf16.msra.mxu0 %v15146_v35  ;;  %v15205_v35 = vld [vmem:[#allocation4 + $0xcbc] ss:$80 sps:$4 sm:$0xff]  }
 0x545   : > { %10671 = vmatpush1.bf16.msra.mxu1 %v15149_v17  ;;  %10631 = vmatprep.subr.bf16.mxu0 %v15154_v4  ;;  %v15200_v17 = vld [vmem:[#allocation4 + $0x7b8] ss:$80 sps:$4 sm:$0xff]  }
 0x546   : > { %10672 = vmatprep.subr.bf16.mxu1 %v15157_v40  ;;  %v15203_v4 = vld [vmem:[#allocation4 + $0xcb8] ss:$80 sps:$4 sm:$0xff]   ;;  %v15208_v40 = vld [vmem:[#allocation4 + $0x71c] ss:$80 sps:$4 sm:$0xff]  }
 0x548   : > { %10632 = vmatpush1.bf16.msra.mxu0 %v15152_v59  ;;  %v15211_v59 = vld [vmem:[#allocation4 + $0xc1c] ss:$80 sps:$4 sm:$0xff]  }
 0x549   : > { %10673 = vmatpush1.bf16.msra.mxu1 %v15155_v32  ;;  %10633 = vmatprep.subr.bf16.mxu0 %v15160_v30  ;;  %v15206_v32 = vld [vmem:[#allocation4 + $0x718] ss:$80 sps:$4 sm:$0xff]  }
 0x54a   : > { %10674 = vmatprep.subr.bf16.mxu1 %v15163_v51  ;;  %v15209_v30 = vld [vmem:[#allocation4 + $0xc18] ss:$80 sps:$4 sm:$0xff]   ;;  %v15214_v51 = vld [vmem:[#allocation4 + $0x67c] ss:$80 sps:$4 sm:$0xff]  }
 0x54c   : > { %10634 = vmatpush1.bf16.msra.mxu0 %v15158_v52  ;;  %v15217_v52 = vld [vmem:[#allocation4 + $0xb7c] ss:$80 sps:$4 sm:$0xff]  }
 0x54d   : > { %10675 = vmatpush1.bf16.msra.mxu1 %v15161_v44  ;;  %10635 = vmatprep.subr.bf16.mxu0 %v15166_v38  ;;  %v15212_v44 = vld [vmem:[#allocation4 + $0x678] ss:$80 sps:$4 sm:$0xff]  }
 0x54e   : > { %10676 = vmatprep.subr.bf16.mxu1 %v15169_v26  ;;  %v15215_v38 = vld [vmem:[#allocation4 + $0xb78] ss:$80 sps:$4 sm:$0xff]   ;;  %v15220_v26 = vld [vmem:[#allocation4 + $0x5dc] ss:$80 sps:$4 sm:$0xff]  }
 0x550   : > { %10636 = vmatpush1.bf16.msra.mxu0 %v15164_v11  ;;  %v15223_v11 = vld [vmem:[#allocation4 + $0xadc] ss:$80 sps:$4 sm:$0xff]  }
 0x551   : > { %10677 = vmatpush1.bf16.msra.mxu1 %v15167_v62  ;;  %10637 = vmatprep.subr.bf16.mxu0 %v15172_v9  ;;  %v15218_v62 = vld [vmem:[#allocation4 + $0x5d8] ss:$80 sps:$4 sm:$0xff]  }
 0x552   : > { %10678 = vmatprep.subr.bf16.mxu1 %v15175_v39  ;;  %v15221_v9 = vld [vmem:[#allocation4 + $0xad8] ss:$80 sps:$4 sm:$0xff]   ;;  %v15226_v39 = vld [vmem:[#allocation4 + $0x53c] ss:$80 sps:$4 sm:$0xff]  }
 0x554   : > { %10638 = vmatpush1.bf16.msra.mxu0 %v15170_v10  ;;  %v15229_v10 = vld [vmem:[#allocation4 + $0xa3c] ss:$80 sps:$4 sm:$0xff]  }
 0x555   : > { %10679 = vmatpush1.bf16.msra.mxu1 %v15173_v18  ;;  %10639 = vmatprep.subr.bf16.mxu0 %v15178_v7  ;;  %v15224_v18 = vld [vmem:[#allocation4 + $0x538] ss:$80 sps:$4 sm:$0xff]  }
 0x556   : > { %10680 = vmatprep.subr.bf16.mxu1 %v15181_v33  ;;  %v15227_v7 = vld [vmem:[#allocation4 + $0xa38] ss:$80 sps:$4 sm:$0xff]   ;;  %v15232_v33 = vld [vmem:[#allocation4 + $0x139c] ss:$80 sps:$4 sm:$0xff]  }
 0x558   : > { %10640 = vmatpush1.bf16.msra.mxu0 %v15176_v23  ;;  %v15235_v23 = vld [vmem:[#allocation4 + $0x189c] ss:$80 sps:$4 sm:$0xff]  }
 0x559   : > { %10681 = vmatpush1.bf16.msra.mxu1 %v15179_v50  ;;  %10707 = vmatprep.subr.bf16.mxu0 %v15187_v55  ;;  %v15230_v50 = vld [vmem:[#allocation4 + $0x1398] ss:$80 sps:$4 sm:$0xff]   ;;  %v15238_v55 = vld [vmem:[#allocation4 + $0x12fc] ss:$80 sps:$4 sm:$0xff]  }
 0x55a   : > { %10682 = vmatprep.subr.bf16.mxu1 %v15184_v2  ;;  %v15233_v2 = vld [vmem:[#allocation4 + $0x1898] ss:$80 sps:$4 sm:$0xff]  }
 0x55b   : > { %v10331_v54 = vpop.f32.mrf.mxu0  ;;  %10658 = vmatmul.mubr.bf16.vlgmr.msra.gmra.mxu0 %v15832_v42 }
 0x55c   : > { %v10372_v31 = vpop.f32.mrf.mxu1  ;;  %10708 = vmatpush1.bf16.msra.mxu0 %v15185_v49  ;;  %10739 = vmatprep.mubr.bf16.mxu0 %v15836_v34 }
 0x55d   : > { %v16955_v63 = vadd.f32 %v10372_v31, %v10331_v54  ;;  %10683 = vmatpush2.bf16.msra.mxu1 %v15182_v37  ;;  %v10333_v8 = vpop.f32.mrf.mxu0  ;;  %10709 = vmatprep.subr.bf16.mxu0 %v15193_v22  ;;  %v15241_v37 = vld [vmem:[#allocation4 + $0x17fc] ss:$80 sps:$4 sm:$0xff]   ;;  %v15236_v22 = vld [vmem:[#allocation4 + $0x12f8] ss:$80 sps:$4 sm:$0xff]  }
 0x55e   : > { %v10374_v16 = vpop.f32.mrf.mxu1  ;;  %10684 = vmatprep.subr.bf16.mxu1 %v15190_v13  ;;  %v15239_v54 = vld [vmem:[#allocation4 + $0x17f8] ss:$80 sps:$4 sm:$0xff]  }
 0x55f   : > { %v16957_v25 = vadd.f32 %v10374_v16, %v10333_v8  ;;  %v10335_v36 = vpop.f32.mrf.mxu0 }
 0x560   : > { %v10376_v27 = vpop.f32.mrf.mxu1  ;;  %10710 = vmatpush1.bf16.msra.mxu0 %v15191_v29  ;;  %v15247_v29 = vld [vmem:[#allocation4 + $0x175c] ss:$80 sps:$4 sm:$0xff]  }
 0x561   : > { %10685 = vmatpush2.bf16.msra.mxu1 %v15188_v0  ;;  %v10336_v60 = vpop.f32.mrf.mxu0  ;;  %10711 = vmatprep.subr.bf16.mxu0 %v15199_v45  ;;  %v15244_v0 = vld [vmem:[#allocation4 + $0x125c] ss:$80 sps:$4 sm:$0xff]  }
 0x562   : > { %v10377_v47 = vpop.f32.mrf.mxu1  ;;  %10686 = vmatprep.subr.bf16.mxu1 %v15196_v12  ;;  %v15242_v12 = vld [vmem:[#allocation4 + $0x1258] ss:$80 sps:$4 sm:$0xff]   ;;  %v15250_v36 = vld [vmem:[#allocation4 + $0x11bc] ss:$80 sps:$4 sm:$0xff]  }
 0x563   : > { %v15253_v27 = vld [vmem:[#allocation4 + $0x16bc] ss:$80 sps:$4 sm:$0xff]   ;;  %v15254_v47 = vld [vmem:[#allocation4 + $0x1118] ss:$80 sps:$4 sm:$0xff]  }
 0x564   : > { %10712 = vmatpush1.bf16.msra.mxu0 %v15197_v48  ;;  %v15251_v48 = vld [vmem:[#allocation4 + $0x16b8] ss:$80 sps:$4 sm:$0xff]   ;;  %v15259_v60 = vld [vmem:[#allocation4 + $0x161c] ss:$80 sps:$4 sm:$0xff]  }
 0x565   : > { %10687 = vmatpush2.bf16.msra.mxu1 %v15194_v21  ;;  %10713 = vmatprep.subr.bf16.mxu0 %v15205_v35  ;;  %v15248_v21 = vld [vmem:[#allocation4 + $0x11b8] ss:$80 sps:$4 sm:$0xff]   ;;  %v15262_v35 = vld [vmem:[#allocation4 + $0x107c] ss:$80 sps:$4 sm:$0xff]  }
 0x566   : > { %10688 = vmatprep.subr.bf16.mxu1 %v15202_v6  ;;  %v15257_v6 = vld [vmem:[#allocation4 + $0x1618] ss:$80 sps:$4 sm:$0xff]  }
 0x568   : > { %10714 = vmatpush1.bf16.msra.mxu0 %v15203_v4  ;;  %v15260_v4 = vld [vmem:[#allocation4 + $0x1078] ss:$80 sps:$4 sm:$0xff]  }
 0x569   : > { %10689 = vmatpush2.bf16.msra.mxu1 %v15200_v17  ;;  %10715 = vmatprep.subr.bf16.mxu0 %v15211_v59  ;;  %v15265_v17 = vld [vmem:[#allocation4 + $0x157c] ss:$80 sps:$4 sm:$0xff]  }
 0x56a   : > { %10690 = vmatprep.subr.bf16.mxu1 %v15208_v40  ;;  %v15263_v40 = vld [vmem:[#allocation4 + $0x1578] ss:$80 sps:$4 sm:$0xff]   ;;  %v15268_v59 = vld [vmem:[#allocation4 + $0xfdc] ss:$80 sps:$4 sm:$0xff]  }
 0x56c   : > { %10716 = vmatpush1.bf16.msra.mxu0 %v15209_v30  ;;  %v15266_v30 = vld [vmem:[#allocation4 + $0xfd8] ss:$80 sps:$4 sm:$0xff]  }
 0x56d   : > { %10691 = vmatpush2.bf16.msra.mxu1 %v15206_v32  ;;  %10717 = vmatprep.subr.bf16.mxu0 %v15217_v52  ;;  %v15271_v32 = vld [vmem:[#allocation4 + $0x14dc] ss:$80 sps:$4 sm:$0xff]  }
 0x56e   : > { %10692 = vmatprep.subr.bf16.mxu1 %v15214_v51  ;;  %v15269_v51 = vld [vmem:[#allocation4 + $0x14d8] ss:$80 sps:$4 sm:$0xff]   ;;  %v15274_v52 = vld [vmem:[#allocation4 + $0xf3c] ss:$80 sps:$4 sm:$0xff]  }
 0x570   : > { %10718 = vmatpush1.bf16.msra.mxu0 %v15215_v38  ;;  %v15272_v38 = vld [vmem:[#allocation4 + $0xf38] ss:$80 sps:$4 sm:$0xff]  }
 0x571   : > { %10693 = vmatpush2.bf16.msra.mxu1 %v15212_v44  ;;  %10719 = vmatprep.subr.bf16.mxu0 %v15223_v11  ;;  %v15277_v44 = vld [vmem:[#allocation4 + $0x143c] ss:$80 sps:$4 sm:$0xff]   ;;  %v15280_v11 = vld [vmem:[#allocation4 + $0x4a4] ss:$80 sps:$4 sm:$0xff]  }
 0x572   : > { %10694 = vmatprep.subr.bf16.mxu1 %v15220_v26  ;;  %v15275_v26 = vld [vmem:[#allocation4 + $0x1438] ss:$80 sps:$4 sm:$0xff]  }
 0x574   : > { %10720 = vmatpush1.bf16.msra.mxu0 %v15221_v9  ;;  %v15278_v9 = vld [vmem:[#allocation4 + $0x4a0] ss:$80 sps:$4 sm:$0xff]  }
 0x575   : > { %10695 = vmatpush2.bf16.msra.mxu1 %v15218_v62  ;;  %10721 = vmatprep.subr.bf16.mxu0 %v15229_v10  ;;  %v15283_v62 = vld [vmem:[#allocation4 + $0xea4] ss:$80 sps:$4 sm:$0xff]  }
 0x576   : > { %10696 = vmatprep.subr.bf16.mxu1 %v15226_v39  ;;  %v15281_v39 = vld [vmem:[#allocation4 + $0xea0] ss:$80 sps:$4 sm:$0xff]   ;;  %v15286_v10 = vld [vmem:[#allocation4 + $0x404] ss:$80 sps:$4 sm:$0xff]  }
 0x578   : > { %10722 = vmatpush1.bf16.msra.mxu0 %v15227_v7 }
 0x579   : > { %10697 = vmatpush2.bf16.msra.mxu1 %v15224_v18  ;;  %10723 = vmatprep.subr.bf16.mxu0 %v15232_v33  ;;  %v15289_v18 = vld [vmem:[#allocation4 + $0xe04] ss:$80 sps:$4 sm:$0xff]   ;;  %v15284_v33 = vld [vmem:[#allocation4 + $0x400] ss:$80 sps:$4 sm:$0xff]  }
 0x57a   : > { %10748 = vmatprep.subr.bf16.mxu1 %v15235_v23  ;;  %v15287_v23 = vld [vmem:[#allocation4 + $0xe00] ss:$80 sps:$4 sm:$0xff]  }
 0x57b   : > { %v10413_v49 = vpop.f32.mrf.mxu0 }
 0x57c   : > { %10699 = vmatmul.mubr.bf16.vlgmr.msra.gmra.mxu1 %v15848_v57  ;;  %v16962_v13 = vadd.f32 %v10413_v49, %v16955_v63  ;;  %10724 = vmatpush2.bf16.msra.mxu0 %v15230_v50  ;;  %v15245_v63 = vld [vmem:[#allocation4 + $0x1758] ss:$80 sps:$4 sm:$0xff]  }
 0x57d   : > { %10749 = vmatpush1.bf16.msra.mxu1 %v15233_v2  ;;  %v10415_v31 = vpop.f32.mrf.mxu0  ;;  %10725 = vmatprep.subr.bf16.mxu0 %v15238_v55  ;;  %v15292_v2 = vld [vmem:[#allocation4 + $0x364] ss:$80 sps:$4 sm:$0xff]   ;;  %v4985_v49 = vld [vmem:[%s16980_s21] sm:$0xff] }
 0x57e   : > { %10750 = vmatprep.subr.bf16.mxu1 %v15241_v37  ;;  %v16965_v8 = vadd.f32 %v10415_v31, %v16957_v25  ;;  %10780 = vmatprep.mubr.bf16.mxu1 %v15862_v61  ;;  %v15256_v25 = vld [vmem:[#allocation4 + $0x111c] ss:$80 sps:$4 sm:$0xff]   ;;  %v15295_v55 = vld [vmem:[#allocation4 + $0xd64] ss:$80 sps:$4 sm:$0xff]  }
 0x57f   : > { %v10417_v16 = vpop.f32.mrf.mxu0  ;;  %v4990_v31 = vld [vmem:[%s16980_s21 + $0x28] sm:$0xff] }
 0x580   : > { %10726 = vmatpush2.bf16.msra.mxu0 %v15236_v22  ;;  %v15290_v22 = vld [vmem:[#allocation4 + $0x360] ss:$80 sps:$4 sm:$0xff]   ;;  %v15301_v16 = vld [vmem:[#allocation4 + $0xcc4] ss:$80 sps:$4 sm:$0xff]  }
 0x581   : > { %10751 = vmatpush1.bf16.msra.mxu1 %v15239_v54  ;;  %v10418_v45 = vpop.f32.mrf.mxu0  ;;  %10727 = vmatprep.subr.bf16.mxu0 %v15244_v0  ;;  %v15293_v54 = vld [vmem:[#allocation4 + $0xd60] ss:$80 sps:$4 sm:$0xff]  }
 0x582   : > { %10752 = vmatprep.subr.bf16.mxu1 %v15247_v29  ;;  %v15298_v29 = vld [vmem:[#allocation4 + $0x2c4] ss:$80 sps:$4 sm:$0xff]  }
 0x583   : > { %v4986_v45 = vld [vmem:[%s16980_s21 + $0x8] sm:$0xff] }
 0x584   : > { %10728 = vmatpush2.bf16.msra.mxu0 %v15242_v12  ;;  %v4991_v12 = vld [vmem:[%s16980_s21 + $0x30] sm:$0xff] }
 0x585   : > { %10753 = vmatpush1.bf16.msra.mxu1 %v15245_v63  ;;  %10729 = vmatprep.subr.bf16.mxu0 %v15250_v36  ;;  %v11035_v63 = vadd.f32 %v16898_v19, %v4985_v49  ;;  %v11040_v36 = vadd.f32 %v16933_v20, %v4990_v31  ;;  %v15302_v19 = vld [vmem:[#allocation4 + $0x220] ss:$80 sps:$4 sm:$0xff]   ;;  %v15310_v20 = vld [vmem:[#allocation4 + $0x184] ss:$80 sps:$4 sm:$0xff]  }
 0x586   : > { %10754 = vmatprep.subr.bf16.mxu1 %v15253_v27  ;;  %v15296_v27 = vld [vmem:[#allocation4 + $0x2c0] ss:$80 sps:$4 sm:$0xff]  }
 0x588   : > { %10730 = vmatpush2.bf16.msra.mxu0 %v15248_v21  ;;  %v15299_v21 = vld [vmem:[#allocation4 + $0xcc0] ss:$80 sps:$4 sm:$0xff]  }
 0x589   : > { %10755 = vmatpush1.bf16.msra.mxu1 %v15251_v48  ;;  %10731 = vmatprep.subr.bf16.mxu0 %v15256_v25  ;;  %v11041_v48 = vadd.f32 %v16945_v14, %v4991_v12  ;;  %v15304_v25 = vld [vmem:[#allocation4 + $0x224] ss:$80 sps:$4 sm:$0xff]   ;;  %v15308_v14 = vld [vmem:[#allocation4 + $0x180] ss:$80 sps:$4 sm:$0xff]  }
 0x58a   : > { %10756 = vmatprep.subr.bf16.mxu1 %v15259_v60  ;;  %v15307_v60 = vld [vmem:[#allocation4 + $0xc24] ss:$80 sps:$4 sm:$0xff]  }
 0x58c   : > { %10732 = vmatpush2.bf16.msra.mxu0 %v15254_v47  ;;  %v13222_v47 = vmul.f32 -1.442695, %v11035_v63  ;;  %v4995_v63 = vld [vmem:[%s16980_s21 + $0x50] sm:$0xff] }
 0x58d   : > { %10757 = vmatpush1.bf16.msra.mxu1 %v15257_v6  ;;  %10733 = vmatprep.subr.bf16.mxu0 %v15262_v35  ;;  %v11036_v6 = vadd.f32 %v16901_v58, %v4986_v45  ;;  %v13227_v35 = vmul.f32 -1.442695, %v11040_v36  ;;  %v15316_v58 = vld [vmem:[#allocation4 + $0xe4] ss:$80 sps:$4 sm:$0xff]  }
 0x58e   : > { %10758 = vmatprep.subr.bf16.mxu1 %v15265_v17  ;;  %v15305_v17 = vld [vmem:[#allocation4 + $0xc20] ss:$80 sps:$4 sm:$0xff]   ;;  %15518 = vpow2.f32 %v13222_v47 }
 0x58f   : > { %15520 = vpow2.f32 %v13227_v35  ;;  %v4996_v47 = vld [vmem:[%s16980_s21 + $0x58] sm:$0xff] }
 0x590   : > { %10734 = vmatpush2.bf16.msra.mxu0 %v15260_v4  ;;  %v13228_v4 = vmul.f32 -1.442695, %v11041_v48 }
 0x591   : > { %10759 = vmatpush1.bf16.msra.mxu1 %v15263_v40  ;;  %10735 = vmatprep.subr.bf16.mxu0 %v15268_v59  ;;  %v15313_v40 = vld [vmem:[#allocation4 + $0xb84] ss:$80 sps:$4 sm:$0xff]   ;;  %v13223_v59 = vmul.f32 -1.442695, %v11036_v6 }
 0x592   : > { %10760 = vmatprep.subr.bf16.mxu1 %v15271_v32  ;;  %v15311_v32 = vld [vmem:[#allocation4 + $0xb80] ss:$80 sps:$4 sm:$0xff]   ;;  %15522 = vpow2.f32 %v13228_v4 }
 0x593   : > { %15524 = vpow2.f32 %v13223_v59  ;;  %v15341_v4 = vld [vmem:[#allocation4 + $0x1260] ss:$80 sps:$4 sm:$0xff]   ;;  %v15346_v59 = vld [vmem:[#allocation4 + $0x7c4] ss:$80 sps:$4 sm:$0xff]  }
 0x594   : > { %10736 = vmatpush2.bf16.msra.mxu0 %v15266_v30  ;;  %v15319_v30 = vld [vmem:[#allocation4 + $0xae4] ss:$80 sps:$4 sm:$0xff]  }
 0x595   : > { %10761 = vmatpush1.bf16.msra.mxu1 %v15269_v51  ;;  %10737 = vmatprep.subr.bf16.mxu0 %v15274_v52  ;;  %v15314_v51 = vld [vmem:[#allocation4 + $0xe0] ss:$80 sps:$4 sm:$0xff]  }
 0x596   : > { %10762 = vmatprep.subr.bf16.mxu1 %v15277_v44  ;;  %v15317_v52 = vld [vmem:[#allocation4 + $0xae0] ss:$80 sps:$4 sm:$0xff]   ;;  %v15322_v44 = vld [vmem:[#allocation4 + $0x44] ss:$80 sps:$4 sm:$0xff]  }
 0x598   : > { %10738 = vmatpush2.bf16.msra.mxu0 %v15272_v38  ;;  %v15325_v38 = vld [vmem:[#allocation4 + $0xa44] ss:$80 sps:$4 sm:$0xff]  }
 0x599   : > { %10763 = vmatpush1.bf16.msra.mxu1 %v15275_v26  ;;  %10789 = vmatprep.subr.bf16.mxu0 %v15280_v11  ;;  %v15320_v26 = vld [vmem:[#allocation4 + $0x40] ss:$80 sps:$4 sm:$0xff]  }
 0x59a   : > { %10830 = vmatprep.subr.bf16.mxu1 %v15283_v62  ;;  %v15323_v11 = vld [vmem:[#allocation4 + $0xa40] ss:$80 sps:$4 sm:$0xff]   ;;  %v15328_v62 = vld [vmem:[#allocation4 + $0x9a4] ss:$80 sps:$4 sm:$0xff]  }
 0x59b   : > { %10740 = vmatmul.mubr.bf16.vlgmr.msra.gmra.mxu0 %v15840_v46 }
 0x59c   : > { %v16972_v7 = vpop.f32.mrf.mxu1  ;;  %10781 = vmatmul.mubr.bf16.vlgmr.msra.gmra.mxu1 %v15832_v42  ;;  %10790 = vmatpush1.bf16.msra.mxu0 %v15278_v9  ;;  %v15331_v9 = vld [vmem:[#allocation4 + $0x13a4] ss:$80 sps:$4 sm:$0xff]  }
 0x59d   : > { %10831 = vmatpush1.bf16.msra.mxu1 %v15281_v39  ;;  %10791 = vmatprep.subr.bf16.mxu0 %v15286_v10  ;;  %v15519_v39 = vpop.eup %15518  ;;  %v15326_v10 = vld [vmem:[#allocation4 + $0x9a0] ss:$80 sps:$4 sm:$0xff]  }
 0x59e   : > { %v16976_v50 = vpop.f32.mrf.mxu1  ;;  %10832 = vmatprep.subr.bf16.mxu1 %v15289_v18  ;;  %10821 = vmatprep.mubr.bf16.mxu0 %v15844_v1  ;;  %v15329_v18 = vld [vmem:[#allocation4 + $0x13a0] ss:$80 sps:$4 sm:$0xff]  }
 0x59f   : > { %10862 = vmatprep.mubr.bf16.mxu1 %v15836_v34 }
 0x5a0   : > { %v10458_v37 = vpop.f32.mrf.mxu1  ;;  %10792 = vmatpush1.bf16.msra.mxu0 %v15284_v33  ;;  %v15521_v33 = vpop.eup %15520 }
 0x5a1   : > { %10833 = vmatpush1.bf16.msra.mxu1 %v15287_v23  ;;  %10793 = vmatprep.subr.bf16.mxu0 %v15292_v2  ;;  %v15334_v23 = vld [vmem:[#allocation4 + $0x904] ss:$80 sps:$4 sm:$0xff]   ;;  %v11070_v37 = vadd.f32 1.0, %v15519_v39  ;;  %v11100_v31 = vadd.f32 1.0, %v15521_v33 }
 0x5a2   : > { %v10459_v0 = vpop.f32.mrf.mxu1  ;;  %10834 = vmatprep.subr.bf16.mxu1 %v15295_v55  ;;  %v15337_v2 = vld [vmem:[#allocation4 + $0x1304] ss:$80 sps:$4 sm:$0xff]   ;;  %v15523_v55 = vpop.eup %15522 }
 0x5a3   : > { %v11101_v12 = vadd.f32 1.0, %v15523_v55  ;;  %15526 = vrcp.f32 %v11070_v37 }
 0x5a4   : > { %10794 = vmatpush1.bf16.msra.mxu0 %v15290_v22  ;;  %15528 = vrcp.f32 %v11100_v31  ;;  %v15370_v31 = vld [vmem:[#allocation4 + $0x544] ss:$80 sps:$4 sm:$0xff]  }
 0x5a5   : > { %10835 = vmatpush1.bf16.msra.mxu1 %v15293_v54  ;;  %10795 = vmatprep.subr.bf16.mxu0 %v15298_v29  ;;  %v15525_v54 = vpop.eup %15524  ;;  %v15332_v29 = vld [vmem:[#allocation4 + $0x900] ss:$80 sps:$4 sm:$0xff]   ;;  %15530 = vrcp.f32 %v11101_v12 }
 0x5a6   : > { %10836 = vmatprep.subr.bf16.mxu1 %v15301_v16  ;;  %v15335_v16 = vld [vmem:[#allocation4 + $0x1300] ss:$80 sps:$4 sm:$0xff]  }
 0x5a7   : > { %v15368_v12 = vld [vmem:[#allocation4 + $0x540] ss:$80 sps:$4 sm:$0xff]  }
 0x5a8   : > { %10796 = vmatpush1.bf16.msra.mxu0 %v15296_v27  ;;  %v15340_v27 = vld [vmem:[#allocation4 + $0x864] ss:$80 sps:$4 sm:$0xff]  }
 0x5a9   : > { %10837 = vmatpush1.bf16.msra.mxu1 %v15299_v21  ;;  %10797 = vmatprep.subr.bf16.mxu0 %v15304_v25  ;;  %v15343_v21 = vld [vmem:[#allocation4 + $0x1264] ss:$80 sps:$4 sm:$0xff]  }
 0x5aa   : > { %10838 = vmatprep.subr.bf16.mxu1 %v15307_v60  ;;  %v11071_v60 = vadd.f32 1.0, %v15525_v54 }
 0x5ac   : > { %10798 = vmatpush1.bf16.msra.mxu0 %v15302_v19 }
 0x5ad   : > { %10839 = vmatpush1.bf16.msra.mxu1 %v15305_v17  ;;  %10799 = vmatprep.subr.bf16.mxu0 %v15310_v20  ;;  %v15338_v17 = vld [vmem:[#allocation4 + $0x860] ss:$80 sps:$4 sm:$0xff]  }
 0x5ae   : > { %10840 = vmatprep.subr.bf16.mxu1 %v15313_v40 }
 0x5b0   : > { %10800 = vmatpush1.bf16.msra.mxu0 %v15308_v14  ;;  %v15349_v14 = vld [vmem:[#allocation4 + $0x11c4] ss:$80 sps:$4 sm:$0xff]  }
 0x5b1   : > { %10841 = vmatpush1.bf16.msra.mxu1 %v15311_v32  ;;  %10801 = vmatprep.subr.bf16.mxu0 %v15316_v58  ;;  %v15344_v32 = vld [vmem:[#allocation4 + $0x7c0] ss:$80 sps:$4 sm:$0xff]  }
 0x5b2   : > { %10842 = vmatprep.subr.bf16.mxu1 %v15319_v30  ;;  %v15347_v58 = vld [vmem:[#allocation4 + $0x11c0] ss:$80 sps:$4 sm:$0xff]   ;;  %v15352_v30 = vld [vmem:[#allocation4 + $0x724] ss:$80 sps:$4 sm:$0xff]  }
 0x5b4   : > { %10802 = vmatpush1.bf16.msra.mxu0 %v15314_v51  ;;  %v15355_v51 = vld [vmem:[#allocation4 + $0x1124] ss:$80 sps:$4 sm:$0xff]  }
 0x5b5   : > { %10843 = vmatpush1.bf16.msra.mxu1 %v15317_v52  ;;  %10803 = vmatprep.subr.bf16.mxu0 %v15322_v44  ;;  %v15350_v52 = vld [vmem:[#allocation4 + $0x720] ss:$80 sps:$4 sm:$0xff]  }
 0x5b6   : > { %10844 = vmatprep.subr.bf16.mxu1 %v15325_v38  ;;  %v15353_v44 = vld [vmem:[#allocation4 + $0x1120] ss:$80 sps:$4 sm:$0xff]   ;;  %v15358_v38 = vld [vmem:[#allocation4 + $0x684] ss:$80 sps:$4 sm:$0xff]  }
 0x5b8   : > { %10804 = vmatpush1.bf16.msra.mxu0 %v15320_v26  ;;  %v15361_v26 = vld [vmem:[#allocation4 + $0x1084] ss:$80 sps:$4 sm:$0xff]  }
 0x5b9   : > { %10845 = vmatpush1.bf16.msra.mxu1 %v15323_v11  ;;  %10805 = vmatprep.subr.bf16.mxu0 %v15328_v62  ;;  %v15527_v11 = vpop.eup %15526  ;;  %v15356_v62 = vld [vmem:[#allocation4 + $0x680] ss:$80 sps:$4 sm:$0xff]  }
 0x5ba   : > { %10846 = vmatprep.subr.bf16.mxu1 %v15331_v9  ;;  %v15359_v9 = vld [vmem:[#allocation4 + $0x1080] ss:$80 sps:$4 sm:$0xff]   ;;  %v15529_v39 = vpop.eup %15528 }
 0x5bb   : > { %v10495_v49 = vpop.f32.mrf.mxu0  ;;  %v15531_v33 = vpop.eup %15530  ;;  %v11150_v55 = vmul.f32 %v15828_v43, %v15529_v39  ;;  %v15419_v39 = vld [vmem:[#allocation4 + $0x48] ss:$80 sps:$4 sm:$0xff]  }
 0x5bc   : > { %v10536_v22 = vpop.f32.mrf.mxu1  ;;  %v10496_v0 = vadd.f32 %v10495_v49, %v16972_v7  ;;  %10806 = vmatpush2.bf16.msra.mxu0 %v15326_v10  ;;  %v15364_v10 = vld [vmem:[#allocation4 + $0x5e4] ss:$80 sps:$4 sm:$0xff]   ;;  %v15362_v49 = vld [vmem:[#allocation4 + $0x5e0] ss:$80 sps:$4 sm:$0xff]  }
 0x5bd   : > { %10847 = vmatpush2.bf16.msra.mxu1 %v15329_v18  ;;  %v10497_v45 = vpop.f32.mrf.mxu0  ;;  %10807 = vmatprep.subr.bf16.mxu0 %v15334_v23  ;;  %v15367_v18 = vld [vmem:[#allocation4 + $0xfe4] ss:$80 sps:$4 sm:$0xff]  }
 0x5be   : > { %v10538_v36 = vpop.f32.mrf.mxu1  ;;  %10848 = vmatprep.subr.bf16.mxu1 %v15337_v2  ;;  %v10537_v48 = vadd.f32 %v10536_v22, %v10496_v0  ;;  %v10498_v25 = vadd.f32 %v10497_v45, %v16976_v50  ;;  %v15365_v22 = vld [vmem:[#allocation4 + $0xfe0] ss:$80 sps:$4 sm:$0xff]   ;;  %v15373_v0 = vld [vmem:[#allocation4 + $0xf44] ss:$80 sps:$4 sm:$0xff]  }
 0x5bf   : > { %v10499_v7 = vpop.f32.mrf.mxu0  ;;  %v15376_v45 = vld [vmem:[#allocation4 + $0x18a4] ss:$80 sps:$4 sm:$0xff]  }
 0x5c0   : > { %v10540_v6 = vpop.f32.mrf.mxu1  ;;  %v11045_v35 = vadd.f32 %v10537_v48, %v4995_v63  ;;  %v10539_v19 = vadd.f32 %v10538_v36, %v10498_v25  ;;  %10808 = vmatpush2.bf16.msra.mxu0 %v15332_v29  ;;  %v11151_v29 = vmul.f32 %v15824_v5, %v15531_v33  ;;  %v15371_v63 = vld [vmem:[#allocation4 + $0xf40] ss:$80 sps:$4 sm:$0xff]   ;;  %v15379_v36 = vld [vmem:[#allocation4 + $0x4ac] ss:$80 sps:$4 sm:$0xff]   ;;  %v15382_v48 = vld [vmem:[#allocation4 + $0x1804] ss:$80 sps:$4 sm:$0xff]  }
 0x5c1   : > { %10849 = vmatpush2.bf16.msra.mxu1 %v15335_v16  ;;  %v10500_v20 = vpop.f32.mrf.mxu0  ;;  %10809 = vmatprep.subr.bf16.mxu0 %v15340_v27  ;;  %v15374_v27 = vld [vmem:[#allocation4 + $0x18a0] ss:$80 sps:$4 sm:$0xff]   ;;  %v15385_v25 = vld [vmem:[#allocation4 + $0x40c] ss:$80 sps:$4 sm:$0xff]   ;;  %v15388_v7 = vld [vmem:[#allocation4 + $0x1764] ss:$80 sps:$4 sm:$0xff]  }
 0x5c2   : > { %v10541_v40 = vpop.f32.mrf.mxu1  ;;  %10850 = vmatprep.subr.bf16.mxu1 %v15343_v21  ;;  %15532 = vtanh.f32 %v11045_v35  ;;  %v11046_v50 = vadd.f32 %v10539_v19, %v4996_v47  ;;  %v15377_v21 = vld [vmem:[#allocation4 + $0x4a8] ss:$80 sps:$4 sm:$0xff]   ;;  %v15391_v6 = vld [vmem:[#allocation4 + $0x36c] ss:$80 sps:$4 sm:$0xff]   ;;  %v15386_v35 = vld [vmem:[#allocation4 + $0x1760] ss:$80 sps:$4 sm:$0xff]  }
 0x5c3   : > { %15534 = vrcp.f32 %v11071_v60  ;;  %v15380_v60 = vld [vmem:[#allocation4 + $0x1800] ss:$80 sps:$4 sm:$0xff]   ;;  %v15383_v47 = vld [vmem:[#allocation4 + $0x408] ss:$80 sps:$4 sm:$0xff]  }
 0x5c4   : > { %15536 = vtanh.f32 %v11046_v50  ;;  %10810 = vmatpush2.bf16.msra.mxu0 %v15338_v17  ;;  %v15389_v19 = vld [vmem:[#allocation4 + $0x368] ss:$80 sps:$4 sm:$0xff]   ;;  %v15394_v17 = vld [vmem:[#allocation4 + $0x16c4] ss:$80 sps:$4 sm:$0xff]   ;;  %v15392_v20 = vld [vmem:[#allocation4 + $0x16c0] ss:$80 sps:$4 sm:$0xff]  }
 0x5c5   : > { %10851 = vmatpush2.bf16.msra.mxu1 %v15341_v4  ;;  %10811 = vmatprep.subr.bf16.mxu0 %v15346_v59  ;;  %v15397_v4 = vld [vmem:[#allocation4 + $0x2cc] ss:$80 sps:$4 sm:$0xff]   ;;  %v15395_v40 = vld [vmem:[#allocation4 + $0x2c8] ss:$80 sps:$4 sm:$0xff]   ;;  %v15400_v59 = vld [vmem:[#allocation4 + $0x1624] ss:$80 sps:$4 sm:$0xff]  }
 0x5c6   : > { %10852 = vmatprep.subr.bf16.mxu1 %v15349_v14  ;;  %v15403_v14 = vld [vmem:[#allocation4 + $0x22c] ss:$80 sps:$4 sm:$0xff]   ;;  %v15398_v50 = vld [vmem:[#allocation4 + $0x1620] ss:$80 sps:$4 sm:$0xff]   ;;  %v15422_v33 = vld [vmem:[#allocation4 + $0x9a8] ss:$80 sps:$4 sm:$0xff]  }
 0x5c8   : > { %10812 = vmatpush2.bf16.msra.mxu0 %v15344_v32  ;;  %v15406_v32 = vld [vmem:[#allocation4 + $0x1584] ss:$80 sps:$4 sm:$0xff]  }
 0x5c9   : > { %10853 = vmatpush2.bf16.msra.mxu1 %v15347_v58  ;;  %10813 = vmatprep.subr.bf16.mxu0 %v15352_v30  ;;  %v15409_v58 = vld [vmem:[#allocation4 + $0x18c] ss:$80 sps:$4 sm:$0xff]   ;;  %v15404_v30 = vld [vmem:[#allocation4 + $0x1580] ss:$80 sps:$4 sm:$0xff]  }
 0x5ca   : > { %10854 = vmatprep.subr.bf16.mxu1 %v15355_v51  ;;  %v15407_v51 = vld [vmem:[#allocation4 + $0x188] ss:$80 sps:$4 sm:$0xff]  }
 0x5cc   : > { %10814 = vmatpush2.bf16.msra.mxu0 %v15350_v52  ;;  %v15412_v52 = vld [vmem:[#allocation4 + $0x14e4] ss:$80 sps:$4 sm:$0xff]  }
 0x5cd   : > { %10855 = vmatpush2.bf16.msra.mxu1 %v15353_v44  ;;  %10815 = vmatprep.subr.bf16.mxu0 %v15358_v38  ;;  %v15415_v44 = vld [vmem:[#allocation4 + $0xec] ss:$80 sps:$4 sm:$0xff]   ;;  %v15410_v38 = vld [vmem:[#allocation4 + $0x14e0] ss:$80 sps:$4 sm:$0xff]  }
 0x5ce   : > { %10856 = vmatprep.subr.bf16.mxu1 %v15361_v26  ;;  %v15413_v26 = vld [vmem:[#allocation4 + $0xe8] ss:$80 sps:$4 sm:$0xff]  }
 0x5cf   : > { %v15533_v23 = vpop.eup %15532 }
 0x5d0   : > { %v15535_v2 = vpop.eup %15534  ;;  %v11155_v37 = vmul.f32 %v15533_v23, %v15527_v11  ;;  %10816 = vmatpush2.bf16.msra.mxu0 %v15356_v62  ;;  %v15418_v11 = vld [vmem:[#allocation4 + $0x1444] ss:$80 sps:$4 sm:$0xff]   ;;  %v15421_v62 = vld [vmem:[#allocation4 + $0x4c] ss:$80 sps:$4 sm:$0xff]   ;;  %v15425_v23 = vld [vmem:[#allocation4 + $0xea8] ss:$80 sps:$4 sm:$0xff]  }
 0x5d1   : > { %10857 = vmatpush2.bf16.msra.mxu1 %v15359_v9  ;;  %v15537_v54 = vpop.eup %15536  ;;  %10817 = vmatprep.subr.bf16.mxu0 %v15364_v10  ;;  %v15416_v9 = vld [vmem:[#allocation4 + $0x1440] ss:$80 sps:$4 sm:$0xff]   ;;  %v15424_v10 = vld [vmem:[#allocation4 + $0x9ac] ss:$80 sps:$4 sm:$0xff]  }
 0x5d2   : > { %10858 = vmatprep.subr.bf16.mxu1 %v15367_v18  ;;  %v16995_v43 = vadd.f32 %v11155_v37, %v11150_v55   ;;  %v11156_v16 = vmul.f32 %v15537_v54, %v15535_v2  ;;  %v15427_v18 = vld [vmem:[#allocation4 + $0xeac] ss:$80 sps:$4 sm:$0xff]   ;;  %v15428_v54 = vld [vmem:[#allocation4 + $0x908] ss:$80 sps:$4 sm:$0xff]  }
 0x5d3   : > { %v15430_v2 = vld [vmem:[#allocation4 + $0x90c] ss:$80 sps:$4 sm:$0xff]  }
 0x5d4   : > { %v16998_v5 = vadd.f32 %v11156_v16, %v11151_v29   ;;  %10818 = vmatpush2.bf16.msra.mxu0 %v15362_v49  ;;  %v15433_v55 = vld [vmem:[#allocation4 + $0xe0c] ss:$80 sps:$4 sm:$0xff]  }
 0x5d5   : > { %10859 = vmatpush2.bf16.msra.mxu1 %v15365_v22  ;;  %10819 = vmatprep.subr.bf16.mxu0 %v15370_v31  ;;  %v15431_v31 = vld [vmem:[#allocation4 + $0xe08] ss:$80 sps:$4 sm:$0xff]   ;;  %v15436_v16 = vld [vmem:[#allocation4 + $0x86c] ss:$80 sps:$4 sm:$0xff]  }
 0x5d6   : > { %10860 = vmatprep.subr.bf16.mxu1 %v15373_v0 }
 0x5d8   : > { %10820 = vmatpush2.bf16.msra.mxu0 %v15368_v12  ;;  %v15439_v12 = vld [vmem:[#allocation4 + $0xd6c] ss:$80 sps:$4 sm:$0xff]  }
 0x5d9   : > { %10861 = vmatpush2.bf16.msra.mxu1 %v15371_v63  ;;  %10871 = vmatprep.subr.bf16.mxu0 %v15376_v45  ;;  %v4987_v63 = vld [vmem:[%s16980_s21 + $0x10] sm:$0xff] }
 0x5da   : > { %10912 = vmatprep.subr.bf16.mxu1 %v15379_v36  ;;  %v4992_v36 = vld [vmem:[%s16980_s21 + $0x38] sm:$0xff] }
 0x5db   : > { %10822 = vmatmul.mubr.bf16.vlgmr.msra.gmra.mxu0 %v15848_v57 }
 0x5dc   : > { %10863 = vmatmul.mubr.bf16.vlgmr.msra.gmra.mxu1 %v15840_v46  ;;  %10872 = vmatpush1.bf16.msra.mxu0 %v15374_v27 }
 0x5dd   : > { %10913 = vmatpush1.bf16.msra.mxu1 %v15377_v21  ;;  %10873 = vmatprep.subr.bf16.mxu0 %v15382_v48  ;;  %v4993_v48 = vld [vmem:[%s16980_s21 + $0x40] sm:$0xff] }
 0x5de   : > { %10914 = vmatprep.subr.bf16.mxu1 %v15385_v25  ;;  %10903 = vmatprep.mubr.bf16.mxu0 %v15862_v61  ;;  %v15434_v25 = vld [vmem:[#allocation4 + $0x868] ss:$80 sps:$4 sm:$0xff]  }
 0x5df   : > { %10944 = vmatprep.mubr.bf16.mxu1 %v15844_v1  ;;  %v15401_v1 = vld [vmem:[#allocation4 + $0x228] ss:$80 sps:$4 sm:$0xff]  }
 0x5e0   : > { %10874 = vmatpush1.bf16.msra.mxu0 %v15380_v60  ;;  %v15437_v60 = vld [vmem:[#allocation4 + $0xd68] ss:$80 sps:$4 sm:$0xff]  }
 0x5e1   : > { %10915 = vmatpush1.bf16.msra.mxu1 %v15383_v47  ;;  %10875 = vmatprep.subr.bf16.mxu0 %v15388_v7  ;;  %v11037_v47 = vadd.f32 %v16913_v3, %v4987_v63  ;;  %v15448_v3 = vld [vmem:[#allocation4 + $0x72c] ss:$80 sps:$4 sm:$0xff]  }
 0x5e2   : > { %10916 = vmatprep.subr.bf16.mxu1 %v15391_v6  ;;  %v4997_v63 = vld [vmem:[%s16980_s21 + $0x60] sm:$0xff] }
 0x5e4   : > { %10876 = vmatpush1.bf16.msra.mxu0 %v15386_v35  ;;  %v15442_v35 = vld [vmem:[#allocation4 + $0x7cc] ss:$80 sps:$4 sm:$0xff]  }
 0x5e5   : > { %10917 = vmatpush1.bf16.msra.mxu1 %v15389_v19  ;;  %10877 = vmatprep.subr.bf16.mxu0 %v15394_v17  ;;  %v15445_v19 = vld [vmem:[#allocation4 + $0xccc] ss:$80 sps:$4 sm:$0xff]   ;;  %v4988_v17 = vld [vmem:[%s16980_s21 + $0x18] sm:$0xff] }
 0x5e6   : > { %10918 = vmatprep.subr.bf16.mxu1 %v15397_v4  ;;  %v11043_v4 = vadd.f32 %v16962_v13, %v4993_v48  ;;  %v15454_v13 = vld [vmem:[#allocation4 + $0x68c] ss:$80 sps:$4 sm:$0xff]   ;;  %v15479_v48 = vld [vmem:[#allocation4 + $0x1808] ss:$80 sps:$4 sm:$0xff]  }
 0x5e8   : > { %10878 = vmatpush1.bf16.msra.mxu0 %v15392_v20  ;;  %v15440_v20 = vld [vmem:[#allocation4 + $0x7c8] ss:$80 sps:$4 sm:$0xff]  }
 0x5e9   : > { %10919 = vmatpush1.bf16.msra.mxu1 %v15395_v40  ;;  %10879 = vmatprep.subr.bf16.mxu0 %v15400_v59  ;;  %v15443_v40 = vld [vmem:[#allocation4 + $0xcc8] ss:$80 sps:$4 sm:$0xff]   ;;  %v13224_v59 = vmul.f32 -1.442695, %v11037_v47 }
 0x5ea   : > { %10920 = vmatprep.subr.bf16.mxu1 %v15403_v14  ;;  %v11038_v14 = vadd.f32 %v16916_v24, %v4988_v17  ;;  %v15452_v24 = vld [vmem:[#allocation4 + $0x688] ss:$80 sps:$4 sm:$0xff]  }
 0x5eb   : > { %15538 = vpow2.f32 %v13224_v59  ;;  %v15482_v17 = vld [vmem:[#allocation4 + $0x1268] ss:$80 sps:$4 sm:$0xff]  }
 0x5ec   : > { %10880 = vmatpush1.bf16.msra.mxu0 %v15398_v50  ;;  %v15451_v50 = vld [vmem:[#allocation4 + $0xc2c] ss:$80 sps:$4 sm:$0xff]   ;;  %v15491_v59 = vld [vmem:[#allocation4 + $0x16c8] ss:$80 sps:$4 sm:$0xff]  }
 0x5ed   : > { %10921 = vmatpush1.bf16.msra.mxu1 %v15401_v1  ;;  %10881 = vmatprep.subr.bf16.mxu0 %v15406_v32  ;;  %v13230_v32 = vmul.f32 -1.442695, %v11043_v4 }
 0x5ee   : > { %10922 = vmatprep.subr.bf16.mxu1 %v15409_v58  ;;  %v15446_v58 = vld [vmem:[#allocation4 + $0x728] ss:$80 sps:$4 sm:$0xff]  }
 0x5f0   : > { %10882 = vmatpush1.bf16.msra.mxu0 %v15404_v30  ;;  %v15449_v30 = vld [vmem:[#allocation4 + $0xc28] ss:$80 sps:$4 sm:$0xff]  }
 0x5f1   : > { %10923 = vmatpush1.bf16.msra.mxu1 %v15407_v51  ;;  %10883 = vmatprep.subr.bf16.mxu0 %v15412_v52  ;;  %v15457_v51 = vld [vmem:[#allocation4 + $0xb8c] ss:$80 sps:$4 sm:$0xff]   ;;  %v15455_v52 = vld [vmem:[#allocation4 + $0xb88] ss:$80 sps:$4 sm:$0xff]  }
 0x5f2   : > { %10924 = vmatprep.subr.bf16.mxu1 %v15415_v44  ;;  %v15460_v44 = vld [vmem:[#allocation4 + $0x5ec] ss:$80 sps:$4 sm:$0xff]  }
 0x5f4   : > { %10884 = vmatpush1.bf16.msra.mxu0 %v15410_v38  ;;  %v15463_v38 = vld [vmem:[#allocation4 + $0xaec] ss:$80 sps:$4 sm:$0xff]  }
 0x5f5   : > { %10925 = vmatpush1.bf16.msra.mxu1 %v15413_v26  ;;  %10885 = vmatprep.subr.bf16.mxu0 %v15418_v11  ;;  %v15458_v26 = vld [vmem:[#allocation4 + $0x5e8] ss:$80 sps:$4 sm:$0xff]  }
 0x5f6   : > { %10926 = vmatprep.subr.bf16.mxu1 %v15421_v62  ;;  %v15461_v11 = vld [vmem:[#allocation4 + $0xae8] ss:$80 sps:$4 sm:$0xff]   ;;  %v15466_v62 = vld [vmem:[#allocation4 + $0x54c] ss:$80 sps:$4 sm:$0xff]  }
 0x5f8   : > { %10886 = vmatpush1.bf16.msra.mxu0 %v15416_v9  ;;  %v15469_v9 = vld [vmem:[#allocation4 + $0xa4c] ss:$80 sps:$4 sm:$0xff]  }
 0x5f9   : > { %10927 = vmatpush1.bf16.msra.mxu1 %v15419_v39  ;;  %10953 = vmatprep.subr.bf16.mxu0 %v15427_v18  ;;  %v15464_v39 = vld [vmem:[#allocation4 + $0x548] ss:$80 sps:$4 sm:$0xff]   ;;  %v15472_v18 = vld [vmem:[#allocation4 + $0x13ac] ss:$80 sps:$4 sm:$0xff]  }
 0x5fa   : > { %10928 = vmatprep.subr.bf16.mxu1 %v15424_v10  ;;  %v15467_v10 = vld [vmem:[#allocation4 + $0xa48] ss:$80 sps:$4 sm:$0xff]  }
 0x5fb   : > { %v10577_v37 = vpop.f32.mrf.mxu0  ;;  %10904 = vmatmul.mubr.bf16.vlgmr.msra.gmra.mxu0 %v15832_v42 }
 0x5fc   : > { %v10618_v49 = vpop.f32.mrf.mxu1  ;;  %10954 = vmatpush1.bf16.msra.mxu0 %v15425_v23  ;;  %10985 = vmatprep.mubr.bf16.mxu0 %v15836_v34  ;;  %v11042_v34 = vadd.f32 %v16948_v41, %v4992_v36  ;;  %v13225_v41 = vmul.f32 -1.442695, %v11038_v14  ;;  %v15539_v23 = vpop.eup %15538  ;;  %v15499_v14 = vld [vmem:[#allocation4 + $0x162c] ss:$80 sps:$4 sm:$0xff]  }
 0x5fd   : > { %v17005_v22 = vadd.f32 %v10618_v49, %v10577_v37  ;;  %10929 = vmatpush2.bf16.msra.mxu1 %v15422_v33  ;;  %v10579_v0 = vpop.f32.mrf.mxu0  ;;  %10955 = vmatprep.subr.bf16.mxu0 %v15433_v55  ;;  %v15475_v33 = vld [vmem:[#allocation4 + $0x18ac] ss:$80 sps:$4 sm:$0xff]   ;;  %v15470_v37 = vld [vmem:[#allocation4 + $0x13a8] ss:$80 sps:$4 sm:$0xff]  }
 0x5fe   : > { %v10620_v29 = vpop.f32.mrf.mxu1  ;;  %10930 = vmatprep.subr.bf16.mxu1 %v15430_v2  ;;  %v13229_v1 = vmul.f32 -1.442695, %v11042_v34  ;;  %v15473_v49 = vld [vmem:[#allocation4 + $0x18a8] ss:$80 sps:$4 sm:$0xff]  }
 0x5ff   : > { %v17008_v45 = vadd.f32 %v10620_v29, %v10579_v0  ;;  %v10581_v27 = vpop.f32.mrf.mxu0  ;;  %v15481_v0 = vld [vmem:[#allocation4 + $0x180c] ss:$80 sps:$4 sm:$0xff]   ;;  %v15485_v34 = vld [vmem:[#allocation4 + $0x1768] ss:$80 sps:$4 sm:$0xff]  }
 0x600   : > { %v10622_v21 = vpop.f32.mrf.mxu1  ;;  %10956 = vmatpush1.bf16.msra.mxu0 %v15431_v31  ;;  %15540 = vpow2.f32 %v13229_v1  ;;  %v15478_v31 = vld [vmem:[#allocation4 + $0x130c] ss:$80 sps:$4 sm:$0xff]  }
 0x601   : > { %10931 = vmatpush2.bf16.msra.mxu1 %v15428_v54  ;;  %v10582_v7 = vpop.f32.mrf.mxu0  ;;  %10957 = vmatprep.subr.bf16.mxu0 %v15439_v12  ;;  %15542 = vpow2.f32 %v13230_v32  ;;  %v11072_v54 = vadd.f32 1.0, %v15539_v23  ;;  %v15476_v21 = vld [vmem:[#allocation4 + $0x1308] ss:$80 sps:$4 sm:$0xff]   ;;  %v15502_v1 = vld [vmem:[#allocation4 + $0x108c] ss:$80 sps:$4 sm:$0xff]  }
 0x602   : > { %v10623_v6 = vpop.f32.mrf.mxu1  ;;  %10932 = vmatprep.subr.bf16.mxu1 %v15436_v16  ;;  %15544 = vpow2.f32 %v13225_v41  ;;  %v15484_v7 = vld [vmem:[#allocation4 + $0x126c] ss:$80 sps:$4 sm:$0xff]  }
 0x603   : > { %15546 = vrcp.f32 %v11072_v54  ;;  %v15487_v6 = vld [vmem:[#allocation4 + $0x176c] ss:$80 sps:$4 sm:$0xff]  }
 0x604   : > { %10958 = vmatpush1.bf16.msra.mxu0 %v15437_v60  ;;  %v4998_v60 = vld [vmem:[%s16980_s21 + $0x68] sm:$0xff]  ;;  %v15505_v32 = vld [vmem:[#allocation4 + $0x158c] ss:$80 sps:$4 sm:$0xff]  }
 0x605   : > { %10933 = vmatpush2.bf16.msra.mxu1 %v15434_v25  ;;  %10959 = vmatprep.subr.bf16.mxu0 %v15445_v19  ;;  %v15517_v23 = vld [vmem:[#allocation4 + $0x144c] ss:$80 sps:$4 sm:$0xff]  }
 0x606   : > { %10934 = vmatprep.subr.bf16.mxu1 %v15442_v35 }
 0x608   : > { %10960 = vmatpush1.bf16.msra.mxu0 %v15443_v40  ;;  %v15493_v40 = vld [vmem:[#allocation4 + $0x16cc] ss:$80 sps:$4 sm:$0xff]  }
 0x609   : > { %10935 = vmatpush2.bf16.msra.mxu1 %v15440_v20  ;;  %10961 = vmatprep.subr.bf16.mxu0 %v15451_v50  ;;  %v15490_v20 = vld [vmem:[#allocation4 + $0x11cc] ss:$80 sps:$4 sm:$0xff]   ;;  %v15497_v50 = vld [vmem:[#allocation4 + $0x1628] ss:$80 sps:$4 sm:$0xff]  }
 0x60a   : > { %10936 = vmatprep.subr.bf16.mxu1 %v15448_v3  ;;  %v15494_v3 = vld [vmem:[#allocation4 + $0x1128] ss:$80 sps:$4 sm:$0xff]  }
 0x60c   : > { %10962 = vmatpush1.bf16.msra.mxu0 %v15449_v30 }
 0x60d   : > { %10937 = vmatpush2.bf16.msra.mxu1 %v15446_v58  ;;  %10963 = vmatprep.subr.bf16.mxu0 %v15457_v51  ;;  %v15541_v2 = vpop.eup %15540  ;;  %v15503_v51 = vld [vmem:[#allocation4 + $0x1588] ss:$80 sps:$4 sm:$0xff]  }
 0x60e   : > { %10938 = vmatprep.subr.bf16.mxu1 %v15454_v13  ;;  %v15543_v55 = vpop.eup %15542  ;;  %v11102_v16 = vadd.f32 1.0, %v15541_v2  ;;  %v15500_v13 = vld [vmem:[#allocation4 + $0x1088] ss:$80 sps:$4 sm:$0xff]  }
 0x60f   : > { %v15545_v29 = vpop.eup %15544  ;;  %v11103_v12 = vadd.f32 1.0, %v15543_v55  ;;  %v15512_v2 = vld [vmem:[#allocation4 + $0xf48] ss:$80 sps:$4 sm:$0xff]  }
 0x610   : > { %10964 = vmatpush1.bf16.msra.mxu0 %v15455_v52  ;;  %v11073_v25 = vadd.f32 1.0, %v15545_v29  ;;  %15548 = vrcp.f32 %v11102_v16  ;;  %v15547_v58 = vpop.eup %15546  ;;  %v15508_v52 = vld [vmem:[#allocation4 + $0xfec] ss:$80 sps:$4 sm:$0xff]   ;;  %v15515_v55 = vld [vmem:[#allocation4 + $0x1448] ss:$80 sps:$4 sm:$0xff]  }
 0x611   : > { %10939 = vmatpush2.bf16.msra.mxu1 %v15452_v24  ;;  %10965 = vmatprep.subr.bf16.mxu0 %v15463_v38  ;;  %15550 = vrcp.f32 %v11103_v12  ;;  %v4989_v29 = vld [vmem:[%s16980_s21 + $0x20] sm:$0xff] }
 0x612   : > { %10940 = vmatprep.subr.bf16.mxu1 %v15460_v44  ;;  %v15511_v44 = vld [vmem:[#allocation4 + $0x14ec] ss:$80 sps:$4 sm:$0xff]   ;;  %v11039_v12 = vadd.f32 %v16930_v15, %v4989_v29 }
 0x614   : > { %10966 = vmatpush1.bf16.msra.mxu0 %v15461_v11 }
 0x615   : > { %10941 = vmatpush2.bf16.msra.mxu1 %v15458_v26  ;;  %10967 = vmatprep.subr.bf16.mxu0 %v15469_v9 }
 0x616   : > { %10942 = vmatprep.subr.bf16.mxu1 %v15466_v62 }
 0x618   : > { %10968 = vmatpush1.bf16.msra.mxu0 %v15467_v10  ;;  %v15506_v10 = vld [vmem:[#allocation4 + $0xfe8] ss:$80 sps:$4 sm:$0xff]  }
 0x619   : > { %10943 = vmatpush2.bf16.msra.mxu1 %v15464_v39  ;;  %10969 = vmatprep.subr.bf16.mxu0 %v15472_v18  ;;  %v15509_v18 = vld [vmem:[#allocation4 + $0x14e8] ss:$80 sps:$4 sm:$0xff]  }
 0x61a   : > { %10994 = vmatprep.subr.bf16.mxu1 %v15475_v33  ;;  %v15514_v33 = vld [vmem:[#allocation4 + $0xf4c] ss:$80 sps:$4 sm:$0xff]  }
 0x61b   : > { %v10659_v36 = vpop.f32.mrf.mxu0 }
 0x61c   : > { %10945 = vmatmul.mubr.bf16.vlgmr.msra.gmra.mxu1 %v15848_v57  ;;  %v10660_v27 = vadd.f32 %v10659_v36, %v17005_v22  ;;  %10970 = vmatpush2.bf16.msra.mxu0 %v15470_v37  ;;  %v13226_v36 = vmul.f32 -1.442695, %v11039_v12 }
 0x61d   : > { %10995 = vmatpush1.bf16.msra.mxu1 %v15473_v49  ;;  %v10661_v47 = vpop.f32.mrf.mxu0  ;;  %10971 = vmatprep.subr.bf16.mxu0 %v15478_v31  ;;  %v15549_v30 = vpop.eup %15548  ;;  %v4994_v31 = vld [vmem:[%s16980_s21 + $0x48] sm:$0xff] }
 0x61e   : > { %10996 = vmatprep.subr.bf16.mxu1 %v15481_v0  ;;  %v11047_v35 = vadd.f32 %v10660_v27, %v4997_v63  ;;  %v10662_v19 = vadd.f32 %v10661_v47, %v17008_v45  ;;  %11026 = vmatprep.mubr.bf16.mxu1 %v15862_v61  ;;  %v15488_v45 = vld [vmem:[#allocation4 + $0x11c8] ss:$80 sps:$4 sm:$0xff]   ;;  %v15496_v61 = vld [vmem:[#allocation4 + $0x112c] ss:$80 sps:$4 sm:$0xff]   ;;  %v15551_v41 = vpop.eup %15550  ;;  %v11152_v26 = vmul.f32 %v15820_v56, %v15549_v30 }
 0x61f   : > { %v10663_v57 = vpop.f32.mrf.mxu0  ;;  %v11153_v9 = vmul.f32 %v15816_v53, %v15551_v41  ;;  %v11044_v16 = vadd.f32 %v16965_v8, %v4994_v31  ;;  %v4999_v47 = vld [vmem:[%s16980_s21 + $0x70] sm:$0xff]  ;;  %v5000_v8 = vld [vmem:[%s16980_s21 + $0x78] sm:$0xff] }
 0x620   : > { %15552 = vtanh.f32 %v11047_v35  ;;  %v11048_v22 = vadd.f32 %v10662_v19, %v4998_v60  ;;  %10972 = vmatpush2.bf16.msra.mxu0 %v15476_v21 }
 0x621   : > { %10997 = vmatpush1.bf16.msra.mxu1 %v15479_v48  ;;  %15554 = vrcp.f32 %v11073_v25  ;;  %v10664_v4 = vpop.f32.mrf.mxu0  ;;  %10973 = vmatprep.subr.bf16.mxu0 %v15484_v7  ;;  %v13231_v63 = vmul.f32 -1.442695, %v11044_v16 }
 0x622   : > { %10998 = vmatprep.subr.bf16.mxu1 %v15487_v6  ;;  %15556 = vtanh.f32 %v11048_v22 }
 0x623   : > { %15558 = vpow2.f32 %v13231_v63 }
 0x624   : > { %10974 = vmatpush2.bf16.msra.mxu0 %v15482_v17  ;;  %15560 = vpow2.f32 %v13226_v36 }
 0x625   : > { %10999 = vmatpush1.bf16.msra.mxu1 %v15485_v34  ;;  %10975 = vmatprep.subr.bf16.mxu0 %v15490_v20 }
 0x626   : > { %11000 = vmatprep.subr.bf16.mxu1 %v15493_v40 }
 0x628   : > { %10976 = vmatpush2.bf16.msra.mxu0 %v15488_v45 }
 0x629   : > { %11001 = vmatpush1.bf16.msra.mxu1 %v15491_v59  ;;  %10977 = vmatprep.subr.bf16.mxu0 %v15496_v61 }
 0x62a   : > { %11002 = vmatprep.subr.bf16.mxu1 %v15499_v14 }
 0x62c   : > { %10978 = vmatpush2.bf16.msra.mxu0 %v15494_v3 }
 0x62d   : > { %11003 = vmatpush1.bf16.msra.mxu1 %v15497_v50  ;;  %v15553_v24 = vpop.eup %15552  ;;  %10979 = vmatprep.subr.bf16.mxu0 %v15502_v1 }
 0x62e   : > { %11004 = vmatprep.subr.bf16.mxu1 %v15505_v32  ;;  %v15555_v38 = vpop.eup %15554  ;;  %v11157_v11 = vmul.f32 %v15553_v24, %v15547_v58 }
 0x62f   : > { %v15557_v62 = vpop.eup %15556 }
 0x630   : > { %v17025_v56 = vadd.f32 %v11157_v11, %v11152_v26   ;;  %v11158_v39 = vmul.f32 %v15557_v62, %v15555_v38  ;;  %10980 = vmatpush2.bf16.msra.mxu0 %v15500_v13  ;;  %v15559_v27 = vpop.eup %15558  ;;  %v5001_v62 = vld [vmem:[%s16980_s21 + $0x80] sm:$0xff] }
 0x631   : > { %11005 = vmatpush1.bf16.msra.mxu1 %v15503_v51  ;;  %10981 = vmatprep.subr.bf16.mxu0 %v15508_v52  ;;  %v15561_v21 = vpop.eup %15560 }
 0x632   : > { %11006 = vmatprep.subr.bf16.mxu1 %v15511_v44  ;;  %v17028_v53 = vadd.f32 %v11158_v39, %v11153_v9   ;;  %v11074_v60 = vadd.f32 1.0, %v15561_v21 }
 0x634   : > { %10982 = vmatpush2.bf16.msra.mxu0 %v15506_v10 }
 0x635   : > { %11007 = vmatpush1.bf16.msra.mxu1 %v15509_v18  ;;  %10983 = vmatprep.subr.bf16.mxu0 %v15514_v33  ;;  %v5002_v18 = vld [vmem:[%s16980_s21 + $0x88] sm:$0xff] }
 0x636   : > { %11008 = vmatprep.subr.bf16.mxu1 %v15517_v23 }
 0x638   : > { %10984 = vmatpush2.bf16.msra.mxu0 %v15512_v2 }
 0x639   : > { %11009 = vmatpush1.bf16.msra.mxu1 %v15515_v55 }
 0x63b   : > { %10986 = vmatmul.mubr.bf16.vlgmr.msra.gmra.mxu0 %v15840_v46 }
 0x63c   : > { %v10700_v37 = vpop.f32.mrf.mxu1  ;;  %11027 = vmatmul.mubr.bf16.vlgmr.msra.gmra.mxu1 %v15832_v42  ;;  %v11104_v42 = vadd.f32 1.0, %v15559_v27 }
 0x63e   : > { %v10702_v49 = vpop.f32.mrf.mxu1  ;;  %15562 = vrcp.f32 %v11104_v42 }
 0x63f   : > { %15564 = vrcp.f32 %v11074_v60 }
 0x640   : > { %v10704_v54 = vpop.f32.mrf.mxu1 }
 0x642   : > { %v10705_v0 = vpop.f32.mrf.mxu1 }
 0x64b   : > { %v15563_v45 = vpop.eup %15562 }
 0x64c   : > { %v15565_v59 = vpop.eup %15564  ;;  %v11154_v14 = vmul.f32 %v15812_v28, %v15563_v45 }
 0x65b   : > { %v10741_v46 = vpop.f32.mrf.mxu0 }
 0x65c   : > { %v10782_v48 = vpop.f32.mrf.mxu1  ;;  %v10742_v25 = vadd.f32 %v10741_v46, %v10700_v37 }
 0x65d   : > { %v10743_v7 = vpop.f32.mrf.mxu0 }
 0x65e   : > { %v10784_v6 = vpop.f32.mrf.mxu1  ;;  %v10783_v35 = vadd.f32 %v10782_v48, %v10742_v25  ;;  %v10744_v19 = vadd.f32 %v10743_v7, %v10702_v49 }
 0x65f   : > { %v10745_v57 = vpop.f32.mrf.mxu0 }
 0x660   : > { %v10786_v15 = vpop.f32.mrf.mxu1  ;;  %v11049_v22 = vadd.f32 %v10783_v35, %v4999_v47  ;;  %v10785_v17 = vadd.f32 %v10784_v6, %v10744_v19  ;;  %v5003_v19 = vld [vmem:[%s16980_s21 + $0x90] sm:$0xff] }
 0x661   : > { %v10746_v34 = vpop.f32.mrf.mxu0 }
 0x662   : > { %v10787_v4 = vpop.f32.mrf.mxu1  ;;  %15566 = vtanh.f32 %v11049_v22  ;;  %v11050_v20 = vadd.f32 %v10785_v17, %v5000_v8  ;;  %v5004_v34 = vld [vmem:[%s16980_s21 + $0x98] sm:$0xff] }
 0x664   : > { %v13232_v40 = vmul.f32 -1.442695, %v11050_v20 }
 0x666   : > { %15568 = vpow2.f32 %v13232_v40 }
 0x667   : > { %15570 = vtanh.f32 %v16995_v43 }
 0x66f   : > { %v15567_v61 = vpop.eup %15566 }
 0x670   : > { %v11159_v3 = vmul.f32 %v15567_v61, %v15565_v59 }
 0x672   : > { %v17039_v28 = vadd.f32 %v11159_v3, %v11154_v14  }
 0x673   : > { %v15569_v50 = vpop.eup %15568 }
 0x674   : > { %v11135_v1 = vadd.f32 1.0, %v15569_v50  ;;  %v15571_v32 = vpop.eup %15570 }
 0x676   : > { %15572 = vrcp.f32 %v11135_v1 }
 0x683   : > { %v15573_v58 = vpop.eup %15572 }
 0x684   : > { %v17043_v57 = vmul.f32 %v15573_v58, %v15571_v32 }
 0x686   : > { %11178 = vst [vmem:[%s17045_s23] sm:$0xff] %v17043_v57  ;;  %v11183_v30 = vpack.c.bf16 %v17043_v57, %v17043_v57  }
 0x688   : > { %v17172_v57 = vmov %v11183_v30 }
 0x69b   : > { %v10823_v41 = vpop.f32.mrf.mxu0 }
 0x69c   : > { %v10864_v13 = vpop.f32.mrf.mxu1 }
 0x69d   : > { %v10825_v51 = vpop.f32.mrf.mxu0  ;;  %v10865_v11 = vadd.f32 %v10864_v13, %v10823_v41 }
 0x69e   : > { %v10866_v24 = vpop.f32.mrf.mxu1 }
 0x69f   : > { %v10827_v52 = vpop.f32.mrf.mxu0  ;;  %v10867_v39 = vadd.f32 %v10866_v24, %v10825_v51 }
 0x6a0   : > { %v10868_v44 = vpop.f32.mrf.mxu1 }
 0x6a1   : > { %v10828_v38 = vpop.f32.mrf.mxu0 }
 0x6a2   : > { %v10869_v26 = vpop.f32.mrf.mxu1 }
 0x6bb   : > { %v10905_v9 = vpop.f32.mrf.mxu0 }
 0x6bc   : > { %v10906_v10 = vadd.f32 %v10905_v9, %v10865_v11 }
 0x6bd   : > { %v10907_v33 = vpop.f32.mrf.mxu0 }
 0x6be   : > { %v11051_v23 = vadd.f32 %v10906_v10, %v5001_v62  ;;  %v10908_v2 = vadd.f32 %v10907_v33, %v10867_v39 }
 0x6bf   : > { %v10909_v55 = vpop.f32.mrf.mxu0 }
 0x6c0   : > { %v13233_v37 = vmul.f32 -1.442695, %v11051_v23  ;;  %v11052_v49 = vadd.f32 %v10908_v2, %v5002_v18 }
 0x6c1   : > { %v10910_v54 = vpop.f32.mrf.mxu0 }
 0x6c2   : > { %15574 = vpow2.f32 %v13233_v37  ;;  %v13234_v31 = vmul.f32 -1.442695, %v11052_v49 }
 0x6c4   : > { %15576 = vpow2.f32 %v13234_v31 }
 0x6c5   : > { %15578 = vtanh.f32 %v16998_v5 }
 0x6cf   : > { %v15575_v0 = vpop.eup %15574 }
 0x6d0   : > { %v11136_v29 = vadd.f32 1.0, %v15575_v0 }
 0x6d1   : > { %v15577_v16 = vpop.eup %15576 }
 0x6d2   : > { %15580 = vrcp.f32 %v11136_v29  ;;  %v11137_v12 = vadd.f32 1.0, %v15577_v16  ;;  %v15579_v27 = vpop.eup %15578 }
 0x6d3   : > { %15582 = vtanh.f32 %v17025_v56 }
 0x6d4   : > { %15584 = vrcp.f32 %v11137_v12 }
 0x6dc   : > { %v10946_v63 = vpop.f32.mrf.mxu1 }
 0x6de   : > { %v10948_v36 = vpop.f32.mrf.mxu1 }
 0x6df   : > { %v15581_v21 = vpop.eup %15580 }
 0x6e0   : > { %v10950_v46 = vpop.f32.mrf.mxu1  ;;  %v15583_v48 = vpop.eup %15582  ;;  %v11171_v42 = vmul.f32 %v15581_v21, %v15579_v27 }
 0x6e1   : > { %v15585_v25 = vpop.eup %15584 }
 0x6e2   : > { %v10951_v60 = vpop.f32.mrf.mxu1  ;;  %11179 = vst [vmem:[%s17045_s23 + $0x8] sm:$0xff] %v11171_v42  ;;  %v11184_v1 = vpack.c.bf16 %v11171_v42, %v11171_v42   ;;  %v11172_v47 = vmul.f32 %v15585_v25, %v15583_v48 }
 0x6e4   : > { %11180 = vst [vmem:[%s17045_s23 + $0x10] sm:$0xff] %v11172_v47  ;;  %v11185_v46 = vpack.c.bf16 %v11172_v47, %v11172_v47  }
 0x6fb   : > { %v10987_v7 = vpop.f32.mrf.mxu0 }
 0x6fc   : > { %v11028_v6 = vpop.f32.mrf.mxu1  ;;  %v10988_v35 = vadd.f32 %v10987_v7, %v10946_v63 }
 0x6fd   : > { %v10989_v8 = vpop.f32.mrf.mxu0 }
 0x6fe   : > { %v11030_v15 = vpop.f32.mrf.mxu1  ;;  %v11029_v22 = vadd.f32 %v11028_v6, %v10988_v35  ;;  %v10990_v17 = vadd.f32 %v10989_v8, %v10948_v36 }
 0x6ff   : > { %v10991_v4 = vpop.f32.mrf.mxu0 }
 0x700   : > { %v11032_v20 = vpop.f32.mrf.mxu1  ;;  %v11053_v40 = vadd.f32 %v11029_v22, %v5003_v19  ;;  %v11031_v45 = vadd.f32 %v11030_v15, %v10990_v17 }
 0x701   : > { %v10992_v59 = vpop.f32.mrf.mxu0 }
 0x702   : > { %v11033_v61 = vpop.f32.mrf.mxu1  ;;  %v13235_v14 = vmul.f32 -1.442695, %v11053_v40  ;;  %v11054_v3 = vadd.f32 %v11031_v45, %v5004_v34 }
 0x704   : > { %15586 = vpow2.f32 %v13235_v14  ;;  %v13236_v50 = vmul.f32 -1.442695, %v11054_v3 }
 0x706   : > { %15588 = vpow2.f32 %v13236_v50 }
 0x707   : > { %15590 = vtanh.f32 %v17028_v53 }
 0x711   : > { %v15587_v32 = vpop.eup %15586 }
 0x712   : > { %v11138_v58 = vadd.f32 1.0, %v15587_v32 }
 0x713   : > { %v15589_v41 = vpop.eup %15588 }
 0x714   : > { %15592 = vrcp.f32 %v11138_v58  ;;  %v11139_v13 = vadd.f32 1.0, %v15589_v41  ;;  %v15591_v51 = vpop.eup %15590 }
 0x715   : > { %15594 = vtanh.f32 %v17039_v28 }
 0x716   : > { %15596 = vrcp.f32 %v11139_v13 }
 0x721   : > { %v15593_v24 = vpop.eup %15592 }
 0x722   : > { %v15595_v52 = vpop.eup %15594  ;;  %v11173_v44 = vmul.f32 %v15593_v24, %v15591_v51  ;;  %4967 = sbr.rel (!%p4965_p11) target bundleno = 794 (0x31a), region = 67 }
 0x723   : > { %v15597_v38 = vpop.eup %15596 }
 0x724   : > { %11181 = vst [vmem:[%s17045_s23 + $0x18] sm:$0xff] %v11173_v44  ;;  %v11186_v34 = vpack.c.bf16 %v11173_v44, %v11173_v44   ;;  %v11174_v26 = vmul.f32 %v15597_v38, %v15595_v52 }
 0x726   : > { %11182 = vst [vmem:[%s17045_s23 + $0x20] sm:$0xff] %v11174_v26  ;;  %v11187_v42 = vpack.c.bf16 %v11174_v26, %v11174_v26  }
 0x727   :  { %15808 = dma.done.wait [#allocation6 + $0x1], 5120 }
 0x728   :  { %15809 = vsyncadd [#allocation6 + $0x1], 4294962176  ;;  %v15598_v11 = vld [vmem:[#allocation5 + $0x78] sm:$0xff]   ;;  %v15602_v10 = vld [vmem:[#allocation5 + $0x70] sm:$0xff]   ;;  %v15863_v19 = vmov 0.0   ;;  %vm15864_vm0 = vmmov 0  }
 0x729   :  { %v15599_v62 = vld [vmem:[#allocation5 + $0xf8] sm:$0xff]   ;;  %13283 = vmatprep.subr.bf16.mxu0 %v15598_v11  ;;  %v15603_v18 = vld [vmem:[#allocation5 + $0xf0] sm:$0xff]   ;;  %v15606_v30 = vld [vmem:[#allocation5 + $0x68] sm:$0xff]  }
 0x72a   :  { %v15600_v9 = vld [vmem:[#allocation5 + $0x38] sm:$0xff]   ;;  %13329 = vmatprep.subr.bf16.mxu1 %v15599_v62  ;;  %v15604_v33 = vld [vmem:[#allocation5 + $0x30] sm:$0xff]   ;;  %v15607_v23 = vld [vmem:[#allocation5 + $0xe8] sm:$0xff]  }
 0x72b   :  { %v15601_v39 = vld [vmem:[#allocation5 + $0xb8] sm:$0xff]   ;;  %13284 = vmatpush3.bf16.msra.mxu0 %v15600_v9  ;;  %v15605_v57 = vld [vmem:[#allocation5 + $0xb0] sm:$0xff]   ;;  %v15608_v28 = vld [vmem:[#allocation5 + $0x28] sm:$0xff]  }
 0x72c   :  { %13330 = vmatpush3.bf16.msra.mxu1 %v15601_v39  ;;  %13285 = vmatprep.subr.bf16.mxu0 %v15602_v10  ;;  %v15609_v53 = vld [vmem:[#allocation5 + $0xa8] sm:$0xff]   ;;  %v15610_v56 = vld [vmem:[#allocation5 + $0x60] sm:$0xff]   ;;  %v15614_v2 = vld [vmem:[#allocation5 + $0x58] sm:$0xff]  }
 0x72d   :  { %13331 = vmatprep.subr.bf16.mxu1 %v15603_v18  ;;  %v15611_v5 = vld [vmem:[#allocation5 + $0xe0] sm:$0xff]   ;;  %v15615_v55 = vld [vmem:[#allocation5 + $0xd8] sm:$0xff]   ;;  %v15618_v54 = vld [vmem:[#allocation5 + $0x50] sm:$0xff]  }
 0x72e   :  { %v15612_v43 = vld [vmem:[#allocation5 + $0x20] sm:$0xff]   ;;  %v15616_v37 = vld [vmem:[#allocation5 + $0x18] sm:$0xff]   ;;  %v15619_v31 = vld [vmem:[#allocation5 + $0xd0] sm:$0xff]  }
 0x72f   :  { %13286 = vmatpush3.bf16.msra.mxu0 %v15604_v33  ;;  %v15613_v1 = vld [vmem:[#allocation5 + $0xa0] sm:$0xff]   ;;  %v15617_v49 = vld [vmem:[#allocation5 + $0x98] sm:$0xff]   ;;  %v15620_v0 = vld [vmem:[#allocation5 + $0x10] sm:$0xff]  }
 0x730   :  { %13332 = vmatpush3.bf16.msra.mxu1 %v15605_v57  ;;  %13287 = vmatprep.subr.bf16.mxu0 %v15606_v30  ;;  %v15621_v29 = vld [vmem:[#allocation5 + $0x90] sm:$0xff]   ;;  %v15622_v16 = vld [vmem:[#allocation5 + $0x48] sm:$0xff]   ;;  %v15626_v27 = vld [vmem:[#allocation5 + $0x40] sm:$0xff]  }
 0x731   :  { %13333 = vmatprep.subr.bf16.mxu1 %v15607_v23  ;;  %v15623_v12 = vld [vmem:[#allocation5 + $0xc8] sm:$0xff]   ;;  %v15627_v21 = vld [vmem:[#allocation5 + $0xc0] sm:$0xff]   ;;  %v11194_v60 = vld [vmem:[#allocation3 + $0x18] sm:$0xff] }
 0x732   :  { %v15624_v63 = vld [vmem:[#allocation5 + $0x8] sm:$0xff]   ;;  %v15628_v46 = vld [vmem:[#allocation5] sm:$0xff]   ;;  %v11199_v7 = vld [vmem:[#allocation3 + $0x40] sm:$0xff] }
 0x733   :  { %13288 = vmatpush3.bf16.msra.mxu0 %v15608_v28  ;;  %v15625_v36 = vld [vmem:[#allocation5 + $0x88] sm:$0xff]   ;;  %v15629_v48 = vld [vmem:[#allocation5 + $0x80] sm:$0xff]   ;;  %v11191_v6 = vld [vmem:[#allocation3] sm:$0xff]  ;;  %v11239_v8 = vpack.c.bf16 %v11199_v7, %v11194_v60 }
 0x734   :  { %13334 = vmatpush3.bf16.msra.mxu1 %v15609_v53  ;;  %13289 = vmatprep.subr.bf16.mxu0 %v15610_v56  ;;  %v11192_v42 = vld [vmem:[#allocation3 + $0x8] sm:$0xff]  ;;  %v11197_v25 = vld [vmem:[#allocation3 + $0x30] sm:$0xff]  ;;  %v11198_v17 = vld [vmem:[#allocation3 + $0x38] sm:$0xff] }
 0x735   :  { %13335 = vmatprep.subr.bf16.mxu1 %v15611_v5  ;;  %v11237_v47 = vpack.c.bf16 %v11197_v25, %v11192_v42  ;;  %v11196_v35 = vld [vmem:[#allocation3 + $0x28] sm:$0xff]  ;;  %v11193_v22 = vld [vmem:[#allocation3 + $0x10] sm:$0xff]  ;;  %v15630_v4 = vld [vmem:[#allocation5 + $0x138] sm:$0xff]   ;;  %11692 = vmatprep.mubr.bf16.mxu1 %v11239_v8 }
 0x736   :  { %v11236_v15 = vpack.c.bf16 %v11196_v35, %v11191_v6  ;;  %v11238_v34 = vpack.c.bf16 %v11198_v17, %v11193_v22  ;;  %v15631_v20 = vld [vmem:[#allocation5 + $0x130] sm:$0xff]   ;;  %v11207_v45 = vld [vmem:[#allocation3 + $0x80] sm:$0xff]  ;;  %v11204_v59 = vld [vmem:[#allocation3 + $0x68] sm:$0xff] }
 0x737   :  { %13290 = vmatpush3.bf16.msra.mxu0 %v15612_v43  ;;  %11620 = vmatprep.mubr.bf16.mxu0 %v11237_v47  ;;  %v11202_v40 = vld [vmem:[#allocation3 + $0x58] sm:$0xff]  ;;  %v11209_v61 = vld [vmem:[#allocation3 + $0x90] sm:$0xff]  ;;  %v11203_v58 = vld [vmem:[#allocation3 + $0x60] sm:$0xff] }
 0x738   :  { %13336 = vmatpush3.bf16.msra.mxu1 %v15613_v1  ;;  %13291 = vmatprep.subr.bf16.mxu0 %v15614_v2  ;;  %v11242_v14 = vpack.c.bf16 %v11207_v45, %v11202_v40  ;;  %v11244_v3 = vpack.c.bf16 %v11209_v61, %v11204_v59  ;;  %v11201_v50 = vld [vmem:[#allocation3 + $0x50] sm:$0xff]  ;;  %v11206_v32 = vld [vmem:[#allocation3 + $0x78] sm:$0xff]  ;;  %v11208_v41 = vld [vmem:[#allocation3 + $0x88] sm:$0xff] }
 0x739   :  { %13337 = vmatprep.subr.bf16.mxu1 %v15615_v55  ;;  %v11241_v13 = vpack.c.bf16 %v11206_v32, %v11201_v50  ;;  %v11212_v51 = vld [vmem:[#allocation3 + $0xa8] sm:$0xff]  ;;  %v11217_v24 = vld [vmem:[#allocation3 + $0xd0] sm:$0xff]  ;;  %v11243_v52 = vpack.c.bf16 %v11208_v41, %v11203_v58  ;;  %v11214_v38 = vld [vmem:[#allocation3 + $0xb8] sm:$0xff] }
 0x73a   :  { %v15632_v44 = vld [vmem:[#allocation5 + $0x128] sm:$0xff]   ;;  %v11219_v26 = vld [vmem:[#allocation3 + $0xe0] sm:$0xff]  ;;  %v11247_v11 = vpack.c.bf16 %v11217_v24, %v11212_v51  ;;  %v11216_v39 = vld [vmem:[#allocation3 + $0xc8] sm:$0xff] }
 0x73b   :  { %13292 = vmatpush3.bf16.msra.mxu0 %v15616_v37  ;;  %v11249_v62 = vpack.c.bf16 %v11219_v26, %v11214_v38  ;;  %v11211_v9 = vld [vmem:[#allocation3 + $0xa0] sm:$0xff]  ;;  %v11213_v10 = vld [vmem:[#allocation3 + $0xb0] sm:$0xff]  ;;  %v15633_v18 = vld [vmem:[#allocation5 + $0x120] sm:$0xff]  }
 0x73c   :  { %13338 = vmatpush3.bf16.msra.mxu1 %v15617_v49  ;;  %13293 = vmatprep.subr.bf16.mxu0 %v15618_v54  ;;  %v11218_v33 = vld [vmem:[#allocation3 + $0xd8] sm:$0xff]  ;;  %v11227_v30 = vld [vmem:[#allocation3 + $0x120] sm:$0xff]  ;;  %v11224_v23 = vld [vmem:[#allocation3 + $0x108] sm:$0xff]  ;;  %v11246_v53 = vpack.c.bf16 %v11216_v39, %v11211_v9 }
 0x73d   :  { %13339 = vmatprep.subr.bf16.mxu1 %v15619_v31  ;;  %v11222_v57 = vld [vmem:[#allocation3 + $0xf8] sm:$0xff]  ;;  %v11229_v28 = vld [vmem:[#allocation3 + $0x130] sm:$0xff]  ;;  %v11248_v56 = vpack.c.bf16 %v11218_v33, %v11213_v10  ;;  %v15634_v5 = vld [vmem:[#allocation5 + $0x118] sm:$0xff]  }
 0x73e   :  { %v11252_v43 = vpack.c.bf16 %v11227_v30, %v11222_v57  ;;  %v11254_v1 = vpack.c.bf16 %v11229_v28, %v11224_v23  ;;  %v11221_v2 = vld [vmem:[#allocation3 + $0xf0] sm:$0xff]  ;;  %v11226_v55 = vld [vmem:[#allocation3 + $0x118] sm:$0xff]  ;;  %v11223_v49 = vld [vmem:[#allocation3 + $0x100] sm:$0xff] }
 0x73f   :  { %13294 = vmatpush3.bf16.msra.mxu0 %v15620_v0  ;;  %v15635_v37 = vld [vmem:[#allocation5 + $0x110] sm:$0xff]   ;;  %v11228_v54 = vld [vmem:[#allocation3 + $0x128] sm:$0xff]  ;;  %v11195_v25 = vld [vmem:[#allocation3 + $0x20] sm:$0xff] }
 0x740   :  { %13340 = vmatpush3.bf16.msra.mxu1 %v15621_v29  ;;  %13295 = vmatprep.subr.bf16.mxu0 %v15622_v16  ;;  %v11232_v31 = vld [vmem:[#allocation3 + $0x148] sm:$0xff]  ;;  %v11234_v0 = vld [vmem:[#allocation3 + $0x158] sm:$0xff]  ;;  %v11251_v29 = vpack.c.bf16 %v11226_v55, %v11221_v2  ;;  %v11253_v16 = vpack.c.bf16 %v11228_v54, %v11223_v49  ;;  %v11225_v47 = vld [vmem:[#allocation3 + $0x110] sm:$0xff] }
 0x741   :  { %13341 = vmatprep.subr.bf16.mxu1 %v15623_v12  ;;  %v11257_v12 = vpack.c.bf16 %v11232_v31, %v11232_v31  ;;  %v11200_v60 = vld [vmem:[#allocation3 + $0x48] sm:$0xff]  ;;  %v11230_v7 = vld [vmem:[#allocation3 + $0x138] sm:$0xff]  ;;  %v11205_v8 = vld [vmem:[#allocation3 + $0x70] sm:$0xff] }
 0x742   :  { %v11240_v6 = vpack.c.bf16 %v11200_v60, %v11195_v25  ;;  %v11255_v35 = vpack.c.bf16 %v11230_v7, %v11225_v47  ;;  %v11235_v22 = vld [vmem:[#allocation3 + $0x160] sm:$0xff] }
 0x743   :  { %13296 = vmatpush3.bf16.msra.mxu0 %v15624_v63  ;;  %v11259_v63 = vpack.c.bf16 %v11234_v0, %v11234_v0 }
 0x744   :  { %13342 = vmatpush3.bf16.msra.mxu1 %v15625_v36  ;;  %13297 = vmatprep.subr.bf16.mxu0 %v15626_v27  ;;  %v15636_v36 = vld [vmem:[#allocation5 + $0x108] sm:$0xff]   ;;  %v11231_v27 = vld [vmem:[#allocation3 + $0x140] sm:$0xff] }
 0x745   :  { %13343 = vmatprep.subr.bf16.mxu1 %v15627_v21  ;;  %v11233_v21 = vld [vmem:[#allocation3 + $0x150] sm:$0xff] }
 0x746   :  { %v11258_v42 = vpack.c.bf16 %v11233_v21, %v11233_v21 }
 0x747   :  { %13298 = vmatpush3.bf16.msra.mxu0 %v15628_v46  ;;  %v15637_v46 = vld [vmem:[#allocation5 + $0x100] sm:$0xff]  }
 0x748   :  { %13344 = vmatpush3.bf16.msra.mxu1 %v15629_v48  ;;  %13388 = vmatprep.subr.bf16.mxu0 %v15863_v19  ;;  %v11256_v48 = vpack.c.bf16 %v11231_v27, %v11231_v27 }
 0x749   :  { %13424 = vmatprep.subr.bf16.mxu1 %v15863_v19 }
 0x74a   :  { %11621 = vmatmul.mubr.bf16.vlgmr.msra.gmra.mxu0 %v11236_v15  ;;  %v11210_v15 = vld [vmem:[#allocation3 + $0x98] sm:$0xff] }
 0x74b   :  { %11693 = vmatmul.mubr.bf16.vlgmr.msra.gmra.mxu1 %v11238_v34  ;;  %13389 = vmatpush3.bf16.msra.mxu0 %v15630_v4  ;;  %v11245_v17 = vpack.c.bf16 %v11210_v15, %v11205_v8  ;;  %v11260_v34 = vpack.c.bf16 %v11235_v22, %v11235_v22 }
 0x74c   :  { %13390 = vmatprep.subr.bf16.mxu0 %v15863_v19  ;;  %13432 = vmatpush3.bf16.msra.mxu1 %v15630_v4  ;;  %v11215_v4 = vld [vmem:[#allocation3 + $0xc0] sm:$0xff] }
 0x74d   :  { %13425 = vmatprep.subr.bf16.mxu1 %v15863_v19  ;;  %11628 = vmatprep.mubr.bf16.mxu0 %v11242_v14 }
 0x74e   :  { %11700 = vmatprep.mubr.bf16.mxu1 %v11244_v3 }
 0x74f   :  { %13391 = vmatpush3.bf16.msra.mxu0 %v15631_v20 }
 0x750   :  { %13392 = vmatprep.subr.bf16.mxu0 %v15863_v19  ;;  %13433 = vmatpush3.bf16.msra.mxu1 %v15631_v20  ;;  %v11220_v20 = vld [vmem:[#allocation3 + $0xe8] sm:$0xff] }
 0x751   :  { %13426 = vmatprep.subr.bf16.mxu1 %v15863_v19  ;;  %v11250_v40 = vpack.c.bf16 %v11220_v20, %v11215_v4 }
 0x752   :  { %11629 = vmatmul.mubr.bf16.gmra.mxu0 %v11241_v13 }
 0x753   :  { %11701 = vmatmul.mubr.bf16.gmra.mxu1 %v11243_v52  ;;  %13393 = vmatpush3.bf16.msra.mxu0 %v15632_v44 }
 0x754   :  { %11636 = vmatprep.mubr.bf16.mxu0 %v11247_v11  ;;  %11708 = vmatprep.mubr.bf16.mxu1 %v11249_v62 }
 0x755   :  { %13394 = vmatprep.subr.bf16.mxu0 %v15863_v19  ;;  %13434 = vmatpush3.bf16.msra.mxu1 %v15632_v44 }
 0x756   :  { %13427 = vmatprep.subr.bf16.mxu1 %v15863_v19 }
 0x757   :  { %13395 = vmatpush3.bf16.msra.mxu0 %v15633_v18 }
 0x758   :  { %13396 = vmatprep.subr.bf16.mxu0 %v15863_v19 }
 0x759   :  { %13435 = vmatpush3.bf16.msra.mxu1 %v15633_v18 }
 0x75a   :  { %11637 = vmatmul.mubr.bf16.gmra.mxu0 %v11246_v53  ;;  %13428 = vmatprep.subr.bf16.mxu1 %v15863_v19 }
 0x75b   :  { %11709 = vmatmul.mubr.bf16.gmra.mxu1 %v11248_v56  ;;  %13397 = vmatpush3.bf16.msra.mxu0 %v15634_v5 }
 0x75c   :  { %11644 = vmatprep.mubr.bf16.mxu0 %v11252_v43  ;;  %11716 = vmatprep.mubr.bf16.mxu1 %v11254_v1 }
 0x75d   :  { %13436 = vmatpush3.bf16.msra.mxu1 %v15634_v5  ;;  %13398 = vmatprep.subr.bf16.mxu0 %v15863_v19 }
 0x75e   :  { %13429 = vmatprep.subr.bf16.mxu1 %v15863_v19 }
 0x75f   :  { %13399 = vmatpush3.bf16.msra.mxu0 %v15635_v37 }
 0x760   :  { %13400 = vmatprep.subr.bf16.mxu0 %v15863_v19 }
 0x761   :  { %13437 = vmatpush3.bf16.msra.mxu1 %v15635_v37 }
 0x762   :  { %11645 = vmatmul.mubr.bf16.gmra.mxu0 %v11251_v29  ;;  %13430 = vmatprep.subr.bf16.mxu1 %v15863_v19 }
 0x763   :  { %11717 = vmatmul.mubr.bf16.gmra.mxu1 %v11253_v16  ;;  %11652 = vmatprep.mubr.bf16.mxu0 %v11257_v12 }
 0x764   :  { %11724 = vmatprep.mubr.bf16.mxu1 %v11259_v63  ;;  %13401 = vmatpush3.bf16.msra.mxu0 %v15636_v36 }
 0x765   :  { %13438 = vmatpush3.bf16.msra.mxu1 %v15636_v36  ;;  %13402 = vmatprep.subr.bf16.mxu0 %v15863_v19 }
 0x766   :  { %13431 = vmatprep.subr.bf16.mxu1 %v15863_v19 }
 0x768   :  { %13403 = vmatpush3.bf16.msra.mxu0 %v15637_v46 }
 0x769   :  { %13439 = vmatpush3.bf16.msra.mxu1 %v15637_v46  ;;  %v13238_v46 = vld [vmem:[#allocation11] ss:$0 sm:$0xff] }
 0x76a   :  { %11653 = vmatmul.mubr.bf16.gmra.mxu0 %v11256_v48 }
 0x76b   :  { %11725 = vmatmul.mubr.bf16.gmra.mxu1 %v11258_v42  ;;  %13404 = vmatprep.mubr.msk.bf16.mxu0 %vm15864_vm0, %v15863_v19 }
 0x76c   :  { %13416 = vmatprep.mubr.msk.bf16.mxu1 %vm15864_vm0, %v15863_v19 }
 0x772   :  { %13405 = vmatmul.mubr.bf16.vlgmr.msra.gmra.mxu0 %v11240_v6 }
 0x773   :  { %13417 = vmatmul.mubr.bf16.vlgmr.msra.gmra.mxu1 %v11255_v35  ;;  %13408 = vmatprep.mubr.msk.bf16.mxu0 %vm15864_vm0, %v15863_v19 }
 0x774   :  { %13420 = vmatprep.mubr.msk.bf16.mxu1 %vm15864_vm0, %v15863_v19 }
 0x77a   :  { %13409 = vmatmul.mubr.bf16.gmra.mxu0 %v11245_v17 }
 0x77b   :  { %13421 = vmatmul.mubr.bf16.gmra.mxu1 %v11260_v34  ;;  %13412 = vmatprep.mubr.msk.bf16.mxu0 %vm15864_vm0, %v15863_v19 }
 0x782   :  { %13413 = vmatmul.mubr.bf16.gmra.mxu0 %v11250_v40 }
 0x80a   :  { %v13299_v45 = vpop.f32.mrf.mxu0 }
 0x80b   :  { %v13345_v59 = vpop.f32.mrf.mxu1 }
 0x80c   :  { %v13300_v61 = vpop.f32.mrf.mxu0 }
 0x80d   :  { %v13346_v14 = vpop.f32.mrf.mxu1  ;;  %v13301_v36 = vadd.f32 %v13300_v61, %v13299_v45 }
 0x80e   :  { %v13302_v3 = vpop.f32.mrf.mxu0  ;;  %v13347_v8 = vadd.f32 %v13346_v14, %v13345_v59 }
 0x80f   :  { %v13348_v50 = vpop.f32.mrf.mxu1  ;;  %v11623_v35 = vadd.f32 %v13301_v36, %v13238_v46 }
 0x810   :  { %v13303_v32 = vpop.f32.mrf.mxu0 }
 0x811   :  { %v13349_v58 = vpop.f32.mrf.mxu1  ;;  %v13304_v16 = vadd.f32 %v13303_v32, %v13302_v3 }
 0x812   :  { %v13305_v41 = vpop.f32.mrf.mxu0  ;;  %v13350_v25 = vadd.f32 %v13349_v58, %v13348_v50 }
 0x813   :  { %v13351_v13 = vpop.f32.mrf.mxu1  ;;  %v11626_v42 = vadd.f32 %v13304_v16, %v13238_v46 }
 0x814   :  { %v13306_v51 = vpop.f32.mrf.mxu0 }
 0x815   :  { %v13352_v24 = vpop.f32.mrf.mxu1  ;;  %v13307_v27 = vadd.f32 %v13306_v51, %v13305_v41  ;;  %v11698_v40 = vadd.f32 %v13350_v25, %v11626_v42  ;;  %v11695_v51 = vadd.f32 %v13347_v8, %v11623_v35 }
 0x816   :  { %v13308_v52 = vpop.f32.mrf.mxu0  ;;  %v13353_v22 = vadd.f32 %v13352_v24, %v13351_v13 }
 0x817   :  { %v13354_v44 = vpop.f32.mrf.mxu1  ;;  %v11631_v15 = vadd.f32 %v13307_v27, %v13238_v46 }
 0x818   :  { %v13309_v38 = vpop.f32.mrf.mxu0 }
 0x819   :  { %v13355_v19 = vpop.f32.mrf.mxu1  ;;  %v13310_v60 = vadd.f32 %v13309_v38, %v13308_v52  ;;  %v11703_v58 = vadd.f32 %v13353_v22, %v11631_v15 }
 0x81a   :  { %v13311_v26 = vpop.f32.mrf.mxu0  ;;  %v13356_v20 = vadd.f32 %v13355_v19, %v13354_v44 }
 0x81b   :  { %v13357_v11 = vpop.f32.mrf.mxu1  ;;  %v11634_v4 = vadd.f32 %v13310_v60, %v13238_v46 }
 0x81c   :  { %v13312_v62 = vpop.f32.mrf.mxu0 }
 0x81d   :  { %v13358_v9 = vpop.f32.mrf.mxu1  ;;  %v13313_v7 = vadd.f32 %v13312_v62, %v13311_v26  ;;  %v11706_v14 = vadd.f32 %v13356_v20, %v11634_v4 }
 0x81e   :  { %v13314_v39 = vpop.f32.mrf.mxu0  ;;  %v13359_v3 = vadd.f32 %v13358_v9, %v13357_v11 }
 0x81f   :  { %v13360_v10 = vpop.f32.mrf.mxu1  ;;  %v11639_v61 = vadd.f32 %v13313_v7, %v13238_v46 }
 0x820   :  { %v13315_v18 = vpop.f32.mrf.mxu0 }
 0x821   :  { %v13361_v33 = vpop.f32.mrf.mxu1  ;;  %v13316_v41 = vadd.f32 %v13315_v18, %v13314_v39 }
 0x822   :  { %v13317_v57 = vpop.f32.mrf.mxu0  ;;  %v13362_v24 = vadd.f32 %v13361_v33, %v13360_v10 }
 0x823   :  { %v17120_v30 = vpop.f32.mrf.mxu1  ;;  %v11642_v44 = vadd.f32 %v13316_v41, %v13238_v46 }
 0x824   :  { %v13318_v23 = vpop.f32.mrf.mxu0 }
 0x825   :  { %v13364_v28 = vpop.f32.mrf.mxu1  ;;  %v13319_v38 = vadd.f32 %v13318_v23, %v13317_v57  ;;  %v11714_v33 = vadd.f32 %v13362_v24, %v11642_v44 }
 0x826   :  { %v13320_v53 = vpop.f32.mrf.mxu0  ;;  %v13365_v39 = vadd.f32 %v13364_v28, %v17120_v30 }
 0x827   :  { %v17122_v56 = vpop.f32.mrf.mxu1  ;;  %v11647_v9 = vadd.f32 %v13319_v38, %v13238_v46 }
 0x828   :  { %v13321_v5 = vpop.f32.mrf.mxu0 }
 0x829   :  { %v17124_v43 = vpop.f32.mrf.mxu1  ;;  %v13322_v19 = vadd.f32 %v13321_v5, %v13320_v53  ;;  %v11719_v27 = vadd.f32 %v13365_v39, %v11647_v9 }
 0x82a   :  { %v13323_v1 = vpop.f32.mrf.mxu0  ;;  %v13368_v36 = vadd.f32 %v17124_v43, %v17122_v56 }
 0x82b   :  { %v17126_v2 = vpop.f32.mrf.mxu1 }
 0x82c   :  { %v13324_v55 = vpop.f32.mrf.mxu0 }
 0x82d   :  { %v17128_v37 = vpop.f32.mrf.mxu1  ;;  %v13325_v16 = vadd.f32 %v13324_v55, %v13323_v1 }
 0x82e   :  { %v13326_v49 = vpop.f32.mrf.mxu0  ;;  %v13371_v5 = vadd.f32 %v17128_v37, %v17126_v2 }
 0x82f   :  { %v13372_v54 = vpop.f32.mrf.mxu1  ;;  %v11655_v53 = vadd.f32 %v13325_v16, %v13238_v46 }
 0x830   :  { %v13327_v31 = vpop.f32.mrf.mxu0  ;;  %v11711_v54 = vadd.f32 %v13359_v3, %v11639_v61 }
 0x831   :  { %v13373_v0 = vpop.f32.mrf.mxu1  ;;  %v11727_v60 = vadd.f32 %v13371_v5, %v11655_v53 }
 0x832   :  { %v11766_v29 = vpop.f32.mrf.mxu0 }
 0x833   :  { %v17130_v12 = vpop.f32.mrf.mxu1  ;;  %v11767_v62 = vadd.f32 %v11766_v29, %v11695_v51  ;;  %v11650_v29 = vadd.f32 %v13322_v19, %v13238_v46 }
 0x834   :  { %v13406_v63 = vpop.f32.mrf.mxu0  ;;  %v11791_v28 = vadd.f32 %v17130_v12, %v11719_v27 }
 0x835   :  { %v13418_v21 = vpop.f32.mrf.mxu1  ;;  %v11722_v1 = vadd.f32 %v13368_v36, %v11650_v29 }
 0x836   :  { %v11769_v48 = vpop.f32.mrf.mxu0 }
 0x837   :  { %v11793_v47 = vpop.f32.mrf.mxu1  ;;  %v11770_v50 = vadd.f32 %v11769_v48, %v11698_v40 }
 0x838   :  { %v13407_v6 = vpop.f32.mrf.mxu0  ;;  %v11794_v25 = vadd.f32 %v11793_v47, %v11722_v1 }
 0x839   :  { %v13419_v17 = vpop.f32.mrf.mxu1  ;;  %v11804_v31 = vmax.f32 %v11767_v62, %v11770_v50 }
 0x83a   :  { %v11774_v34 = vpop.f32.mrf.mxu0 }
 0x83b   :  { %v11798_v45 = vpop.f32.mrf.mxu1  ;;  %v11775_v59 = vadd.f32 %v11774_v34, %v11703_v58 }
 0x83c   :  { %v13410_v32 = vpop.f32.mrf.mxu0  ;;  %v11799_v6 = vadd.f32 %v11798_v45, %v11727_v60 }
 0x83d   :  { %v13422_v52 = vpop.f32.mrf.mxu1  ;;  %v11805_v63 = vmax.f32 %v11804_v31, %v11775_v59 }
 0x83e   :  { %v11777_v26 = vpop.f32.mrf.mxu0 }
 0x83f   :  { %v11801_v13 = vpop.f32.mrf.mxu1  ;;  %v11778_v0 = vadd.f32 %v11777_v26, %v11706_v14 }
 0x840   :  { %v13411_v49 = vpop.f32.mrf.mxu0 }
 0x841   :  { %v13423_v11 = vpop.f32.mrf.mxu1  ;;  %v11806_v10 = vmax.f32 %v11805_v63, %v11778_v0 }
 0x842   :  { %v11782_v18 = vpop.f32.mrf.mxu0 }
 0x843   :  { %v11783_v57 = vadd.f32 %v11782_v18, %v11711_v54 }
 0x844   :  { %v13414_v23 = vpop.f32.mrf.mxu0 }
 0x845   :  { %v11807_v48 = vmax.f32 %v11806_v10, %v11783_v57 }
 0x846   :  { %v11785_v21 = vpop.f32.mrf.mxu0 }
 0x847   :  { %v11786_v42 = vadd.f32 %v11785_v21, %v11714_v33 }
 0x848   :  { %v13415_v30 = vpop.f32.mrf.mxu0 }
 0x849   :  { %v11808_v55 = vmax.f32 %v11807_v48, %v11786_v42 }
 0x84b   :  { %v11809_v7 = vmax.f32 %v11808_v55, %v11791_v28 }
 0x84d   :  { %v11810_v56 = vmax.f32 %v11809_v7, %v11794_v25 }
 0x84f   :  { %v11811_v43 = vmax.f32 %v11810_v56, %v11799_v6 }
 0x851   :  { %v11812_v35 = vsub.f32 %v11767_v62, %v11811_v43  ;;  %v11816_v8 = vsub.f32 %v11770_v50, %v11811_v43  ;;  %v11820_v15 = vsub.f32 %v11775_v59, %v11811_v43  ;;  %v11824_v46 = vsub.f32 %v11778_v0, %v11811_v43 }
 0x852   :  { %v11828_v37 = vsub.f32 %v11783_v57, %v11811_v43  ;;  %v11832_v12 = vsub.f32 %v11786_v42, %v11811_v43  ;;  %v11836_v47 = vsub.f32 %v11791_v28, %v11811_v43  ;;  %v11840_v40 = vsub.f32 %v11794_v25, %v11811_v43 }
 0x853   :  { %v11813_v22 = vmul.f32 1.442695, %v11812_v35  ;;  %v11817_v17 = vmul.f32 1.442695, %v11816_v8  ;;  %v11821_v2 = vmul.f32 1.442695, %v11820_v15  ;;  %v11844_v61 = vsub.f32 %v11799_v6, %v11811_v43 }
 0x854   :  { %v11825_v34 = vmul.f32 1.442695, %v11824_v46  ;;  %v11829_v4 = vmul.f32 1.442695, %v11828_v37  ;;  %v11833_v20 = vmul.f32 1.442695, %v11832_v12 }
 0x855   :  { %15638 = vpow2.f32 %v11813_v22  ;;  %v11837_v45 = vmul.f32 1.442695, %v11836_v47  ;;  %v11841_v3 = vmul.f32 1.442695, %v11840_v40  ;;  %v11845_v32 = vmul.f32 1.442695, %v11844_v61 }
 0x856   :  { %15640 = vpow2.f32 %v11817_v17 }
 0x857   :  { %15642 = vpow2.f32 %v11821_v2 }
 0x858   :  { %15644 = vpow2.f32 %v11825_v34 }
 0x859   :  { %15646 = vpow2.f32 %v11829_v4 }
 0x85a   :  { %15648 = vpow2.f32 %v11833_v20 }
 0x85b   :  { %15650 = vpow2.f32 %v11837_v45 }
 0x85c   :  { %15652 = vpow2.f32 %v11841_v3 }
 0x85d   :  { %15654 = vpow2.f32 %v11845_v32 }
 0x862   :  { %v15639_v41 = vpop.eup %15638 }
 0x863   :  { %v15641_v51 = vpop.eup %15640 }
 0x864   :  { %v11819_v50 = vadd.f32 %v15641_v51, %v15639_v41  ;;  %v15643_v58 = vpop.eup %15642 }
 0x865   :  { %v15645_v38 = vpop.eup %15644 }
 0x866   :  { %v11823_v52 = vadd.f32 %v15643_v58, %v11819_v50  ;;  %v15647_v62 = vpop.eup %15646 }
 0x867   :  { %v15649_v14 = vpop.eup %15648 }
 0x868   :  { %v11827_v26 = vadd.f32 %v15645_v38, %v11823_v52  ;;  %v15651_v24 = vpop.eup %15650 }
 0x869   :  { %v15653_v54 = vpop.eup %15652 }
 0x86a   :  { %v11831_v59 = vadd.f32 %v15647_v62, %v11827_v26  ;;  %v15655_v19 = vpop.eup %15654 }
 0x86c   :  { %v11835_v13 = vadd.f32 %v15649_v14, %v11831_v59 }
 0x86e   :  { %v11839_v49 = vadd.f32 %v15651_v24, %v11835_v13 }
 0x870   :  { %v11843_v44 = vadd.f32 %v15653_v54, %v11839_v49 }
 0x872   :  { %v11847_v31 = vadd.f32 %v15655_v19, %v11843_v44 }
 0x874   :  { %15656 = vrcp.f32 %v11847_v31 }
 0x881   :  { %v15657_v0 = vpop.eup %15656 }
 0x882   :  { %v11849_v11 = vmul.f32 %v15657_v0, %v15639_v41  ;;  %v11851_v9 = vmul.f32 %v15657_v0, %v15641_v51  ;;  %v11853_v39 = vmul.f32 %v15657_v0, %v15643_v58  ;;  %v11855_v18 = vmul.f32 %v15657_v0, %v15645_v38 }
 0x883   :  { %v11857_v16 = vmul.f32 %v15657_v0, %v15647_v62  ;;  %v11859_v63 = vmul.f32 %v15657_v0, %v15649_v14  ;;  %v11861_v57 = vmul.f32 %v15657_v0, %v15651_v24  ;;  %v11863_v23 = vmul.f32 %v15657_v0, %v15653_v54 }
 0x884   :  { %11850 = vst [vmem:[%s17171_s6] sm:$0xff] %v11849_v11  ;;  %11852 = vst [vmem:[%s17171_s6 + $0x8] sm:$0xff] %v11851_v9  ;;  %v11865_v29 = vmul.f32 %v15657_v0, %v15655_v19 }
 0x885   :  { %11854 = vst [vmem:[%s17171_s6 + $0x10] sm:$0xff] %v11853_v39  ;;  %11856 = vst [vmem:[%s17171_s6 + $0x18] sm:$0xff] %v11855_v18 }
 0x886   :  { %11858 = vst [vmem:[%s17171_s6 + $0x20] sm:$0xff] %v11857_v16  ;;  %11860 = vst [vmem:[%s17171_s6 + $0x28] sm:$0xff] %v11859_v63 }
 0x887   :  { %11862 = vst [vmem:[%s17171_s6 + $0x30] sm:$0xff] %v11861_v57  ;;  %11864 = vst [vmem:[%s17171_s6 + $0x38] sm:$0xff] %v11863_v23 }
 0x888   :  { %11866 = vst [vmem:[%s17171_s6 + $0x40] sm:$0xff] %v11865_v29 }
 0x889   :  { %11871 = vsyncpa [#allocation8], 1 }
 0x88a   :  { %11872 = vsyncpa [#allocation10], 1 }
 0x88b   :  { %11873 = vsyncmov [#allocation6] }
 0x88e   :  { %s11874_s14 = vpop.sfrf %11873 }
 0x88f   :  { %p13279_p12 = scmp.ne.s32.totalorder %s11874_s14, 0 }
 0x891   :  { %11878 = shalt.err (%p13279_p12)  }
 0x892   :  { %11880 = vsyncmov [#allocation6 + $0x1] }
 0x895   :  { %s11881_s15 = vpop.sfrf %11880 }
 0x896   :  { %p13280_p13 = scmp.ne.s32.totalorder %s11881_s15, 0 }
 0x898   :  { %11885 = shalt.err (%p13280_p13)  }

</bundles_post_ra>
